<compile_context>
chip_gen: v7x
topology: tpu7x:2x2x1
jax: 0.10.0
libtpu: 0.0.40
codegen_flags: <defaults>
</compile_context>

<pallas_src>
import functools

import jax
import jax.numpy as jnp
from jax.experimental import pallas as pl
from jax.experimental.pallas import tpu as pltpu


# ----------------------------------------------------------------------------- config
_TM_ROWS = 256   # row-tile cap (keeps f32 residual + hidden comfortably in vregs/VMEM)
_COMPILER_PARAMS = pltpu.CompilerParams(
    # Rows are independent: "parallel" is semantically right.  It only has an effect on
    # v7x (2 TCs) and only when the grid has >= 2 steps; harmless elsewhere.
    dimension_semantics=("parallel",),
    vmem_limit_bytes=32 * 1024 * 1024,   # safe on v5e/v6e/v7x; re-budget before scaling
)


def _const_spec(a):
    nd = a.ndim
    return pl.BlockSpec(a.shape, lambda i, _n=nd: (0,) * _n)


def _ln(x, g, b, eps=1e-5):
    # var = E[x^2] - E[x]^2: the two cross-lane reductions are independent.
    mu = jnp.mean(x, axis=-1, keepdims=True)
    ms = jnp.mean(x * x, axis=-1, keepdims=True)
    var = jnp.maximum(ms - mu * mu, 0.0)
    return (x - mu) * jax.lax.rsqrt(var + eps) * g + b


# ----------------------------------------------------------------------------- kernel
def _fused_stage_kernel(*refs, pre, n_blocks, skip_mode, has_epi, has_tail, emit_skip):
    """One fused stage: [prologue] -> VSS blocks -> [skip add] -> [epilogue] -> [tail]."""
    out_ref = refs[-1]
    skip_out_ref = refs[-2] if emit_skip else None
    n_out = 2 if emit_skip else 1
    it = iter(refs[:len(refs) - n_out])

    x = next(it)[...].astype(jnp.float32)

    skip_val = None
    if skip_mode == "input":
        skip_val = next(it)[...].astype(jnp.float32)

    # ---- prologue -------------------------------------------------------------
    if pre == "embed":                       # patch-embed matmul + bias, then LN
        w = next(it)[...]
        v = next(it)[...]                    # (3, C): [bias, ln_g, ln_b]
        x = jnp.dot(x.astype(w.dtype), w, preferred_element_type=jnp.float32)
        x = x + v[0:1, :]
        x = _ln(x, v[1:2, :], v[2:3, :])
    elif pre == "merge":                     # PatchMerging: LN(4C) then Linear(4C,2C)
        v = next(it)[...]                    # (2, 4C)
        w = next(it)[...]
        x = _ln(x, v[0:1, :], v[1:2, :])
        x = jnp.dot(x.astype(w.dtype), w, preferred_element_type=jnp.float32)
    elif pre == "ln":                        # deferred PatchExpand2D norm
        v = next(it)[...]                    # (2, C)
        x = _ln(x, v[0:1, :], v[1:2, :])

    if skip_mode == "internal":              # skip_list entry produced in this kernel
        skip_val = x
    if emit_skip:
        skip_out_ref[...] = x.astype(skip_out_ref.dtype)

    # ---- VSS blocks: LN -> Linear -> SiLU -> Linear -> residual ----------------
    if n_blocks:
        vec_ref, w1_ref, w2_ref = next(it), next(it), next(it)
        C = x.shape[-1]
        for j in range(n_blocks):
            v = vec_ref[j]                                   # (4, 2C): ln_g, ln_b, b1, b2
            h = _ln(x, v[0:1, :C], v[1:2, :C])
            w1 = w1_ref[j]
            a = jnp.dot(h.astype(w1.dtype), w1,
                        preferred_element_type=jnp.float32) + v[2:3, :]
            a = a * jax.nn.sigmoid(a)                        # SiLU in f32 (EUP)
            w2 = w2_ref[j]
            y = jnp.dot(a.astype(w2.dtype), w2,
                        preferred_element_type=jnp.float32) + v[3:4, :C]
            x = x + y

    if skip_mode is not None:
        x = x + skip_val

    # ---- epilogue: PatchExpand / Final_PatchExpand Linear (bias=False) ---------
    if has_epi:
        w = next(it)[...]
        x = jnp.dot(x.astype(w.dtype), w, preferred_element_type=jnp.float32)

    # ---- tail: per-pixel LN(cq) + 1x1 conv, no reshape needed ------------------
    if has_tail:
        gs = next(it)[...]                   # (Ne, Ne): group-mean-and-broadcast matrix
        tl = next(it)[...]                   # (2, Ne): tiled gamma / beta
        bd = next(it)[...]                   # (Ne+1, Nout): block-diag conv + bias row
        gm = jnp.dot(x, gs, preferred_element_type=jnp.float32)
        gv = jnp.dot(x * x, gs, preferred_element_type=jnp.float32) - gm * gm
        xn = (x - gm) * jax.lax.rsqrt(jnp.maximum(gv, 0.0) + 1e-5)
        xn = xn * tl[0:1, :] + tl[1:2, :]
        kdim = bd.shape[0] - 1
        x = jnp.dot(xn, bd[:kdim, :], preferred_element_type=jnp.float32) + bd[kdim:, :]

    out_ref[...] = x.astype(out_ref.dtype)


# ----------------------------------------------------------------------------- wrapper
def _stage(x, ar, *, skip=None, skip_internal=False, emit_skip=False):
    M, kin = x.shape
    tm = min(M, _TM_ROWS)
    grid = (pl.cdiv(M, tm),)

    ins = [x]
    specs = [pl.BlockSpec((tm, kin), lambda i: (i, 0))]

    skip_mode = None
    if skip is not None:
        skip_mode = "input"
        ins.append(skip)
        specs.append(pl.BlockSpec((tm, skip.shape[1]), lambda i: (i, 0)))
    elif skip_internal:
        skip_mode = "internal"

    pre = None
    width = kin
    if "embed_w" in ar:
        pre = "embed"
        ins += [ar["embed_w"], ar["pre_vec"]]
        specs += [_const_spec(ar["embed_w"]), _const_spec(ar["pre_vec"])]
        width = ar["embed_w"].shape[1]
    elif "merge_w" in ar:
        pre = "merge"
        ins += [ar["pre_ln"], ar["merge_w"]]
        specs += [_const_spec(ar["pre_ln"]), _const_spec(ar["merge_w"])]
        width = ar["merge_w"].shape[1]
    elif "pre_ln" in ar:
        pre = "ln"
        ins.append(ar["pre_ln"])
        specs.append(_const_spec(ar["pre_ln"]))
    skip_width = width

    blk = ar.get("blocks")
    n_blocks = 0
    if blk is not None:
        n_blocks = blk["vec"].shape[0]
        ins += [blk["vec"], blk["w1"], blk["w2"]]
        specs += [_const_spec(blk["vec"]), _const_spec(blk["w1"]), _const_spec(blk["w2"])]

    has_epi = "epi_w" in ar
    if has_epi:
        ins.append(ar["epi_w"])
        specs.append(_const_spec(ar["epi_w"]))
        width = ar["epi_w"].shape[1]

    has_tail = "tail" in ar
    if has_tail:
        t = ar["tail"]
        ins += [t["gs"], t["ln"], t["bd"]]
        specs += [_const_spec(t["gs"]), _const_spec(t["ln"]), _const_spec(t["bd"])]
        width = t["bd"].shape[1]

    out_shape = jax.ShapeDtypeStruct((M, width), jnp.float32)
    out_spec = pl.BlockSpec((tm, width), lambda i: (i, 0))
    if emit_skip:
        out_shape = (jax.ShapeDtypeStruct((M, skip_width), jnp.float32), out_shape)
        out_spec = [pl.BlockSpec((tm, skip_width), lambda i: (i, 0)), out_spec]

    kernel = functools.partial(
        _fused_stage_kernel, pre=pre, n_blocks=n_blocks, skip_mode=skip_mode,
        has_epi=has_epi, has_tail=has_tail, emit_skip=emit_skip)

    return pl.pallas_call(
        kernel, grid=grid, in_specs=specs, out_specs=out_spec, out_shape=out_shape,
        compiler_params=_COMPILER_PARAMS)(*ins)


# ----------------------------------------------------------------------------- forward
def lmessm_forward(x_nchw, kp, cfg):
    dims = cfg["dims"]
    dims_dec = cfg["dims_decoder"]
    L = len(dims)
    nlev = L - 1
    P = cfg["patch_size"]
    S = 4                                                   # Final_PatchExpand2D scale
    nc = cfg["num_classes"]

    B, cin, H, W = x_nchw.shape
    Hp, Wp = H // P, W // P
    assert Hp % (1 << nlev) == 0 and Wp % (1 << nlev) == 0
    Hc, Wc = Hp >> nlev, Wp >> nlev

    # ---- im2col + recursive (merge-friendly) token ordering: single host transpose.
    x = jnp.transpose(x_nchw, (0, 2, 3, 1))
    x = x.reshape((B, Hc) + (2,) * nlev + (P, Wc) + (2,) * nlev + (P, cin))
    perm = [0, 1, nlev + 3]
    for l in range(nlev):
        perm += [nlev + 4 + l, 2 + l]
    perm += [nlev + 2, 2 * nlev + 4, 2 * nlev + 5]
    x = jnp.transpose(x, perm).reshape(B * Hp * Wp, P * P * cin)
    # pos_drop (p=0), drop_path (eval) and absolute_pos_embed (ape=False) are identity.
    # TODO(synk): the heatmap (matplotlib/seaborn) and scipy.io.savemat dumps inside
    # forward_features(_up) are host-side file I/O with no kernel equivalent; skipped.

    # ---- encoder: embed+stage0, then merge-prologue stages (each one pallas_call).
    x = _stage(x, kp["e0"])
    skips = []
    for i in range(1, L - 1):
        x = x.reshape(x.shape[0] // 4, x.shape[1] * 4)       # free: recursive order
        s, x = _stage(x, kp["enc"][i - 1], emit_skip=True)
        skips.append(s)

    # ---- bottom: last encoder stage + decoder stage 0 + skip add + expand, one call.
    x = x.reshape(x.shape[0] // 4, x.shape[1] * 4)
    x = _stage(x, kp["mid"], skip_internal=True)

    # ---- decoder middle stages: deferred LN + blocks + skip add + next expand.
    for i in range(1, L - 1):
        x = x.reshape(x.shape[0] * 4, x.shape[1] // 4)       # free pixel shuffle
        x = _stage(x, kp["dec"][i - 1], skip=skips[-i])

    # ---- last decoder stage + Final_PatchExpand2D + LN(4) + 1x1 conv, one call.
    x = x.reshape(x.shape[0] * 4, x.shape[1] // 4)
    x = _stage(x, kp["dlast"])                               # (B*Hp*Wp, S*S*num_classes)

    # ---- unscramble recursive ordering + 4x4 pixel blocks -> NCHW.
    out = x.reshape((B, Hc, Wc) + (2, 2) * nlev + (S, S, nc))
    perm = ([0, 2 * nlev + 5, 1] + [4 + 2 * l for l in range(nlev)] + [2 * nlev + 3]
            + [2] + [3 + 2 * l for l in range(nlev)] + [2 * nlev + 4])
    return jnp.transpose(out, perm).reshape(B, nc, Hp * S, Wp * S)


# ----------------------------------------------------------------------------- params
class _KeyGen:
    def __init__(self, key):
        self.key = key

    def __call__(self):
        self.key, sub = jax.random.split(self.key)
        return sub


def _dense(kg, cin, cout, std=0.02, dtype=jnp.bfloat16):
    w = std * jax.random.truncated_normal(kg(), -2.0, 2.0, (cin, cout), jnp.float32)
    return w.astype(dtype), jnp.zeros((cout,), jnp.float32)


def _ln_params(c):
    return jnp.ones((c,), jnp.float32), jnp.zeros((c,), jnp.float32)


def _block_params(kg, c):
    # TODO(synk): VSSBlock / SS2D selective-scan internals are not part of the provided
    # source; a LayerNorm -> Linear -> SiLU -> Linear residual token mixer stands in.
    ln_g, ln_b = _ln_params(c)
    w1, b1 = _dense(kg, c, 2 * c)
    w2, b2 = _dense(kg, 2 * c, c)
    return {"ln_g": ln_g, "ln_b": ln_b, "w1": w1, "b1": b1, "w2": w2, "b2": b2}


def init_params(key, cfg):
    kg = _KeyGen(key)
    dims, dims_dec = cfg["dims"], cfg["dims_decoder"]
    depths, depths_dec = cfg["depths"], cfg["depths_decoder"]
    p = {}

    # patch embed: Conv2d(in_chans, dims[0], k=p, s=p) as (p*p*in_chans, dims[0]) matmul.
    # TODO(synk): when loading torch weights, flatten conv weight as (ph, pw, cin)-major.
    w, b = _dense(kg, cfg["patch_size"] ** 2 * cfg["in_chans"], dims[0])
    g, bb = _ln_params(dims[0])
    p["patch_embed"] = {"w": w, "b": b, "ln_g": g, "ln_b": bb}

    p["layers"] = []
    for i, c in enumerate(dims):
        # TODO(synk): msVSSLayer's multi-scale `downsamples=[0, 4]` internals are not in
        # the provided source; treated as a plain VSS layer (blocks + PatchMerging2D).
        layer = {"blocks": [_block_params(kg, c) for _ in range(depths[i])],
                 "downsample": None}
        if i < len(dims) - 1:                                # PatchMerging2D (bias=False)
            g, bb = _ln_params(4 * c)
            w, _ = _dense(kg, 4 * c, 2 * c)
            layer["downsample"] = {"ln_g": g, "ln_b": bb, "w": w}
        p["layers"].append(layer)

    p["layers_up"] = []
    for i, c in enumerate(dims_dec):
        layer = {"blocks": [_block_params(kg, c) for _ in range(depths_dec[i])],
                 "upsample": None}
        if i != 0:                                           # PatchExpand2D (bias=False)
            # TODO(synk): for torch checkpoints, permute expand output chunks to the
            # (dw, dh) child order used by the recursive token layout.
            w, _ = _dense(kg, 2 * c, 4 * c)
            g, bb = _ln_params(c)
            layer["upsample"] = {"w": w, "ln_g": g, "ln_b": bb}
        p["layers_up"].append(layer)

    c = dims_dec[-1]
    w, _ = _dense(kg, c, 4 * c)                              # Final_PatchExpand2D (x4)
    g, bb = _ln_params(c // 4)
    p["final_up"] = {"w": w, "ln_g": g, "ln_b": bb}

    w, b = _dense(kg, c // 4, cfg["num_classes"], dtype=jnp.float32)   # 1x1 conv
    p["final_conv"] = {"w": w, "b": b}
    return p


def _pack_blocks(blocks, c):
    if not blocks:
        return None
    zeros = jnp.zeros((c,), jnp.float32)
    vec = jnp.stack([jnp.stack([jnp.concatenate([bp["ln_g"], zeros]),
                                jnp.concatenate([bp["ln_b"], zeros]),
                                bp["b1"],
                                jnp.concatenate([bp["b2"], zeros])]) for bp in blocks])
    w1 = jnp.stack([bp["w1"] for bp in blocks])
    w2 = jnp.stack([bp["w2"] for bp in blocks])
    return {"vec": vec, "w1": w1, "w2": w2}


def pack_params(params, cfg):
    dims, dims_dec = cfg["dims"], cfg["dims_decoder"]
    L = len(dims)
    assert list(dims_dec) == list(dims[::-1])
    kp = {}

    pe = params["patch_embed"]
    kp["e0"] = dict(embed_w=pe["w"],
                    pre_vec=jnp.stack([pe["b"], pe["ln_g"], pe["ln_b"]]),
                    blocks=_pack_blocks(params["layers"][0]["blocks"], dims[0]))

    kp["enc"] = []
    for i in range(1, L - 1):
        ds = params["layers"][i - 1]["downsample"]
        kp["enc"].append(dict(pre_ln=jnp.stack([ds["ln_g"], ds["ln_b"]]),
                              merge_w=ds["w"],
                              blocks=_pack_blocks(params["layers"][i]["blocks"], dims[i])))

    dsm = params["layers"][L - 2]["downsample"]
    kp["mid"] = dict(pre_ln=jnp.stack([dsm["ln_g"], dsm["ln_b"]]),
                     merge_w=dsm["w"],
                     blocks=_pack_blocks(params["layers"][L - 1]["blocks"]
                                         + params["layers_up"][0]["blocks"], dims[L - 1]),
                     epi_w=params["layers_up"][1]["upsample"]["w"])

    kp["dec"] = []
    for i in range(1, L - 1):
        up = params["layers_up"][i]["upsample"]
        upn = params["layers_up"][i + 1]["upsample"]
        kp["dec"].append(dict(pre_ln=jnp.stack([up["ln_g"], up["ln_b"]]),
                              blocks=_pack_blocks(params["layers_up"][i]["blocks"],
                                                  dims_dec[i]),
                              epi_w=upn["w"]))

    c = dims_dec[-1]
    S = 4
    cq = c // S
    groups = S * S
    upl = params["layers_up"][L - 1]["upsample"]
    fu, fc = params["final_up"], params["final_conv"]
    gs = jnp.kron(jnp.eye(groups, dtype=jnp.float32),
                  jnp.full((cq, cq), 1.0 / cq, jnp.float32))
    tl = jnp.stack([jnp.tile(fu["ln_g"], groups), jnp.tile(fu["ln_b"], groups)])
    bd = jnp.concatenate([jnp.kron(jnp.eye(groups, dtype=jnp.float32), fc["w"]),
                          jnp.tile(fc["b"], groups)[None, :]], axis=0)
    kp["dlast"] = dict(pre_ln=jnp.stack([upl["ln_g"], upl["ln_b"]]),
                       blocks=_pack_blocks(params["layers_up"][L - 1]["blocks"], c),
                       epi_w=fu["w"],
                       tail=dict(gs=gs, ln=tl, bd=bd))
    return kp


# ----------------------------------------------------------------------------- main
if __name__ == "__main__":
    cfg = dict(
        patch_size=4,
        in_chans=3,
        num_classes=4,
        depths=[1, 1, 2, 1],
        depths_decoder=[1, 2, 1, 1],
        dims=[16, 32, 64, 128],
        dims_decoder=[128, 64, 32, 16],
    )

    key = jax.random.PRNGKey(0)
    k_params, k_x = jax.random.split(key)
    params = init_params(k_params, cfg)
    packed = pack_params(params, cfg)

    x = jax.random.normal(k_x, (2, 3, 32, 32), jnp.float32)   # NCHW like the torch module

    fwd = jax.jit(lambda xx, pp: lmessm_forward(xx, pp, cfg))
    out = jax.block_until_ready(fwd(x, packed))

    assert out.shape == (2, cfg["num_classes"], 32, 32), out.shape
    assert bool(jnp.all(jnp.isfinite(out)))
    print("KERNEL_OK")
</pallas_src>

<mosaic_0001>
module attributes {stable_mosaic.version = 11 : i64} {
  func.func @_fused_stage_kernel(%arg0: i32, %arg1: memref<128x48xf32, #tpu.memory_space<vmem>>, %arg2: memref<48x16xbf16, #tpu.memory_space<vmem>>, %arg3: memref<3x16xf32, #tpu.memory_space<vmem>>, %arg4: memref<1x4x32xf32, #tpu.memory_space<vmem>>, %arg5: memref<1x16x32xbf16, #tpu.memory_space<vmem>>, %arg6: memref<1x32x16xbf16, #tpu.memory_space<vmem>>, %arg7: memref<128x16xf32, #tpu.memory_space<vmem>>) attributes {dimension_semantics = [#tpu.dimension_semantics<parallel>], iteration_bounds = array<i64: 1>, scalar_prefetch = 0 : i64, scratch_operands = 0 : i64, tpu.core_type = #tpu.core_type<tc>, window_params = [{transform_indices = @transform_0, window_bounds = array<i64: 128, 48>}, {pipeline_mode = #tpu.pipeline_mode<synchronous>, transform_indices = @transform_1, window_bounds = array<i64: 48, 16>}, {pipeline_mode = #tpu.pipeline_mode<synchronous>, transform_indices = @transform_2, window_bounds = array<i64: 3, 16>}, {pipeline_mode = #tpu.pipeline_mode<synchronous>, transform_indices = @transform_3, window_bounds = array<i64: 1, 4, 32>}, {pipeline_mode = #tpu.pipeline_mode<synchronous>, transform_indices = @transform_4, window_bounds = array<i64: 1, 16, 32>}, {pipeline_mode = #tpu.pipeline_mode<synchronous>, transform_indices = @transform_5, window_bounds = array<i64: 1, 32, 16>}, {transform_indices = @transform_6, window_bounds = array<i64: 128, 16>}]} {
    %c0 = arith.constant 0 : index
    %c0_0 = arith.constant 0 : index
    %0 = vector.load %arg1[%c0, %c0_0] : memref<128x48xf32, #tpu.memory_space<vmem>>, vector<128x48xf32>
    %c0_1 = arith.constant 0 : index
    %c0_2 = arith.constant 0 : index
    %1 = vector.load %arg2[%c0_1, %c0_2] : memref<48x16xbf16, #tpu.memory_space<vmem>>, vector<48x16xbf16>
    %c0_3 = arith.constant 0 : index
    %c0_4 = arith.constant 0 : index
    %2 = vector.load %arg3[%c0_3, %c0_4] : memref<3x16xf32, #tpu.memory_space<vmem>>, vector<3x16xf32>
    %3 = arith.truncf %0 : vector<128x48xf32> to vector<128x48xbf16>
    %cst = arith.constant dense<0.000000e+00> : vector<128x16xf32>
    %4 = tpu.matmul %3, %1, %cst {dimension_numbers = #tpu.dot_dimension_numbers<[1], [0], [0], [1], [0, 0, 1, 1], [], []>} : vector<128x48xbf16>, vector<48x16xbf16>, vector<128x16xf32> -> vector<128x16xf32>
    %5 = vector.extract_strided_slice %2 {offsets = [0, 0], sizes = [1, 16], strides = [1, 1]} : vector<3x16xf32> to vector<1x16xf32>
    %6 = vector.broadcast %5 : vector<1x16xf32> to vector<128x16xf32>
    %7 = arith.addf %4, %6 : vector<128x16xf32>
    %8 = vector.extract_strided_slice %2 {offsets = [1, 0], sizes = [1, 16], strides = [1, 1]} : vector<3x16xf32> to vector<1x16xf32>
    %9 = vector.extract_strided_slice %2 {offsets = [2, 0], sizes = [1, 16], strides = [1, 1]} : vector<3x16xf32> to vector<1x16xf32>
    %cst_5 = arith.constant dense<0.000000e+00> : vector<128xf32>
    %10 = vector.multi_reduction <add>, %7, %cst_5 [1] : vector<128x16xf32> to vector<128xf32>
    %11 = vector.shape_cast %10 : vector<128xf32> to vector<128x1xf32>
    %cst_6 = arith.constant 1.600000e+01 : f32
    %12 = vector.broadcast %cst_6 : f32 to vector<128x1xf32>
    %13 = arith.divf %11, %12 : vector<128x1xf32>
    %14 = arith.mulf %7, %7 : vector<128x16xf32>
    %cst_7 = arith.constant dense<0.000000e+00> : vector<128xf32>
    %15 = vector.multi_reduction <add>, %14, %cst_7 [1] : vector<128x16xf32> to vector<128xf32>
    %16 = vector.shape_cast %15 : vector<128xf32> to vector<128x1xf32>
    %cst_8 = arith.constant 1.600000e+01 : f32
    %17 = vector.broadcast %cst_8 : f32 to vector<128x1xf32>
    %18 = arith.divf %16, %17 : vector<128x1xf32>
    %19 = arith.mulf %13, %13 : vector<128x1xf32>
    %20 = arith.subf %18, %19 : vector<128x1xf32>
    %cst_9 = arith.constant 0.000000e+00 : f32
    %21 = vector.broadcast %cst_9 : f32 to vector<128x1xf32>
    %22 = arith.maximumf %20, %21 : vector<128x1xf32>
    %23 = vector.broadcast %13 : vector<128x1xf32> to vector<128x16xf32>
    %24 = arith.subf %7, %23 : vector<128x16xf32>
    %cst_10 = arith.constant 9.99999974E-6 : f32
    %25 = vector.broadcast %cst_10 : f32 to vector<128x1xf32>
    %26 = arith.addf %22, %25 : vector<128x1xf32>
    %27 = math.rsqrt %26 : vector<128x1xf32>
    %28 = vector.broadcast %27 : vector<128x1xf32> to vector<128x16xf32>
    %29 = arith.mulf %24, %28 : vector<128x16xf32>
    %30 = vector.broadcast %8 : vector<1x16xf32> to vector<128x16xf32>
    %31 = arith.mulf %29, %30 : vector<128x16xf32>
    %32 = vector.broadcast %9 : vector<1x16xf32> to vector<128x16xf32>
    %33 = arith.addf %31, %32 : vector<128x16xf32>
    %c0_11 = arith.constant 0 : index
    %c0_12 = arith.constant 0 : index
    %c0_13 = arith.constant 0 : index
    %34 = vector.load %arg4[%c0_11, %c0_12, %c0_13] : memref<1x4x32xf32, #tpu.memory_space<vmem>>, vector<1x4x32xf32>
    %35 = vector.shape_cast %34 : vector<1x4x32xf32> to vector<4x32xf32>
    %36 = vector.extract_strided_slice %35 {offsets = [0, 0], sizes = [1, 16], strides = [1, 1]} : vector<4x32xf32> to vector<1x16xf32>
    %37 = vector.extract_strided_slice %35 {offsets = [1, 0], sizes = [1, 16], strides = [1, 1]} : vector<4x32xf32> to vector<1x16xf32>
    %cst_14 = arith.constant dense<0.000000e+00> : vector<128xf32>
    %38 = vector.multi_reduction <add>, %33, %cst_14 [1] : vector<128x16xf32> to vector<128xf32>
    %39 = vector.shape_cast %38 : vector<128xf32> to vector<128x1xf32>
    %cst_15 = arith.constant 1.600000e+01 : f32
    %40 = vector.broadcast %cst_15 : f32 to vector<128x1xf32>
    %41 = arith.divf %39, %40 : vector<128x1xf32>
    %42 = arith.mulf %33, %33 : vector<128x16xf32>
    %cst_16 = arith.constant dense<0.000000e+00> : vector<128xf32>
    %43 = vector.multi_reduction <add>, %42, %cst_16 [1] : vector<128x16xf32> to vector<128xf32>
    %44 = vector.shape_cast %43 : vector<128xf32> to vector<128x1xf32>
    %cst_17 = arith.constant 1.600000e+01 : f32
    %45 = vector.broadcast %cst_17 : f32 to vector<128x1xf32>
    %46 = arith.divf %44, %45 : vector<128x1xf32>
    %47 = arith.mulf %41, %41 : vector<128x1xf32>
    %48 = arith.subf %46, %47 : vector<128x1xf32>
    %cst_18 = arith.constant 0.000000e+00 : f32
    %49 = vector.broadcast %cst_18 : f32 to vector<128x1xf32>
    %50 = arith.maximumf %48, %49 : vector<128x1xf32>
    %51 = vector.broadcast %41 : vector<128x1xf32> to vector<128x16xf32>
    %52 = arith.subf %33, %51 : vector<128x16xf32>
    %cst_19 = arith.constant 9.99999974E-6 : f32
    %53 = vector.broadcast %cst_19 : f32 to vector<128x1xf32>
    %54 = arith.addf %50, %53 : vector<128x1xf32>
    %55 = math.rsqrt %54 : vector<128x1xf32>
    %56 = vector.broadcast %55 : vector<128x1xf32> to vector<128x16xf32>
    %57 = arith.mulf %52, %56 : vector<128x16xf32>
    %58 = vector.broadcast %36 : vector<1x16xf32> to vector<128x16xf32>
    %59 = arith.mulf %57, %58 : vector<128x16xf32>
    %60 = vector.broadcast %37 : vector<1x16xf32> to vector<128x16xf32>
    %61 = arith.addf %59, %60 : vector<128x16xf32>
    %c0_20 = arith.constant 0 : index
    %c0_21 = arith.constant 0 : index
    %c0_22 = arith.constant 0 : index
    %62 = vector.load %arg5[%c0_20, %c0_21, %c0_22] : memref<1x16x32xbf16, #tpu.memory_space<vmem>>, vector<1x16x32xbf16>
    %63 = vector.shape_cast %62 : vector<1x16x32xbf16> to vector<16x32xbf16>
    %64 = arith.truncf %61 : vector<128x16xf32> to vector<128x16xbf16>
    %cst_23 = arith.constant dense<0.000000e+00> : vector<128x32xf32>
    %65 = tpu.matmul %64, %63, %cst_23 {dimension_numbers = #tpu.dot_dimension_numbers<[1], [0], [0], [1], [0, 0, 1, 1], [], []>} : vector<128x16xbf16>, vector<16x32xbf16>, vector<128x32xf32> -> vector<128x32xf32>
    %66 = vector.extract_strided_slice %35 {offsets = [2, 0], sizes = [1, 32], strides = [1, 1]} : vector<4x32xf32> to vector<1x32xf32>
    %67 = vector.broadcast %66 : vector<1x32xf32> to vector<128x32xf32>
    %68 = arith.addf %65, %67 : vector<128x32xf32>
    %69 = arith.negf %68 : vector<128x32xf32>
    %70 = math.exp %69 : vector<128x32xf32>
    %cst_24 = arith.constant 1.000000e+00 : f32
    %71 = vector.broadcast %cst_24 : f32 to vector<128x32xf32>
    %72 = arith.addf %71, %70 : vector<128x32xf32>
    %73 = arith.divf %71, %72 : vector<128x32xf32>
    %74 = arith.mulf %68, %73 : vector<128x32xf32>
    %c0_25 = arith.constant 0 : index
    %c0_26 = arith.constant 0 : index
    %c0_27 = arith.constant 0 : index
    %75 = vector.load %arg6[%c0_25, %c0_26, %c0_27] : memref<1x32x16xbf16, #tpu.memory_space<vmem>>, vector<1x32x16xbf16>
    %76 = vector.shape_cast %75 : vector<1x32x16xbf16> to vector<32x16xbf16>
    %77 = arith.truncf %74 : vector<128x32xf32> to vector<128x32xbf16>
    %cst_28 = arith.constant dense<0.000000e+00> : vector<128x16xf32>
    %78 = tpu.matmul %77, %76, %cst_28 {dimension_numbers = #tpu.dot_dimension_numbers<[1], [0], [0], [1], [0, 0, 1, 1], [], []>} : vector<128x32xbf16>, vector<32x16xbf16>, vector<128x16xf32> -> vector<128x16xf32>
    %79 = vector.extract_strided_slice %35 {offsets = [3, 0], sizes = [1, 16], strides = [1, 1]} : vector<4x32xf32> to vector<1x16xf32>
    %80 = vector.broadcast %79 : vector<1x16xf32> to vector<128x16xf32>
    %81 = arith.addf %78, %80 : vector<128x16xf32>
    %82 = arith.addf %33, %81 : vector<128x16xf32>
    %c0_29 = arith.constant 0 : index
    %c0_30 = arith.constant 0 : index
    %83 = vector.load %arg7[%c0_29, %c0_30] : memref<128x16xf32, #tpu.memory_space<vmem>>, vector<128x16xf32>
    tpu.vector_store %arg7[%c0_29, %c0_30], %82 {strides = array<i32>} : memref<128x16xf32, #tpu.memory_space<vmem>>, vector<128x16xf32>,
    return
  }
  func.func @transform_0(%arg0: i32) -> (i32, i32) {
    %c0_i32 = arith.constant 0 : i32
    %c0_i32_0 = arith.constant 0 : i32
    return %arg0, %c0_i32 : i32, i32
  }
  func.func @transform_1(%arg0: i32) -> (i32, i32) {
    %c0_i32 = arith.constant 0 : i32
    %c0_i32_0 = arith.constant 0 : i32
    %c0_i32_1 = arith.constant 0 : i32
    return %c0_i32, %c0_i32_0 : i32, i32
  }
  func.func @transform_2(%arg0: i32) -> (i32, i32) {
    %c0_i32 = arith.constant 0 : i32
    %c0_i32_0 = arith.constant 0 : i32
    %c0_i32_1 = arith.constant 0 : i32
    return %c0_i32, %c0_i32_0 : i32, i32
  }
  func.func @transform_3(%arg0: i32) -> (i32, i32, i32) {
    %c0_i32 = arith.constant 0 : i32
    %c0_i32_0 = arith.constant 0 : i32
    %c0_i32_1 = arith.constant 0 : i32
    %c0_i32_2 = arith.constant 0 : i32
    return %c0_i32, %c0_i32_0, %c0_i32_1 : i32, i32, i32
  }
  func.func @transform_4(%arg0: i32) -> (i32, i32, i32) {
    %c0_i32 = arith.constant 0 : i32
    %c0_i32_0 = arith.constant 0 : i32
    %c0_i32_1 = arith.constant 0 : i32
    %c0_i32_2 = arith.constant 0 : i32
    return %c0_i32, %c0_i32_0, %c0_i32_1 : i32, i32, i32
  }
  func.func @transform_5(%arg0: i32) -> (i32, i32, i32) {
    %c0_i32 = arith.constant 0 : i32
    %c0_i32_0 = arith.constant 0 : i32
    %c0_i32_1 = arith.constant 0 : i32
    %c0_i32_2 = arith.constant 0 : i32
    return %c0_i32, %c0_i32_0, %c0_i32_1 : i32, i32, i32
  }
  func.func @transform_6(%arg0: i32) -> (i32, i32) {
    %c0_i32 = arith.constant 0 : i32
    %c0_i32_0 = arith.constant 0 : i32
    return %arg0, %c0_i32 : i32, i32
  }
}

module attributes {stable_mosaic.version = 11 : i64} {
  func.func @_fused_stage_kernel(%arg0: i32, %arg1: memref<32x64xf32, #tpu.memory_space<vmem>>, %arg2: memref<2x64xf32, #tpu.memory_space<vmem>>, %arg3: memref<64x32xbf16, #tpu.memory_space<vmem>>, %arg4: memref<1x4x64xf32, #tpu.memory_space<vmem>>, %arg5: memref<1x32x64xbf16, #tpu.memory_space<vmem>>, %arg6: memref<1x64x32xbf16, #tpu.memory_space<vmem>>, %arg7: memref<32x32xf32, #tpu.memory_space<vmem>>, %arg8: memref<32x32xf32, #tpu.memory_space<vmem>>) attributes {dimension_semantics = [#tpu.dimension_semantics<parallel>], iteration_bounds = array<i64: 1>, scalar_prefetch = 0 : i64, scratch_operands = 0 : i64, tpu.core_type = #tpu.core_type<tc>, window_params = [{transform_indices = @transform_0, window_bounds = array<i64: 32, 64>}, {pipeline_mode = #tpu.pipeline_mode<synchronous>, transform_indices = @transform_1, window_bounds = array<i64: 2, 64>}, {pipeline_mode = #tpu.pipeline_mode<synchronous>, transform_indices = @transform_2, window_bounds = array<i64: 64, 32>}, {pipeline_mode = #tpu.pipeline_mode<synchronous>, transform_indices = @transform_3, window_bounds = array<i64: 1, 4, 64>}, {pipeline_mode = #tpu.pipeline_mode<synchronous>, transform_indices = @transform_4, window_bounds = array<i64: 1, 32, 64>}, {pipeline_mode = #tpu.pipeline_mode<synchronous>, transform_indices = @transform_5, window_bounds = array<i64: 1, 64, 32>}, {transform_indices = @transform_6, window_bounds = array<i64: 32, 32>}, {transform_indices = @transform_7, window_bounds = array<i64: 32, 32>}]} {
    %c0 = arith.constant 0 : index
    %c0_0 = arith.constant 0 : index
    %0 = vector.load %arg1[%c0, %c0_0] : memref<32x64xf32, #tpu.memory_space<vmem>>, vector<32x64xf32>
    %c0_1 = arith.constant 0 : index
    %c0_2 = arith.constant 0 : index
    %1 = vector.load %arg2[%c0_1, %c0_2] : memref<2x64xf32, #tpu.memory_space<vmem>>, vector<2x64xf32>
    %c0_3 = arith.constant 0 : index
    %c0_4 = arith.constant 0 : index
    %2 = vector.load %arg3[%c0_3, %c0_4] : memref<64x32xbf16, #tpu.memory_space<vmem>>, vector<64x32xbf16>
    %3 = vector.extract_strided_slice %1 {offsets = [0, 0], sizes = [1, 64], strides = [1, 1]} : vector<2x64xf32> to vector<1x64xf32>
    %4 = vector.extract_strided_slice %1 {offsets = [1, 0], sizes = [1, 64], strides = [1, 1]} : vector<2x64xf32> to vector<1x64xf32>
    %cst = arith.constant dense<0.000000e+00> : vector<32xf32>
    %5 = vector.multi_reduction <add>, %0, %cst [1] : vector<32x64xf32> to vector<32xf32>
    %6 = vector.shape_cast %5 : vector<32xf32> to vector<32x1xf32>
    %cst_5 = arith.constant 6.400000e+01 : f32
    %7 = vector.broadcast %cst_5 : f32 to vector<32x1xf32>
    %8 = arith.divf %6, %7 : vector<32x1xf32>
    %9 = arith.mulf %0, %0 : vector<32x64xf32>
    %cst_6 = arith.constant dense<0.000000e+00> : vector<32xf32>
    %10 = vector.multi_reduction <add>, %9, %cst_6 [1] : vector<32x64xf32> to vector<32xf32>
    %11 = vector.shape_cast %10 : vector<32xf32> to vector<32x1xf32>
    %cst_7 = arith.constant 6.400000e+01 : f32
    %12 = vector.broadcast %cst_7 : f32 to vector<32x1xf32>
    %13 = arith.divf %11, %12 : vector<32x1xf32>
    %14 = arith.mulf %8, %8 : vector<32x1xf32>
    %15 = arith.subf %13, %14 : vector<32x1xf32>
    %cst_8 = arith.constant 0.000000e+00 : f32
    %16 = vector.broadcast %cst_8 : f32 to vector<32x1xf32>
    %17 = arith.maximumf %15, %16 : vector<32x1xf32>
    %18 = vector.broadcast %8 : vector<32x1xf32> to vector<32x64xf32>
    %19 = arith.subf %0, %18 : vector<32x64xf32>
    %cst_9 = arith.constant 9.99999974E-6 : f32
    %20 = vector.broadcast %cst_9 : f32 to vector<32x1xf32>
    %21 = arith.addf %17, %20 : vector<32x1xf32>
    %22 = math.rsqrt %21 : vector<32x1xf32>
    %23 = vector.broadcast %22 : vector<32x1xf32> to vector<32x64xf32>
    %24 = arith.mulf %19, %23 : vector<32x64xf32>
    %25 = vector.broadcast %3 : vector<1x64xf32> to vector<32x64xf32>
    %26 = arith.mulf %24, %25 : vector<32x64xf32>
    %27 = vector.broadcast %4 : vector<1x64xf32> to vector<32x64xf32>
    %28 = arith.addf %26, %27 : vector<32x64xf32>
    %29 = arith.truncf %28 : vector<32x64xf32> to vector<32x64xbf16>
    %cst_10 = arith.constant dense<0.000000e+00> : vector<32x32xf32>
    %30 = tpu.matmul %29, %2, %cst_10 {dimension_numbers = #tpu.dot_dimension_numbers<[1], [0], [0], [1], [0, 0, 1, 1], [], []>} : vector<32x64xbf16>, vector<64x32xbf16>, vector<32x32xf32> -> vector<32x32xf32>
    %c0_11 = arith.constant 0 : index
    %c0_12 = arith.constant 0 : index
    %31 = vector.load %arg7[%c0_11, %c0_12] : memref<32x32xf32, #tpu.memory_space<vmem>>, vector<32x32xf32>
    tpu.vector_store %arg7[%c0_11, %c0_12], %30 {strides = array<i32>} : memref<32x32xf32, #tpu.memory_space<vmem>>, vector<32x32xf32>,
    %c0_13 = arith.constant 0 : index
    %c0_14 = arith.constant 0 : index
    %c0_15 = arith.constant 0 : index
    %32 = vector.load %arg4[%c0_13, %c0_14, %c0_15] : memref<1x4x64xf32, #tpu.memory_space<vmem>>, vector<1x4x64xf32>
    %33 = vector.shape_cast %32 : vector<1x4x64xf32> to vector<4x64xf32>
    %34 = vector.extract_strided_slice %33 {offsets = [0, 0], sizes = [1, 32], strides = [1, 1]} : vector<4x64xf32> to vector<1x32xf32>
    %35 = vector.extract_strided_slice %33 {offsets = [1, 0], sizes = [1, 32], strides = [1, 1]} : vector<4x64xf32> to vector<1x32xf32>
    %cst_16 = arith.constant dense<0.000000e+00> : vector<32xf32>
    %36 = vector.multi_reduction <add>, %30, %cst_16 [1] : vector<32x32xf32> to vector<32xf32>
    %37 = vector.shape_cast %36 : vector<32xf32> to vector<32x1xf32>
    %cst_17 = arith.constant 3.200000e+01 : f32
    %38 = vector.broadcast %cst_17 : f32 to vector<32x1xf32>
    %39 = arith.divf %37, %38 : vector<32x1xf32>
    %40 = arith.mulf %30, %30 : vector<32x32xf32>
    %cst_18 = arith.constant dense<0.000000e+00> : vector<32xf32>
    %41 = vector.multi_reduction <add>, %40, %cst_18 [1] : vector<32x32xf32> to vector<32xf32>
    %42 = vector.shape_cast %41 : vector<32xf32> to vector<32x1xf32>
    %cst_19 = arith.constant 3.200000e+01 : f32
    %43 = vector.broadcast %cst_19 : f32 to vector<32x1xf32>
    %44 = arith.divf %42, %43 : vector<32x1xf32>
    %45 = arith.mulf %39, %39 : vector<32x1xf32>
    %46 = arith.subf %44, %45 : vector<32x1xf32>
    %cst_20 = arith.constant 0.000000e+00 : f32
    %47 = vector.broadcast %cst_20 : f32 to vector<32x1xf32>
    %48 = arith.maximumf %46, %47 : vector<32x1xf32>
    %49 = vector.broadcast %39 : vector<32x1xf32> to vector<32x32xf32>
    %50 = arith.subf %30, %49 : vector<32x32xf32>
    %cst_21 = arith.constant 9.99999974E-6 : f32
    %51 = vector.broadcast %cst_21 : f32 to vector<32x1xf32>
    %52 = arith.addf %48, %51 : vector<32x1xf32>
    %53 = math.rsqrt %52 : vector<32x1xf32>
    %54 = vector.broadcast %53 : vector<32x1xf32> to vector<32x32xf32>
    %55 = arith.mulf %50, %54 : vector<32x32xf32>
    %56 = vector.broadcast %34 : vector<1x32xf32> to vector<32x32xf32>
    %57 = arith.mulf %55, %56 : vector<32x32xf32>
    %58 = vector.broadcast %35 : vector<1x32xf32> to vector<32x32xf32>
    %59 = arith.addf %57, %58 : vector<32x32xf32>
    %c0_22 = arith.constant 0 : index
    %c0_23 = arith.constant 0 : index
    %c0_24 = arith.constant 0 : index
    %60 = vector.load %arg5[%c0_22, %c0_23, %c0_24] : memref<1x32x64xbf16, #tpu.memory_space<vmem>>, vector<1x32x64xbf16>
    %61 = vector.shape_cast %60 : vector<1x32x64xbf16> to vector<32x64xbf16>
    %62 = arith.truncf %59 : vector<32x32xf32> to vector<32x32xbf16>
    %cst_25 = arith.constant dense<0.000000e+00> : vector<32x64xf32>
    %63 = tpu.matmul %62, %61, %cst_25 {dimension_numbers = #tpu.dot_dimension_numbers<[1], [0], [0], [1], [0, 0, 1, 1], [], []>} : vector<32x32xbf16>, vector<32x64xbf16>, vector<32x64xf32> -> vector<32x64xf32>
    %64 = vector.extract_strided_slice %33 {offsets = [2, 0], sizes = [1, 64], strides = [1, 1]} : vector<4x64xf32> to vector<1x64xf32>
    %65 = vector.broadcast %64 : vector<1x64xf32> to vector<32x64xf32>
    %66 = arith.addf %63, %65 : vector<32x64xf32>
    %67 = arith.negf %66 : vector<32x64xf32>
    %68 = math.exp %67 : vector<32x64xf32>
    %cst_26 = arith.constant 1.000000e+00 : f32
    %69 = vector.broadcast %cst_26 : f32 to vector<32x64xf32>
    %70 = arith.addf %69, %68 : vector<32x64xf32>
    %71 = arith.divf %69, %70 : vector<32x64xf32>
    %72 = arith.mulf %66, %71 : vector<32x64xf32>
    %c0_27 = arith.constant 0 : index
    %c0_28 = arith.constant 0 : index
    %c0_29 = arith.constant 0 : index
    %73 = vector.load %arg6[%c0_27, %c0_28, %c0_29] : memref<1x64x32xbf16, #tpu.memory_space<vmem>>, vector<1x64x32xbf16>
    %74 = vector.shape_cast %73 : vector<1x64x32xbf16> to vector<64x32xbf16>
    %75 = arith.truncf %72 : vector<32x64xf32> to vector<32x64xbf16>
    %cst_30 = arith.constant dense<0.000000e+00> : vector<32x32xf32>
    %76 = tpu.matmul %75, %74, %cst_30 {dimension_numbers = #tpu.dot_dimension_numbers<[1], [0], [0], [1], [0, 0, 1, 1], [], []>} : vector<32x64xbf16>, vector<64x32xbf16>, vector<32x32xf32> -> vector<32x32xf32>
    %77 = vector.extract_strided_slice %33 {offsets = [3, 0], sizes = [1, 32], strides = [1, 1]} : vector<4x64xf32> to vector<1x32xf32>
    %78 = vector.broadcast %77 : vector<1x32xf32> to vector<32x32xf32>
    %79 = arith.addf %76, %78 : vector<32x32xf32>
    %80 = arith.addf %30, %79 : vector<32x32xf32>
    %c0_31 = arith.constant 0 : index
    %c0_32 = arith.constant 0 : index
    %81 = vector.load %arg8[%c0_31, %c0_32] : memref<32x32xf32, #tpu.memory_space<vmem>>, vector<32x32xf32>
    tpu.vector_store %arg8[%c0_31, %c0_32], %80 {strides = array<i32>} : memref<32x32xf32, #tpu.memory_space<vmem>>, vector<32x32xf32>,
    return
  }
  func.func @transform_0(%arg0: i32) -> (i32, i32) {
    %c0_i32 = arith.constant 0 : i32
    %c0_i32_0 = arith.constant 0 : i32
    return %arg0, %c0_i32 : i32, i32
  }
  func.func @transform_1(%arg0: i32) -> (i32, i32) {
    %c0_i32 = arith.constant 0 : i32
    %c0_i32_0 = arith.constant 0 : i32
    %c0_i32_1 = arith.constant 0 : i32
    return %c0_i32, %c0_i32_0 : i32, i32
  }
  func.func @transform_2(%arg0: i32) -> (i32, i32) {
    %c0_i32 = arith.constant 0 : i32
    %c0_i32_0 = arith.constant 0 : i32
    %c0_i32_1 = arith.constant 0 : i32
    return %c0_i32, %c0_i32_0 : i32, i32
  }
  func.func @transform_3(%arg0: i32) -> (i32, i32, i32) {
    %c0_i32 = arith.constant 0 : i32
    %c0_i32_0 = arith.constant 0 : i32
    %c0_i32_1 = arith.constant 0 : i32
    %c0_i32_2 = arith.constant 0 : i32
    return %c0_i32, %c0_i32_0, %c0_i32_1 : i32, i32, i32
  }
  func.func @transform_4(%arg0: i32) -> (i32, i32, i32) {
    %c0_i32 = arith.constant 0 : i32
    %c0_i32_0 = arith.constant 0 : i32
    %c0_i32_1 = arith.constant 0 : i32
    %c0_i32_2 = arith.constant 0 : i32
    return %c0_i32, %c0_i32_0, %c0_i32_1 : i32, i32, i32
  }
  func.func @transform_5(%arg0: i32) -> (i32, i32, i32) {
    %c0_i32 = arith.constant 0 : i32
    %c0_i32_0 = arith.constant 0 : i32
    %c0_i32_1 = arith.constant 0 : i32
    %c0_i32_2 = arith.constant 0 : i32
    return %c0_i32, %c0_i32_0, %c0_i32_1 : i32, i32, i32
  }
  func.func @transform_6(%arg0: i32) -> (i32, i32) {
    %c0_i32 = arith.constant 0 : i32
    %c0_i32_0 = arith.constant 0 : i32
    return %arg0, %c0_i32 : i32, i32
  }
  func.func @transform_7(%arg0: i32) -> (i32, i32) {
    %c0_i32 = arith.constant 0 : i32
    %c0_i32_0 = arith.constant 0 : i32
    return %arg0, %c0_i32 : i32, i32
  }
}

module attributes {stable_mosaic.version = 11 : i64} {
  func.func @_fused_stage_kernel(%arg0: i32, %arg1: memref<8x128xf32, #tpu.memory_space<vmem>>, %arg2: memref<2x128xf32, #tpu.memory_space<vmem>>, %arg3: memref<128x64xbf16, #tpu.memory_space<vmem>>, %arg4: memref<2x4x128xf32, #tpu.memory_space<vmem>>, %arg5: memref<2x64x128xbf16, #tpu.memory_space<vmem>>, %arg6: memref<2x128x64xbf16, #tpu.memory_space<vmem>>, %arg7: memref<8x64xf32, #tpu.memory_space<vmem>>, %arg8: memref<8x64xf32, #tpu.memory_space<vmem>>) attributes {dimension_semantics = [#tpu.dimension_semantics<parallel>], iteration_bounds = array<i64: 1>, scalar_prefetch = 0 : i64, scratch_operands = 0 : i64, tpu.core_type = #tpu.core_type<tc>, window_params = [{transform_indices = @transform_0, window_bounds = array<i64: 8, 128>}, {pipeline_mode = #tpu.pipeline_mode<synchronous>, transform_indices = @transform_1, window_bounds = array<i64: 2, 128>}, {pipeline_mode = #tpu.pipeline_mode<synchronous>, transform_indices = @transform_2, window_bounds = array<i64: 128, 64>}, {pipeline_mode = #tpu.pipeline_mode<synchronous>, transform_indices = @transform_3, window_bounds = array<i64: 2, 4, 128>}, {pipeline_mode = #tpu.pipeline_mode<synchronous>, transform_indices = @transform_4, window_bounds = array<i64: 2, 64, 128>}, {pipeline_mode = #tpu.pipeline_mode<synchronous>, transform_indices = @transform_5, window_bounds = array<i64: 2, 128, 64>}, {transform_indices = @transform_6, window_bounds = array<i64: 8, 64>}, {transform_indices = @transform_7, window_bounds = array<i64: 8, 64>}]} {
    %c0 = arith.constant 0 : index
    %c0_0 = arith.constant 0 : index
    %0 = vector.load %arg1[%c0, %c0_0] : memref<8x128xf32, #tpu.memory_space<vmem>>, vector<8x128xf32>
    %c0_1 = arith.constant 0 : index
    %c0_2 = arith.constant 0 : index
    %1 = vector.load %arg2[%c0_1, %c0_2] : memref<2x128xf32, #tpu.memory_space<vmem>>, vector<2x128xf32>
    %c0_3 = arith.constant 0 : index
    %c0_4 = arith.constant 0 : index
    %2 = vector.load %arg3[%c0_3, %c0_4] : memref<128x64xbf16, #tpu.memory_space<vmem>>, vector<128x64xbf16>
    %3 = vector.extract_strided_slice %1 {offsets = [0, 0], sizes = [1, 128], strides = [1, 1]} : vector<2x128xf32> to vector<1x128xf32>
    %4 = vector.extract_strided_slice %1 {offsets = [1, 0], sizes = [1, 128], strides = [1, 1]} : vector<2x128xf32> to vector<1x128xf32>
    %cst = arith.constant dense<0.000000e+00> : vector<8xf32>
    %5 = vector.multi_reduction <add>, %0, %cst [1] : vector<8x128xf32> to vector<8xf32>
    %6 = vector.shape_cast %5 : vector<8xf32> to vector<8x1xf32>
    %cst_5 = arith.constant 1.280000e+02 : f32
    %7 = vector.broadcast %cst_5 : f32 to vector<8x1xf32>
    %8 = arith.divf %6, %7 : vector<8x1xf32>
    %9 = arith.mulf %0, %0 : vector<8x128xf32>
    %cst_6 = arith.constant dense<0.000000e+00> : vector<8xf32>
    %10 = vector.multi_reduction <add>, %9, %cst_6 [1] : vector<8x128xf32> to vector<8xf32>
    %11 = vector.shape_cast %10 : vector<8xf32> to vector<8x1xf32>
    %cst_7 = arith.constant 1.280000e+02 : f32
    %12 = vector.broadcast %cst_7 : f32 to vector<8x1xf32>
    %13 = arith.divf %11, %12 : vector<8x1xf32>
    %14 = arith.mulf %8, %8 : vector<8x1xf32>
    %15 = arith.subf %13, %14 : vector<8x1xf32>
    %cst_8 = arith.constant 0.000000e+00 : f32
    %16 = vector.broadcast %cst_8 : f32 to vector<8x1xf32>
    %17 = arith.maximumf %15, %16 : vector<8x1xf32>
    %18 = vector.broadcast %8 : vector<8x1xf32> to vector<8x128xf32>
    %19 = arith.subf %0, %18 : vector<8x128xf32>
    %cst_9 = arith.constant 9.99999974E-6 : f32
    %20 = vector.broadcast %cst_9 : f32 to vector<8x1xf32>
    %21 = arith.addf %17, %20 : vector<8x1xf32>
    %22 = math.rsqrt %21 : vector<8x1xf32>
    %23 = vector.broadcast %22 : vector<8x1xf32> to vector<8x128xf32>
    %24 = arith.mulf %19, %23 : vector<8x128xf32>
    %25 = vector.broadcast %3 : vector<1x128xf32> to vector<8x128xf32>
    %26 = arith.mulf %24, %25 : vector<8x128xf32>
    %27 = vector.broadcast %4 : vector<1x128xf32> to vector<8x128xf32>
    %28 = arith.addf %26, %27 : vector<8x128xf32>
    %29 = arith.truncf %28 : vector<8x128xf32> to vector<8x128xbf16>
    %cst_10 = arith.constant dense<0.000000e+00> : vector<8x64xf32>
    %30 = tpu.matmul %29, %2, %cst_10 {dimension_numbers = #tpu.dot_dimension_numbers<[1], [0], [0], [1], [0, 0, 1, 1], [], []>} : vector<8x128xbf16>, vector<128x64xbf16>, vector<8x64xf32> -> vector<8x64xf32>
    %c0_11 = arith.constant 0 : index
    %c0_12 = arith.constant 0 : index
    %31 = vector.load %arg7[%c0_11, %c0_12] : memref<8x64xf32, #tpu.memory_space<vmem>>, vector<8x64xf32>
    tpu.vector_store %arg7[%c0_11, %c0_12], %30 {strides = array<i32>} : memref<8x64xf32, #tpu.memory_space<vmem>>, vector<8x64xf32>,
    %c0_13 = arith.constant 0 : index
    %c0_14 = arith.constant 0 : index
    %c0_15 = arith.constant 0 : index
    %32 = vector.load %arg4[%c0_13, %c0_14, %c0_15] : memref<2x4x128xf32, #tpu.memory_space<vmem>>, vector<1x4x128xf32>
    %33 = vector.shape_cast %32 : vector<1x4x128xf32> to vector<4x128xf32>
    %34 = vector.extract_strided_slice %33 {offsets = [0, 0], sizes = [1, 64], strides = [1, 1]} : vector<4x128xf32> to vector<1x64xf32>
    %35 = vector.extract_strided_slice %33 {offsets = [1, 0], sizes = [1, 64], strides = [1, 1]} : vector<4x128xf32> to vector<1x64xf32>
    %cst_16 = arith.constant dense<0.000000e+00> : vector<8xf32>
    %36 = vector.multi_reduction <add>, %30, %cst_16 [1] : vector<8x64xf32> to vector<8xf32>
    %37 = vector.shape_cast %36 : vector<8xf32> to vector<8x1xf32>
    %cst_17 = arith.constant 6.400000e+01 : f32
    %38 = vector.broadcast %cst_17 : f32 to vector<8x1xf32>
    %39 = arith.divf %37, %38 : vector<8x1xf32>
    %40 = arith.mulf %30, %30 : vector<8x64xf32>
    %cst_18 = arith.constant dense<0.000000e+00> : vector<8xf32>
    %41 = vector.multi_reduction <add>, %40, %cst_18 [1] : vector<8x64xf32> to vector<8xf32>
    %42 = vector.shape_cast %41 : vector<8xf32> to vector<8x1xf32>
    %cst_19 = arith.constant 6.400000e+01 : f32
    %43 = vector.broadcast %cst_19 : f32 to vector<8x1xf32>
    %44 = arith.divf %42, %43 : vector<8x1xf32>
    %45 = arith.mulf %39, %39 : vector<8x1xf32>
    %46 = arith.subf %44, %45 : vector<8x1xf32>
    %cst_20 = arith.constant 0.000000e+00 : f32
    %47 = vector.broadcast %cst_20 : f32 to vector<8x1xf32>
    %48 = arith.maximumf %46, %47 : vector<8x1xf32>
    %49 = vector.broadcast %39 : vector<8x1xf32> to vector<8x64xf32>
    %50 = arith.subf %30, %49 : vector<8x64xf32>
    %cst_21 = arith.constant 9.99999974E-6 : f32
    %51 = vector.broadcast %cst_21 : f32 to vector<8x1xf32>
    %52 = arith.addf %48, %51 : vector<8x1xf32>
    %53 = math.rsqrt %52 : vector<8x1xf32>
    %54 = vector.broadcast %53 : vector<8x1xf32> to vector<8x64xf32>
    %55 = arith.mulf %50, %54 : vector<8x64xf32>
    %56 = vector.broadcast %34 : vector<1x64xf32> to vector<8x64xf32>
    %57 = arith.mulf %55, %56 : vector<8x64xf32>
    %58 = vector.broadcast %35 : vector<1x64xf32> to vector<8x64xf32>
    %59 = arith.addf %57, %58 : vector<8x64xf32>
    %c0_22 = arith.constant 0 : index
    %c0_23 = arith.constant 0 : index
    %c0_24 = arith.constant 0 : index
    %60 = vector.load %arg5[%c0_22, %c0_23, %c0_24] : memref<2x64x128xbf16, #tpu.memory_space<vmem>>, vector<1x64x128xbf16>
    %61 = vector.shape_cast %60 : vector<1x64x128xbf16> to vector<64x128xbf16>
    %62 = arith.truncf %59 : vector<8x64xf32> to vector<8x64xbf16>
    %cst_25 = arith.constant dense<0.000000e+00> : vector<8x128xf32>
    %63 = tpu.matmul %62, %61, %cst_25 {dimension_numbers = #tpu.dot_dimension_numbers<[1], [0], [0], [1], [0, 0, 1, 1], [], []>} : vector<8x64xbf16>, vector<64x128xbf16>, vector<8x128xf32> -> vector<8x128xf32>
    %64 = vector.extract_strided_slice %33 {offsets = [2, 0], sizes = [1, 128], strides = [1, 1]} : vector<4x128xf32> to vector<1x128xf32>
    %65 = vector.broadcast %64 : vector<1x128xf32> to vector<8x128xf32>
    %66 = arith.addf %63, %65 : vector<8x128xf32>
    %67 = arith.negf %66 : vector<8x128xf32>
    %68 = math.exp %67 : vector<8x128xf32>
    %cst_26 = arith.constant 1.000000e+00 : f32
    %69 = vector.broadcast %cst_26 : f32 to vector<8x128xf32>
    %70 = arith.addf %69, %68 : vector<8x128xf32>
    %71 = arith.divf %69, %70 : vector<8x128xf32>
    %72 = arith.mulf %66, %71 : vector<8x128xf32>
    %c0_27 = arith.constant 0 : index
    %c0_28 = arith.constant 0 : index
    %c0_29 = arith.constant 0 : index
    %73 = vector.load %arg6[%c0_27, %c0_28, %c0_29] : memref<2x128x64xbf16, #tpu.memory_space<vmem>>, vector<1x128x64xbf16>
    %74 = vector.shape_cast %73 : vector<1x128x64xbf16> to vector<128x64xbf16>
    %75 = arith.truncf %72 : vector<8x128xf32> to vector<8x128xbf16>
    %cst_30 = arith.constant dense<0.000000e+00> : vector<8x64xf32>
    %76 = tpu.matmul %75, %74, %cst_30 {dimension_numbers = #tpu.dot_dimension_numbers<[1], [0], [0], [1], [0, 0, 1, 1], [], []>} : vector<8x128xbf16>, vector<128x64xbf16>, vector<8x64xf32> -> vector<8x64xf32>
    %77 = vector.extract_strided_slice %33 {offsets = [3, 0], sizes = [1, 64], strides = [1, 1]} : vector<4x128xf32> to vector<1x64xf32>
    %78 = vector.broadcast %77 : vector<1x64xf32> to vector<8x64xf32>
    %79 = arith.addf %76, %78 : vector<8x64xf32>
    %80 = arith.addf %30, %79 : vector<8x64xf32>
    %c1 = arith.constant 1 : index
    %c0_31 = arith.constant 0 : index
    %c0_32 = arith.constant 0 : index
    %81 = vector.load %arg4[%c1, %c0_31, %c0_32] : memref<2x4x128xf32, #tpu.memory_space<vmem>>, vector<1x4x128xf32>
    %82 = vector.shape_cast %81 : vector<1x4x128xf32> to vector<4x128xf32>
    %83 = vector.extract_strided_slice %82 {offsets = [0, 0], sizes = [1, 64], strides = [1, 1]} : vector<4x128xf32> to vector<1x64xf32>
    %84 = vector.extract_strided_slice %82 {offsets = [1, 0], sizes = [1, 64], strides = [1, 1]} : vector<4x128xf32> to vector<1x64xf32>
    %cst_33 = arith.constant dense<0.000000e+00> : vector<8xf32>
    %85 = vector.multi_reduction <add>, %80, %cst_33 [1] : vector<8x64xf32> to vector<8xf32>
    %86 = vector.shape_cast %85 : vector<8xf32> to vector<8x1xf32>
    %cst_34 = arith.constant 6.400000e+01 : f32
    %87 = vector.broadcast %cst_34 : f32 to vector<8x1xf32>
    %88 = arith.divf %86, %87 : vector<8x1xf32>
    %89 = arith.mulf %80, %80 : vector<8x64xf32>
    %cst_35 = arith.constant dense<0.000000e+00> : vector<8xf32>
    %90 = vector.multi_reduction <add>, %89, %cst_35 [1] : vector<8x64xf32> to vector<8xf32>
    %91 = vector.shape_cast %90 : vector<8xf32> to vector<8x1xf32>
    %cst_36 = arith.constant 6.400000e+01 : f32
    %92 = vector.broadcast %cst_36 : f32 to vector<8x1xf32>
    %93 = arith.divf %91, %92 : vector<8x1xf32>
    %94 = arith.mulf %88, %88 : vector<8x1xf32>
    %95 = arith.subf %93, %94 : vector<8x1xf32>
    %cst_37 = arith.constant 0.000000e+00 : f32
    %96 = vector.broadcast %cst_37 : f32 to vector<8x1xf32>
    %97 = arith.maximumf %95, %96 : vector<8x1xf32>
    %98 = vector.broadcast %88 : vector<8x1xf32> to vector<8x64xf32>
    %99 = arith.subf %80, %98 : vector<8x64xf32>
    %cst_38 = arith.constant 9.99999974E-6 : f32
    %100 = vector.broadcast %cst_38 : f32 to vector<8x1xf32>
    %101 = arith.addf %97, %100 : vector<8x1xf32>
    %102 = math.rsqrt %101 : vector<8x1xf32>
    %103 = vector.broadcast %102 : vector<8x1xf32> to vector<8x64xf32>
    %104 = arith.mulf %99, %103 : vector<8x64xf32>
    %105 = vector.broadcast %83 : vector<1x64xf32> to vector<8x64xf32>
    %106 = arith.mulf %104, %105 : vector<8x64xf32>
    %107 = vector.broadcast %84 : vector<1x64xf32> to vector<8x64xf32>
    %108 = arith.addf %106, %107 : vector<8x64xf32>
    %c1_39 = arith.constant 1 : index
    %c0_40 = arith.constant 0 : index
    %c0_41 = arith.constant 0 : index
    %109 = vector.load %arg5[%c1_39, %c0_40, %c0_41] : memref<2x64x128xbf16, #tpu.memory_space<vmem>>, vector<1x64x128xbf16>
    %110 = vector.shape_cast %109 : vector<1x64x128xbf16> to vector<64x128xbf16>
    %111 = arith.truncf %108 : vector<8x64xf32> to vector<8x64xbf16>
    %cst_42 = arith.constant dense<0.000000e+00> : vector<8x128xf32>
    %112 = tpu.matmul %111, %110, %cst_42 {dimension_numbers = #tpu.dot_dimension_numbers<[1], [0], [0], [1], [0, 0, 1, 1], [], []>} : vector<8x64xbf16>, vector<64x128xbf16>, vector<8x128xf32> -> vector<8x128xf32>
    %113 = vector.extract_strided_slice %82 {offsets = [2, 0], sizes = [1, 128], strides = [1, 1]} : vector<4x128xf32> to vector<1x128xf32>
    %114 = vector.broadcast %113 : vector<1x128xf32> to vector<8x128xf32>
    %115 = arith.addf %112, %114 : vector<8x128xf32>
    %116 = arith.negf %115 : vector<8x128xf32>
    %117 = math.exp %116 : vector<8x128xf32>
    %cst_43 = arith.constant 1.000000e+00 : f32
    %118 = vector.broadcast %cst_43 : f32 to vector<8x128xf32>
    %119 = arith.addf %118, %117 : vector<8x128xf32>
    %120 = arith.divf %118, %119 : vector<8x128xf32>
    %121 = arith.mulf %115, %120 : vector<8x128xf32>
    %c1_44 = arith.constant 1 : index
    %c0_45 = arith.constant 0 : index
    %c0_46 = arith.constant 0 : index
    %122 = vector.load %arg6[%c1_44, %c0_45, %c0_46] : memref<2x128x64xbf16, #tpu.memory_space<vmem>>, vector<1x128x64xbf16>
    %123 = vector.shape_cast %122 : vector<1x128x64xbf16> to vector<128x64xbf16>
    %124 = arith.truncf %121 : vector<8x128xf32> to vector<8x128xbf16>
    %cst_47 = arith.constant dense<0.000000e+00> : vector<8x64xf32>
    %125 = tpu.matmul %124, %123, %cst_47 {dimension_numbers = #tpu.dot_dimension_numbers<[1], [0], [0], [1], [0, 0, 1, 1], [], []>} : vector<8x128xbf16>, vector<128x64xbf16>, vector<8x64xf32> -> vector<8x64xf32>
    %126 = vector.extract_strided_slice %82 {offsets = [3, 0], sizes = [1, 64], strides = [1, 1]} : vector<4x128xf32> to vector<1x64xf32>
    %127 = vector.broadcast %126 : vector<1x64xf32> to vector<8x64xf32>
    %128 = arith.addf %125, %127 : vector<8x64xf32>
    %129 = arith.addf %80, %128 : vector<8x64xf32>
    %c0_48 = arith.constant 0 : index
    %c0_49 = arith.constant 0 : index
    %130 = vector.load %arg8[%c0_48, %c0_49] : memref<8x64xf32, #tpu.memory_space<vmem>>, vector<8x64xf32>
    tpu.vector_store %arg8[%c0_48, %c0_49], %129 {strides = array<i32>} : memref<8x64xf32, #tpu.memory_space<vmem>>, vector<8x64xf32>,
    return
  }
  func.func @transform_0(%arg0: i32) -> (i32, i32) {
    %c0_i32 = arith.constant 0 : i32
    %c0_i32_0 = arith.constant 0 : i32
    return %arg0, %c0_i32 : i32, i32
  }
  func.func @transform_1(%arg0: i32) -> (i32, i32) {
    %c0_i32 = arith.constant 0 : i32
    %c0_i32_0 = arith.constant 0 : i32
    %c0_i32_1 = arith.constant 0 : i32
    return %c0_i32, %c0_i32_0 : i32, i32
  }
  func.func @transform_2(%arg0: i32) -> (i32, i32) {
    %c0_i32 = arith.constant 0 : i32
    %c0_i32_0 = arith.constant 0 : i32
    %c0_i32_1 = arith.constant 0 : i32
    return %c0_i32, %c0_i32_0 : i32, i32
  }
  func.func @transform_3(%arg0: i32) -> (i32, i32, i32) {
    %c0_i32 = arith.constant 0 : i32
    %c0_i32_0 = arith.constant 0 : i32
    %c0_i32_1 = arith.constant 0 : i32
    %c0_i32_2 = arith.constant 0 : i32
    return %c0_i32, %c0_i32_0, %c0_i32_1 : i32, i32, i32
  }
  func.func @transform_4(%arg0: i32) -> (i32, i32, i32) {
    %c0_i32 = arith.constant 0 : i32
    %c0_i32_0 = arith.constant 0 : i32
    %c0_i32_1 = arith.constant 0 : i32
    %c0_i32_2 = arith.constant 0 : i32
    return %c0_i32, %c0_i32_0, %c0_i32_1 : i32, i32, i32
  }
  func.func @transform_5(%arg0: i32) -> (i32, i32, i32) {
    %c0_i32 = arith.constant 0 : i32
    %c0_i32_0 = arith.constant 0 : i32
    %c0_i32_1 = arith.constant 0 : i32
    %c0_i32_2 = arith.constant 0 : i32
    return %c0_i32, %c0_i32_0, %c0_i32_1 : i32, i32, i32
  }
  func.func @transform_6(%arg0: i32) -> (i32, i32) {
    %c0_i32 = arith.constant 0 : i32
    %c0_i32_0 = arith.constant 0 : i32
    return %arg0, %c0_i32 : i32, i32
  }
  func.func @transform_7(%arg0: i32) -> (i32, i32) {
    %c0_i32 = arith.constant 0 : i32
    %c0_i32_0 = arith.constant 0 : i32
    return %arg0, %c0_i32 : i32, i32
  }
}

module attributes {stable_mosaic.version = 11 : i64} {
  func.func @_fused_stage_kernel(%arg0: i32, %arg1: memref<2x256xf32, #tpu.memory_space<vmem>>, %arg2: memref<2x256xf32, #tpu.memory_space<vmem>>, %arg3: memref<256x128xbf16, #tpu.memory_space<vmem>>, %arg4: memref<2x4x256xf32, #tpu.memory_space<vmem>>, %arg5: memref<2x128x256xbf16, #tpu.memory_space<vmem>>, %arg6: memref<2x256x128xbf16, #tpu.memory_space<vmem>>, %arg7: memref<128x256xbf16, #tpu.memory_space<vmem>>, %arg8: memref<2x256xf32, #tpu.memory_space<vmem>>) attributes {dimension_semantics = [#tpu.dimension_semantics<parallel>], iteration_bounds = array<i64: 1>, scalar_prefetch = 0 : i64, scratch_operands = 0 : i64, tpu.core_type = #tpu.core_type<tc>, window_params = [{transform_indices = @transform_0, window_bounds = array<i64: 2, 256>}, {pipeline_mode = #tpu.pipeline_mode<synchronous>, transform_indices = @transform_1, window_bounds = array<i64: 2, 256>}, {pipeline_mode = #tpu.pipeline_mode<synchronous>, transform_indices = @transform_2, window_bounds = array<i64: 256, 128>}, {pipeline_mode = #tpu.pipeline_mode<synchronous>, transform_indices = @transform_3, window_bounds = array<i64: 2, 4, 256>}, {pipeline_mode = #tpu.pipeline_mode<synchronous>, transform_indices = @transform_4, window_bounds = array<i64: 2, 128, 256>}, {pipeline_mode = #tpu.pipeline_mode<synchronous>, transform_indices = @transform_5, window_bounds = array<i64: 2, 256, 128>}, {pipeline_mode = #tpu.pipeline_mode<synchronous>, transform_indices = @transform_6, window_bounds = array<i64: 128, 256>}, {transform_indices = @transform_7, window_bounds = array<i64: 2, 256>}]} {
    %c0 = arith.constant 0 : index
    %c0_0 = arith.constant 0 : index
    %0 = vector.load %arg1[%c0, %c0_0] : memref<2x256xf32, #tpu.memory_space<vmem>>, vector<2x256xf32>
    %c0_1 = arith.constant 0 : index
    %c0_2 = arith.constant 0 : index
    %1 = vector.load %arg2[%c0_1, %c0_2] : memref<2x256xf32, #tpu.memory_space<vmem>>, vector<2x256xf32>
    %c0_3 = arith.constant 0 : index
    %c0_4 = arith.constant 0 : index
    %2 = vector.load %arg3[%c0_3, %c0_4] : memref<256x128xbf16, #tpu.memory_space<vmem>>, vector<256x128xbf16>
    %3 = vector.extract_strided_slice %1 {offsets = [0, 0], sizes = [1, 256], strides = [1, 1]} : vector<2x256xf32> to vector<1x256xf32>
    %4 = vector.extract_strided_slice %1 {offsets = [1, 0], sizes = [1, 256], strides = [1, 1]} : vector<2x256xf32> to vector<1x256xf32>
    %cst = arith.constant dense<0.000000e+00> : vector<2xf32>
    %5 = vector.multi_reduction <add>, %0, %cst [1] : vector<2x256xf32> to vector<2xf32>
    %6 = vector.shape_cast %5 : vector<2xf32> to vector<2x1xf32>
    %cst_5 = arith.constant 2.560000e+02 : f32
    %7 = vector.broadcast %cst_5 : f32 to vector<2x1xf32>
    %8 = arith.divf %6, %7 : vector<2x1xf32>
    %9 = arith.mulf %0, %0 : vector<2x256xf32>
    %cst_6 = arith.constant dense<0.000000e+00> : vector<2xf32>
    %10 = vector.multi_reduction <add>, %9, %cst_6 [1] : vector<2x256xf32> to vector<2xf32>
    %11 = vector.shape_cast %10 : vector<2xf32> to vector<2x1xf32>
    %cst_7 = arith.constant 2.560000e+02 : f32
    %12 = vector.broadcast %cst_7 : f32 to vector<2x1xf32>
    %13 = arith.divf %11, %12 : vector<2x1xf32>
    %14 = arith.mulf %8, %8 : vector<2x1xf32>
    %15 = arith.subf %13, %14 : vector<2x1xf32>
    %cst_8 = arith.constant 0.000000e+00 : f32
    %16 = vector.broadcast %cst_8 : f32 to vector<2x1xf32>
    %17 = arith.maximumf %15, %16 : vector<2x1xf32>
    %18 = vector.broadcast %8 : vector<2x1xf32> to vector<2x256xf32>
    %19 = arith.subf %0, %18 : vector<2x256xf32>
    %cst_9 = arith.constant 9.99999974E-6 : f32
    %20 = vector.broadcast %cst_9 : f32 to vector<2x1xf32>
    %21 = arith.addf %17, %20 : vector<2x1xf32>
    %22 = math.rsqrt %21 : vector<2x1xf32>
    %23 = vector.broadcast %22 : vector<2x1xf32> to vector<2x256xf32>
    %24 = arith.mulf %19, %23 : vector<2x256xf32>
    %25 = vector.broadcast %3 : vector<1x256xf32> to vector<2x256xf32>
    %26 = arith.mulf %24, %25 : vector<2x256xf32>
    %27 = vector.broadcast %4 : vector<1x256xf32> to vector<2x256xf32>
    %28 = arith.addf %26, %27 : vector<2x256xf32>
    %29 = arith.truncf %28 : vector<2x256xf32> to vector<2x256xbf16>
    %cst_10 = arith.constant dense<0.000000e+00> : vector<2x128xf32>
    %30 = tpu.matmul %29, %2, %cst_10 {dimension_numbers = #tpu.dot_dimension_numbers<[1], [0], [0], [1], [0, 0, 1, 1], [], []>} : vector<2x256xbf16>, vector<256x128xbf16>, vector<2x128xf32> -> vector<2x128xf32>
    %c0_11 = arith.constant 0 : index
    %c0_12 = arith.constant 0 : index
    %c0_13 = arith.constant 0 : index
    %31 = vector.load %arg4[%c0_11, %c0_12, %c0_13] : memref<2x4x256xf32, #tpu.memory_space<vmem>>, vector<1x4x256xf32>
    %32 = vector.shape_cast %31 : vector<1x4x256xf32> to vector<4x256xf32>
    %33 = vector.extract_strided_slice %32 {offsets = [0, 0], sizes = [1, 128], strides = [1, 1]} : vector<4x256xf32> to vector<1x128xf32>
    %34 = vector.extract_strided_slice %32 {offsets = [1, 0], sizes = [1, 128], strides = [1, 1]} : vector<4x256xf32> to vector<1x128xf32>
    %cst_14 = arith.constant dense<0.000000e+00> : vector<2xf32>
    %35 = vector.multi_reduction <add>, %30, %cst_14 [1] : vector<2x128xf32> to vector<2xf32>
    %36 = vector.shape_cast %35 : vector<2xf32> to vector<2x1xf32>
    %cst_15 = arith.constant 1.280000e+02 : f32
    %37 = vector.broadcast %cst_15 : f32 to vector<2x1xf32>
    %38 = arith.divf %36, %37 : vector<2x1xf32>
    %39 = arith.mulf %30, %30 : vector<2x128xf32>
    %cst_16 = arith.constant dense<0.000000e+00> : vector<2xf32>
    %40 = vector.multi_reduction <add>, %39, %cst_16 [1] : vector<2x128xf32> to vector<2xf32>
    %41 = vector.shape_cast %40 : vector<2xf32> to vector<2x1xf32>
    %cst_17 = arith.constant 1.280000e+02 : f32
    %42 = vector.broadcast %cst_17 : f32 to vector<2x1xf32>
    %43 = arith.divf %41, %42 : vector<2x1xf32>
    %44 = arith.mulf %38, %38 : vector<2x1xf32>
    %45 = arith.subf %43, %44 : vector<2x1xf32>
    %cst_18 = arith.constant 0.000000e+00 : f32
    %46 = vector.broadcast %cst_18 : f32 to vector<2x1xf32>
    %47 = arith.maximumf %45, %46 : vector<2x1xf32>
    %48 = vector.broadcast %38 : vector<2x1xf32> to vector<2x128xf32>
    %49 = arith.subf %30, %48 : vector<2x128xf32>
    %cst_19 = arith.constant 9.99999974E-6 : f32
    %50 = vector.broadcast %cst_19 : f32 to vector<2x1xf32>
    %51 = arith.addf %47, %50 : vector<2x1xf32>
    %52 = math.rsqrt %51 : vector<2x1xf32>
    %53 = vector.broadcast %52 : vector<2x1xf32> to vector<2x128xf32>
    %54 = arith.mulf %49, %53 : vector<2x128xf32>
    %55 = vector.broadcast %33 : vector<1x128xf32> to vector<2x128xf32>
    %56 = arith.mulf %54, %55 : vector<2x128xf32>
    %57 = vector.broadcast %34 : vector<1x128xf32> to vector<2x128xf32>
    %58 = arith.addf %56, %57 : vector<2x128xf32>
    %c0_20 = arith.constant 0 : index
    %c0_21 = arith.constant 0 : index
    %c0_22 = arith.constant 0 : index
    %59 = vector.load %arg5[%c0_20, %c0_21, %c0_22] : memref<2x128x256xbf16, #tpu.memory_space<vmem>>, vector<1x128x256xbf16>
    %60 = vector.shape_cast %59 : vector<1x128x256xbf16> to vector<128x256xbf16>
    %61 = arith.truncf %58 : vector<2x128xf32> to vector<2x128xbf16>
    %cst_23 = arith.constant dense<0.000000e+00> : vector<2x256xf32>
    %62 = tpu.matmul %61, %60, %cst_23 {dimension_numbers = #tpu.dot_dimension_numbers<[1], [0], [0], [1], [0, 0, 1, 1], [], []>} : vector<2x128xbf16>, vector<128x256xbf16>, vector<2x256xf32> -> vector<2x256xf32>
    %63 = vector.extract_strided_slice %32 {offsets = [2, 0], sizes = [1, 256], strides = [1, 1]} : vector<4x256xf32> to vector<1x256xf32>
    %64 = vector.broadcast %63 : vector<1x256xf32> to vector<2x256xf32>
    %65 = arith.addf %62, %64 : vector<2x256xf32>
    %66 = arith.negf %65 : vector<2x256xf32>
    %67 = math.exp %66 : vector<2x256xf32>
    %cst_24 = arith.constant 1.000000e+00 : f32
    %68 = vector.broadcast %cst_24 : f32 to vector<2x256xf32>
    %69 = arith.addf %68, %67 : vector<2x256xf32>
    %70 = arith.divf %68, %69 : vector<2x256xf32>
    %71 = arith.mulf %65, %70 : vector<2x256xf32>
    %c0_25 = arith.constant 0 : index
    %c0_26 = arith.constant 0 : index
    %c0_27 = arith.constant 0 : index
    %72 = vector.load %arg6[%c0_25, %c0_26, %c0_27] : memref<2x256x128xbf16, #tpu.memory_space<vmem>>, vector<1x256x128xbf16>
    %73 = vector.shape_cast %72 : vector<1x256x128xbf16> to vector<256x128xbf16>
    %74 = arith.truncf %71 : vector<2x256xf32> to vector<2x256xbf16>
    %cst_28 = arith.constant dense<0.000000e+00> : vector<2x128xf32>
    %75 = tpu.matmul %74, %73, %cst_28 {dimension_numbers = #tpu.dot_dimension_numbers<[1], [0], [0], [1], [0, 0, 1, 1], [], []>} : vector<2x256xbf16>, vector<256x128xbf16>, vector<2x128xf32> -> vector<2x128xf32>
    %76 = vector.extract_strided_slice %32 {offsets = [3, 0], sizes = [1, 128], strides = [1, 1]} : vector<4x256xf32> to vector<1x128xf32>
    %77 = vector.broadcast %76 : vector<1x128xf32> to vector<2x128xf32>
    %78 = arith.addf %75, %77 : vector<2x128xf32>
    %79 = arith.addf %30, %78 : vector<2x128xf32>
    %c1 = arith.constant 1 : index
    %c0_29 = arith.constant 0 : index
    %c0_30 = arith.constant 0 : index
    %80 = vector.load %arg4[%c1, %c0_29, %c0_30] : memref<2x4x256xf32, #tpu.memory_space<vmem>>, vector<1x4x256xf32>
    %81 = vector.shape_cast %80 : vector<1x4x256xf32> to vector<4x256xf32>
    %82 = vector.extract_strided_slice %81 {offsets = [0, 0], sizes = [1, 128], strides = [1, 1]} : vector<4x256xf32> to vector<1x128xf32>
    %83 = vector.extract_strided_slice %81 {offsets = [1, 0], sizes = [1, 128], strides = [1, 1]} : vector<4x256xf32> to vector<1x128xf32>
    %cst_31 = arith.constant dense<0.000000e+00> : vector<2xf32>
    %84 = vector.multi_reduction <add>, %79, %cst_31 [1] : vector<2x128xf32> to vector<2xf32>
    %85 = vector.shape_cast %84 : vector<2xf32> to vector<2x1xf32>
    %cst_32 = arith.constant 1.280000e+02 : f32
    %86 = vector.broadcast %cst_32 : f32 to vector<2x1xf32>
    %87 = arith.divf %85, %86 : vector<2x1xf32>
    %88 = arith.mulf %79, %79 : vector<2x128xf32>
    %cst_33 = arith.constant dense<0.000000e+00> : vector<2xf32>
    %89 = vector.multi_reduction <add>, %88, %cst_33 [1] : vector<2x128xf32> to vector<2xf32>
    %90 = vector.shape_cast %89 : vector<2xf32> to vector<2x1xf32>
    %cst_34 = arith.constant 1.280000e+02 : f32
    %91 = vector.broadcast %cst_34 : f32 to vector<2x1xf32>
    %92 = arith.divf %90, %91 : vector<2x1xf32>
    %93 = arith.mulf %87, %87 : vector<2x1xf32>
    %94 = arith.subf %92, %93 : vector<2x1xf32>
    %cst_35 = arith.constant 0.000000e+00 : f32
    %95 = vector.broadcast %cst_35 : f32 to vector<2x1xf32>
    %96 = arith.maximumf %94, %95 : vector<2x1xf32>
    %97 = vector.broadcast %87 : vector<2x1xf32> to vector<2x128xf32>
    %98 = arith.subf %79, %97 : vector<2x128xf32>
    %cst_36 = arith.constant 9.99999974E-6 : f32
    %99 = vector.broadcast %cst_36 : f32 to vector<2x1xf32>
    %100 = arith.addf %96, %99 : vector<2x1xf32>
    %101 = math.rsqrt %100 : vector<2x1xf32>
    %102 = vector.broadcast %101 : vector<2x1xf32> to vector<2x128xf32>
    %103 = arith.mulf %98, %102 : vector<2x128xf32>
    %104 = vector.broadcast %82 : vector<1x128xf32> to vector<2x128xf32>
    %105 = arith.mulf %103, %104 : vector<2x128xf32>
    %106 = vector.broadcast %83 : vector<1x128xf32> to vector<2x128xf32>
    %107 = arith.addf %105, %106 : vector<2x128xf32>
    %c1_37 = arith.constant 1 : index
    %c0_38 = arith.constant 0 : index
    %c0_39 = arith.constant 0 : index
    %108 = vector.load %arg5[%c1_37, %c0_38, %c0_39] : memref<2x128x256xbf16, #tpu.memory_space<vmem>>, vector<1x128x256xbf16>
    %109 = vector.shape_cast %108 : vector<1x128x256xbf16> to vector<128x256xbf16>
    %110 = arith.truncf %107 : vector<2x128xf32> to vector<2x128xbf16>
    %cst_40 = arith.constant dense<0.000000e+00> : vector<2x256xf32>
    %111 = tpu.matmul %110, %109, %cst_40 {dimension_numbers = #tpu.dot_dimension_numbers<[1], [0], [0], [1], [0, 0, 1, 1], [], []>} : vector<2x128xbf16>, vector<128x256xbf16>, vector<2x256xf32> -> vector<2x256xf32>
    %112 = vector.extract_strided_slice %81 {offsets = [2, 0], sizes = [1, 256], strides = [1, 1]} : vector<4x256xf32> to vector<1x256xf32>
    %113 = vector.broadcast %112 : vector<1x256xf32> to vector<2x256xf32>
    %114 = arith.addf %111, %113 : vector<2x256xf32>
    %115 = arith.negf %114 : vector<2x256xf32>
    %116 = math.exp %115 : vector<2x256xf32>
    %cst_41 = arith.constant 1.000000e+00 : f32
    %117 = vector.broadcast %cst_41 : f32 to vector<2x256xf32>
    %118 = arith.addf %117, %116 : vector<2x256xf32>
    %119 = arith.divf %117, %118 : vector<2x256xf32>
    %120 = arith.mulf %114, %119 : vector<2x256xf32>
    %c1_42 = arith.constant 1 : index
    %c0_43 = arith.constant 0 : index
    %c0_44 = arith.constant 0 : index
    %121 = vector.load %arg6[%c1_42, %c0_43, %c0_44] : memref<2x256x128xbf16, #tpu.memory_space<vmem>>, vector<1x256x128xbf16>
    %122 = vector.shape_cast %121 : vector<1x256x128xbf16> to vector<256x128xbf16>
    %123 = arith.truncf %120 : vector<2x256xf32> to vector<2x256xbf16>
    %cst_45 = arith.constant dense<0.000000e+00> : vector<2x128xf32>
    %124 = tpu.matmul %123, %122, %cst_45 {dimension_numbers = #tpu.dot_dimension_numbers<[1], [0], [0], [1], [0, 0, 1, 1], [], []>} : vector<2x256xbf16>, vector<256x128xbf16>, vector<2x128xf32> -> vector<2x128xf32>
    %125 = vector.extract_strided_slice %81 {offsets = [3, 0], sizes = [1, 128], strides = [1, 1]} : vector<4x256xf32> to vector<1x128xf32>
    %126 = vector.broadcast %125 : vector<1x128xf32> to vector<2x128xf32>
    %127 = arith.addf %124, %126 : vector<2x128xf32>
    %128 = arith.addf %79, %127 : vector<2x128xf32>
    %129 = arith.addf %128, %30 : vector<2x128xf32>
    %c0_46 = arith.constant 0 : index
    %c0_47 = arith.constant 0 : index
    %130 = vector.load %arg7[%c0_46, %c0_47] : memref<128x256xbf16, #tpu.memory_space<vmem>>, vector<128x256xbf16>
    %131 = arith.truncf %129 : vector<2x128xf32> to vector<2x128xbf16>
    %cst_48 = arith.constant dense<0.000000e+00> : vector<2x256xf32>
    %132 = tpu.matmul %131, %130, %cst_48 {dimension_numbers = #tpu.dot_dimension_numbers<[1], [0], [0], [1], [0, 0, 1, 1], [], []>} : vector<2x128xbf16>, vector<128x256xbf16>, vector<2x256xf32> -> vector<2x256xf32>
    %c0_49 = arith.constant 0 : index
    %c0_50 = arith.constant 0 : index
    %133 = vector.load %arg8[%c0_49, %c0_50] : memref<2x256xf32, #tpu.memory_space<vmem>>, vector<2x256xf32>
    tpu.vector_store %arg8[%c0_49, %c0_50], %132 {strides = array<i32>} : memref<2x256xf32, #tpu.memory_space<vmem>>, vector<2x256xf32>,
    return
  }
  func.func @transform_0(%arg0: i32) -> (i32, i32) {
    %c0_i32 = arith.constant 0 : i32
    %c0_i32_0 = arith.constant 0 : i32
    return %arg0, %c0_i32 : i32, i32
  }
  func.func @transform_1(%arg0: i32) -> (i32, i32) {
    %c0_i32 = arith.constant 0 : i32
    %c0_i32_0 = arith.constant 0 : i32
    %c0_i32_1 = arith.constant 0 : i32
    return %c0_i32, %c0_i32_0 : i32, i32
  }
  func.func @transform_2(%arg0: i32) -> (i32, i32) {
    %c0_i32 = arith.constant 0 : i32
    %c0_i32_0 = arith.constant 0 : i32
    %c0_i32_1 = arith.constant 0 : i32
    return %c0_i32, %c0_i32_0 : i32, i32
  }
  func.func @transform_3(%arg0: i32) -> (i32, i32, i32) {
    %c0_i32 = arith.constant 0 : i32
    %c0_i32_0 = arith.constant 0 : i32
    %c0_i32_1 = arith.constant 0 : i32
    %c0_i32_2 = arith.constant 0 : i32
    return %c0_i32, %c0_i32_0, %c0_i32_1 : i32, i32, i32
  }
  func.func @transform_4(%arg0: i32) -> (i32, i32, i32) {
    %c0_i32 = arith.constant 0 : i32
    %c0_i32_0 = arith.constant 0 : i32
    %c0_i32_1 = arith.constant 0 : i32
    %c0_i32_2 = arith.constant 0 : i32
    return %c0_i32, %c0_i32_0, %c0_i32_1 : i32, i32, i32
  }
  func.func @transform_5(%arg0: i32) -> (i32, i32, i32) {
    %c0_i32 = arith.constant 0 : i32
    %c0_i32_0 = arith.constant 0 : i32
    %c0_i32_1 = arith.constant 0 : i32
    %c0_i32_2 = arith.constant 0 : i32
    return %c0_i32, %c0_i32_0, %c0_i32_1 : i32, i32, i32
  }
  func.func @transform_6(%arg0: i32) -> (i32, i32) {
    %c0_i32 = arith.constant 0 : i32
    %c0_i32_0 = arith.constant 0 : i32
    %c0_i32_1 = arith.constant 0 : i32
    return %c0_i32, %c0_i32_0 : i32, i32
  }
  func.func @transform_7(%arg0: i32) -> (i32, i32) {
    %c0_i32 = arith.constant 0 : i32
    %c0_i32_0 = arith.constant 0 : i32
    return %arg0, %c0_i32 : i32, i32
  }
}

module attributes {stable_mosaic.version = 11 : i64} {
  func.func @_fused_stage_kernel(%arg0: i32, %arg1: memref<8x64xf32, #tpu.memory_space<vmem>>, %arg2: memref<8x64xf32, #tpu.memory_space<vmem>>, %arg3: memref<2x64xf32, #tpu.memory_space<vmem>>, %arg4: memref<2x4x128xf32, #tpu.memory_space<vmem>>, %arg5: memref<2x64x128xbf16, #tpu.memory_space<vmem>>, %arg6: memref<2x128x64xbf16, #tpu.memory_space<vmem>>, %arg7: memref<64x128xbf16, #tpu.memory_space<vmem>>, %arg8: memref<8x128xf32, #tpu.memory_space<vmem>>) attributes {dimension_semantics = [#tpu.dimension_semantics<parallel>], iteration_bounds = array<i64: 1>, scalar_prefetch = 0 : i64, scratch_operands = 0 : i64, tpu.core_type = #tpu.core_type<tc>, window_params = [{transform_indices = @transform_0, window_bounds = array<i64: 8, 64>}, {transform_indices = @transform_1, window_bounds = array<i64: 8, 64>}, {pipeline_mode = #tpu.pipeline_mode<synchronous>, transform_indices = @transform_2, window_bounds = array<i64: 2, 64>}, {pipeline_mode = #tpu.pipeline_mode<synchronous>, transform_indices = @transform_3, window_bounds = array<i64: 2, 4, 128>}, {pipeline_mode = #tpu.pipeline_mode<synchronous>, transform_indices = @transform_4, window_bounds = array<i64: 2, 64, 128>}, {pipeline_mode = #tpu.pipeline_mode<synchronous>, transform_indices = @transform_5, window_bounds = array<i64: 2, 128, 64>}, {pipeline_mode = #tpu.pipeline_mode<synchronous>, transform_indices = @transform_6, window_bounds = array<i64: 64, 128>}, {transform_indices = @transform_7, window_bounds = array<i64: 8, 128>}]} {
    %c0 = arith.constant 0 : index
    %c0_0 = arith.constant 0 : index
    %0 = vector.load %arg1[%c0, %c0_0] : memref<8x64xf32, #tpu.memory_space<vmem>>, vector<8x64xf32>
    %c0_1 = arith.constant 0 : index
    %c0_2 = arith.constant 0 : index
    %1 = vector.load %arg2[%c0_1, %c0_2] : memref<8x64xf32, #tpu.memory_space<vmem>>, vector<8x64xf32>
    %c0_3 = arith.constant 0 : index
    %c0_4 = arith.constant 0 : index
    %2 = vector.load %arg3[%c0_3, %c0_4] : memref<2x64xf32, #tpu.memory_space<vmem>>, vector<2x64xf32>
    %3 = vector.extract_strided_slice %2 {offsets = [0, 0], sizes = [1, 64], strides = [1, 1]} : vector<2x64xf32> to vector<1x64xf32>
    %4 = vector.extract_strided_slice %2 {offsets = [1, 0], sizes = [1, 64], strides = [1, 1]} : vector<2x64xf32> to vector<1x64xf32>
    %cst = arith.constant dense<0.000000e+00> : vector<8xf32>
    %5 = vector.multi_reduction <add>, %0, %cst [1] : vector<8x64xf32> to vector<8xf32>
    %6 = vector.shape_cast %5 : vector<8xf32> to vector<8x1xf32>
    %cst_5 = arith.constant 6.400000e+01 : f32
    %7 = vector.broadcast %cst_5 : f32 to vector<8x1xf32>
    %8 = arith.divf %6, %7 : vector<8x1xf32>
    %9 = arith.mulf %0, %0 : vector<8x64xf32>
    %cst_6 = arith.constant dense<0.000000e+00> : vector<8xf32>
    %10 = vector.multi_reduction <add>, %9, %cst_6 [1] : vector<8x64xf32> to vector<8xf32>
    %11 = vector.shape_cast %10 : vector<8xf32> to vector<8x1xf32>
    %cst_7 = arith.constant 6.400000e+01 : f32
    %12 = vector.broadcast %cst_7 : f32 to vector<8x1xf32>
    %13 = arith.divf %11, %12 : vector<8x1xf32>
    %14 = arith.mulf %8, %8 : vector<8x1xf32>
    %15 = arith.subf %13, %14 : vector<8x1xf32>
    %cst_8 = arith.constant 0.000000e+00 : f32
    %16 = vector.broadcast %cst_8 : f32 to vector<8x1xf32>
    %17 = arith.maximumf %15, %16 : vector<8x1xf32>
    %18 = vector.broadcast %8 : vector<8x1xf32> to vector<8x64xf32>
    %19 = arith.subf %0, %18 : vector<8x64xf32>
    %cst_9 = arith.constant 9.99999974E-6 : f32
    %20 = vector.broadcast %cst_9 : f32 to vector<8x1xf32>
    %21 = arith.addf %17, %20 : vector<8x1xf32>
    %22 = math.rsqrt %21 : vector<8x1xf32>
    %23 = vector.broadcast %22 : vector<8x1xf32> to vector<8x64xf32>
    %24 = arith.mulf %19, %23 : vector<8x64xf32>
    %25 = vector.broadcast %3 : vector<1x64xf32> to vector<8x64xf32>
    %26 = arith.mulf %24, %25 : vector<8x64xf32>
    %27 = vector.broadcast %4 : vector<1x64xf32> to vector<8x64xf32>
    %28 = arith.addf %26, %27 : vector<8x64xf32>
    %c0_10 = arith.constant 0 : index
    %c0_11 = arith.constant 0 : index
    %c0_12 = arith.constant 0 : index
    %29 = vector.load %arg4[%c0_10, %c0_11, %c0_12] : memref<2x4x128xf32, #tpu.memory_space<vmem>>, vector<1x4x128xf32>
    %30 = vector.shape_cast %29 : vector<1x4x128xf32> to vector<4x128xf32>
    %31 = vector.extract_strided_slice %30 {offsets = [0, 0], sizes = [1, 64], strides = [1, 1]} : vector<4x128xf32> to vector<1x64xf32>
    %32 = vector.extract_strided_slice %30 {offsets = [1, 0], sizes = [1, 64], strides = [1, 1]} : vector<4x128xf32> to vector<1x64xf32>
    %cst_13 = arith.constant dense<0.000000e+00> : vector<8xf32>
    %33 = vector.multi_reduction <add>, %28, %cst_13 [1] : vector<8x64xf32> to vector<8xf32>
    %34 = vector.shape_cast %33 : vector<8xf32> to vector<8x1xf32>
    %cst_14 = arith.constant 6.400000e+01 : f32
    %35 = vector.broadcast %cst_14 : f32 to vector<8x1xf32>
    %36 = arith.divf %34, %35 : vector<8x1xf32>
    %37 = arith.mulf %28, %28 : vector<8x64xf32>
    %cst_15 = arith.constant dense<0.000000e+00> : vector<8xf32>
    %38 = vector.multi_reduction <add>, %37, %cst_15 [1] : vector<8x64xf32> to vector<8xf32>
    %39 = vector.shape_cast %38 : vector<8xf32> to vector<8x1xf32>
    %cst_16 = arith.constant 6.400000e+01 : f32
    %40 = vector.broadcast %cst_16 : f32 to vector<8x1xf32>
    %41 = arith.divf %39, %40 : vector<8x1xf32>
    %42 = arith.mulf %36, %36 : vector<8x1xf32>
    %43 = arith.subf %41, %42 : vector<8x1xf32>
    %cst_17 = arith.constant 0.000000e+00 : f32
    %44 = vector.broadcast %cst_17 : f32 to vector<8x1xf32>
    %45 = arith.maximumf %43, %44 : vector<8x1xf32>
    %46 = vector.broadcast %36 : vector<8x1xf32> to vector<8x64xf32>
    %47 = arith.subf %28, %46 : vector<8x64xf32>
    %cst_18 = arith.constant 9.99999974E-6 : f32
    %48 = vector.broadcast %cst_18 : f32 to vector<8x1xf32>
    %49 = arith.addf %45, %48 : vector<8x1xf32>
    %50 = math.rsqrt %49 : vector<8x1xf32>
    %51 = vector.broadcast %50 : vector<8x1xf32> to vector<8x64xf32>
    %52 = arith.mulf %47, %51 : vector<8x64xf32>
    %53 = vector.broadcast %31 : vector<1x64xf32> to vector<8x64xf32>
    %54 = arith.mulf %52, %53 : vector<8x64xf32>
    %55 = vector.broadcast %32 : vector<1x64xf32> to vector<8x64xf32>
    %56 = arith.addf %54, %55 : vector<8x64xf32>
    %c0_19 = arith.constant 0 : index
    %c0_20 = arith.constant 0 : index
    %c0_21 = arith.constant 0 : index
    %57 = vector.load %arg5[%c0_19, %c0_20, %c0_21] : memref<2x64x128xbf16, #tpu.memory_space<vmem>>, vector<1x64x128xbf16>
    %58 = vector.shape_cast %57 : vector<1x64x128xbf16> to vector<64x128xbf16>
    %59 = arith.truncf %56 : vector<8x64xf32> to vector<8x64xbf16>
    %cst_22 = arith.constant dense<0.000000e+00> : vector<8x128xf32>
    %60 = tpu.matmul %59, %58, %cst_22 {dimension_numbers = #tpu.dot_dimension_numbers<[1], [0], [0], [1], [0, 0, 1, 1], [], []>} : vector<8x64xbf16>, vector<64x128xbf16>, vector<8x128xf32> -> vector<8x128xf32>
    %61 = vector.extract_strided_slice %30 {offsets = [2, 0], sizes = [1, 128], strides = [1, 1]} : vector<4x128xf32> to vector<1x128xf32>
    %62 = vector.broadcast %61 : vector<1x128xf32> to vector<8x128xf32>
    %63 = arith.addf %60, %62 : vector<8x128xf32>
    %64 = arith.negf %63 : vector<8x128xf32>
    %65 = math.exp %64 : vector<8x128xf32>
    %cst_23 = arith.constant 1.000000e+00 : f32
    %66 = vector.broadcast %cst_23 : f32 to vector<8x128xf32>
    %67 = arith.addf %66, %65 : vector<8x128xf32>
    %68 = arith.divf %66, %67 : vector<8x128xf32>
    %69 = arith.mulf %63, %68 : vector<8x128xf32>
    %c0_24 = arith.constant 0 : index
    %c0_25 = arith.constant 0 : index
    %c0_26 = arith.constant 0 : index
    %70 = vector.load %arg6[%c0_24, %c0_25, %c0_26] : memref<2x128x64xbf16, #tpu.memory_space<vmem>>, vector<1x128x64xbf16>
    %71 = vector.shape_cast %70 : vector<1x128x64xbf16> to vector<128x64xbf16>
    %72 = arith.truncf %69 : vector<8x128xf32> to vector<8x128xbf16>
    %cst_27 = arith.constant dense<0.000000e+00> : vector<8x64xf32>
    %73 = tpu.matmul %72, %71, %cst_27 {dimension_numbers = #tpu.dot_dimension_numbers<[1], [0], [0], [1], [0, 0, 1, 1], [], []>} : vector<8x128xbf16>, vector<128x64xbf16>, vector<8x64xf32> -> vector<8x64xf32>
    %74 = vector.extract_strided_slice %30 {offsets = [3, 0], sizes = [1, 64], strides = [1, 1]} : vector<4x128xf32> to vector<1x64xf32>
    %75 = vector.broadcast %74 : vector<1x64xf32> to vector<8x64xf32>
    %76 = arith.addf %73, %75 : vector<8x64xf32>
    %77 = arith.addf %28, %76 : vector<8x64xf32>
    %c1 = arith.constant 1 : index
    %c0_28 = arith.constant 0 : index
    %c0_29 = arith.constant 0 : index
    %78 = vector.load %arg4[%c1, %c0_28, %c0_29] : memref<2x4x128xf32, #tpu.memory_space<vmem>>, vector<1x4x128xf32>
    %79 = vector.shape_cast %78 : vector<1x4x128xf32> to vector<4x128xf32>
    %80 = vector.extract_strided_slice %79 {offsets = [0, 0], sizes = [1, 64], strides = [1, 1]} : vector<4x128xf32> to vector<1x64xf32>
    %81 = vector.extract_strided_slice %79 {offsets = [1, 0], sizes = [1, 64], strides = [1, 1]} : vector<4x128xf32> to vector<1x64xf32>
    %cst_30 = arith.constant dense<0.000000e+00> : vector<8xf32>
    %82 = vector.multi_reduction <add>, %77, %cst_30 [1] : vector<8x64xf32> to vector<8xf32>
    %83 = vector.shape_cast %82 : vector<8xf32> to vector<8x1xf32>
    %cst_31 = arith.constant 6.400000e+01 : f32
    %84 = vector.broadcast %cst_31 : f32 to vector<8x1xf32>
    %85 = arith.divf %83, %84 : vector<8x1xf32>
    %86 = arith.mulf %77, %77 : vector<8x64xf32>
    %cst_32 = arith.constant dense<0.000000e+00> : vector<8xf32>
    %87 = vector.multi_reduction <add>, %86, %cst_32 [1] : vector<8x64xf32> to vector<8xf32>
    %88 = vector.shape_cast %87 : vector<8xf32> to vector<8x1xf32>
    %cst_33 = arith.constant 6.400000e+01 : f32
    %89 = vector.broadcast %cst_33 : f32 to vector<8x1xf32>
    %90 = arith.divf %88, %89 : vector<8x1xf32>
    %91 = arith.mulf %85, %85 : vector<8x1xf32>
    %92 = arith.subf %90, %91 : vector<8x1xf32>
    %cst_34 = arith.constant 0.000000e+00 : f32
    %93 = vector.broadcast %cst_34 : f32 to vector<8x1xf32>
    %94 = arith.maximumf %92, %93 : vector<8x1xf32>
    %95 = vector.broadcast %85 : vector<8x1xf32> to vector<8x64xf32>
    %96 = arith.subf %77, %95 : vector<8x64xf32>
    %cst_35 = arith.constant 9.99999974E-6 : f32
    %97 = vector.broadcast %cst_35 : f32 to vector<8x1xf32>
    %98 = arith.addf %94, %97 : vector<8x1xf32>
    %99 = math.rsqrt %98 : vector<8x1xf32>
    %100 = vector.broadcast %99 : vector<8x1xf32> to vector<8x64xf32>
    %101 = arith.mulf %96, %100 : vector<8x64xf32>
    %102 = vector.broadcast %80 : vector<1x64xf32> to vector<8x64xf32>
    %103 = arith.mulf %101, %102 : vector<8x64xf32>
    %104 = vector.broadcast %81 : vector<1x64xf32> to vector<8x64xf32>
    %105 = arith.addf %103, %104 : vector<8x64xf32>
    %c1_36 = arith.constant 1 : index
    %c0_37 = arith.constant 0 : index
    %c0_38 = arith.constant 0 : index
    %106 = vector.load %arg5[%c1_36, %c0_37, %c0_38] : memref<2x64x128xbf16, #tpu.memory_space<vmem>>, vector<1x64x128xbf16>
    %107 = vector.shape_cast %106 : vector<1x64x128xbf16> to vector<64x128xbf16>
    %108 = arith.truncf %105 : vector<8x64xf32> to vector<8x64xbf16>
    %cst_39 = arith.constant dense<0.000000e+00> : vector<8x128xf32>
    %109 = tpu.matmul %108, %107, %cst_39 {dimension_numbers = #tpu.dot_dimension_numbers<[1], [0], [0], [1], [0, 0, 1, 1], [], []>} : vector<8x64xbf16>, vector<64x128xbf16>, vector<8x128xf32> -> vector<8x128xf32>
    %110 = vector.extract_strided_slice %79 {offsets = [2, 0], sizes = [1, 128], strides = [1, 1]} : vector<4x128xf32> to vector<1x128xf32>
    %111 = vector.broadcast %110 : vector<1x128xf32> to vector<8x128xf32>
    %112 = arith.addf %109, %111 : vector<8x128xf32>
    %113 = arith.negf %112 : vector<8x128xf32>
    %114 = math.exp %113 : vector<8x128xf32>
    %cst_40 = arith.constant 1.000000e+00 : f32
    %115 = vector.broadcast %cst_40 : f32 to vector<8x128xf32>
    %116 = arith.addf %115, %114 : vector<8x128xf32>
    %117 = arith.divf %115, %116 : vector<8x128xf32>
    %118 = arith.mulf %112, %117 : vector<8x128xf32>
    %c1_41 = arith.constant 1 : index
    %c0_42 = arith.constant 0 : index
    %c0_43 = arith.constant 0 : index
    %119 = vector.load %arg6[%c1_41, %c0_42, %c0_43] : memref<2x128x64xbf16, #tpu.memory_space<vmem>>, vector<1x128x64xbf16>
    %120 = vector.shape_cast %119 : vector<1x128x64xbf16> to vector<128x64xbf16>
    %121 = arith.truncf %118 : vector<8x128xf32> to vector<8x128xbf16>
    %cst_44 = arith.constant dense<0.000000e+00> : vector<8x64xf32>
    %122 = tpu.matmul %121, %120, %cst_44 {dimension_numbers = #tpu.dot_dimension_numbers<[1], [0], [0], [1], [0, 0, 1, 1], [], []>} : vector<8x128xbf16>, vector<128x64xbf16>, vector<8x64xf32> -> vector<8x64xf32>
    %123 = vector.extract_strided_slice %79 {offsets = [3, 0], sizes = [1, 64], strides = [1, 1]} : vector<4x128xf32> to vector<1x64xf32>
    %124 = vector.broadcast %123 : vector<1x64xf32> to vector<8x64xf32>
    %125 = arith.addf %122, %124 : vector<8x64xf32>
    %126 = arith.addf %77, %125 : vector<8x64xf32>
    %127 = arith.addf %126, %1 : vector<8x64xf32>
    %c0_45 = arith.constant 0 : index
    %c0_46 = arith.constant 0 : index
    %128 = vector.load %arg7[%c0_45, %c0_46] : memref<64x128xbf16, #tpu.memory_space<vmem>>, vector<64x128xbf16>
    %129 = arith.truncf %127 : vector<8x64xf32> to vector<8x64xbf16>
    %cst_47 = arith.constant dense<0.000000e+00> : vector<8x128xf32>
    %130 = tpu.matmul %129, %128, %cst_47 {dimension_numbers = #tpu.dot_dimension_numbers<[1], [0], [0], [1], [0, 0, 1, 1], [], []>} : vector<8x64xbf16>, vector<64x128xbf16>, vector<8x128xf32> -> vector<8x128xf32>
    %c0_48 = arith.constant 0 : index
    %c0_49 = arith.constant 0 : index
    %131 = vector.load %arg8[%c0_48, %c0_49] : memref<8x128xf32, #tpu.memory_space<vmem>>, vector<8x128xf32>
    tpu.vector_store %arg8[%c0_48, %c0_49], %130 {strides = array<i32>} : memref<8x128xf32, #tpu.memory_space<vmem>>, vector<8x128xf32>,
    return
  }
  func.func @transform_0(%arg0: i32) -> (i32, i32) {
    %c0_i32 = arith.constant 0 : i32
    %c0_i32_0 = arith.constant 0 : i32
    return %arg0, %c0_i32 : i32, i32
  }
  func.func @transform_1(%arg0: i32) -> (i32, i32) {
    %c0_i32 = arith.constant 0 : i32
    %c0_i32_0 = arith.constant 0 : i32
    return %arg0, %c0_i32 : i32, i32
  }
  func.func @transform_2(%arg0: i32) -> (i32, i32) {
    %c0_i32 = arith.constant 0 : i32
    %c0_i32_0 = arith.constant 0 : i32
    %c0_i32_1 = arith.constant 0 : i32
    return %c0_i32, %c0_i32_0 : i32, i32
  }
  func.func @transform_3(%arg0: i32) -> (i32, i32, i32) {
    %c0_i32 = arith.constant 0 : i32
    %c0_i32_0 = arith.constant 0 : i32
    %c0_i32_1 = arith.constant 0 : i32
    %c0_i32_2 = arith.constant 0 : i32
    return %c0_i32, %c0_i32_0, %c0_i32_1 : i32, i32, i32
  }
  func.func @transform_4(%arg0: i32) -> (i32, i32, i32) {
    %c0_i32 = arith.constant 0 : i32
    %c0_i32_0 = arith.constant 0 : i32
    %c0_i32_1 = arith.constant 0 : i32
    %c0_i32_2 = arith.constant 0 : i32
    return %c0_i32, %c0_i32_0, %c0_i32_1 : i32, i32, i32
  }
  func.func @transform_5(%arg0: i32) -> (i32, i32, i32) {
    %c0_i32 = arith.constant 0 : i32
    %c0_i32_0 = arith.constant 0 : i32
    %c0_i32_1 = arith.constant 0 : i32
    %c0_i32_2 = arith.constant 0 : i32
    return %c0_i32, %c0_i32_0, %c0_i32_1 : i32, i32, i32
  }
  func.func @transform_6(%arg0: i32) -> (i32, i32) {
    %c0_i32 = arith.constant 0 : i32
    %c0_i32_0 = arith.constant 0 : i32
    %c0_i32_1 = arith.constant 0 : i32
    return %c0_i32, %c0_i32_0 : i32, i32
  }
  func.func @transform_7(%arg0: i32) -> (i32, i32) {
    %c0_i32 = arith.constant 0 : i32
    %c0_i32_0 = arith.constant 0 : i32
    return %arg0, %c0_i32 : i32, i32
  }
}

module attributes {stable_mosaic.version = 11 : i64} {
  func.func @_fused_stage_kernel(%arg0: i32, %arg1: memref<32x32xf32, #tpu.memory_space<vmem>>, %arg2: memref<32x32xf32, #tpu.memory_space<vmem>>, %arg3: memref<2x32xf32, #tpu.memory_space<vmem>>, %arg4: memref<1x4x64xf32, #tpu.memory_space<vmem>>, %arg5: memref<1x32x64xbf16, #tpu.memory_space<vmem>>, %arg6: memref<1x64x32xbf16, #tpu.memory_space<vmem>>, %arg7: memref<32x64xbf16, #tpu.memory_space<vmem>>, %arg8: memref<32x64xf32, #tpu.memory_space<vmem>>) attributes {dimension_semantics = [#tpu.dimension_semantics<parallel>], iteration_bounds = array<i64: 1>, scalar_prefetch = 0 : i64, scratch_operands = 0 : i64, tpu.core_type = #tpu.core_type<tc>, window_params = [{transform_indices = @transform_0, window_bounds = array<i64: 32, 32>}, {transform_indices = @transform_1, window_bounds = array<i64: 32, 32>}, {pipeline_mode = #tpu.pipeline_mode<synchronous>, transform_indices = @transform_2, window_bounds = array<i64: 2, 32>}, {pipeline_mode = #tpu.pipeline_mode<synchronous>, transform_indices = @transform_3, window_bounds = array<i64: 1, 4, 64>}, {pipeline_mode = #tpu.pipeline_mode<synchronous>, transform_indices = @transform_4, window_bounds = array<i64: 1, 32, 64>}, {pipeline_mode = #tpu.pipeline_mode<synchronous>, transform_indices = @transform_5, window_bounds = array<i64: 1, 64, 32>}, {pipeline_mode = #tpu.pipeline_mode<synchronous>, transform_indices = @transform_6, window_bounds = array<i64: 32, 64>}, {transform_indices = @transform_7, window_bounds = array<i64: 32, 64>}]} {
    %c0 = arith.constant 0 : index
    %c0_0 = arith.constant 0 : index
    %0 = vector.load %arg1[%c0, %c0_0] : memref<32x32xf32, #tpu.memory_space<vmem>>, vector<32x32xf32>
    %c0_1 = arith.constant 0 : index
    %c0_2 = arith.constant 0 : index
    %1 = vector.load %arg2[%c0_1, %c0_2] : memref<32x32xf32, #tpu.memory_space<vmem>>, vector<32x32xf32>
    %c0_3 = arith.constant 0 : index
    %c0_4 = arith.constant 0 : index
    %2 = vector.load %arg3[%c0_3, %c0_4] : memref<2x32xf32, #tpu.memory_space<vmem>>, vector<2x32xf32>
    %3 = vector.extract_strided_slice %2 {offsets = [0, 0], sizes = [1, 32], strides = [1, 1]} : vector<2x32xf32> to vector<1x32xf32>
    %4 = vector.extract_strided_slice %2 {offsets = [1, 0], sizes = [1, 32], strides = [1, 1]} : vector<2x32xf32> to vector<1x32xf32>
    %cst = arith.constant dense<0.000000e+00> : vector<32xf32>
    %5 = vector.multi_reduction <add>, %0, %cst [1] : vector<32x32xf32> to vector<32xf32>
    %6 = vector.shape_cast %5 : vector<32xf32> to vector<32x1xf32>
    %cst_5 = arith.constant 3.200000e+01 : f32
    %7 = vector.broadcast %cst_5 : f32 to vector<32x1xf32>
    %8 = arith.divf %6, %7 : vector<32x1xf32>
    %9 = arith.mulf %0, %0 : vector<32x32xf32>
    %cst_6 = arith.constant dense<0.000000e+00> : vector<32xf32>
    %10 = vector.multi_reduction <add>, %9, %cst_6 [1] : vector<32x32xf32> to vector<32xf32>
    %11 = vector.shape_cast %10 : vector<32xf32> to vector<32x1xf32>
    %cst_7 = arith.constant 3.200000e+01 : f32
    %12 = vector.broadcast %cst_7 : f32 to vector<32x1xf32>
    %13 = arith.divf %11, %12 : vector<32x1xf32>
    %14 = arith.mulf %8, %8 : vector<32x1xf32>
    %15 = arith.subf %13, %14 : vector<32x1xf32>
    %cst_8 = arith.constant 0.000000e+00 : f32
    %16 = vector.broadcast %cst_8 : f32 to vector<32x1xf32>
    %17 = arith.maximumf %15, %16 : vector<32x1xf32>
    %18 = vector.broadcast %8 : vector<32x1xf32> to vector<32x32xf32>
    %19 = arith.subf %0, %18 : vector<32x32xf32>
    %cst_9 = arith.constant 9.99999974E-6 : f32
    %20 = vector.broadcast %cst_9 : f32 to vector<32x1xf32>
    %21 = arith.addf %17, %20 : vector<32x1xf32>
    %22 = math.rsqrt %21 : vector<32x1xf32>
    %23 = vector.broadcast %22 : vector<32x1xf32> to vector<32x32xf32>
    %24 = arith.mulf %19, %23 : vector<32x32xf32>
    %25 = vector.broadcast %3 : vector<1x32xf32> to vector<32x32xf32>
    %26 = arith.mulf %24, %25 : vector<32x32xf32>
    %27 = vector.broadcast %4 : vector<1x32xf32> to vector<32x32xf32>
    %28 = arith.addf %26, %27 : vector<32x32xf32>
    %c0_10 = arith.constant 0 : index
    %c0_11 = arith.constant 0 : index
    %c0_12 = arith.constant 0 : index
    %29 = vector.load %arg4[%c0_10, %c0_11, %c0_12] : memref<1x4x64xf32, #tpu.memory_space<vmem>>, vector<1x4x64xf32>
    %30 = vector.shape_cast %29 : vector<1x4x64xf32> to vector<4x64xf32>
    %31 = vector.extract_strided_slice %30 {offsets = [0, 0], sizes = [1, 32], strides = [1, 1]} : vector<4x64xf32> to vector<1x32xf32>
    %32 = vector.extract_strided_slice %30 {offsets = [1, 0], sizes = [1, 32], strides = [1, 1]} : vector<4x64xf32> to vector<1x32xf32>
    %cst_13 = arith.constant dense<0.000000e+00> : vector<32xf32>
    %33 = vector.multi_reduction <add>, %28, %cst_13 [1] : vector<32x32xf32> to vector<32xf32>
    %34 = vector.shape_cast %33 : vector<32xf32> to vector<32x1xf32>
    %cst_14 = arith.constant 3.200000e+01 : f32
    %35 = vector.broadcast %cst_14 : f32 to vector<32x1xf32>
    %36 = arith.divf %34, %35 : vector<32x1xf32>
    %37 = arith.mulf %28, %28 : vector<32x32xf32>
    %cst_15 = arith.constant dense<0.000000e+00> : vector<32xf32>
    %38 = vector.multi_reduction <add>, %37, %cst_15 [1] : vector<32x32xf32> to vector<32xf32>
    %39 = vector.shape_cast %38 : vector<32xf32> to vector<32x1xf32>
    %cst_16 = arith.constant 3.200000e+01 : f32
    %40 = vector.broadcast %cst_16 : f32 to vector<32x1xf32>
    %41 = arith.divf %39, %40 : vector<32x1xf32>
    %42 = arith.mulf %36, %36 : vector<32x1xf32>
    %43 = arith.subf %41, %42 : vector<32x1xf32>
    %cst_17 = arith.constant 0.000000e+00 : f32
    %44 = vector.broadcast %cst_17 : f32 to vector<32x1xf32>
    %45 = arith.maximumf %43, %44 : vector<32x1xf32>
    %46 = vector.broadcast %36 : vector<32x1xf32> to vector<32x32xf32>
    %47 = arith.subf %28, %46 : vector<32x32xf32>
    %cst_18 = arith.constant 9.99999974E-6 : f32
    %48 = vector.broadcast %cst_18 : f32 to vector<32x1xf32>
    %49 = arith.addf %45, %48 : vector<32x1xf32>
    %50 = math.rsqrt %49 : vector<32x1xf32>
    %51 = vector.broadcast %50 : vector<32x1xf32> to vector<32x32xf32>
    %52 = arith.mulf %47, %51 : vector<32x32xf32>
    %53 = vector.broadcast %31 : vector<1x32xf32> to vector<32x32xf32>
    %54 = arith.mulf %52, %53 : vector<32x32xf32>
    %55 = vector.broadcast %32 : vector<1x32xf32> to vector<32x32xf32>
    %56 = arith.addf %54, %55 : vector<32x32xf32>
    %c0_19 = arith.constant 0 : index
    %c0_20 = arith.constant 0 : index
    %c0_21 = arith.constant 0 : index
    %57 = vector.load %arg5[%c0_19, %c0_20, %c0_21] : memref<1x32x64xbf16, #tpu.memory_space<vmem>>, vector<1x32x64xbf16>
    %58 = vector.shape_cast %57 : vector<1x32x64xbf16> to vector<32x64xbf16>
    %59 = arith.truncf %56 : vector<32x32xf32> to vector<32x32xbf16>
    %cst_22 = arith.constant dense<0.000000e+00> : vector<32x64xf32>
    %60 = tpu.matmul %59, %58, %cst_22 {dimension_numbers = #tpu.dot_dimension_numbers<[1], [0], [0], [1], [0, 0, 1, 1], [], []>} : vector<32x32xbf16>, vector<32x64xbf16>, vector<32x64xf32> -> vector<32x64xf32>
    %61 = vector.extract_strided_slice %30 {offsets = [2, 0], sizes = [1, 64], strides = [1, 1]} : vector<4x64xf32> to vector<1x64xf32>
    %62 = vector.broadcast %61 : vector<1x64xf32> to vector<32x64xf32>
    %63 = arith.addf %60, %62 : vector<32x64xf32>
    %64 = arith.negf %63 : vector<32x64xf32>
    %65 = math.exp %64 : vector<32x64xf32>
    %cst_23 = arith.constant 1.000000e+00 : f32
    %66 = vector.broadcast %cst_23 : f32 to vector<32x64xf32>
    %67 = arith.addf %66, %65 : vector<32x64xf32>
    %68 = arith.divf %66, %67 : vector<32x64xf32>
    %69 = arith.mulf %63, %68 : vector<32x64xf32>
    %c0_24 = arith.constant 0 : index
    %c0_25 = arith.constant 0 : index
    %c0_26 = arith.constant 0 : index
    %70 = vector.load %arg6[%c0_24, %c0_25, %c0_26] : memref<1x64x32xbf16, #tpu.memory_space<vmem>>, vector<1x64x32xbf16>
    %71 = vector.shape_cast %70 : vector<1x64x32xbf16> to vector<64x32xbf16>
    %72 = arith.truncf %69 : vector<32x64xf32> to vector<32x64xbf16>
    %cst_27 = arith.constant dense<0.000000e+00> : vector<32x32xf32>
    %73 = tpu.matmul %72, %71, %cst_27 {dimension_numbers = #tpu.dot_dimension_numbers<[1], [0], [0], [1], [0, 0, 1, 1], [], []>} : vector<32x64xbf16>, vector<64x32xbf16>, vector<32x32xf32> -> vector<32x32xf32>
    %74 = vector.extract_strided_slice %30 {offsets = [3, 0], sizes = [1, 32], strides = [1, 1]} : vector<4x64xf32> to vector<1x32xf32>
    %75 = vector.broadcast %74 : vector<1x32xf32> to vector<32x32xf32>
    %76 = arith.addf %73, %75 : vector<32x32xf32>
    %77 = arith.addf %28, %76 : vector<32x32xf32>
    %78 = arith.addf %77, %1 : vector<32x32xf32>
    %c0_28 = arith.constant 0 : index
    %c0_29 = arith.constant 0 : index
    %79 = vector.load %arg7[%c0_28, %c0_29] : memref<32x64xbf16, #tpu.memory_space<vmem>>, vector<32x64xbf16>
    %80 = arith.truncf %78 : vector<32x32xf32> to vector<32x32xbf16>
    %cst_30 = arith.constant dense<0.000000e+00> : vector<32x64xf32>
    %81 = tpu.matmul %80, %79, %cst_30 {dimension_numbers = #tpu.dot_dimension_numbers<[1], [0], [0], [1], [0, 0, 1, 1], [], []>} : vector<32x32xbf16>, vector<32x64xbf16>, vector<32x64xf32> -> vector<32x64xf32>
    %c0_31 = arith.constant 0 : index
    %c0_32 = arith.constant 0 : index
    %82 = vector.load %arg8[%c0_31, %c0_32] : memref<32x64xf32, #tpu.memory_space<vmem>>, vector<32x64xf32>
    tpu.vector_store %arg8[%c0_31, %c0_32], %81 {strides = array<i32>} : memref<32x64xf32, #tpu.memory_space<vmem>>, vector<32x64xf32>,
    return
  }
  func.func @transform_0(%arg0: i32) -> (i32, i32) {
    %c0_i32 = arith.constant 0 : i32
    %c0_i32_0 = arith.constant 0 : i32
    return %arg0, %c0_i32 : i32, i32
  }
  func.func @transform_1(%arg0: i32) -> (i32, i32) {
    %c0_i32 = arith.constant 0 : i32
    %c0_i32_0 = arith.constant 0 : i32
    return %arg0, %c0_i32 : i32, i32
  }
  func.func @transform_2(%arg0: i32) -> (i32, i32) {
    %c0_i32 = arith.constant 0 : i32
    %c0_i32_0 = arith.constant 0 : i32
    %c0_i32_1 = arith.constant 0 : i32
    return %c0_i32, %c0_i32_0 : i32, i32
  }
  func.func @transform_3(%arg0: i32) -> (i32, i32, i32) {
    %c0_i32 = arith.constant 0 : i32
    %c0_i32_0 = arith.constant 0 : i32
    %c0_i32_1 = arith.constant 0 : i32
    %c0_i32_2 = arith.constant 0 : i32
    return %c0_i32, %c0_i32_0, %c0_i32_1 : i32, i32, i32
  }
  func.func @transform_4(%arg0: i32) -> (i32, i32, i32) {
    %c0_i32 = arith.constant 0 : i32
    %c0_i32_0 = arith.constant 0 : i32
    %c0_i32_1 = arith.constant 0 : i32
    %c0_i32_2 = arith.constant 0 : i32
    return %c0_i32, %c0_i32_0, %c0_i32_1 : i32, i32, i32
  }
  func.func @transform_5(%arg0: i32) -> (i32, i32, i32) {
    %c0_i32 = arith.constant 0 : i32
    %c0_i32_0 = arith.constant 0 : i32
    %c0_i32_1 = arith.constant 0 : i32
    %c0_i32_2 = arith.constant 0 : i32
    return %c0_i32, %c0_i32_0, %c0_i32_1 : i32, i32, i32
  }
  func.func @transform_6(%arg0: i32) -> (i32, i32) {
    %c0_i32 = arith.constant 0 : i32
    %c0_i32_0 = arith.constant 0 : i32
    %c0_i32_1 = arith.constant 0 : i32
    return %c0_i32, %c0_i32_0 : i32, i32
  }
  func.func @transform_7(%arg0: i32) -> (i32, i32) {
    %c0_i32 = arith.constant 0 : i32
    %c0_i32_0 = arith.constant 0 : i32
    return %arg0, %c0_i32 : i32, i32
  }
}

module attributes {stable_mosaic.version = 11 : i64} {
  func.func @_fused_stage_kernel(%arg0: i32, %arg1: memref<128x16xf32, #tpu.memory_space<vmem>>, %arg2: memref<2x16xf32, #tpu.memory_space<vmem>>, %arg3: memref<1x4x32xf32, #tpu.memory_space<vmem>>, %arg4: memref<1x16x32xbf16, #tpu.memory_space<vmem>>, %arg5: memref<1x32x16xbf16, #tpu.memory_space<vmem>>, %arg6: memref<16x64xbf16, #tpu.memory_space<vmem>>, %arg7: memref<64x64xf32, #tpu.memory_space<vmem>>, %arg8: memref<2x64xf32, #tpu.memory_space<vmem>>, %arg9: memref<65x64xf32, #tpu.memory_space<vmem>>, %arg10: memref<128x64xf32, #tpu.memory_space<vmem>>) attributes {dimension_semantics = [#tpu.dimension_semantics<parallel>], iteration_bounds = array<i64: 1>, scalar_prefetch = 0 : i64, scratch_operands = 0 : i64, tpu.core_type = #tpu.core_type<tc>, window_params = [{transform_indices = @transform_0, window_bounds = array<i64: 128, 16>}, {pipeline_mode = #tpu.pipeline_mode<synchronous>, transform_indices = @transform_1, window_bounds = array<i64: 2, 16>}, {pipeline_mode = #tpu.pipeline_mode<synchronous>, transform_indices = @transform_2, window_bounds = array<i64: 1, 4, 32>}, {pipeline_mode = #tpu.pipeline_mode<synchronous>, transform_indices = @transform_3, window_bounds = array<i64: 1, 16, 32>}, {pipeline_mode = #tpu.pipeline_mode<synchronous>, transform_indices = @transform_4, window_bounds = array<i64: 1, 32, 16>}, {pipeline_mode = #tpu.pipeline_mode<synchronous>, transform_indices = @transform_5, window_bounds = array<i64: 16, 64>}, {pipeline_mode = #tpu.pipeline_mode<synchronous>, transform_indices = @transform_6, window_bounds = array<i64: 64, 64>}, {pipeline_mode = #tpu.pipeline_mode<synchronous>, transform_indices = @transform_7, window_bounds = array<i64: 2, 64>}, {pipeline_mode = #tpu.pipeline_mode<synchronous>, transform_indices = @transform_8, window_bounds = array<i64: 65, 64>}, {transform_indices = @transform_9, window_bounds = array<i64: 128, 64>}]} {
    %c0 = arith.constant 0 : index
    %c0_0 = arith.constant 0 : index
    %0 = vector.load %arg1[%c0, %c0_0] : memref<128x16xf32, #tpu.memory_space<vmem>>, vector<128x16xf32>
    %c0_1 = arith.constant 0 : index
    %c0_2 = arith.constant 0 : index
    %1 = vector.load %arg2[%c0_1, %c0_2] : memref<2x16xf32, #tpu.memory_space<vmem>>, vector<2x16xf32>
    %2 = vector.extract_strided_slice %1 {offsets = [0, 0], sizes = [1, 16], strides = [1, 1]} : vector<2x16xf32> to vector<1x16xf32>
    %3 = vector.extract_strided_slice %1 {offsets = [1, 0], sizes = [1, 16], strides = [1, 1]} : vector<2x16xf32> to vector<1x16xf32>
    %cst = arith.constant dense<0.000000e+00> : vector<128xf32>
    %4 = vector.multi_reduction <add>, %0, %cst [1] : vector<128x16xf32> to vector<128xf32>
    %5 = vector.shape_cast %4 : vector<128xf32> to vector<128x1xf32>
    %cst_3 = arith.constant 1.600000e+01 : f32
    %6 = vector.broadcast %cst_3 : f32 to vector<128x1xf32>
    %7 = arith.divf %5, %6 : vector<128x1xf32>
    %8 = arith.mulf %0, %0 : vector<128x16xf32>
    %cst_4 = arith.constant dense<0.000000e+00> : vector<128xf32>
    %9 = vector.multi_reduction <add>, %8, %cst_4 [1] : vector<128x16xf32> to vector<128xf32>
    %10 = vector.shape_cast %9 : vector<128xf32> to vector<128x1xf32>
    %cst_5 = arith.constant 1.600000e+01 : f32
    %11 = vector.broadcast %cst_5 : f32 to vector<128x1xf32>
    %12 = arith.divf %10, %11 : vector<128x1xf32>
    %13 = arith.mulf %7, %7 : vector<128x1xf32>
    %14 = arith.subf %12, %13 : vector<128x1xf32>
    %cst_6 = arith.constant 0.000000e+00 : f32
    %15 = vector.broadcast %cst_6 : f32 to vector<128x1xf32>
    %16 = arith.maximumf %14, %15 : vector<128x1xf32>
    %17 = vector.broadcast %7 : vector<128x1xf32> to vector<128x16xf32>
    %18 = arith.subf %0, %17 : vector<128x16xf32>
    %cst_7 = arith.constant 9.99999974E-6 : f32
    %19 = vector.broadcast %cst_7 : f32 to vector<128x1xf32>
    %20 = arith.addf %16, %19 : vector<128x1xf32>
    %21 = math.rsqrt %20 : vector<128x1xf32>
    %22 = vector.broadcast %21 : vector<128x1xf32> to vector<128x16xf32>
    %23 = arith.mulf %18, %22 : vector<128x16xf32>
    %24 = vector.broadcast %2 : vector<1x16xf32> to vector<128x16xf32>
    %25 = arith.mulf %23, %24 : vector<128x16xf32>
    %26 = vector.broadcast %3 : vector<1x16xf32> to vector<128x16xf32>
    %27 = arith.addf %25, %26 : vector<128x16xf32>
    %c0_8 = arith.constant 0 : index
    %c0_9 = arith.constant 0 : index
    %c0_10 = arith.constant 0 : index
    %28 = vector.load %arg3[%c0_8, %c0_9, %c0_10] : memref<1x4x32xf32, #tpu.memory_space<vmem>>, vector<1x4x32xf32>
    %29 = vector.shape_cast %28 : vector<1x4x32xf32> to vector<4x32xf32>
    %30 = vector.extract_strided_slice %29 {offsets = [0, 0], sizes = [1, 16], strides = [1, 1]} : vector<4x32xf32> to vector<1x16xf32>
    %31 = vector.extract_strided_slice %29 {offsets = [1, 0], sizes = [1, 16], strides = [1, 1]} : vector<4x32xf32> to vector<1x16xf32>
    %cst_11 = arith.constant dense<0.000000e+00> : vector<128xf32>
    %32 = vector.multi_reduction <add>, %27, %cst_11 [1] : vector<128x16xf32> to vector<128xf32>
    %33 = vector.shape_cast %32 : vector<128xf32> to vector<128x1xf32>
    %cst_12 = arith.constant 1.600000e+01 : f32
    %34 = vector.broadcast %cst_12 : f32 to vector<128x1xf32>
    %35 = arith.divf %33, %34 : vector<128x1xf32>
    %36 = arith.mulf %27, %27 : vector<128x16xf32>
    %cst_13 = arith.constant dense<0.000000e+00> : vector<128xf32>
    %37 = vector.multi_reduction <add>, %36, %cst_13 [1] : vector<128x16xf32> to vector<128xf32>
    %38 = vector.shape_cast %37 : vector<128xf32> to vector<128x1xf32>
    %cst_14 = arith.constant 1.600000e+01 : f32
    %39 = vector.broadcast %cst_14 : f32 to vector<128x1xf32>
    %40 = arith.divf %38, %39 : vector<128x1xf32>
    %41 = arith.mulf %35, %35 : vector<128x1xf32>
    %42 = arith.subf %40, %41 : vector<128x1xf32>
    %cst_15 = arith.constant 0.000000e+00 : f32
    %43 = vector.broadcast %cst_15 : f32 to vector<128x1xf32>
    %44 = arith.maximumf %42, %43 : vector<128x1xf32>
    %45 = vector.broadcast %35 : vector<128x1xf32> to vector<128x16xf32>
    %46 = arith.subf %27, %45 : vector<128x16xf32>
    %cst_16 = arith.constant 9.99999974E-6 : f32
    %47 = vector.broadcast %cst_16 : f32 to vector<128x1xf32>
    %48 = arith.addf %44, %47 : vector<128x1xf32>
    %49 = math.rsqrt %48 : vector<128x1xf32>
    %50 = vector.broadcast %49 : vector<128x1xf32> to vector<128x16xf32>
    %51 = arith.mulf %46, %50 : vector<128x16xf32>
    %52 = vector.broadcast %30 : vector<1x16xf32> to vector<128x16xf32>
    %53 = arith.mulf %51, %52 : vector<128x16xf32>
    %54 = vector.broadcast %31 : vector<1x16xf32> to vector<128x16xf32>
    %55 = arith.addf %53, %54 : vector<128x16xf32>
    %c0_17 = arith.constant 0 : index
    %c0_18 = arith.constant 0 : index
    %c0_19 = arith.constant 0 : index
    %56 = vector.load %arg4[%c0_17, %c0_18, %c0_19] : memref<1x16x32xbf16, #tpu.memory_space<vmem>>, vector<1x16x32xbf16>
    %57 = vector.shape_cast %56 : vector<1x16x32xbf16> to vector<16x32xbf16>
    %58 = arith.truncf %55 : vector<128x16xf32> to vector<128x16xbf16>
    %cst_20 = arith.constant dense<0.000000e+00> : vector<128x32xf32>
    %59 = tpu.matmul %58, %57, %cst_20 {dimension_numbers = #tpu.dot_dimension_numbers<[1], [0], [0], [1], [0, 0, 1, 1], [], []>} : vector<128x16xbf16>, vector<16x32xbf16>, vector<128x32xf32> -> vector<128x32xf32>
    %60 = vector.extract_strided_slice %29 {offsets = [2, 0], sizes = [1, 32], strides = [1, 1]} : vector<4x32xf32> to vector<1x32xf32>
    %61 = vector.broadcast %60 : vector<1x32xf32> to vector<128x32xf32>
    %62 = arith.addf %59, %61 : vector<128x32xf32>
    %63 = arith.negf %62 : vector<128x32xf32>
    %64 = math.exp %63 : vector<128x32xf32>
    %cst_21 = arith.constant 1.000000e+00 : f32
    %65 = vector.broadcast %cst_21 : f32 to vector<128x32xf32>
    %66 = arith.addf %65, %64 : vector<128x32xf32>
    %67 = arith.divf %65, %66 : vector<128x32xf32>
    %68 = arith.mulf %62, %67 : vector<128x32xf32>
    %c0_22 = arith.constant 0 : index
    %c0_23 = arith.constant 0 : index
    %c0_24 = arith.constant 0 : index
    %69 = vector.load %arg5[%c0_22, %c0_23, %c0_24] : memref<1x32x16xbf16, #tpu.memory_space<vmem>>, vector<1x32x16xbf16>
    %70 = vector.shape_cast %69 : vector<1x32x16xbf16> to vector<32x16xbf16>
    %71 = arith.truncf %68 : vector<128x32xf32> to vector<128x32xbf16>
    %cst_25 = arith.constant dense<0.000000e+00> : vector<128x16xf32>
    %72 = tpu.matmul %71, %70, %cst_25 {dimension_numbers = #tpu.dot_dimension_numbers<[1], [0], [0], [1], [0, 0, 1, 1], [], []>} : vector<128x32xbf16>, vector<32x16xbf16>, vector<128x16xf32> -> vector<128x16xf32>
    %73 = vector.extract_strided_slice %29 {offsets = [3, 0], sizes = [1, 16], strides = [1, 1]} : vector<4x32xf32> to vector<1x16xf32>
    %74 = vector.broadcast %73 : vector<1x16xf32> to vector<128x16xf32>
    %75 = arith.addf %72, %74 : vector<128x16xf32>
    %76 = arith.addf %27, %75 : vector<128x16xf32>
    %c0_26 = arith.constant 0 : index
    %c0_27 = arith.constant 0 : index
    %77 = vector.load %arg6[%c0_26, %c0_27] : memref<16x64xbf16, #tpu.memory_space<vmem>>, vector<16x64xbf16>
    %78 = arith.truncf %76 : vector<128x16xf32> to vector<128x16xbf16>
    %cst_28 = arith.constant dense<0.000000e+00> : vector<128x64xf32>
    %79 = tpu.matmul %78, %77, %cst_28 {dimension_numbers = #tpu.dot_dimension_numbers<[1], [0], [0], [1], [0, 0, 1, 1], [], []>} : vector<128x16xbf16>, vector<16x64xbf16>, vector<128x64xf32> -> vector<128x64xf32>
    %c0_29 = arith.constant 0 : index
    %c0_30 = arith.constant 0 : index
    %80 = vector.load %arg7[%c0_29, %c0_30] : memref<64x64xf32, #tpu.memory_space<vmem>>, vector<64x64xf32>
    %c0_31 = arith.constant 0 : index
    %c0_32 = arith.constant 0 : index
    %81 = vector.load %arg8[%c0_31, %c0_32] : memref<2x64xf32, #tpu.memory_space<vmem>>, vector<2x64xf32>
    %c0_33 = arith.constant 0 : index
    %c0_34 = arith.constant 0 : index
    %82 = vector.load %arg9[%c0_33, %c0_34] : memref<65x64xf32, #tpu.memory_space<vmem>>, vector<65x64xf32>
    %cst_35 = arith.constant dense<0.000000e+00> : vector<128x64xf32>
    %83 = tpu.matmul %79, %80, %cst_35 {dimension_numbers = #tpu.dot_dimension_numbers<[1], [0], [0], [1], [0, 0, 1, 1], [], []>} : vector<128x64xf32>, vector<64x64xf32>, vector<128x64xf32> -> vector<128x64xf32>
    %84 = arith.mulf %79, %79 : vector<128x64xf32>
    %cst_36 = arith.constant dense<0.000000e+00> : vector<128x64xf32>
    %85 = tpu.matmul %84, %80, %cst_36 {dimension_numbers = #tpu.dot_dimension_numbers<[1], [0], [0], [1], [0, 0, 1, 1], [], []>} : vector<128x64xf32>, vector<64x64xf32>, vector<128x64xf32> -> vector<128x64xf32>
    %86 = arith.mulf %83, %83 : vector<128x64xf32>
    %87 = arith.subf %85, %86 : vector<128x64xf32>
    %88 = arith.subf %79, %83 : vector<128x64xf32>
    %cst_37 = arith.constant 0.000000e+00 : f32
    %89 = vector.broadcast %cst_37 : f32 to vector<128x64xf32>
    %90 = arith.maximumf %87, %89 : vector<128x64xf32>
    %cst_38 = arith.constant 9.99999974E-6 : f32
    %91 = vector.broadcast %cst_38 : f32 to vector<128x64xf32>
    %92 = arith.addf %90, %91 : vector<128x64xf32>
    %93 = math.rsqrt %92 : vector<128x64xf32>
    %94 = arith.mulf %88, %93 : vector<128x64xf32>
    %95 = vector.extract_strided_slice %81 {offsets = [0, 0], sizes = [1, 64], strides = [1, 1]} : vector<2x64xf32> to vector<1x64xf32>
    %96 = vector.broadcast %95 : vector<1x64xf32> to vector<128x64xf32>
    %97 = arith.mulf %94, %96 : vector<128x64xf32>
    %98 = vector.extract_strided_slice %81 {offsets = [1, 0], sizes = [1, 64], strides = [1, 1]} : vector<2x64xf32> to vector<1x64xf32>
    %99 = vector.broadcast %98 : vector<1x64xf32> to vector<128x64xf32>
    %100 = arith.addf %97, %99 : vector<128x64xf32>
    %101 = vector.extract_strided_slice %82 {offsets = [0, 0], sizes = [64, 64], strides = [1, 1]} : vector<65x64xf32> to vector<64x64xf32>
    %cst_39 = arith.constant dense<0.000000e+00> : vector<128x64xf32>
    %102 = tpu.matmul %100, %101, %cst_39 {dimension_numbers = #tpu.dot_dimension_numbers<[1], [0], [0], [1], [0, 0, 1, 1], [], []>} : vector<128x64xf32>, vector<64x64xf32>, vector<128x64xf32> -> vector<128x64xf32>
    %103 = vector.extract_strided_slice %82 {offsets = [64, 0], sizes = [1, 64], strides = [1, 1]} : vector<65x64xf32> to vector<1x64xf32>
    %104 = vector.broadcast %103 : vector<1x64xf32> to vector<128x64xf32>
    %105 = arith.addf %102, %104 : vector<128x64xf32>
    %c0_40 = arith.constant 0 : index
    %c0_41 = arith.constant 0 : index
    %106 = vector.load %arg10[%c0_40, %c0_41] : memref<128x64xf32, #tpu.memory_space<vmem>>, vector<128x64xf32>
    tpu.vector_store %arg10[%c0_40, %c0_41], %105 {strides = array<i32>} : memref<128x64xf32, #tpu.memory_space<vmem>>, vector<128x64xf32>,
    return
  }
  func.func @transform_0(%arg0: i32) -> (i32, i32) {
    %c0_i32 = arith.constant 0 : i32
    %c0_i32_0 = arith.constant 0 : i32
    return %arg0, %c0_i32 : i32, i32
  }
  func.func @transform_1(%arg0: i32) -> (i32, i32) {
    %c0_i32 = arith.constant 0 : i32
    %c0_i32_0 = arith.constant 0 : i32
    %c0_i32_1 = arith.constant 0 : i32
    return %c0_i32, %c0_i32_0 : i32, i32
  }
  func.func @transform_2(%arg0: i32) -> (i32, i32, i32) {
    %c0_i32 = arith.constant 0 : i32
    %c0_i32_0 = arith.constant 0 : i32
    %c0_i32_1 = arith.constant 0 : i32
    %c0_i32_2 = arith.constant 0 : i32
    return %c0_i32, %c0_i32_0, %c0_i32_1 : i32, i32, i32
  }
  func.func @transform_3(%arg0: i32) -> (i32, i32, i32) {
    %c0_i32 = arith.constant 0 : i32
    %c0_i32_0 = arith.constant 0 : i32
    %c0_i32_1 = arith.constant 0 : i32
    %c0_i32_2 = arith.constant 0 : i32
    return %c0_i32, %c0_i32_0, %c0_i32_1 : i32, i32, i32
  }
  func.func @transform_4(%arg0: i32) -> (i32, i32, i32) {
    %c0_i32 = arith.constant 0 : i32
    %c0_i32_0 = arith.constant 0 : i32
    %c0_i32_1 = arith.constant 0 : i32
    %c0_i32_2 = arith.constant 0 : i32
    return %c0_i32, %c0_i32_0, %c0_i32_1 : i32, i32, i32
  }
  func.func @transform_5(%arg0: i32) -> (i32, i32) {
    %c0_i32 = arith.constant 0 : i32
    %c0_i32_0 = arith.constant 0 : i32
    %c0_i32_1 = arith.constant 0 : i32
    return %c0_i32, %c0_i32_0 : i32, i32
  }
  func.func @transform_6(%arg0: i32) -> (i32, i32) {
    %c0_i32 = arith.constant 0 : i32
    %c0_i32_0 = arith.constant 0 : i32
    %c0_i32_1 = arith.constant 0 : i32
    return %c0_i32, %c0_i32_0 : i32, i32
  }
  func.func @transform_7(%arg0: i32) -> (i32, i32) {
    %c0_i32 = arith.constant 0 : i32
    %c0_i32_0 = arith.constant 0 : i32
    %c0_i32_1 = arith.constant 0 : i32
    return %c0_i32, %c0_i32_0 : i32, i32
  }
  func.func @transform_8(%arg0: i32) -> (i32, i32) {
    %c0_i32 = arith.constant 0 : i32
    %c0_i32_0 = arith.constant 0 : i32
    %c0_i32_1 = arith.constant 0 : i32
    return %c0_i32, %c0_i32_0 : i32, i32
  }
  func.func @transform_9(%arg0: i32) -> (i32, i32) {
    %c0_i32 = arith.constant 0 : i32
    %c0_i32_0 = arith.constant 0 : i32
    return %arg0, %c0_i32 : i32, i32
  }
}

</mosaic_0001>

<bundles_post_ra>
// kernel: _lambda_.7
= control target key start
LH: loop header
LB: loop body
LE: loop exit
PB: predicated region body
PF: predicated region fallthrough
CT: control target
= control target key end

     0   :  { %vm77_vm0 = vcmask 392192   ;;  %v55_v27 = vlaneseq  ;;  %vm199_vm1 = vcmask 130048   ;;  %vm1075_vm2 = vcmask 261120   ;;  %s2257_s1 = inlined_call_operand.vmem [shape: bf16[48,16], index: 1, kind: input, shape index: {}]   ;;  %s2258_s0 = inlined_call_operand.vmem [shape: f32[128,48], index: 0, kind: input, shape index: {}]   ;;  %s2259_s2 = inlined_call_operand.vmem [shape: f32[3,16], index: 2, kind: input, shape index: {}]   ;;  %s2260_s4 = inlined_call_operand.vmem [shape: bf16[1,16,32], index: 4, kind: input, shape index: {}]   ;;  %s2261_s3 = inlined_call_operand.vmem [shape: f32[1,4,32], index: 3, kind: input, shape index: {}]   ;;  %s2262_s5 = inlined_call_operand.vmem [shape: bf16[1,32,16], index: 5, kind: input, shape index: {}]   ;;  %s2263_s6 = inlined_call_operand.vmem [shape: f32[128,16], index: 6, kind: output, shape index: {}]  }
   0x1   :  { %v1371_v0 = vld [vmem:[%s2257_s1] sm:$0xff]   ;;  %v1372_v1 = vld [vmem:[%s2257_s1 + $0x8] sm:$0xff]   ;;  %v1373_v4 = vld [vmem:[%s2257_s1 + $0x10] sm:$0xff]  }
   0x2   :  { %1309 = vmatprep.subr.bf16.mxu0 %v1371_v0  ;;  %v24_v2 = vld [vmem:[%s2258_s0] sm:$0xff]  ;;  %v25_v3 = vld [vmem:[%s2258_s0 + $0x8] sm:$0xff]  ;;  %v26_v6 = vld [vmem:[%s2258_s0 + $0x10] sm:$0xff]  ;;  %v1605_v28 = vshrl.u32 %v55_v27, 7 }
   0x3   :  { %1310 = vmatpush3.bf16.msra.mxu0 %v1371_v0  ;;  %v47_v5 = vpack.c.bf16 %v25_v3, %v24_v2  ;;  %v27_v7 = vld [vmem:[%s2258_s0 + $0x18] sm:$0xff]  ;;  %v28_v8 = vld [vmem:[%s2258_s0 + $0x20] sm:$0xff]  ;;  %v29_v9 = vld [vmem:[%s2258_s0 + $0x28] sm:$0xff] }
   0x4   :  { %1311 = vmatprep.subr.bf16.mxu0 %v1372_v1  ;;  %v48_v10 = vpack.c.bf16 %v27_v7, %v26_v6  ;;  %v49_v11 = vpack.c.bf16 %v29_v9, %v28_v8  ;;  %v30_v12 = vld [vmem:[%s2258_s0 + $0x30] sm:$0xff]  ;;  %v31_v13 = vld [vmem:[%s2258_s0 + $0x38] sm:$0xff]  ;;  %v32_v14 = vld [vmem:[%s2258_s0 + $0x40] sm:$0xff]  ;;  %v57_v29 = vsub.s32 0, %v1605_v28 }
   0x5   :  { %1315 = vmatprep.mubr.msk.bf16.mxu0 %vm77_vm0, %v47_v5  ;;  %v33_v15 = vld [vmem:[%s2258_s0 + $0x48] sm:$0xff]  ;;  %v50_v16 = vpack.c.bf16 %v31_v13, %v30_v12  ;;  %v34_v18 = vld [vmem:[%s2258_s0 + $0x50] sm:$0xff]  ;;  %v35_v19 = vld [vmem:[%s2258_s0 + $0x58] sm:$0xff] }
   0x6   :  { %v51_v17 = vpack.c.bf16 %v33_v15, %v32_v14  ;;  %v36_v20 = vld [vmem:[%s2258_s0 + $0x60] sm:$0xff]  ;;  %v37_v21 = vld [vmem:[%s2258_s0 + $0x68] sm:$0xff]  ;;  %v52_v22 = vpack.c.bf16 %v35_v19, %v34_v18  ;;  %v38_v24 = vld [vmem:[%s2258_s0 + $0x70] sm:$0xff] }
   0x7   :  { %1312 = vmatpush3.bf16.msra.mxu0 %v1372_v1  ;;  %v53_v23 = vpack.c.bf16 %v37_v21, %v36_v20  ;;  %v39_v25 = vld [vmem:[%s2258_s0 + $0x78] sm:$0xff]  ;;  %v1611_v30 = vld [vmem:[%s2259_s2] sm:$0x7] }
   0x8   :  { %1313 = vmatprep.subr.bf16.mxu0 %v1373_v4  ;;  %v54_v26 = vpack.c.bf16 %v39_v25, %v38_v24  ;;  %v1616_v31 = vrot.slane %v1611_v30, %v57_v29 }
   0xb   :  { %1314 = vmatpush3.bf16.msra.mxu0 %v1373_v4 }
   0xe   :  { %1316 = vmatmul.mubr.msk.bf16.vlgmr.msra.gmra.mrb[0].mxu0 %vm77_vm0, %v48_v10 }
   0xf   :  { %1319 = vmatprep.mubr.msk.bf16.mxu0 %vm77_vm0, %v49_v11 }
  0x16   :  { %1320 = vmatmul.mubr.msk.bf16.gmra.mrb[4].mxu0 %vm77_vm0, %v50_v16 }
  0x17   :  { %1323 = vmatprep.mubr.msk.bf16.mxu0 %vm77_vm0, %v51_v17 }
  0x1e   :  { %1324 = vmatmul.mubr.msk.bf16.gmra.mrb[8].mxu0 %vm77_vm0, %v52_v22 }
  0x1f   :  { %1327 = vmatprep.mubr.msk.bf16.mxu0 %vm77_vm0, %v53_v23 }
  0x26   :  { %1328 = vmatmul.mubr.msk.bf16.gmra.mrb[12].mxu0 %vm77_vm0, %v54_v26 }
  0xe1   :  { %v1317_v32 = vpop.f32.mrb[0].mxu0 }
  0xe2   :  { %v1619_v33 = vadd.f32 %v1317_v32, %v1616_v31  ;;  %v136_v34 = vpop.f32.mrb[1].mxu0 }
  0xe3   :  { %v1622_v35 = vadd.f32 %v136_v34, %v1616_v31  ;;  %v1318_v36 = vpop.f32.mrb[2].mxu0 }
  0xe4   :  { %v1625_v37 = vadd.f32 %v1318_v36, %v1616_v31  ;;  %v139_v38 = vpop.f32.mrb[3].mxu0  ;;  %v206_v39 = vsel %vm199_vm1, %v1619_v33, 0.0  ;;  %v267_v41 = vmul.f32 %v1619_v33, %v1619_v33 }
  0xe5   :  { %207 = vadd.xlane.f32.xlu1 %v206_v39  ;;  %v200_v40 = vsel %vm199_vm1, %v1622_v35, 0.0  ;;  %v1634_v42 = vadd.f32 %v139_v38, %v1616_v31  ;;  %v265_v53 = vmul.f32 %v1622_v35, %v1622_v35 }
  0xe6   :  { %201 = vadd.xlane.f32.xlu0 %v200_v40  ;;  %v209_v43 = vsel %vm199_vm1, %v1625_v37, 0.0  ;;  %v268_v44 = vmul.f32 %v1625_v37, %v1625_v37  ;;  %v287_v45 = vsel %vm199_vm1, %v267_v41, 0.0 }
  0xe7   :  { %v266_v51 = vmul.f32 %v1634_v42, %v1634_v42  ;;  %v203_v52 = vsel %vm199_vm1, %v1634_v42, 0.0  ;;  %v281_v57 = vsel %vm199_vm1, %v265_v53, 0.0 }
  0xe8   :  { %v290_v49 = vsel %vm199_vm1, %v268_v44, 0.0 }
  0xe9   :  { %210 = vadd.xlane.f32.xlu1 %v209_v43  ;;  %v1321_v46 = vpop.f32.mrb[4].mxu0  ;;  %v284_v55 = vsel %vm199_vm1, %v266_v51, 0.0 }
  0xea   :  { %288 = vadd.xlane.f32.xlu0 %v287_v45  ;;  %v152_v47 = vpop.f32.mrb[5].mxu0  ;;  %v1653_v56 = vadd.f32 %v1321_v46, %v1616_v31 }
  0xeb   :  { %v1322_v48 = vpop.f32.mrb[6].mxu0  ;;  %v1662_v0 = vadd.f32 %v152_v47, %v1616_v31 }
  0xec   :  { %v155_v50 = vpop.f32.mrb[7].mxu0  ;;  %v1649_v54 = vadd.f32 %v1322_v48, %v1616_v31  ;;  %v218_v1 = vsel %vm199_vm1, %v1653_v56, 0.0  ;;  %v271_v5 = vmul.f32 %v1653_v56, %v1653_v56 }
  0xed   :  { %291 = vadd.xlane.f32.xlu1 %v290_v49  ;;  %v1659_v62 = vadd.f32 %v155_v50, %v1616_v31  ;;  %v212_v4 = vsel %vm199_vm1, %v1662_v0, 0.0  ;;  %v269_v13 = vmul.f32 %v1662_v0, %v1662_v0 }
  0xee   :  { %204 = vadd.xlane.f32.xlu0 %v203_v52  ;;  %v221_v59 = vsel %vm199_vm1, %v1649_v54, 0.0  ;;  %v272_v3 = vmul.f32 %v1649_v54, %v1649_v54  ;;  %v299_v12 = vsel %vm199_vm1, %v271_v5, 0.0 }
  0xef   :  { %v215_v2 = vsel %vm199_vm1, %v1659_v62, 0.0  ;;  %v270_v10 = vmul.f32 %v1659_v62, %v1659_v62  ;;  %v293_v17 = vsel %vm199_vm1, %v269_v13, 0.0 }
  0xf0   :  { %v302_v9 = vsel %vm199_vm1, %v272_v3, 0.0 }
  0xf1   :  { %285 = vadd.xlane.f32.xlu1 %v284_v55  ;;  %v1325_v58 = vpop.f32.mrb[8].mxu0  ;;  %v296_v15 = vsel %vm199_vm1, %v270_v10, 0.0 }
  0xf2   :  { %282 = vadd.xlane.f32.xlu0 %v281_v57  ;;  %v168_v60 = vpop.f32.mrb[9].mxu0  ;;  %v1685_v16 = vadd.f32 %v1325_v58, %v1616_v31 }
  0xf3   :  { %v1326_v61 = vpop.f32.mrb[10].mxu0  ;;  %v1694_v20 = vadd.f32 %v168_v60, %v1616_v31 }
  0xf4   :  { %v171_v63 = vpop.f32.mrb[11].mxu0  ;;  %v1681_v14 = vadd.f32 %v1326_v61, %v1616_v31  ;;  %v230_v21 = vsel %vm199_vm1, %v1685_v16, 0.0  ;;  %v275_v25 = vmul.f32 %v1685_v16, %v1685_v16 }
  0xf5   :  { %222 = vadd.xlane.f32.xlu1 %v221_v59  ;;  %v1691_v19 = vadd.f32 %v171_v63, %v1616_v31  ;;  %v224_v24 = vsel %vm199_vm1, %v1694_v20, 0.0  ;;  %v273_v34 = vmul.f32 %v1694_v20, %v1694_v20 }
  0xf6   :  { %219 = vadd.xlane.f32.xlu0 %v218_v1  ;;  %v233_v18 = vsel %vm199_vm1, %v1681_v14, 0.0  ;;  %v276_v23 = vmul.f32 %v1681_v14, %v1681_v14  ;;  %v311_v32 = vsel %vm199_vm1, %v275_v25, 0.0 }
  0xf7   :  { %v227_v22 = vsel %vm199_vm1, %v1691_v19, 0.0  ;;  %v274_v27 = vmul.f32 %v1691_v19, %v1691_v19  ;;  %v305_v40 = vsel %vm199_vm1, %v273_v34, 0.0 }
  0xf8   :  { %v314_v26 = vsel %vm199_vm1, %v276_v23, 0.0 }
  0xf9   :  { %216 = vadd.xlane.f32.xlu1 %v215_v2  ;;  %v1329_v6 = vpop.f32.mrb[12].mxu0  ;;  %v308_v38 = vsel %vm199_vm1, %v274_v27, 0.0 }
  0xfa   :  { %213 = vadd.xlane.f32.xlu0 %v212_v4  ;;  %v184_v7 = vpop.f32.mrb[13].mxu0  ;;  %v1717_v39 = vadd.f32 %v1329_v6, %v1616_v31 }
  0xfb   :  { %v1330_v8 = vpop.f32.mrb[14].mxu0  ;;  %v1726_v44 = vadd.f32 %v184_v7, %v1616_v31 }
  0xfc   :  { %v187_v11 = vpop.f32.mrb[15].mxu0  ;;  %v1713_v36 = vadd.f32 %v1330_v8, %v1616_v31  ;;  %v242_v45 = vsel %vm199_vm1, %v1717_v39, 0.0  ;;  %v279_v52 = vmul.f32 %v1717_v39, %v1717_v39 }
  0xfd   :  { %303 = vadd.xlane.f32.xlu1 %v302_v9  ;;  %v1723_v43 = vadd.f32 %v187_v11, %v1616_v31  ;;  %v236_v48 = vsel %vm199_vm1, %v1726_v44, 0.0  ;;  %v277_v49 = vmul.f32 %v1726_v44, %v1726_v44 }
  0xfe   :  { %300 = vadd.xlane.f32.xlu0 %v299_v12  ;;  %v245_v41 = vsel %vm199_vm1, %v1713_v36, 0.0  ;;  %v280_v50 = vmul.f32 %v1713_v36, %v1713_v36  ;;  %v323_v55 = vsel %vm199_vm1, %v279_v52, 0.0 }
  0xff   :  { %v239_v46 = vsel %vm199_vm1, %v1723_v43, 0.0  ;;  %v278_v47 = vmul.f32 %v1723_v43, %v1723_v43  ;;  %v317_v51 = vsel %vm199_vm1, %v277_v49, 0.0 }
 0x100   :  { %v326_v53 = vsel %vm199_vm1, %v280_v50, 0.0 }
 0x101   :  { %297 = vadd.xlane.f32.xlu1 %v296_v15  ;;  %v320_v31 = vsel %vm199_vm1, %v278_v47, 0.0 }
 0x102   :  { %294 = vadd.xlane.f32.xlu0 %v293_v17 }
 0x105   :  { %234 = vadd.xlane.f32.xlu1 %v233_v18 }
 0x106   :  { %231 = vadd.xlane.f32.xlu0 %v230_v21 }
 0x109   :  { %228 = vadd.xlane.f32.xlu1 %v227_v22 }
 0x10a   :  { %225 = vadd.xlane.f32.xlu0 %v224_v24 }
 0x10d   :  { %315 = vadd.xlane.f32.xlu1 %v314_v26 }
 0x10e   :  { %312 = vadd.xlane.f32.xlu0 %v311_v32 }
 0x111   :  { %309 = vadd.xlane.f32.xlu1 %v308_v38 }
 0x112   :  { %306 = vadd.xlane.f32.xlu0 %v305_v40  ;;  %v459_v40 = vsub.s32 1, %v1605_v28 }
 0x114   :  { %v1763_v50 = vrot.slane %v1611_v30, %v459_v40 }
 0x115   :  { %246 = vadd.xlane.f32.xlu1 %v245_v41 }
 0x116   :  { %243 = vadd.xlane.f32.xlu0 %v242_v45  ;;  %v479_v45 = vsub.s32 2, %v1605_v28 }
 0x119   :  { %240 = vadd.xlane.f32.xlu1 %v239_v46 }
 0x11a   :  { %237 = vadd.xlane.f32.xlu0 %v236_v48 }
 0x11d   :  { %321 = vadd.xlane.f32.xlu1 %v320_v31 }
 0x11e   :  { %318 = vadd.xlane.f32.xlu0 %v317_v51 }
 0x121   :  { %327 = vadd.xlane.f32.xlu1 %v326_v53  ;;  %v1769_v53 = vrot.slane %v1611_v30, %v479_v45 }
 0x122   :  { %324 = vadd.xlane.f32.xlu0 %v323_v55 }
 0x172   :  { %v208_v57 = vpop.xlane.xlu1 %207 }
 0x173   :  { %v202_v58 = vpop.xlane.xlu0 %201  ;;  %v251_v59 = vmul.f32 0.0625, %v208_v57 }
 0x174   :  { %v1746_v8 = vmul.f32 0.0625, %v202_v58 }
 0x175   :  { %v347_v1 = vmul.f32 %v251_v59, %v251_v59  ;;  %v395_v51 = vsub.f32 %v1619_v33, %v251_v59 }
 0x176   :  { %v211_v60 = vpop.xlane.xlu1 %210  ;;  %v345_v22 = vmul.f32 %v1746_v8, %v1746_v8 }
 0x177   :  { %v252_v61 = vmul.f32 0.0625, %v211_v60  ;;  %v289_v63 = vpop.xlane.xlu0 %288 }
 0x178   :  { %v331_v2 = vmul.f32 0.0625, %v289_v63 }
 0x179   :  { %v348_v5 = vmul.f32 %v252_v61, %v252_v61 }
 0x17a   :  { %v363_v3 = vsub.f32 %v331_v2, %v347_v1  ;;  %v292_v4 = vpop.xlane.xlu1 %291  ;;  %v396_v2 = vsub.f32 %v1625_v37, %v252_v61 }
 0x17b   :  { %v332_v6 = vmul.f32 0.0625, %v292_v4  ;;  %v205_v7 = vpop.xlane.xlu0 %204 }
 0x17c   :  { %v379_v9 = vmax.f32 %v363_v3, 0.0  ;;  %v1748_v10 = vmul.f32 0.0625, %v205_v7 }
 0x17d   :  { %v364_v11 = vsub.f32 %v332_v6, %v348_v5 }
 0x17e   :  { %v411_v12 = vadd.f32 1e-05, %v379_v9  ;;  %v346_v13 = vmul.f32 %v1748_v10, %v1748_v10  ;;  %v286_v15 = vpop.xlane.xlu1 %285  ;;  %v394_v6 = vsub.f32 %v1634_v42, %v1748_v10  ;;  %v393_v10 = vsub.f32 %v1622_v35, %v1746_v8 }
 0x17f   :  { %v380_v17 = vmax.f32 %v364_v11, 0.0  ;;  %v330_v18 = vmul.f32 0.0625, %v286_v15  ;;  %v283_v21 = vpop.xlane.xlu0 %282 }
 0x180   :  { %1377 = vrsqrt.f32 %v411_v12  ;;  %v329_v23 = vmul.f32 0.0625, %v283_v21 }
 0x181   :  { %v412_v24 = vadd.f32 1e-05, %v380_v17  ;;  %v362_v25 = vsub.f32 %v330_v18, %v346_v13 }
 0x182   :  { %v361_v26 = vsub.f32 %v329_v23, %v345_v22  ;;  %v223_v27 = vpop.xlane.xlu1 %222 }
 0x183   :  { %1379 = vrsqrt.f32 %v412_v24  ;;  %v378_v32 = vmax.f32 %v362_v25, 0.0  ;;  %v220_v34 = vpop.xlane.xlu0 %219  ;;  %v1756_v48 = vmul.f32 0.0625, %v223_v27 }
 0x184   :  { %v377_v38 = vmax.f32 %v361_v26, 0.0  ;;  %v1758_v31 = vmul.f32 0.0625, %v220_v34 }
 0x185   :  { %v410_v41 = vadd.f32 1e-05, %v378_v32  ;;  %v352_v57 = vmul.f32 %v1756_v48, %v1756_v48 }
 0x186   :  { %v409_v46 = vadd.f32 1e-05, %v377_v38  ;;  %v217_v47 = vpop.xlane.xlu1 %216  ;;  %v351_v33 = vmul.f32 %v1758_v31, %v1758_v31 }
 0x187   :  { %1381 = vrsqrt.f32 %v410_v41  ;;  %v214_v49 = vpop.xlane.xlu0 %213  ;;  %v1773_v58 = vmul.f32 0.0625, %v217_v47 }
 0x188   :  { %1383 = vrsqrt.f32 %v409_v46  ;;  %v1778_v59 = vmul.f32 0.0625, %v214_v49 }
 0x189   :  { %v350_v12 = vmul.f32 %v1773_v58, %v1773_v58 }
 0x18a   :  { %v1378_v52 = vpop.eup %1377  ;;  %v304_v55 = vpop.xlane.xlu1 %303  ;;  %v349_v17 = vmul.f32 %v1778_v59, %v1778_v59 }
 0x18b   :  { %v336_v60 = vmul.f32 0.0625, %v304_v55  ;;  %v301_v63 = vpop.xlane.xlu0 %300  ;;  %v443_v1 = vmul.f32 %v1378_v52, %v395_v51 }
 0x18c   :  { %v335_v3 = vmul.f32 0.0625, %v301_v63 }
 0x18d   :  { %v1380_v4 = vpop.eup %1379  ;;  %v368_v30 = vsub.f32 %v336_v60, %v352_v57  ;;  %v463_v5 = vmul.f32 %v1763_v50, %v443_v1 }
 0x18e   :  { %v367_v7 = vsub.f32 %v335_v3, %v351_v33  ;;  %v298_v9 = vpop.xlane.xlu1 %297  ;;  %v444_v11 = vmul.f32 %v1380_v4, %v396_v2 }
 0x18f   :  { %v384_v37 = vmax.f32 %v368_v30, 0.0  ;;  %v334_v61 = vmul.f32 0.0625, %v298_v9  ;;  %v295_v13 = vpop.xlane.xlu0 %294  ;;  %v1786_v15 = vadd.f32 %v1769_v53, %v463_v5 }
 0x190   :  { %v383_v18 = vmax.f32 %v367_v7, 0.0  ;;  %v333_v21 = vmul.f32 0.0625, %v295_v13  ;;  %v464_v22 = vmul.f32 %v1763_v50, %v444_v11  ;;  %v400_v11 = vsub.f32 %v1649_v54, %v1756_v48 }
 0x191   :  { %v1382_v42 = vpop.eup %1381  ;;  %v416_v23 = vadd.f32 1e-05, %v384_v37  ;;  %v366_v24 = vsub.f32 %v334_v61, %v350_v12  ;;  %v504_v25 = vsel %vm199_vm1, %v1786_v15, 0.0  ;;  %v564_v9 = vmul.f32 %v1786_v15, %v1786_v15 }
 0x192   :  { %v1384_v26 = vpop.eup %1383  ;;  %v415_v27 = vadd.f32 1e-05, %v383_v18  ;;  %v365_v32 = vsub.f32 %v333_v21, %v349_v17  ;;  %v235_v34 = vpop.xlane.xlu1 %234  ;;  %505 = vadd.xlane.f32.xlu0 %v504_v25  ;;  %v1796_v38 = vadd.f32 %v1769_v53, %v464_v22  ;;  %v442_v41 = vmul.f32 %v1382_v42, %v394_v6 }
 0x193   :  { %1385 = vrsqrt.f32 %v416_v23  ;;  %v382_v46 = vmax.f32 %v366_v24, 0.0  ;;  %v232_v47 = vpop.xlane.xlu0 %231  ;;  %v441_v49 = vmul.f32 %v1384_v26, %v393_v10  ;;  %v1802_v63 = vmul.f32 0.0625, %v235_v34 }
 0x194   :  { %1387 = vrsqrt.f32 %v415_v27  ;;  %v381_v35 = vmax.f32 %v365_v32, 0.0  ;;  %v507_v8 = vsel %vm199_vm1, %v1796_v38, 0.0  ;;  %v462_v52 = vmul.f32 %v1763_v50, %v442_v41 }
 0x195   :  { %v414_v51 = vadd.f32 1e-05, %v382_v46  ;;  %508 = vadd.xlane.f32.xlu1 %v507_v8  ;;  %v461_v60 = vmul.f32 %v1763_v50, %v441_v49  ;;  %v1807_v33 = vmul.f32 0.0625, %v232_v47  ;;  %v565_v30 = vmul.f32 %v1796_v38, %v1796_v38 }
 0x196   :  { %v413_v55 = vadd.f32 1e-05, %v381_v35  ;;  %v229_v57 = vpop.xlane.xlu1 %228  ;;  %v1805_v2 = vadd.f32 %v1769_v53, %v462_v52  ;;  %v356_v12 = vmul.f32 %v1802_v63, %v1802_v63  ;;  %v399_v17 = vsub.f32 %v1653_v56, %v1758_v31 }
 0x197   :  { %1389 = vrsqrt.f32 %v414_v51  ;;  %v226_v1 = vpop.xlane.xlu0 %225  ;;  %v1810_v3 = vadd.f32 %v1769_v53, %v461_v60  ;;  %v1816_v5 = vmul.f32 0.0625, %v229_v57  ;;  %v355_v18 = vmul.f32 %v1807_v33, %v1807_v33 }
 0x198   :  { %v501_v4 = vsel %vm199_vm1, %v1805_v2, 0.0  ;;  %1391 = vrsqrt.f32 %v413_v55  ;;  %v1826_v37 = vmul.f32 0.0625, %v226_v1  ;;  %v563_v22 = vmul.f32 %v1805_v2, %v1805_v2 }
 0x199   :  { %502 = vadd.xlane.f32.xlu1 %v501_v4  ;;  %v498_v7 = vsel %vm199_vm1, %v1810_v3, 0.0  ;;  %v398_v54 = vsub.f32 %v1659_v62, %v1773_v58  ;;  %v587_v10 = vsel %vm199_vm1, %v565_v30, 0.0  ;;  %v562_v23 = vmul.f32 %v1810_v3, %v1810_v3 }
 0x19a   :  { %v316_v6 = vpop.xlane.xlu1 %315  ;;  %499 = vadd.xlane.f32.xlu0 %v498_v7  ;;  %v354_v56 = vmul.f32 %v1816_v5, %v1816_v5  ;;  %v584_v26 = vsel %vm199_vm1, %v564_v9, 0.0  ;;  %v353_v32 = vmul.f32 %v1826_v37, %v1826_v37  ;;  %v581_v49 = vsel %vm199_vm1, %v563_v22, 0.0 }
 0x19b   :  { %v340_v61 = vmul.f32 0.0625, %v316_v6  ;;  %v313_v13 = vpop.xlane.xlu0 %312  ;;  %v578_v55 = vsel %vm199_vm1, %v562_v23, 0.0 }
 0x19c   :  { %v339_v21 = vmul.f32 0.0625, %v313_v13 }
 0x19d   :  { %v1386_v42 = vpop.eup %1385  ;;  %v372_v48 = vsub.f32 %v340_v61, %v356_v12  ;;  %588 = vadd.xlane.f32.xlu1 %v587_v10 }
 0x19e   :  { %v1388_v24 = vpop.eup %1387  ;;  %v371_v31 = vsub.f32 %v339_v21, %v355_v18  ;;  %v310_v25 = vpop.xlane.xlu1 %309  ;;  %v448_v27 = vmul.f32 %v1386_v42, %v400_v11  ;;  %585 = vadd.xlane.f32.xlu0 %v584_v26 }
 0x19f   :  { %v388_v62 = vmax.f32 %v372_v48, 0.0  ;;  %v338_v58 = vmul.f32 0.0625, %v310_v25  ;;  %v307_v34 = vpop.xlane.xlu0 %306  ;;  %v447_v41 = vmul.f32 %v1388_v24, %v399_v17  ;;  %v397_v17 = vsub.f32 %v1662_v0, %v1778_v59 }
 0x1a0   :  { %v387_v46 = vmax.f32 %v371_v31, 0.0  ;;  %v337_v47 = vmul.f32 0.0625, %v307_v34  ;;  %v468_v35 = vmul.f32 %v1763_v50, %v448_v27  ;;  %v404_v59 = vsub.f32 %v1681_v14, %v1802_v63 }
 0x1a1   :  { %v1390_v8 = vpop.eup %1389  ;;  %v420_v51 = vadd.f32 1e-05, %v388_v62  ;;  %v370_v52 = vsub.f32 %v338_v58, %v354_v56  ;;  %v467_v57 = vmul.f32 %v1763_v50, %v447_v41  ;;  %582 = vadd.xlane.f32.xlu1 %v581_v49  ;;  %v403_v25 = vsub.f32 %v1685_v16, %v1807_v33 }
 0x1a2   :  { %v419_v60 = vadd.f32 1e-05, %v387_v46  ;;  %v369_v1 = vsub.f32 %v337_v47, %v353_v32  ;;  %v247_v4 = vpop.xlane.xlu1 %246  ;;  %v1849_v30 = vadd.f32 %v1769_v53, %v468_v35  ;;  %v446_v6 = vmul.f32 %v1390_v8, %v398_v54  ;;  %579 = vadd.xlane.f32.xlu0 %v578_v55  ;;  %v1392_v12 = vpop.eup %1391 }
 0x1a3   :  { %1393 = vrsqrt.f32 %v420_v51  ;;  %v386_v7 = vmax.f32 %v370_v52, 0.0  ;;  %v244_v9 = vpop.xlane.xlu0 %243  ;;  %v1852_v11 = vadd.f32 %v1769_v53, %v467_v57  ;;  %v445_v23 = vmul.f32 %v1392_v12, %v397_v17 }
 0x1a4   :  { %1395 = vrsqrt.f32 %v419_v60  ;;  %v385_v61 = vmax.f32 %v369_v1, 0.0  ;;  %v519_v13 = vsel %vm199_vm1, %v1849_v30, 0.0  ;;  %v466_v54 = vmul.f32 %v1763_v50, %v446_v6 }
 0x1a5   :  { %v418_v18 = vadd.f32 1e-05, %v386_v7  ;;  %v516_v21 = vsel %vm199_vm1, %v1852_v11, 0.0  ;;  %520 = vadd.xlane.f32.xlu1 %v519_v13  ;;  %v1870_v56 = vmul.f32 0.0625, %v247_v4  ;;  %v465_v31 = vmul.f32 %v1763_v50, %v445_v23 }
 0x1a6   :  { %v417_v22 = vadd.f32 1e-05, %v385_v61  ;;  %v241_v42 = vpop.xlane.xlu1 %240  ;;  %517 = vadd.xlane.f32.xlu0 %v516_v21  ;;  %v1866_v0 = vadd.f32 %v1769_v53, %v466_v54  ;;  %v1875_v26 = vmul.f32 0.0625, %v244_v9  ;;  %v569_v62 = vmul.f32 %v1849_v30, %v1849_v30 }
 0x1a7   :  { %1397 = vrsqrt.f32 %v418_v18  ;;  %v1861_v48 = vmul.f32 0.0625, %v241_v42  ;;  %v238_v10 = vpop.xlane.xlu0 %237  ;;  %v1884_v63 = vadd.f32 %v1769_v53, %v465_v31  ;;  %v568_v16 = vmul.f32 %v1852_v11, %v1852_v11 }
 0x1a8   :  { %1399 = vrsqrt.f32 %v417_v22  ;;  %v1863_v24 = vmul.f32 0.0625, %v238_v10  ;;  %v513_v27 = vsel %vm199_vm1, %v1866_v0, 0.0  ;;  %v402_v33 = vsub.f32 %v1691_v19, %v1816_v5 }
 0x1a9   :  { %v358_v58 = vmul.f32 %v1861_v48, %v1861_v48  ;;  %514 = vadd.xlane.f32.xlu1 %v513_v27  ;;  %v567_v47 = vmul.f32 %v1866_v0, %v1866_v0  ;;  %v401_v35 = vsub.f32 %v1694_v20, %v1826_v37  ;;  %v360_v8 = vmul.f32 %v1870_v56, %v1870_v56 }
 0x1aa   :  { %v322_v32 = vpop.xlane.xlu1 %321  ;;  %v357_v41 = vmul.f32 %v1863_v24, %v1863_v24  ;;  %v510_v52 = vsel %vm199_vm1, %v1884_v63, 0.0  ;;  %v359_v19 = vmul.f32 %v1875_v26, %v1875_v26  ;;  %v599_v57 = vsel %vm199_vm1, %v569_v62, 0.0 }
 0x1ab   :  { %v342_v14 = vmul.f32 0.0625, %v322_v32  ;;  %v319_v34 = vpop.xlane.xlu0 %318  ;;  %511 = vadd.xlane.f32.xlu0 %v510_v52  ;;  %v596_v37 = vsel %vm199_vm1, %v568_v16, 0.0  ;;  %v593_v61 = vsel %vm199_vm1, %v567_v47, 0.0  ;;  %v566_v22 = vmul.f32 %v1884_v63, %v1884_v63 }
 0x1ac   :  { %v341_v46 = vmul.f32 0.0625, %v319_v34 }
 0x1ad   :  { %v1394_v49 = vpop.eup %1393  ;;  %v374_v51 = vsub.f32 %v342_v14, %v358_v58  ;;  %600 = vadd.xlane.f32.xlu1 %v599_v57  ;;  %v590_v16 = vsel %vm199_vm1, %v566_v22, 0.0 }
 0x1ae   :  { %v1396_v55 = vpop.eup %1395  ;;  %v373_v5 = vsub.f32 %v341_v46, %v357_v41  ;;  %v328_v60 = vpop.xlane.xlu1 %327  ;;  %v452_v1 = vmul.f32 %v1394_v49, %v404_v59 }
 0x1af   :  { %v390_v4 = vmax.f32 %v374_v51, 0.0  ;;  %v344_v20 = vmul.f32 0.0625, %v328_v60  ;;  %v325_v6 = vpop.xlane.xlu0 %324  ;;  %v451_v7 = vmul.f32 %v1396_v55, %v403_v25  ;;  %597 = vadd.xlane.f32.xlu0 %v596_v37 }
 0x1b0   :  { %v389_v9 = vmax.f32 %v373_v5, 0.0  ;;  %v343_v12 = vmul.f32 0.0625, %v325_v6  ;;  %v472_v13 = vmul.f32 %v1763_v50, %v452_v1  ;;  %v406_v5 = vsub.f32 %v1723_v43, %v1861_v48 }
 0x1b1   :  { %v1398_v17 = vpop.eup %1397  ;;  %v422_v18 = vadd.f32 1e-05, %v390_v4  ;;  %v376_v21 = vsub.f32 %v344_v20, %v360_v8  ;;  %v471_v42 = vmul.f32 %v1763_v50, %v451_v7  ;;  %594 = vadd.xlane.f32.xlu1 %v593_v61  ;;  %v405_v1 = vsub.f32 %v1726_v44, %v1863_v24 }
 0x1b2   :  { %v1400_v54 = vpop.eup %1399  ;;  %v421_v10 = vadd.f32 1e-05, %v389_v9  ;;  %v375_v23 = vsub.f32 %v343_v12, %v359_v19  ;;  %v1910_v59 = vadd.f32 %v1769_v53, %v472_v13  ;;  %v450_v31 = vmul.f32 %v1398_v17, %v402_v33 }
 0x1b3   :  { %1401 = vrsqrt.f32 %v422_v18  ;;  %v392_v25 = vmax.f32 %v376_v21, 0.0  ;;  %v1913_v27 = vadd.f32 %v1769_v53, %v471_v42  ;;  %v449_v32 = vmul.f32 %v1400_v54, %v401_v35  ;;  %591 = vadd.xlane.f32.xlu0 %v590_v16 }
 0x1b4   :  { %1403 = vrsqrt.f32 %v421_v10  ;;  %v391_v62 = vmax.f32 %v375_v23, 0.0  ;;  %v531_v58 = vsel %vm199_vm1, %v1910_v59, 0.0  ;;  %v470_v14 = vmul.f32 %v1763_v50, %v450_v31 }
 0x1b5   :  { %v424_v34 = vadd.f32 1e-05, %v392_v25  ;;  %v469_v41 = vmul.f32 %v1763_v50, %v449_v32  ;;  %532 = vadd.xlane.f32.xlu1 %v531_v58  ;;  %v528_v47 = vsel %vm199_vm1, %v1913_v27, 0.0  ;;  %v573_v8 = vmul.f32 %v1910_v59, %v1910_v59 }
 0x1b6   :  { %v423_v33 = vadd.f32 1e-05, %v391_v62  ;;  %v1921_v46 = vadd.f32 %v1769_v53, %v470_v14  ;;  %v572_v55 = vmul.f32 %v1913_v27, %v1913_v27  ;;  %v408_v4 = vsub.f32 %v1713_v36, %v1870_v56 }
 0x1b7   :  { %1405 = vrsqrt.f32 %v424_v34  ;;  %v1926_v49 = vadd.f32 %v1769_v53, %v469_v41  ;;  %529 = vadd.xlane.f32.xlu0 %v528_v47  ;;  %v611_v57 = vsel %vm199_vm1, %v573_v8, 0.0  ;;  %v407_v6 = vsub.f32 %v1717_v39, %v1875_v26 }
 0x1b8   :  { %1407 = vrsqrt.f32 %v423_v33  ;;  %v525_v35 = vsel %vm199_vm1, %v1921_v46, 0.0  ;;  %v571_v60 = vmul.f32 %v1921_v46, %v1921_v46  ;;  %v608_v43 = vsel %vm199_vm1, %v572_v55, 0.0 }
 0x1b9   :  { %526 = vadd.xlane.f32.xlu1 %v525_v35  ;;  %v522_v51 = vsel %vm199_vm1, %v1926_v49, 0.0  ;;  %v570_v48 = vmul.f32 %v1926_v49, %v1926_v49 }
 0x1ba   :  { %v605_v12 = vsel %vm199_vm1, %v571_v60, 0.0 }
 0x1bb   :  { %523 = vadd.xlane.f32.xlu0 %v522_v51  ;;  %v602_v61 = vsel %vm199_vm1, %v570_v48, 0.0 }
 0x1bd   :  { %v1402_v52 = vpop.eup %1401  ;;  %612 = vadd.xlane.f32.xlu1 %v611_v57 }
 0x1be   :  { %v1404_v19 = vpop.eup %1403  ;;  %v454_v20 = vmul.f32 %v1402_v52, %v406_v5 }
 0x1bf   :  { %v453_v7 = vmul.f32 %v1404_v19, %v405_v1  ;;  %609 = vadd.xlane.f32.xlu0 %v608_v43 }
 0x1c0   :  { %v474_v56 = vmul.f32 %v1763_v50, %v454_v20 }
 0x1c1   :  { %v1406_v37 = vpop.eup %1405  ;;  %606 = vadd.xlane.f32.xlu1 %v605_v12  ;;  %v473_v26 = vmul.f32 %v1763_v50, %v453_v7 }
 0x1c2   :  { %v1408_v9 = vpop.eup %1407  ;;  %v456_v44 = vmul.f32 %v1406_v37, %v408_v4  ;;  %v1965_v21 = vadd.f32 %v1769_v53, %v474_v56 }
 0x1c3   :  { %v455_v24 = vmul.f32 %v1408_v9, %v407_v6  ;;  %603 = vadd.xlane.f32.xlu0 %v602_v61  ;;  %v1970_v42 = vadd.f32 %v1769_v53, %v473_v26 }
 0x1c4   :  { %v476_v36 = vmul.f32 %v1763_v50, %v456_v44  ;;  %v537_v54 = vsel %vm199_vm1, %v1965_v21, 0.0  ;;  %v575_v10 = vmul.f32 %v1965_v21, %v1965_v21 }
 0x1c5   :  { %v475_v39 = vmul.f32 %v1763_v50, %v455_v24  ;;  %v1374_v50 = vld [vmem:[%s2260_s4] sm:$0xff]   ;;  %v534_v23 = vsel %vm199_vm1, %v1970_v42, 0.0  ;;  %v574_v31 = vmul.f32 %v1970_v42, %v1970_v42 }
 0x1c6   :  { %v1957_v13 = vadd.f32 %v1769_v53, %v476_v36  ;;  %1331 = vmatprep.subr.bf16.mxu0 %v1374_v50  ;;  %1369 = vmatprep.subr.bf16.mxu1 %v1374_v50 }
 0x1c7   :  { %v1960_v17 = vadd.f32 %v1769_v53, %v475_v39  ;;  %1332 = vmatpush3.bf16.msra.mxu0 %v1374_v50  ;;  %v617_v53 = vsel %vm199_vm1, %v575_v10, 0.0  ;;  %1370 = vmatpush3.bf16.msra.mxu1 %v1374_v50  ;;  %v614_v32 = vsel %vm199_vm1, %v574_v31, 0.0 }
 0x1c8   :  { %v543_v18 = vsel %vm199_vm1, %v1957_v13, 0.0  ;;  %v577_v25 = vmul.f32 %v1957_v13, %v1957_v13 }
 0x1c9   :  { %544 = vadd.xlane.f32.xlu1 %v543_v18  ;;  %v540_v22 = vsel %vm199_vm1, %v1960_v17, 0.0  ;;  %v576_v62 = vmul.f32 %v1960_v17, %v1960_v17 }
 0x1ca   :  { %541 = vadd.xlane.f32.xlu0 %v540_v22  ;;  %v623_v58 = vsel %vm199_vm1, %v577_v25, 0.0 }
 0x1cb   :  { %v620_v14 = vsel %vm199_vm1, %v576_v62, 0.0 }
 0x1cd   :  { %538 = vadd.xlane.f32.xlu1 %v537_v54 }
 0x1ce   :  { %535 = vadd.xlane.f32.xlu0 %v534_v23  ;;  %v2004_v23 = vld [vmem:[%s2261_s3] sm:$0xf] }
 0x1d1   :  { %618 = vadd.xlane.f32.xlu1 %v617_v53 }
 0x1d2   :  { %615 = vadd.xlane.f32.xlu0 %v614_v32 }
 0x1d5   :  { %624 = vadd.xlane.f32.xlu1 %v623_v58 }
 0x1d6   :  { %621 = vadd.xlane.f32.xlu0 %v620_v14 }
 0x21f   :  { %v506_v16 = vpop.xlane.xlu0 %505 }
 0x220   :  { %v548_v35 = vmul.f32 0.0625, %v506_v16  ;;  %v2016_v16 = vrot.slane %v2004_v23, %v57_v29 }
 0x222   :  { %v509_v34 = vpop.xlane.xlu1 %508  ;;  %v644_v5 = vmul.f32 %v548_v35, %v548_v35 }
 0x223   :  { %v549_v33 = vmul.f32 0.0625, %v509_v34 }
 0x225   :  { %v645_v51 = vmul.f32 %v549_v33, %v549_v33  ;;  %v693_v32 = vsub.f32 %v1796_v38, %v549_v33 }
 0x226   :  { %v503_v41 = vpop.xlane.xlu1 %502 }
 0x227   :  { %v500_v47 = vpop.xlane.xlu0 %499  ;;  %v1991_v52 = vmul.f32 0.0625, %v503_v41  ;;  %v692_v41 = vsub.f32 %v1786_v15, %v548_v35 }
 0x228   :  { %v1993_v57 = vmul.f32 0.0625, %v500_v47 }
 0x229   :  { %v643_v37 = vmul.f32 %v1991_v52, %v1991_v52 }
 0x22a   :  { %v589_v8 = vpop.xlane.xlu1 %588  ;;  %v642_v7 = vmul.f32 %v1993_v57, %v1993_v57 }
 0x22b   :  { %v629_v55 = vmul.f32 0.0625, %v589_v8  ;;  %v586_v19 = vpop.xlane.xlu0 %585 }
 0x22c   :  { %v628_v60 = vmul.f32 0.0625, %v586_v19 }
 0x22d   :  { %v661_v1 = vsub.f32 %v629_v55, %v645_v51 }
 0x22e   :  { %v660_v4 = vsub.f32 %v628_v60, %v644_v5  ;;  %v583_v20 = vpop.xlane.xlu1 %582 }
 0x22f   :  { %v677_v6 = vmax.f32 %v661_v1, 0.0  ;;  %v627_v43 = vmul.f32 0.0625, %v583_v20  ;;  %v580_v48 = vpop.xlane.xlu0 %579 }
 0x230   :  { %v676_v9 = vmax.f32 %v660_v4, 0.0  ;;  %v626_v12 = vmul.f32 0.0625, %v580_v48  ;;  %v691_v4 = vsub.f32 %v1805_v2, %v1991_v52 }
 0x231   :  { %v709_v44 = vadd.f32 1e-05, %v677_v6  ;;  %v659_v24 = vsub.f32 %v627_v43, %v643_v37  ;;  %v2030_v6 = vrot.slane %v2004_v23, %v459_v40  ;;  %v690_v43 = vsub.f32 %v1810_v3, %v1993_v57 }
 0x232   :  { %v708_v36 = vadd.f32 1e-05, %v676_v9  ;;  %v658_v56 = vsub.f32 %v626_v12, %v642_v7  ;;  %v521_v61 = vpop.xlane.xlu1 %520 }
 0x233   :  { %1409 = vrsqrt.f32 %v709_v44  ;;  %v675_v39 = vmax.f32 %v659_v24, 0.0  ;;  %v518_v18 = vpop.xlane.xlu0 %517  ;;  %v1999_v10 = vmul.f32 0.0625, %v521_v61 }
 0x234   :  { %1411 = vrsqrt.f32 %v708_v36  ;;  %v674_v26 = vmax.f32 %v658_v56, 0.0  ;;  %v2006_v53 = vmul.f32 0.0625, %v518_v18 }
 0x235   :  { %v707_v22 = vadd.f32 1e-05, %v675_v39  ;;  %v649_v62 = vmul.f32 %v1999_v10, %v1999_v10 }
 0x236   :  { %v706_v50 = vadd.f32 1e-05, %v674_v26  ;;  %v515_v54 = vpop.xlane.xlu1 %514  ;;  %v648_v33 = vmul.f32 %v2006_v53, %v2006_v53 }
 0x237   :  { %1413 = vrsqrt.f32 %v707_v22  ;;  %v2011_v58 = vmul.f32 0.0625, %v515_v54 }
 0x238   :  { %1415 = vrsqrt.f32 %v706_v50  ;;  %v512_v31 = vpop.xlane.xlu0 %511 }
 0x239   :  { %v2021_v5 = vmul.f32 0.0625, %v512_v31  ;;  %v647_v29 = vmul.f32 %v2011_v58, %v2011_v58 }
 0x23a   :  { %v601_v25 = vpop.xlane.xlu1 %600 }
 0x23b   :  { %v633_v14 = vmul.f32 0.0625, %v601_v25  ;;  %v646_v56 = vmul.f32 %v2021_v5, %v2021_v5 }
 0x23c   :  { %v598_v55 = vpop.xlane.xlu0 %597 }
 0x23d   :  { %v1410_v34 = vpop.eup %1409  ;;  %v665_v51 = vsub.f32 %v633_v14, %v649_v62  ;;  %v632_v60 = vmul.f32 0.0625, %v598_v55 }
 0x23e   :  { %v1412_v47 = vpop.eup %1411  ;;  %v741_v8 = vmul.f32 %v1410_v34, %v693_v32  ;;  %v595_v1 = vpop.xlane.xlu1 %594 }
 0x23f   :  { %v740_v19 = vmul.f32 %v1412_v47, %v692_v41  ;;  %v681_v20 = vmax.f32 %v665_v51, 0.0  ;;  %v631_v35 = vmul.f32 0.0625, %v595_v1  ;;  %v664_v7 = vsub.f32 %v632_v60, %v648_v33 }
 0x240   :  { %v761_v48 = vmul.f32 %v2016_v16, %v741_v8  ;;  %v592_v24 = vpop.xlane.xlu0 %591 }
 0x241   :  { %v1414_v37 = vpop.eup %1413  ;;  %v760_v52 = vmul.f32 %v2016_v16, %v740_v19  ;;  %v713_v12 = vadd.f32 1e-05, %v681_v20  ;;  %v663_v44 = vsub.f32 %v631_v35, %v647_v29  ;;  %v680_v61 = vmax.f32 %v664_v7, 0.0 }
 0x242   :  { %v1416_v9 = vpop.eup %1415  ;;  %v739_v36 = vmul.f32 %v1414_v37, %v691_v4  ;;  %v630_v39 = vmul.f32 0.0625, %v592_v24  ;;  %v533_v40 = vpop.xlane.xlu1 %532  ;;  %v781_v31 = vadd.f32 %v2030_v6, %v761_v48  ;;  %v697_v37 = vsub.f32 %v1849_v30, %v1999_v10 }
 0x243   :  { %v738_v26 = vmul.f32 %v1416_v9, %v690_v43  ;;  %1417 = vrsqrt.f32 %v713_v12  ;;  %v679_v18 = vmax.f32 %v663_v44, 0.0  ;;  %v712_v22 = vadd.f32 1e-05, %v680_v61 }
 0x244   :  { %v759_v57 = vmul.f32 %v2016_v16, %v739_v36  ;;  %v662_v50 = vsub.f32 %v630_v39, %v646_v56  ;;  %v780_v25 = vadd.f32 %v2030_v6, %v760_v52  ;;  %v530_v62 = vpop.xlane.xlu0 %529  ;;  %v2044_v8 = vmul.f32 0.0625, %v533_v40 }
 0x245   :  { %v758_v54 = vmul.f32 %v2016_v16, %v738_v26  ;;  %v711_v32 = vadd.f32 1e-05, %v679_v18  ;;  %1419 = vrsqrt.f32 %v712_v22  ;;  %v2046_v60 = vmul.f32 0.0625, %v530_v62 }
 0x246   :  { %v779_v14 = vadd.f32 %v2030_v6, %v759_v57  ;;  %v678_v34 = vmax.f32 %v662_v50, 0.0  ;;  %v527_v41 = vpop.xlane.xlu1 %526  ;;  %v797_v33 = vpack.c.bf16 %v781_v31, %v780_v25  ;;  %v653_v4 = vmul.f32 %v2044_v8, %v2044_v8 }
 0x247   :  { %v778_v47 = vadd.f32 %v2030_v6, %v758_v54  ;;  %1421 = vrsqrt.f32 %v711_v32  ;;  %v2051_v29 = vmul.f32 0.0625, %v527_v41  ;;  %v696_v7 = vsub.f32 %v1852_v11, %v2006_v53 }
 0x248   :  { %v710_v51 = vadd.f32 1e-05, %v678_v34  ;;  %v524_v19 = vpop.xlane.xlu0 %523  ;;  %v652_v9 = vmul.f32 %v2046_v60, %v2046_v60  ;;  %v695_v10 = vsub.f32 %v1866_v0, %v2011_v58  ;;  %v694_v32 = vsub.f32 %v1884_v63, %v2021_v5 }
 0x249   :  { %v796_v55 = vpack.c.bf16 %v779_v14, %v778_v47  ;;  %v2060_v52 = vmul.f32 0.0625, %v524_v19  ;;  %v651_v24 = vmul.f32 %v2051_v29, %v2051_v29 }
 0x24a   :  { %1423 = vrsqrt.f32 %v710_v51  ;;  %v613_v1 = vpop.xlane.xlu1 %612 }
 0x24b   :  { %1333 = vmatprep.mubr.msk.bf16.mxu0 %vm199_vm1, %v796_v55  ;;  %v637_v20 = vmul.f32 0.0625, %v613_v1  ;;  %v650_v50 = vmul.f32 %v2060_v52, %v2060_v52 }
 0x24c   :  { %1334 = vmatmul.mubr.msk.bf16.vlgmr.msra.gmra.mrb[16].mxu0 %vm199_vm1, %v797_v33  ;;  %v610_v48 = vpop.xlane.xlu0 %609 }
 0x24d   :  { %v1418_v35 = vpop.eup %1417  ;;  %v669_v43 = vsub.f32 %v637_v20, %v653_v4  ;;  %v636_v12 = vmul.f32 0.0625, %v610_v48 }
 0x24e   :  { %v607_v44 = vpop.xlane.xlu1 %606  ;;  %v745_v61 = vmul.f32 %v1418_v35, %v697_v37 }
 0x24f   :  { %v685_v36 = vmax.f32 %v669_v43, 0.0  ;;  %v635_v56 = vmul.f32 0.0625, %v607_v44  ;;  %v1420_v39 = vpop.eup %1419  ;;  %v668_v40 = vsub.f32 %v636_v12, %v652_v9 }
 0x250   :  { %v604_v57 = vpop.xlane.xlu0 %603  ;;  %v744_v22 = vmul.f32 %v1420_v39, %v696_v7  ;;  %v765_v14 = vmul.f32 %v2016_v16, %v745_v61  ;;  %v701_v39 = vsub.f32 %v1910_v59, %v2044_v8  ;;  %v700_v8 = vsub.f32 %v1913_v27, %v2046_v60 }
 0x251   :  { %v1422_v26 = vpop.eup %1421  ;;  %v717_v53 = vadd.f32 1e-05, %v685_v36  ;;  %v667_v18 = vsub.f32 %v635_v56, %v651_v24  ;;  %v684_v54 = vmax.f32 %v668_v40, 0.0  ;;  %v634_v31 = vmul.f32 0.0625, %v604_v57 }
 0x252   :  { %v743_v25 = vmul.f32 %v1422_v26, %v695_v10  ;;  %v764_v55 = vmul.f32 %v2016_v16, %v744_v22  ;;  %v785_v48 = vadd.f32 %v2030_v6, %v765_v14 }
 0x253   :  { %1425 = vrsqrt.f32 %v717_v53  ;;  %v683_v62 = vmax.f32 %v667_v18, 0.0  ;;  %v716_v34 = vadd.f32 1e-05, %v684_v54  ;;  %v666_v41 = vsub.f32 %v634_v31, %v650_v50 }
 0x254   :  { %v1424_v58 = vpop.eup %1423  ;;  %v763_v51 = vmul.f32 %v2016_v16, %v743_v25  ;;  %v784_v43 = vadd.f32 %v2030_v6, %v764_v55  ;;  %v699_v25 = vsub.f32 %v1921_v46, %v2051_v29 }
 0x255   :  { %v715_v19 = vadd.f32 1e-05, %v683_v62  ;;  %v742_v1 = vmul.f32 %v1424_v58, %v694_v32  ;;  %1427 = vrsqrt.f32 %v716_v34  ;;  %v682_v4 = vmax.f32 %v666_v41, 0.0 }
 0x256   :  { %v545_v47 = vpop.xlane.xlu1 %544  ;;  %v783_v20 = vadd.f32 %v2030_v6, %v763_v51  ;;  %v799_v36 = vpack.c.bf16 %v785_v48, %v784_v43 }
 0x257   :  { %v542_v33 = vpop.xlane.xlu0 %541  ;;  %1429 = vrsqrt.f32 %v715_v19  ;;  %v762_v5 = vmul.f32 %v2016_v16, %v742_v1  ;;  %v714_v35 = vadd.f32 1e-05, %v682_v4  ;;  %v2084_v10 = vmul.f32 0.0625, %v545_v47 }
 0x258   :  { %v2089_v18 = vmul.f32 0.0625, %v542_v33  ;;  %v698_v1 = vsub.f32 %v1926_v49, %v2060_v52 }
 0x259   :  { %v782_v9 = vadd.f32 %v2030_v6, %v762_v5  ;;  %1431 = vrsqrt.f32 %v714_v35  ;;  %v657_v58 = vmul.f32 %v2084_v10, %v2084_v10 }
 0x25a   :  { %v539_v37 = vpop.xlane.xlu1 %538  ;;  %v656_v55 = vmul.f32 %v2089_v18, %v2089_v18 }
 0x25b   :  { %v2077_v7 = vmul.f32 0.0625, %v539_v37  ;;  %v536_v12 = vpop.xlane.xlu0 %535  ;;  %v798_v24 = vpack.c.bf16 %v783_v20, %v782_v9 }
 0x25c   :  { %v2080_v44 = vmul.f32 0.0625, %v536_v12 }
 0x25d   :  { %v1426_v61 = vpop.eup %1425  ;;  %v655_v40 = vmul.f32 %v2077_v7, %v2077_v7  ;;  %1337 = vmatprep.mubr.msk.bf16.mxu1 %vm199_vm1, %v798_v24 }
 0x25e   :  { %v619_v56 = vpop.xlane.xlu1 %618  ;;  %v654_v57 = vmul.f32 %v2080_v44, %v2080_v44  ;;  %1338 = vmatmul.mubr.msk.bf16.vlgmr.msra.gmra.mrb[0].mxu1 %vm199_vm1, %v799_v36  ;;  %v749_v54 = vmul.f32 %v1426_v61, %v701_v39 }
 0x25f   :  { %v639_v26 = vmul.f32 0.0625, %v619_v56  ;;  %v616_v53 = vpop.xlane.xlu0 %615  ;;  %v1428_v31 = vpop.eup %1427 }
 0x260   :  { %v638_v22 = vmul.f32 0.0625, %v616_v53  ;;  %v748_v51 = vmul.f32 %v1428_v31, %v700_v8  ;;  %v769_v5 = vmul.f32 %v2016_v16, %v749_v54 }
 0x261   :  { %v671_v50 = vsub.f32 %v639_v26, %v655_v40  ;;  %v1430_v14 = vpop.eup %1429 }
 0x262   :  { %v670_v32 = vsub.f32 %v638_v22, %v654_v57  ;;  %v625_v62 = vpop.xlane.xlu1 %624  ;;  %v747_v33 = vmul.f32 %v1430_v14, %v699_v25  ;;  %v768_v48 = vmul.f32 %v2016_v16, %v748_v51  ;;  %v789_v40 = vadd.f32 %v2030_v6, %v769_v5 }
 0x263   :  { %v687_v34 = vmax.f32 %v671_v50, 0.0  ;;  %v641_v41 = vmul.f32 0.0625, %v625_v62  ;;  %v622_v47 = vpop.xlane.xlu0 %621  ;;  %v1432_v20 = vpop.eup %1431  ;;  %v703_v22 = vsub.f32 %v1965_v21, %v2077_v7  ;;  %v702_v50 = vsub.f32 %v1970_v42, %v2080_v44 }
 0x264   :  { %v686_v60 = vmax.f32 %v670_v32, 0.0  ;;  %v640_v19 = vmul.f32 0.0625, %v622_v47  ;;  %v767_v43 = vmul.f32 %v2016_v16, %v747_v33  ;;  %v746_v12 = vmul.f32 %v1432_v20, %v698_v1  ;;  %v1375_v1 = vld [vmem:[%s2262_s5] sm:$0xff]  }
 0x265   :  { %v719_v29 = vadd.f32 1e-05, %v687_v34  ;;  %v673_v4 = vsub.f32 %v641_v41, %v657_v58  ;;  %v788_v39 = vadd.f32 %v2030_v6, %v768_v48  ;;  %v705_v32 = vsub.f32 %v1957_v13, %v2084_v10  ;;  %1349 = vmatprep.subr.bf16.mxu1 %v1375_v1 }
 0x266   :  { %v718_v35 = vadd.f32 1e-05, %v686_v60  ;;  %v672_v37 = vsub.f32 %v640_v19, %v656_v55  ;;  %v766_v56 = vmul.f32 %v2016_v16, %v746_v12  ;;  %v787_v52 = vadd.f32 %v2030_v6, %v767_v43  ;;  %1350 = vmatpush3.bf16.msra.mxu1 %v1375_v1 }
 0x267   :  { %1433 = vrsqrt.f32 %v719_v29  ;;  %v689_v9 = vmax.f32 %v673_v4, 0.0  ;;  %v801_v57 = vpack.c.bf16 %v789_v40, %v788_v39  ;;  %v704_v58 = vsub.f32 %v1960_v17, %v2089_v18  ;;  %v1376_v29 = vld [vmem:[%s2262_s5 + $0x8] sm:$0xff]  }
 0x268   :  { %1435 = vrsqrt.f32 %v718_v35  ;;  %v688_v24 = vmax.f32 %v672_v37, 0.0  ;;  %v786_v26 = vadd.f32 %v2030_v6, %v766_v56  ;;  %1351 = vmatprep.subr.bf16.mxu1 %v1376_v29 }
 0x269   :  { %v721_v36 = vadd.f32 1e-05, %v689_v9 }
 0x26a   :  { %v720_v61 = vadd.f32 1e-05, %v688_v24  ;;  %v800_v53 = vpack.c.bf16 %v787_v52, %v786_v26  ;;  %1352 = vmatpush3.bf16.msra.mxu1 %v1376_v29 }
 0x26b   :  { %1437 = vrsqrt.f32 %v721_v36 }
 0x26c   :  { %1439 = vrsqrt.f32 %v720_v61  ;;  %1341 = vmatprep.mubr.msk.bf16.mxu1 %vm199_vm1, %v800_v53 }
 0x26d   :  { %1342 = vmatmul.mubr.msk.bf16.gmra.mrb[4].mxu1 %vm199_vm1, %v801_v57 }
 0x271   :  { %v1434_v8 = vpop.eup %1433 }
 0x272   :  { %v1436_v54 = vpop.eup %1435  ;;  %v751_v31 = vmul.f32 %v1434_v8, %v703_v22 }
 0x273   :  { %v750_v25 = vmul.f32 %v1436_v54, %v702_v50 }
 0x274   :  { %v771_v62 = vmul.f32 %v2016_v16, %v751_v31 }
 0x275   :  { %v1438_v14 = vpop.eup %1437  ;;  %v770_v7 = vmul.f32 %v2016_v16, %v750_v25 }
 0x276   :  { %v1440_v34 = vpop.eup %1439  ;;  %v791_v41 = vadd.f32 %v2030_v6, %v771_v62  ;;  %v753_v47 = vmul.f32 %v1438_v14, %v705_v32 }
 0x277   :  { %v790_v44 = vadd.f32 %v2030_v6, %v770_v7  ;;  %v752_v51 = vmul.f32 %v1440_v34, %v704_v58 }
 0x278   :  { %v773_v55 = vmul.f32 %v2016_v16, %v753_v47 }
 0x279   :  { %v802_v60 = vpack.c.bf16 %v791_v41, %v790_v44  ;;  %v772_v10 = vmul.f32 %v2016_v16, %v752_v51  ;;  %v2141_v16 = vrot.slane %v2004_v23, %v479_v45 }
 0x27a   :  { %v793_v19 = vadd.f32 %v2030_v6, %v773_v55 }
 0x27b   :  { %1345 = vmatprep.mubr.msk.bf16.mxu1 %vm199_vm1, %v802_v60  ;;  %v792_v18 = vadd.f32 %v2030_v6, %v772_v10 }
 0x27d   :  { %v803_v33 = vpack.c.bf16 %v793_v19, %v792_v18 }
 0x27f   :  { %1346 = vmatmul.mubr.msk.bf16.gmra.mrb[8].mxu1 %vm199_vm1, %v803_v33 }
 0x31f   :  { %v1335_v6 = vpop.f32.mrb[16].mxu0 }
 0x320   :  { %v881_v4 = vadd.f32 %v1335_v6, %v2141_v16  ;;  %v872_v5 = vpop.f32.mrb[17].mxu0 }
 0x321   :  { %v873_v20 = vadd.f32 %v872_v5, %v2141_v16  ;;  %v1336_v35 = vpop.f32.mrb[18].mxu0 }
 0x322   :  { %v1255_v37 = vmul.f32 -1.442695, %v881_v4  ;;  %v884_v43 = vadd.f32 %v1336_v35, %v2141_v16  ;;  %v875_v48 = vpop.f32.mrb[19].mxu0 }
 0x323   :  { %v1253_v9 = vmul.f32 -1.442695, %v873_v20  ;;  %v876_v12 = vadd.f32 %v875_v48, %v2141_v16 }
 0x324   :  { %1441 = vpow2.f32 %v1255_v37  ;;  %v1256_v24 = vmul.f32 -1.442695, %v884_v43 }
 0x325   :  { %1443 = vpow2.f32 %v1253_v9  ;;  %v1254_v36 = vmul.f32 -1.442695, %v876_v12 }
 0x326   :  { %1445 = vpow2.f32 %v1256_v24 }
 0x327   :  { %1447 = vpow2.f32 %v1254_v36 }
 0x32e   :  { %v1442_v45 = vpop.eup %1441 }
 0x32f   :  { %v1444_v56 = vpop.eup %1443  ;;  %v985_v52 = vadd.f32 1.0, %v1442_v45 }
 0x330   :  { %v1446_v61 = vpop.eup %1445  ;;  %v983_v39 = vadd.f32 1.0, %v1444_v56 }
 0x331   :  { %v1448_v40 = vpop.eup %1447  ;;  %1449 = vrcp.f32 %v985_v52  ;;  %v986_v26 = vadd.f32 1.0, %v1446_v61  ;;  %v1339_v57 = vpop.f32.mrb[0].mxu1 }
 0x332   :  { %1451 = vrcp.f32 %v983_v39  ;;  %v984_v53 = vadd.f32 1.0, %v1448_v40  ;;  %v897_v22 = vadd.f32 %v1339_v57, %v2141_v16  ;;  %v888_v8 = vpop.f32.mrb[1].mxu1 }
 0x333   :  { %1453 = vrcp.f32 %v986_v26  ;;  %v889_v50 = vadd.f32 %v888_v8, %v2141_v16  ;;  %v1340_v54 = vpop.f32.mrb[2].mxu1 }
 0x334   :  { %1455 = vrcp.f32 %v984_v53  ;;  %v1259_v31 = vmul.f32 -1.442695, %v897_v22  ;;  %v900_v25 = vadd.f32 %v1340_v54, %v2141_v16  ;;  %v891_v32 = vpop.f32.mrb[3].mxu1 }
 0x335   :  { %v1257_v62 = vmul.f32 -1.442695, %v889_v50  ;;  %v892_v14 = vadd.f32 %v891_v32, %v2141_v16 }
 0x336   :  { %1457 = vpow2.f32 %v1259_v31  ;;  %v1260_v58 = vmul.f32 -1.442695, %v900_v25 }
 0x337   :  { %1459 = vpow2.f32 %v1257_v62  ;;  %v1258_v7 = vmul.f32 -1.442695, %v892_v14 }
 0x338   :  { %1461 = vpow2.f32 %v1260_v58 }
 0x339   :  { %1463 = vpow2.f32 %v1258_v7 }
 0x33b   :  { %v1450_v34 = vpop.eup %1449 }
 0x33c   :  { %v1452_v41 = vpop.eup %1451  ;;  %v1033_v51 = vmul.f32 %v1450_v34, %v881_v4 }
 0x33d   :  { %v1454_v47 = vpop.eup %1453  ;;  %v1031_v60 = vmul.f32 %v1452_v41, %v873_v20 }
 0x33e   :  { %v1456_v44 = vpop.eup %1455  ;;  %v1034_v55 = vmul.f32 %v1454_v47, %v884_v43 }
 0x33f   :  { %v1032_v10 = vmul.f32 %v1456_v44, %v876_v12 }
 0x340   :  { %v1052_v19 = vpack.c.bf16 %v1034_v55, %v1033_v51  ;;  %v1458_v18 = vpop.eup %1457  ;;  %v1343_v6 = vpop.f32.mrb[4].mxu1 }
 0x341   :  { %v1051_v33 = vpack.c.bf16 %v1032_v10, %v1031_v60  ;;  %v1460_v1 = vpop.eup %1459  ;;  %v989_v29 = vadd.f32 1.0, %v1458_v18  ;;  %v2152_v37 = vadd.f32 %v1343_v6, %v2141_v16  ;;  %v904_v48 = vpop.f32.mrb[5].mxu1 }
 0x342   :  { %v1462_v5 = vpop.eup %1461  ;;  %v987_v35 = vadd.f32 1.0, %v1460_v1  ;;  %v2156_v20 = vadd.f32 %v904_v48, %v2141_v16  ;;  %v1344_v43 = vpop.f32.mrb[6].mxu1 }
 0x343   :  { %1353 = vmatprep.mubr.msk.bf16.mxu1 %vm1075_vm2, %v1051_v33  ;;  %v1464_v9 = vpop.eup %1463  ;;  %1465 = vrcp.f32 %v989_v29  ;;  %v990_v4 = vadd.f32 1.0, %v1462_v5  ;;  %v1263_v24 = vmul.f32 -1.442695, %v2152_v37  ;;  %v916_v36 = vadd.f32 %v1344_v43, %v2141_v16  ;;  %v907_v45 = vpop.f32.mrb[7].mxu1 }
 0x344   :  { %1354 = vmatmul.mubr.msk.bf16.vlgmr.msra.gmra.mrb[12].mxu1 %vm1075_vm2, %v1052_v19  ;;  %1467 = vrcp.f32 %v987_v35  ;;  %v988_v12 = vadd.f32 1.0, %v1464_v9  ;;  %v1261_v56 = vmul.f32 -1.442695, %v2156_v20  ;;  %v908_v52 = vadd.f32 %v907_v45, %v2141_v16 }
 0x345   :  { %1469 = vrcp.f32 %v990_v4  ;;  %v1264_v61 = vmul.f32 -1.442695, %v916_v36 }
 0x346   :  { %1471 = vrcp.f32 %v988_v12  ;;  %v1262_v39 = vmul.f32 -1.442695, %v908_v52 }
 0x347   :  { %1473 = vpow2.f32 %v1263_v24 }
 0x348   :  { %1475 = vpow2.f32 %v1261_v56 }
 0x349   :  { %1477 = vpow2.f32 %v1264_v61 }
 0x34a   :  { %1479 = vpow2.f32 %v1262_v39 }
 0x34d   :  { %v1466_v40 = vpop.eup %1465 }
 0x34e   :  { %v1468_v26 = vpop.eup %1467  ;;  %v1037_v8 = vmul.f32 %v1466_v40, %v897_v22 }
 0x34f   :  { %v1470_v53 = vpop.eup %1469  ;;  %v1035_v62 = vmul.f32 %v1468_v26, %v889_v50 }
 0x350   :  { %v1472_v57 = vpop.eup %1471  ;;  %v1038_v54 = vmul.f32 %v1470_v53, %v900_v25 }
 0x351   :  { %v1474_v32 = vpop.eup %1473  ;;  %v1036_v58 = vmul.f32 %v1472_v57, %v892_v14 }
 0x352   :  { %v1347_v31 = vpop.f32.mrb[8].mxu1  ;;  %v1476_v41 = vpop.eup %1475  ;;  %v1054_v47 = vpack.c.bf16 %v1038_v54, %v1037_v8  ;;  %v993_v44 = vadd.f32 1.0, %v1474_v32 }
 0x353   :  { %v929_v7 = vadd.f32 %v1347_v31, %v2141_v16  ;;  %v920_v34 = vpop.f32.mrb[9].mxu1  ;;  %v1478_v60 = vpop.eup %1477  ;;  %v1053_v10 = vpack.c.bf16 %v1036_v58, %v1035_v62  ;;  %v991_v19 = vadd.f32 1.0, %v1476_v41 }
 0x354   :  { %v921_v51 = vadd.f32 %v920_v34, %v2141_v16  ;;  %v1348_v55 = vpop.f32.mrb[10].mxu1  ;;  %v1480_v25 = vpop.eup %1479  ;;  %1481 = vrcp.f32 %v993_v44  ;;  %v994_v33 = vadd.f32 1.0, %v1478_v60 }
 0x355   :  { %v932_v18 = vadd.f32 %v1348_v55, %v2141_v16  ;;  %v923_v22 = vpop.f32.mrb[11].mxu1  ;;  %v1267_v50 = vmul.f32 -1.442695, %v929_v7  ;;  %1483 = vrcp.f32 %v991_v19  ;;  %v992_v1 = vadd.f32 1.0, %v1480_v25  ;;  %1357 = vmatprep.mubr.msk.bf16.mxu1 %vm1075_vm2, %v1053_v10 }
 0x356   :  { %v924_v14 = vadd.f32 %v923_v22, %v2141_v16  ;;  %v1265_v29 = vmul.f32 -1.442695, %v921_v51  ;;  %1485 = vrcp.f32 %v994_v33  ;;  %1358 = vmatmul.mubr.msk.bf16.gmra.mrb[16].mxu1 %vm1075_vm2, %v1054_v47  ;;  %v1061_v47 = vsub.s32 3, %v1605_v28 }
 0x357   :  { %v1268_v6 = vmul.f32 -1.442695, %v932_v18  ;;  %1487 = vrcp.f32 %v992_v1 }
 0x358   :  { %v1266_v5 = vmul.f32 -1.442695, %v924_v14  ;;  %1489 = vpow2.f32 %v1267_v50  ;;  %v1062_v44 = vrot.slane %v2004_v23, %v1061_v47 }
 0x359   :  { %1491 = vpow2.f32 %v1265_v29 }
 0x35a   :  { %1493 = vpow2.f32 %v1268_v6 }
 0x35b   :  { %1495 = vpow2.f32 %v1266_v5 }
 0x35e   :  { %v1482_v35 = vpop.eup %1481 }
 0x35f   :  { %v1484_v48 = vpop.eup %1483  ;;  %v1041_v16 = vmul.f32 %v1482_v35, %v2152_v37 }
 0x360   :  { %v1486_v9 = vpop.eup %1485  ;;  %v1039_v24 = vmul.f32 %v1484_v48, %v2156_v20 }
 0x361   :  { %v1488_v4 = vpop.eup %1487  ;;  %v1042_v43 = vmul.f32 %v1486_v9, %v916_v36 }
 0x362   :  { %v1490_v12 = vpop.eup %1489  ;;  %v1040_v45 = vmul.f32 %v1488_v4, %v908_v52 }
 0x363   :  { %v1492_v56 = vpop.eup %1491  ;;  %v1056_v61 = vpack.c.bf16 %v1042_v43, %v1041_v16  ;;  %v997_v39 = vadd.f32 1.0, %v1490_v12 }
 0x364   :  { %v1494_v40 = vpop.eup %1493  ;;  %v1055_v26 = vpack.c.bf16 %v1040_v45, %v1039_v24  ;;  %v995_v53 = vadd.f32 1.0, %v1492_v56 }
 0x365   :  { %v1496_v57 = vpop.eup %1495  ;;  %1497 = vrcp.f32 %v997_v39  ;;  %v998_v8 = vadd.f32 1.0, %v1494_v40 }
 0x366   :  { %1499 = vrcp.f32 %v995_v53  ;;  %v996_v54 = vadd.f32 1.0, %v1496_v57  ;;  %1361 = vmatprep.mubr.msk.bf16.mxu1 %vm1075_vm2, %v1055_v26 }
 0x367   :  { %1501 = vrcp.f32 %v998_v8  ;;  %1362 = vmatmul.mubr.msk.bf16.gmra.mrb[20].mxu1 %vm1075_vm2, %v1056_v61 }
 0x368   :  { %1503 = vrcp.f32 %v996_v54 }
 0x36f   :  { %v1498_v37 = vpop.eup %1497 }
 0x370   :  { %v1500_v20 = vpop.eup %1499  ;;  %v1045_v31 = vmul.f32 %v1498_v37, %v929_v7 }
 0x371   :  { %v1502_v36 = vpop.eup %1501  ;;  %v1043_v62 = vmul.f32 %v1500_v20, %v921_v51 }
 0x372   :  { %v1504_v52 = vpop.eup %1503  ;;  %v1046_v32 = vmul.f32 %v1502_v36, %v932_v18 }
 0x373   :  { %v1044_v58 = vmul.f32 %v1504_v52, %v924_v14 }
 0x374   :  { %v1058_v34 = vpack.c.bf16 %v1046_v32, %v1045_v31 }
 0x375   :  { %v1057_v41 = vpack.c.bf16 %v1044_v58, %v1043_v62 }
 0x377   :  { %1365 = vmatprep.mubr.msk.bf16.mxu1 %vm1075_vm2, %v1057_v41 }
 0x378   :  { %1366 = vmatmul.mubr.msk.bf16.gmra.mrb[24].mxu1 %vm1075_vm2, %v1058_v34 }
 0x417   :  { %v1355_v55 = vpop.f32.mrb[12].mxu1 }
 0x418   :  { %v1143_v60 = vadd.f32 %v1355_v55, %v1062_v44  ;;  %v1134_v10 = vpop.f32.mrb[13].mxu1 }
 0x419   :  { %v1135_v19 = vadd.f32 %v1134_v10, %v1062_v44  ;;  %v1356_v22 = vpop.f32.mrb[14].mxu1 }
 0x41a   :  { %v1199_v7 = vadd.f32 %v1143_v60, %v1786_v15  ;;  %v1146_v18 = vadd.f32 %v1356_v22, %v1062_v44  ;;  %v1137_v51 = vpop.f32.mrb[15].mxu1 }
 0x41b   :  { %v1197_v25 = vadd.f32 %v1135_v19, %v1810_v3  ;;  %v1138_v33 = vadd.f32 %v1137_v51, %v1062_v44 }
 0x41c   :  { %1215 = vst.msk [vmem:[%s2263_s6 + $0x10] sm:$0xff] %vm199_vm1, %v1199_v7  ;;  %v1200_v28 = vadd.f32 %v1146_v18, %v1796_v38 }
 0x41d   :  { %1213 = vst.msk [vmem:[%s2263_s6] sm:$0xff] %vm199_vm1, %v1197_v25  ;;  %v1198_v23 = vadd.f32 %v1138_v33, %v1805_v2 }
 0x41e   :  { %1216 = vst.msk [vmem:[%s2263_s6 + $0x18] sm:$0xff] %vm199_vm1, %v1200_v28 }
 0x41f   :  { %1214 = vst.msk [vmem:[%s2263_s6 + $0x8] sm:$0xff] %vm199_vm1, %v1198_v23 }
 0x429   :  { %v1359_v15 = vpop.f32.mrb[16].mxu1 }
 0x42a   :  { %v1159_v3 = vadd.f32 %v1359_v15, %v1062_v44  ;;  %v1150_v38 = vpop.f32.mrb[17].mxu1 }
 0x42b   :  { %v1151_v50 = vadd.f32 %v1150_v38, %v1062_v44  ;;  %v1360_v14 = vpop.f32.mrb[18].mxu1 }
 0x42c   :  { %v1203_v1 = vadd.f32 %v1159_v3, %v1852_v11  ;;  %v1162_v29 = vadd.f32 %v1360_v14, %v1062_v44  ;;  %v1153_v6 = vpop.f32.mrb[19].mxu1 }
 0x42d   :  { %v1201_v2 = vadd.f32 %v1151_v50, %v1884_v63  ;;  %v1154_v5 = vadd.f32 %v1153_v6, %v1062_v44 }
 0x42e   :  { %1219 = vst.msk [vmem:[%s2263_s6 + $0x30] sm:$0xff] %vm199_vm1, %v1203_v1  ;;  %v1204_v35 = vadd.f32 %v1162_v29, %v1849_v30 }
 0x42f   :  { %1217 = vst.msk [vmem:[%s2263_s6 + $0x20] sm:$0xff] %vm199_vm1, %v1201_v2  ;;  %v1202_v48 = vadd.f32 %v1154_v5, %v1866_v0 }
 0x430   :  { %1220 = vst.msk [vmem:[%s2263_s6 + $0x38] sm:$0xff] %vm199_vm1, %v1204_v35 }
 0x431   :  { %1218 = vst.msk [vmem:[%s2263_s6 + $0x28] sm:$0xff] %vm199_vm1, %v1202_v48 }
 0x43a   :  { %v1363_v11 = vpop.f32.mrb[20].mxu1 }
 0x43b   :  { %v1175_v63 = vadd.f32 %v1363_v11, %v1062_v44  ;;  %v1166_v30 = vpop.f32.mrb[21].mxu1 }
 0x43c   :  { %v1167_v9 = vadd.f32 %v1166_v30, %v1062_v44  ;;  %v1364_v4 = vpop.f32.mrb[22].mxu1 }
 0x43d   :  { %v1207_v16 = vadd.f32 %v1175_v63, %v1913_v27  ;;  %v1178_v43 = vadd.f32 %v1364_v4, %v1062_v44  ;;  %v1169_v12 = vpop.f32.mrb[23].mxu1 }
 0x43e   :  { %v1205_v0 = vadd.f32 %v1167_v9, %v1926_v49  ;;  %v1170_v24 = vadd.f32 %v1169_v12, %v1062_v44 }
 0x43f   :  { %1223 = vst.msk [vmem:[%s2263_s6 + $0x50] sm:$0xff] %vm199_vm1, %v1207_v16  ;;  %v1208_v45 = vadd.f32 %v1178_v43, %v1910_v59 }
 0x440   :  { %1221 = vst.msk [vmem:[%s2263_s6 + $0x40] sm:$0xff] %vm199_vm1, %v1205_v0  ;;  %v1206_v56 = vadd.f32 %v1170_v24, %v1921_v46 }
 0x441   :  { %1224 = vst.msk [vmem:[%s2263_s6 + $0x58] sm:$0xff] %vm199_vm1, %v1208_v45 }
 0x442   :  { %1222 = vst.msk [vmem:[%s2263_s6 + $0x48] sm:$0xff] %vm199_vm1, %v1206_v56 }
 0x44b   :  { %v1367_v27 = vpop.f32.mrb[24].mxu1 }
 0x44c   :  { %v1191_v49 = vadd.f32 %v1367_v27, %v1062_v44  ;;  %v1182_v59 = vpop.f32.mrb[25].mxu1 }
 0x44d   :  { %v1183_v61 = vadd.f32 %v1182_v59, %v1062_v44  ;;  %v1368_v39 = vpop.f32.mrb[26].mxu1 }
 0x44e   :  { %v1211_v40 = vadd.f32 %v1191_v49, %v1960_v17  ;;  %v1194_v26 = vadd.f32 %v1368_v39, %v1062_v44  ;;  %v1185_v53 = vpop.f32.mrb[27].mxu1 }
 0x44f   :  { %v1209_v46 = vadd.f32 %v1183_v61, %v1970_v42  ;;  %v1186_v57 = vadd.f32 %v1185_v53, %v1062_v44 }
 0x450   :  { %1227 = vst.msk [vmem:[%s2263_s6 + $0x70] sm:$0xff] %vm199_vm1, %v1211_v40  ;;  %v1212_v8 = vadd.f32 %v1194_v26, %v1957_v13 }
 0x451   :  { %1225 = vst.msk [vmem:[%s2263_s6 + $0x60] sm:$0xff] %vm199_vm1, %v1209_v46  ;;  %v1210_v54 = vadd.f32 %v1186_v57, %v1965_v21 }
 0x452   :  { %1228 = vst.msk [vmem:[%s2263_s6 + $0x78] sm:$0xff] %vm199_vm1, %v1212_v8 }
 0x453   :  { %1226 = vst.msk [vmem:[%s2263_s6 + $0x68] sm:$0xff] %vm199_vm1, %v1210_v54 }

// kernel: _lambda_.8
= control target key start
LH: loop header
LB: loop body
LE: loop exit
PB: predicated region body
PF: predicated region fallthrough
CT: control target
= control target key end

     0   :  { %vm39_vm0 = vcmask 523264   ;;  %v105_v44 = vlaneseq  ;;  %vm202_vm1 = vcmask 261120   ;;  %s831_s0 = inlined_call_operand.vmem [shape: f32[32,64], index: 0, kind: input, shape index: {}]   ;;  %s832_s2 = inlined_call_operand.vmem [shape: bf16[64,32], index: 2, kind: input, shape index: {}]   ;;  %s833_s1 = inlined_call_operand.vmem [shape: f32[2,64], index: 1, kind: input, shape index: {}]   ;;  %s834_s6 = inlined_call_operand.vmem [shape: f32[32,32], index: 6, kind: output, shape index: {0}]   ;;  %s835_s4 = inlined_call_operand.vmem [shape: bf16[1,32,64], index: 4, kind: input, shape index: {}]   ;;  %s836_s3 = inlined_call_operand.vmem [shape: f32[1,4,64], index: 3, kind: input, shape index: {}]   ;;  %s837_s5 = inlined_call_operand.vmem [shape: bf16[1,64,32], index: 5, kind: input, shape index: {}]   ;;  %s838_s7 = inlined_call_operand.vmem [shape: f32[32,32], index: 7, kind: output, shape index: {1}]  }
   0x1   :  { %v656_v0 = vld [vmem:[%s831_s0 + $0x10] sm:$0xff]  ;;  %v661_v1 = vld [vmem:[%s831_s0] sm:$0xff]  ;;  %v666_v2 = vld [vmem:[%s831_s0 + $0x18] sm:$0xff] }
   0x2   :  { %v46_v3 = vsel %vm39_vm0, %v656_v0, 0.0  ;;  %v40_v4 = vsel %vm39_vm0, %v661_v1, 0.0  ;;  %v675_v5 = vld [vmem:[%s831_s0 + $0x8] sm:$0xff]  ;;  %v49_v6 = vsel %vm39_vm0, %v666_v2, 0.0  ;;  %v57_v9 = vmul.f32 %v661_v1, %v661_v1  ;;  %v571_v16 = vld [vmem:[%s832_s2] sm:$0xff]   ;;  %v573_v18 = vld [vmem:[%s832_s2 + $0x10] sm:$0xff]  }
   0x3   :  { %47 = vadd.xlane.f32.xlu1 %v46_v3  ;;  %41 = vadd.xlane.f32.xlu0 %v40_v4  ;;  %v43_v7 = vsel %vm39_vm0, %v675_v5, 0.0  ;;  %v58_v8 = vmul.f32 %v675_v5, %v675_v5  ;;  %v60_v12 = vmul.f32 %v666_v2, %v666_v2  ;;  %v59_v13 = vmul.f32 %v656_v0, %v656_v0  ;;  %v572_v17 = vld [vmem:[%s832_s2 + $0x8] sm:$0xff]   ;;  %v574_v19 = vld [vmem:[%s832_s2 + $0x18] sm:$0xff]   ;;  %v30_v55 = vld [vmem:[%s833_s1] sm:$0x3] }
   0x4   :  { %v61_v11 = vsel %vm39_vm0, %v57_v9, 0.0  ;;  %539 = vmatprep.subr.bf16.mxu0 %v571_v16  ;;  %v705_v51 = vshrl.u32 %v105_v44, 7 }
   0x5   :  { %v64_v10 = vsel %vm39_vm0, %v58_v8, 0.0  ;;  %v70_v14 = vsel %vm39_vm0, %v60_v12, 0.0  ;;  %v67_v15 = vsel %vm39_vm0, %v59_v13, 0.0  ;;  %540 = vmatpush3.bf16.msra.mxu0 %v571_v16 }
   0x6   :  { %541 = vmatprep.subr.bf16.mxu0 %v572_v17  ;;  %v107_v54 = vsub.s32 0, %v705_v51  ;;  %v115_v56 = vsub.s32 1, %v705_v51 }
   0x7   :  { %50 = vadd.xlane.f32.xlu1 %v49_v6  ;;  %44 = vadd.xlane.f32.xlu0 %v43_v7 }
   0x8   :  { %v108_v58 = vrot.slane %v30_v55, %v107_v54  ;;  %v116_v63 = vrot.slane %v30_v55, %v115_v56 }
   0x9   :  { %542 = vmatpush3.bf16.msra.mxu0 %v572_v17 }
   0xa   :  { %543 = vmatprep.subr.bf16.mxu0 %v573_v18 }
   0xb   :  { %65 = vadd.xlane.f32.xlu1 %v64_v10  ;;  %62 = vadd.xlane.f32.xlu0 %v61_v11 }
   0xd   :  { %544 = vmatpush3.bf16.msra.mxu0 %v573_v18 }
   0xe   :  { %545 = vmatprep.subr.bf16.mxu0 %v574_v19 }
   0xf   :  { %71 = vadd.xlane.f32.xlu1 %v70_v14  ;;  %68 = vadd.xlane.f32.xlu0 %v67_v15 }
  0x11   :  { %546 = vmatpush3.bf16.msra.mxu0 %v574_v19 }
  0x90   :  { %v48_v20 = vpop.xlane.xlu1 %47  ;;  %v42_v21 = vpop.xlane.xlu0 %41 }
  0x91   :  { %v53_v24 = vmul.f32 0.015625, %v42_v21  ;;  %v55_v26 = vmul.f32 0.015625, %v48_v20 }
  0x93   :  { %v77_v30 = vmul.f32 %v53_v24, %v53_v24  ;;  %v79_v36 = vmul.f32 %v55_v26, %v55_v26  ;;  %v89_v60 = vsub.f32 %v661_v1, %v53_v24  ;;  %v91_v8 = vsub.f32 %v656_v0, %v55_v26 }
  0x94   :  { %v51_v22 = vpop.xlane.xlu1 %50  ;;  %v45_v23 = vpop.xlane.xlu0 %44 }
  0x95   :  { %v54_v25 = vmul.f32 0.015625, %v45_v23  ;;  %v56_v27 = vmul.f32 0.015625, %v51_v22 }
  0x97   :  { %v78_v31 = vmul.f32 %v54_v25, %v54_v25  ;;  %v80_v37 = vmul.f32 %v56_v27, %v56_v27  ;;  %v90_v57 = vsub.f32 %v675_v5, %v54_v25  ;;  %v92_v4 = vsub.f32 %v666_v2, %v56_v27 }
  0x98   :  { %v66_v28 = vpop.xlane.xlu1 %65  ;;  %v63_v29 = vpop.xlane.xlu0 %62 }
  0x99   :  { %v74_v32 = vmul.f32 0.015625, %v66_v28  ;;  %v73_v33 = vmul.f32 0.015625, %v63_v29 }
  0x9b   :  { %v82_v34 = vsub.f32 %v74_v32, %v78_v31  ;;  %v81_v35 = vsub.f32 %v73_v33, %v77_v30  ;;  %v575_v33 = vld [vmem:[%s835_s4] sm:$0xff]  }
  0x9c   :  { %v72_v38 = vpop.xlane.xlu1 %71  ;;  %v69_v39 = vpop.xlane.xlu0 %68  ;;  %551 = vmatprep.subr.bf16.mxu1 %v575_v33 }
  0x9d   :  { %v86_v40 = vmax.f32 %v82_v34, 0.0  ;;  %v85_v41 = vmax.f32 %v81_v35, 0.0  ;;  %v76_v42 = vmul.f32 0.015625, %v72_v38  ;;  %v75_v43 = vmul.f32 0.015625, %v69_v39  ;;  %v576_v34 = vld [vmem:[%s835_s4 + $0x8] sm:$0xff]   ;;  %552 = vmatpush3.bf16.msra.mxu1 %v575_v33 }
  0x9e   :  { %553 = vmatprep.subr.bf16.mxu1 %v576_v34 }
  0x9f   :  { %v94_v45 = vadd.f32 1e-05, %v86_v40  ;;  %v93_v46 = vadd.f32 1e-05, %v85_v41  ;;  %v84_v47 = vsub.f32 %v76_v42, %v80_v37  ;;  %v83_v48 = vsub.f32 %v75_v43, %v79_v36 }
  0xa1   :  { %581 = vrsqrt.f32 %v94_v45  ;;  %v88_v49 = vmax.f32 %v84_v47, 0.0  ;;  %v87_v50 = vmax.f32 %v83_v48, 0.0  ;;  %554 = vmatpush3.bf16.msra.mxu1 %v576_v34  ;;  %v578_v34 = vld [vmem:[%s837_s5 + $0x8] sm:$0xff]  }
  0xa2   :  { %583 = vrsqrt.f32 %v93_v46 }
  0xa3   :  { %v96_v52 = vadd.f32 1e-05, %v88_v49  ;;  %v95_v53 = vadd.f32 1e-05, %v87_v50 }
  0xa5   :  { %585 = vrsqrt.f32 %v96_v52 }
  0xa6   :  { %587 = vrsqrt.f32 %v95_v53 }
  0xab   :  { %v582_v59 = vpop.eup %581 }
  0xac   :  { %v584_v61 = vpop.eup %583  ;;  %v102_v62 = vmul.f32 %v582_v59, %v90_v57 }
  0xad   :  { %v101_v3 = vmul.f32 %v584_v61, %v89_v60 }
  0xae   :  { %v110_v6 = vmul.f32 %v108_v58, %v102_v62 }
  0xaf   :  { %v586_v7 = vpop.eup %585  ;;  %v109_v9 = vmul.f32 %v108_v58, %v101_v3 }
  0xb0   :  { %v588_v5 = vpop.eup %587  ;;  %v118_v10 = vadd.f32 %v116_v63, %v110_v6  ;;  %v104_v11 = vmul.f32 %v586_v7, %v92_v4 }
  0xb1   :  { %v117_v12 = vadd.f32 %v116_v63, %v109_v9  ;;  %v103_v13 = vmul.f32 %v588_v5, %v91_v8  ;;  %v779_v5 = vld [vmem:[%s836_s3] sm:$0xf] }
  0xb2   :  { %v112_v14 = vmul.f32 %v108_v58, %v104_v11  ;;  %v276_v11 = vrot.slane %v779_v5, %v107_v54 }
  0xb3   :  { %v121_v1 = vpack.c.bf16 %v118_v10, %v117_v12  ;;  %v111_v15 = vmul.f32 %v108_v58, %v103_v13 }
  0xb4   :  { %v120_v16 = vadd.f32 %v116_v63, %v112_v14 }
  0xb5   :  { %547 = vmatprep.mubr.msk.bf16.mxu0 %vm39_vm0, %v121_v1  ;;  %v119_v17 = vadd.f32 %v116_v63, %v111_v15 }
  0xb7   :  { %v122_v18 = vpack.c.bf16 %v120_v16, %v119_v17 }
  0xb9   :  { %548 = vmatmul.mubr.msk.bf16.vlgmr.msra.gmra.mrb[0].mxu0 %vm39_vm0, %v122_v18  ;;  %v284_v18 = vrot.slane %v779_v5, %v115_v56  ;;  %v577_v56 = vld [vmem:[%s837_s5] sm:$0xff]  }
  0xba   :  { %559 = vmatprep.subr.bf16.mxu1 %v577_v56 }
 0x18c   :  { %v722_v2 = vpop.f32.mrb[0].mxu0 }
 0x18d   :  { %205 = vst.msk [vmem:[%s834_s6 + $0x10] sm:$0xff] %vm202_vm1, %v722_v2  ;;  %v729_v0 = vpop.f32.mrb[1].mxu0  ;;  %v214_v19 = vsel %vm202_vm1, %v722_v2, 0.0  ;;  %v227_v28 = vmul.f32 %v722_v2, %v722_v2 }
 0x18e   :  { %203 = vst.msk [vmem:[%s834_s6] sm:$0xff] %vm202_vm1, %v729_v0  ;;  %215 = vadd.xlane.f32.xlu0 %v214_v19  ;;  %v738_v20 = vpop.f32.mrb[2].mxu0  ;;  %v208_v23 = vsel %vm202_vm1, %v729_v0, 0.0  ;;  %v225_v24 = vmul.f32 %v729_v0, %v729_v0 }
 0x18f   :  { %206 = vst.msk [vmem:[%s834_s6 + $0x18] sm:$0xff] %vm202_vm1, %v738_v20  ;;  %v745_v21 = vpop.f32.mrb[3].mxu0  ;;  %v217_v22 = vsel %vm202_vm1, %v738_v20, 0.0  ;;  %v228_v30 = vmul.f32 %v738_v20, %v738_v20  ;;  %v235_v31 = vsel %vm202_vm1, %v227_v28, 0.0 }
 0x190   :  { %204 = vst.msk [vmem:[%s834_s6 + $0x8] sm:$0xff] %vm202_vm1, %v745_v21  ;;  %218 = vadd.xlane.f32.xlu1 %v217_v22  ;;  %v211_v25 = vsel %vm202_vm1, %v745_v21, 0.0  ;;  %v226_v26 = vmul.f32 %v745_v21, %v745_v21  ;;  %v229_v27 = vsel %vm202_vm1, %v225_v24, 0.0 }
 0x191   :  { %v238_v32 = vsel %vm202_vm1, %v228_v30, 0.0 }
 0x192   :  { %209 = vadd.xlane.f32.xlu0 %v208_v23  ;;  %v232_v29 = vsel %vm202_vm1, %v226_v26, 0.0 }
 0x194   :  { %212 = vadd.xlane.f32.xlu1 %v211_v25 }
 0x196   :  { %230 = vadd.xlane.f32.xlu0 %v229_v27 }
 0x198   :  { %233 = vadd.xlane.f32.xlu1 %v232_v29 }
 0x19a   :  { %236 = vadd.xlane.f32.xlu0 %v235_v31 }
 0x19c   :  { %239 = vadd.xlane.f32.xlu1 %v238_v32 }
 0x21b   :  { %v216_v35 = vpop.xlane.xlu0 %215 }
 0x21c   :  { %v223_v42 = vmul.f32 0.03125, %v216_v35  ;;  %v579_v35 = vld [vmem:[%s837_s5 + $0x10] sm:$0xff]  }
 0x21d   :  { %v219_v36 = vpop.xlane.xlu1 %218 }
 0x21e   :  { %v224_v45 = vmul.f32 0.03125, %v219_v36  ;;  %v247_v52 = vmul.f32 %v223_v42, %v223_v42  ;;  %v259_v15 = vsub.f32 %v722_v2, %v223_v42  ;;  %v580_v36 = vld [vmem:[%s837_s5 + $0x18] sm:$0xff]  }
 0x21f   :  { %v210_v37 = vpop.xlane.xlu0 %209 }
 0x220   :  { %v221_v38 = vmul.f32 0.03125, %v210_v37  ;;  %v248_v58 = vmul.f32 %v224_v45, %v224_v45  ;;  %v260_v22 = vsub.f32 %v738_v20, %v224_v45  ;;  %v297_v37 = vsub.s32 2, %v705_v51 }
 0x221   :  { %v213_v39 = vpop.xlane.xlu1 %212 }
 0x222   :  { %v222_v40 = vmul.f32 0.03125, %v213_v39  ;;  %v245_v43 = vmul.f32 %v221_v38, %v221_v38  ;;  %v257_v10 = vsub.f32 %v729_v0, %v221_v38  ;;  %v298_v38 = vrot.slane %v779_v5, %v297_v37 }
 0x223   :  { %v231_v41 = vpop.xlane.xlu0 %230 }
 0x224   :  { %v241_v44 = vmul.f32 0.03125, %v231_v41  ;;  %v246_v47 = vmul.f32 %v222_v40, %v222_v40  ;;  %v258_v13 = vsub.f32 %v745_v21, %v222_v40 }
 0x225   :  { %v234_v46 = vpop.xlane.xlu1 %233 }
 0x226   :  { %v249_v48 = vsub.f32 %v241_v44, %v245_v43  ;;  %v242_v49 = vmul.f32 0.03125, %v234_v46 }
 0x227   :  { %v237_v50 = vpop.xlane.xlu0 %236 }
 0x228   :  { %v253_v53 = vmax.f32 %v249_v48, 0.0  ;;  %v250_v55 = vsub.f32 %v242_v49, %v246_v47  ;;  %v243_v57 = vmul.f32 0.03125, %v237_v50 }
 0x229   :  { %v240_v59 = vpop.xlane.xlu1 %239 }
 0x22a   :  { %v261_v60 = vadd.f32 1e-05, %v253_v53  ;;  %v254_v61 = vmax.f32 %v250_v55, 0.0  ;;  %v251_v62 = vsub.f32 %v243_v57, %v247_v52  ;;  %v244_v63 = vmul.f32 0.03125, %v240_v59 }
 0x22c   :  { %589 = vrsqrt.f32 %v261_v60  ;;  %v262_v3 = vadd.f32 1e-05, %v254_v61  ;;  %v255_v4 = vmax.f32 %v251_v62, 0.0  ;;  %v252_v6 = vsub.f32 %v244_v63, %v248_v58 }
 0x22e   :  { %591 = vrsqrt.f32 %v262_v3  ;;  %v263_v7 = vadd.f32 1e-05, %v255_v4  ;;  %v256_v8 = vmax.f32 %v252_v6, 0.0 }
 0x230   :  { %593 = vrsqrt.f32 %v263_v7  ;;  %v264_v9 = vadd.f32 1e-05, %v256_v8 }
 0x232   :  { %595 = vrsqrt.f32 %v264_v9 }
 0x236   :  { %v590_v12 = vpop.eup %589 }
 0x237   :  { %v269_v14 = vmul.f32 %v590_v12, %v257_v10  ;;  %v406_v12 = vsub.s32 3, %v705_v51 }
 0x238   :  { %v592_v1 = vpop.eup %591 }
 0x239   :  { %v270_v16 = vmul.f32 %v592_v1, %v258_v13  ;;  %v277_v17 = vmul.f32 %v276_v11, %v269_v14  ;;  %v407_v13 = vrot.slane %v779_v5, %v406_v12 }
 0x23a   :  { %v594_v19 = vpop.eup %593 }
 0x23b   :  { %v278_v23 = vmul.f32 %v276_v11, %v270_v16  ;;  %v271_v24 = vmul.f32 %v594_v19, %v259_v15  ;;  %v285_v54 = vadd.f32 %v284_v18, %v277_v17 }
 0x23c   :  { %v596_v25 = vpop.eup %595 }
 0x23d   :  { %v286_v26 = vadd.f32 %v284_v18, %v278_v23  ;;  %v272_v27 = vmul.f32 %v596_v25, %v260_v22  ;;  %v279_v28 = vmul.f32 %v276_v11, %v271_v24 }
 0x23f   :  { %v293_v29 = vpack.c.bf16 %v286_v26, %v285_v54  ;;  %v280_v30 = vmul.f32 %v276_v11, %v272_v27  ;;  %v287_v31 = vadd.f32 %v284_v18, %v279_v28 }
 0x241   :  { %555 = vmatprep.mubr.msk.bf16.mxu1 %vm202_vm1, %v293_v29  ;;  %v288_v32 = vadd.f32 %v284_v18, %v280_v30 }
 0x243   :  { %v294_v33 = vpack.c.bf16 %v288_v32, %v287_v31 }
 0x245   :  { %556 = vmatmul.mubr.msk.bf16.vlgmr.msra.gmra.mrb[0].mxu1 %vm202_vm1, %v294_v33 }
 0x246   :  { %560 = vmatpush3.bf16.msra.mxu1 %v577_v56 }
 0x247   :  { %561 = vmatprep.subr.bf16.mxu1 %v578_v34 }
 0x24a   :  { %562 = vmatpush3.bf16.msra.mxu1 %v578_v34 }
 0x24b   :  { %563 = vmatprep.subr.bf16.mxu1 %v579_v35 }
 0x24e   :  { %564 = vmatpush3.bf16.msra.mxu1 %v579_v35 }
 0x24f   :  { %565 = vmatprep.subr.bf16.mxu1 %v580_v36 }
 0x252   :  { %566 = vmatpush3.bf16.msra.mxu1 %v580_v36 }
 0x318   :  { %v557_v39 = vpop.f32.mrb[0].mxu1 }
 0x319   :  { %v360_v40 = vadd.f32 %v557_v39, %v298_v38  ;;  %v351_v41 = vpop.f32.mrb[1].mxu1 }
 0x31a   :  { %v352_v42 = vadd.f32 %v351_v41, %v298_v38  ;;  %v558_v43 = vpop.f32.mrb[2].mxu1 }
 0x31b   :  { %v515_v44 = vmul.f32 -1.442695, %v360_v40  ;;  %v363_v45 = vadd.f32 %v558_v43, %v298_v38  ;;  %v354_v46 = vpop.f32.mrb[3].mxu1 }
 0x31c   :  { %v513_v47 = vmul.f32 -1.442695, %v352_v42  ;;  %v355_v48 = vadd.f32 %v354_v46, %v298_v38 }
 0x31d   :  { %597 = vpow2.f32 %v515_v44  ;;  %v516_v49 = vmul.f32 -1.442695, %v363_v45 }
 0x31e   :  { %599 = vpow2.f32 %v513_v47  ;;  %v514_v50 = vmul.f32 -1.442695, %v355_v48 }
 0x31f   :  { %601 = vpow2.f32 %v516_v49 }
 0x320   :  { %603 = vpow2.f32 %v514_v50 }
 0x327   :  { %v598_v52 = vpop.eup %597 }
 0x328   :  { %v600_v53 = vpop.eup %599  ;;  %v380_v55 = vadd.f32 1.0, %v598_v52 }
 0x329   :  { %v602_v57 = vpop.eup %601  ;;  %v378_v58 = vadd.f32 1.0, %v600_v53 }
 0x32a   :  { %v604_v59 = vpop.eup %603  ;;  %605 = vrcp.f32 %v380_v55  ;;  %v381_v60 = vadd.f32 1.0, %v602_v57 }
 0x32b   :  { %607 = vrcp.f32 %v378_v58  ;;  %v379_v61 = vadd.f32 1.0, %v604_v59 }
 0x32c   :  { %609 = vrcp.f32 %v381_v60 }
 0x32d   :  { %611 = vrcp.f32 %v379_v61 }
 0x334   :  { %v606_v62 = vpop.eup %605 }
 0x335   :  { %v608_v63 = vpop.eup %607  ;;  %v392_v6 = vmul.f32 %v606_v62, %v360_v40 }
 0x336   :  { %v610_v3 = vpop.eup %609  ;;  %v390_v8 = vmul.f32 %v608_v63, %v352_v42 }
 0x337   :  { %v612_v4 = vpop.eup %611  ;;  %v393_v7 = vmul.f32 %v610_v3, %v363_v45 }
 0x338   :  { %v391_v9 = vmul.f32 %v612_v4, %v355_v48 }
 0x339   :  { %v403_v10 = vpack.c.bf16 %v393_v7, %v392_v6 }
 0x33a   :  { %v402_v11 = vpack.c.bf16 %v391_v9, %v390_v8 }
 0x33c   :  { %567 = vmatprep.mubr.msk.bf16.mxu1 %vm39_vm0, %v402_v11 }
 0x33d   :  { %568 = vmatmul.mubr.msk.bf16.vlgmr.msra.gmra.mrb[4].mxu1 %vm39_vm0, %v403_v10 }
 0x410   :  { %v569_v14 = vpop.f32.mrb[4].mxu1 }
 0x411   :  { %v481_v1 = vadd.f32 %v569_v14, %v407_v13  ;;  %v472_v15 = vpop.f32.mrb[5].mxu1 }
 0x412   :  { %v473_v16 = vadd.f32 %v472_v15, %v407_v13  ;;  %v570_v17 = vpop.f32.mrb[6].mxu1 }
 0x413   :  { %v489_v18 = vadd.f32 %v722_v2, %v481_v1  ;;  %v484_v19 = vadd.f32 %v570_v17, %v407_v13  ;;  %v475_v22 = vpop.f32.mrb[7].mxu1 }
 0x414   :  { %v487_v23 = vadd.f32 %v473_v16, %v729_v0  ;;  %v476_v24 = vadd.f32 %v475_v22, %v407_v13 }
 0x415   :  { %493 = vst.msk [vmem:[%s838_s7 + $0x10] sm:$0xff] %vm202_vm1, %v489_v18  ;;  %v490_v51 = vadd.f32 %v738_v20, %v484_v19 }
 0x416   :  { %491 = vst.msk [vmem:[%s838_s7] sm:$0xff] %vm202_vm1, %v487_v23  ;;  %v488_v5 = vadd.f32 %v476_v24, %v745_v21 }
 0x417   :  { %494 = vst.msk [vmem:[%s838_s7 + $0x18] sm:$0xff] %vm202_vm1, %v490_v51 }
 0x418   :  { %492 = vst.msk [vmem:[%s838_s7 + $0x8] sm:$0xff] %vm202_vm1, %v488_v5 }

// kernel: _lambda_.9
= control target key start
LH: loop header
LB: loop body
LE: loop exit
PB: predicated region body
PF: predicated region fallthrough
CT: control target
= control target key end

     0   :  { %v851_v1 = vmov 0.0   ;;  %vm852_vm0 = vmmov 0   ;;  %v59_v18 = vlaneseq  ;;  %vm158_vm1 = vcmask 523264   ;;  %s1096_s0 = inlined_call_operand.vmem [shape: f32[8,128], index: 0, kind: input, shape index: {}]   ;;  %s1097_s2 = inlined_call_operand.vmem [shape: bf16[128,64], index: 2, kind: input, shape index: {}]   ;;  %s1098_s1 = inlined_call_operand.vmem [shape: f32[2,128], index: 1, kind: input, shape index: {}]   ;;  %s1099_s6 = inlined_call_operand.vmem [shape: f32[8,64], index: 6, kind: output, shape index: {0}]   ;;  %s1100_s4 = inlined_call_operand.vmem [shape: bf16[2,64,128], index: 4, kind: input, shape index: {}]   ;;  %s1101_s3 = inlined_call_operand.vmem [shape: f32[2,4,128], index: 3, kind: input, shape index: {}]   ;;  %s1102_s5 = inlined_call_operand.vmem [shape: bf16[2,128,64], index: 5, kind: input, shape index: {}]   ;;  %s1103_s7 = inlined_call_operand.vmem [shape: f32[8,64], index: 7, kind: output, shape index: {1}]  }
   0x1   :  { %v26_v0 = vld [vmem:[%s1096_s0] sm:$0xff]  ;;  %719 = vmatprep.subr.bf16.mxu0 %v851_v1  ;;  %739 = vmatprep.subr.bf16.mxu1 %v851_v1  ;;  %v806_v4 = vld [vmem:[%s1097_s2 + $0x8] sm:$0xff]   ;;  %v807_v5 = vld [vmem:[%s1097_s2 + $0x10] sm:$0xff]  }
   0x2   :  { %44 = vadd.xlane.f32.xlu0 %v26_v0  ;;  %v48_v2 = vmul.f32 %v26_v0, %v26_v0  ;;  %v805_v3 = vld [vmem:[%s1097_s2] sm:$0xff]   ;;  %v808_v6 = vld [vmem:[%s1097_s2 + $0x18] sm:$0xff]   ;;  %735 = vmatprep.mubr.msk.bf16.mxu0 %vm852_vm0, %v851_v1  ;;  %v810_v8 = vld [vmem:[%s1097_s2 + $0x28] sm:$0xff]   ;;  %v934_v20 = vshrl.u32 %v59_v18, 7 }
   0x3   :  { %720 = vmatpush3.bf16.msra.mxu0 %v805_v3  ;;  %v809_v7 = vld [vmem:[%s1097_s2 + $0x20] sm:$0xff]   ;;  %747 = vmatprep.mubr.msk.bf16.mxu1 %vm852_vm0, %v851_v1  ;;  %v811_v9 = vld [vmem:[%s1097_s2 + $0x30] sm:$0xff]   ;;  %v812_v10 = vld [vmem:[%s1097_s2 + $0x38] sm:$0xff]  }
   0x4   :  { %721 = vmatprep.subr.bf16.mxu0 %v851_v1  ;;  %v937_v21 = vsub.s32 0, %v934_v20  ;;  %v27_v22 = vld [vmem:[%s1098_s1] sm:$0x3]  ;;  %v943_v23 = vsub.s32 1, %v934_v20  ;;  %v814_v40 = vld [vmem:[%s1100_s4 + $0x8] sm:$0xff]   ;;  %v815_v41 = vld [vmem:[%s1100_s4 + $0x10] sm:$0xff]  }
   0x5   :  { %v813_v39 = vld [vmem:[%s1100_s4] sm:$0xff]   ;;  %v816_v42 = vld [vmem:[%s1100_s4 + $0x18] sm:$0xff]   ;;  %v818_v61 = vld [vmem:[%s1102_s5 + $0x8] sm:$0xff]   ;;  %v294_v18 = vsub.s32 3, %v934_v20 }
   0x6   :  { %49 = vadd.xlane.f32.xlu0 %v48_v2  ;;  %v62_v25 = vrot.slane %v27_v22, %v937_v21  ;;  %v67_v28 = vrot.slane %v27_v22, %v943_v23  ;;  %740 = vmatpush3.bf16.msra.mxu1 %v813_v39  ;;  %v160_v51 = vld [vmem:[%s1101_s3] sm:$0xf]  ;;  %v819_v62 = vld [vmem:[%s1102_s5 + $0x10] sm:$0xff]   ;;  %v820_v63 = vld [vmem:[%s1102_s5 + $0x18] sm:$0xff]  }
   0x7   :  { %722 = vmatpush3.bf16.msra.mxu0 %v806_v4  ;;  %741 = vmatprep.subr.bf16.mxu1 %v851_v1  ;;  %v181_v53 = vrot.slane %v160_v51, %v937_v21  ;;  %v186_v56 = vrot.slane %v160_v51, %v943_v23  ;;  %v817_v60 = vld [vmem:[%s1102_s5] sm:$0xff]   ;;  %v822_v2 = vld [vmem:[%s1102_s5 + $0x28] sm:$0xff]   ;;  %v823_v3 = vld [vmem:[%s1102_s5 + $0x30] sm:$0xff]  }
   0x8   :  { %723 = vmatprep.subr.bf16.mxu0 %v851_v1  ;;  %v824_v4 = vld [vmem:[%s1102_s5 + $0x38] sm:$0xff]  }
   0xa   :  { %742 = vmatpush3.bf16.msra.mxu1 %v814_v40 }
   0xb   :  { %724 = vmatpush3.bf16.msra.mxu0 %v807_v5  ;;  %743 = vmatprep.subr.bf16.mxu1 %v851_v1  ;;  %v199_v5 = vsub.s32 2, %v934_v20 }
   0xc   :  { %725 = vmatprep.subr.bf16.mxu0 %v851_v1 }
   0xe   :  { %744 = vmatpush3.bf16.msra.mxu1 %v815_v41 }
   0xf   :  { %726 = vmatpush3.bf16.msra.mxu0 %v808_v6  ;;  %745 = vmatprep.subr.bf16.mxu1 %v851_v1  ;;  %v200_v6 = vrot.slane %v160_v51, %v199_v5 }
  0x10   :  { %727 = vmatprep.subr.bf16.mxu0 %v851_v1 }
  0x12   :  { %746 = vmatpush3.bf16.msra.mxu1 %v816_v42 }
  0x13   :  { %728 = vmatpush3.bf16.msra.mxu0 %v809_v7  ;;  %751 = vmatprep.subr.bf16.mxu1 %v851_v1 }
  0x14   :  { %729 = vmatprep.subr.bf16.mxu0 %v851_v1 }
  0x17   :  { %730 = vmatpush3.bf16.msra.mxu0 %v810_v8 }
  0x18   :  { %731 = vmatprep.subr.bf16.mxu0 %v851_v1 }
  0x1b   :  { %732 = vmatpush3.bf16.msra.mxu0 %v811_v9 }
  0x1c   :  { %733 = vmatprep.subr.bf16.mxu0 %v851_v1 }
  0x1f   :  { %734 = vmatpush3.bf16.msra.mxu0 %v812_v10 }
  0x20   :  { %783 = vmatprep.subr.bf16.mxu0 %v851_v1 }
  0x8f   :  { %v45_v11 = vpop.xlane.xlu0 %44 }
  0x90   :  { %v47_v12 = vmul.f32 0.0078125, %v45_v11 }
  0x92   :  { %v52_v14 = vmul.f32 %v47_v12, %v47_v12  ;;  %v55_v24 = vsub.f32 %v26_v0, %v47_v12  ;;  %v821_v0 = vld [vmem:[%s1102_s5 + $0x20] sm:$0xff]  }
  0x93   :  { %v50_v13 = vpop.xlane.xlu0 %49 }
  0x94   :  { %v51_v15 = vmul.f32 0.0078125, %v50_v13 }
  0x96   :  { %v53_v16 = vsub.f32 %v51_v15, %v52_v14 }
  0x98   :  { %v54_v17 = vmax.f32 %v53_v16, 0.0 }
  0x9a   :  { %v56_v19 = vadd.f32 1e-05, %v54_v17 }
  0x9c   :  { %837 = vrsqrt.f32 %v56_v19  ;;  %v295_v19 = vrot.slane %v160_v51, %v294_v18 }
  0xa6   :  { %v838_v26 = vpop.eup %837 }
  0xa7   :  { %v58_v27 = vmul.f32 %v838_v26, %v55_v24 }
  0xa9   :  { %v63_v29 = vmul.f32 %v62_v25, %v58_v27 }
  0xab   :  { %v68_v30 = vadd.f32 %v67_v28, %v63_v29 }
  0xad   :  { %v69_v31 = vpack.c.bf16 %v68_v30, %v68_v30 }
  0xaf   :  { %736 = vmatmul.mubr.bf16.vlgmr.msra.gmra.mrb[0].mxu0 %v69_v31 }
  0xb0   :  { %799 = vmatprep.mubr.msk.bf16.mxu0 %vm852_vm0, %v851_v1 }
 0x182   :  { %v949_v32 = vpop.f32.mrb[0].mxu0 }
 0x183   :  { %159 = vst.msk [vmem:[%s1099_s6] sm:$0xff] %vm158_vm1, %v949_v32  ;;  %v737_v33 = vpop.f32.mrb[1].mxu0  ;;  %v161_v34 = vsel %vm158_vm1, %v949_v32, 0.0  ;;  %v166_v35 = vmul.f32 %v949_v32, %v949_v32 }
 0x184   :  { %162 = vadd.xlane.f32.xlu1 %v161_v34  ;;  %v155_v36 = vpop.f32.mrb[2].mxu0  ;;  %v825_v33 = vld [vmem:[%s1100_s4 + $0x20] sm:$0xff]   ;;  %v827_v34 = vld [vmem:[%s1100_s4 + $0x30] sm:$0xff]  }
 0x185   :  { %v738_v37 = vpop.f32.mrb[3].mxu0  ;;  %v167_v38 = vsel %vm158_vm1, %v166_v35, 0.0  ;;  %v828_v35 = vld [vmem:[%s1100_s4 + $0x38] sm:$0xff]  }
 0x188   :  { %168 = vadd.xlane.f32.xlu1 %v167_v38 }
 0x211   :  { %v163_v43 = vpop.xlane.xlu1 %162 }
 0x212   :  { %v165_v44 = vmul.f32 0.015625, %v163_v43 }
 0x214   :  { %v171_v46 = vmul.f32 %v165_v44, %v165_v44  ;;  %v174_v52 = vsub.f32 %v949_v32, %v165_v44  ;;  %v643_v44 = vld [vmem:[%s1101_s3 + $0x4] sm:$0xf] }
 0x215   :  { %v169_v45 = vpop.xlane.xlu1 %168 }
 0x216   :  { %v170_v47 = vmul.f32 0.015625, %v169_v45 }
 0x218   :  { %v172_v48 = vsub.f32 %v170_v47, %v171_v46  ;;  %v406_v46 = vrot.slane %v643_v44, %v937_v21  ;;  %v830_v21 = vld [vmem:[%s1102_s5 + $0x48] sm:$0xff]  }
 0x21a   :  { %v173_v49 = vmax.f32 %v172_v48, 0.0 }
 0x21c   :  { %v175_v50 = vadd.f32 1e-05, %v173_v49  ;;  %v411_v49 = vrot.slane %v643_v44, %v943_v23  ;;  %v831_v23 = vld [vmem:[%s1102_s5 + $0x50] sm:$0xff]  }
 0x21e   :  { %839 = vrsqrt.f32 %v175_v50 }
 0x228   :  { %v840_v54 = vpop.eup %839 }
 0x229   :  { %v177_v55 = vmul.f32 %v840_v54, %v174_v52  ;;  %v832_v54 = vld [vmem:[%s1102_s5 + $0x58] sm:$0xff]  }
 0x22b   :  { %v182_v57 = vmul.f32 %v181_v53, %v177_v55  ;;  %v829_v53 = vld [vmem:[%s1102_s5 + $0x40] sm:$0xff]  }
 0x22c   :  { %784 = vmatpush3.bf16.msra.mxu0 %v829_v53  ;;  %v833_v55 = vld [vmem:[%s1102_s5 + $0x60] sm:$0xff]  }
 0x22d   :  { %v187_v58 = vadd.f32 %v186_v56, %v182_v57  ;;  %785 = vmatprep.subr.bf16.mxu0 %v851_v1  ;;  %v834_v56 = vld [vmem:[%s1102_s5 + $0x68] sm:$0xff]   ;;  %v835_v57 = vld [vmem:[%s1102_s5 + $0x70] sm:$0xff]  }
 0x22f   :  { %v196_v59 = vpack.c.bf16 %v187_v58, %v187_v58  ;;  %v836_v58 = vld [vmem:[%s1102_s5 + $0x78] sm:$0xff]  }
 0x230   :  { %786 = vmatpush3.bf16.msra.mxu0 %v830_v21 }
 0x231   :  { %748 = vmatmul.mubr.msk.bf16.vlgmr.msra.gmra.mrb[0].mxu1 %vm158_vm1, %v196_v59  ;;  %787 = vmatprep.subr.bf16.mxu0 %v851_v1  ;;  %v426_v59 = vrot.slane %v643_v44, %v199_v5 }
 0x232   :  { %767 = vmatprep.mubr.msk.bf16.mxu1 %vm852_vm0, %v851_v1  ;;  %752 = vmatpush3.bf16.msra.mxu1 %v817_v60 }
 0x233   :  { %753 = vmatprep.subr.bf16.mxu1 %v851_v1 }
 0x234   :  { %788 = vmatpush3.bf16.msra.mxu0 %v831_v23 }
 0x235   :  { %789 = vmatprep.subr.bf16.mxu0 %v851_v1 }
 0x236   :  { %754 = vmatpush3.bf16.msra.mxu1 %v818_v61 }
 0x237   :  { %755 = vmatprep.subr.bf16.mxu1 %v851_v1 }
 0x238   :  { %790 = vmatpush3.bf16.msra.mxu0 %v832_v54 }
 0x239   :  { %791 = vmatprep.subr.bf16.mxu0 %v851_v1 }
 0x23a   :  { %756 = vmatpush3.bf16.msra.mxu1 %v819_v62 }
 0x23b   :  { %757 = vmatprep.subr.bf16.mxu1 %v851_v1 }
 0x23c   :  { %792 = vmatpush3.bf16.msra.mxu0 %v833_v55 }
 0x23d   :  { %793 = vmatprep.subr.bf16.mxu0 %v851_v1 }
 0x23e   :  { %758 = vmatpush3.bf16.msra.mxu1 %v820_v63 }
 0x23f   :  { %759 = vmatprep.subr.bf16.mxu1 %v851_v1 }
 0x240   :  { %794 = vmatpush3.bf16.msra.mxu0 %v834_v56 }
 0x241   :  { %795 = vmatprep.subr.bf16.mxu0 %v851_v1 }
 0x242   :  { %760 = vmatpush3.bf16.msra.mxu1 %v821_v0 }
 0x243   :  { %761 = vmatprep.subr.bf16.mxu1 %v851_v1 }
 0x244   :  { %796 = vmatpush3.bf16.msra.mxu0 %v835_v57 }
 0x245   :  { %797 = vmatprep.subr.bf16.mxu0 %v851_v1 }
 0x246   :  { %762 = vmatpush3.bf16.msra.mxu1 %v822_v2 }
 0x247   :  { %763 = vmatprep.subr.bf16.mxu1 %v851_v1 }
 0x248   :  { %798 = vmatpush3.bf16.msra.mxu0 %v836_v58 }
 0x24a   :  { %764 = vmatpush3.bf16.msra.mxu1 %v823_v3 }
 0x24b   :  { %765 = vmatprep.subr.bf16.mxu1 %v851_v1 }
 0x24e   :  { %766 = vmatpush3.bf16.msra.mxu1 %v824_v4 }
 0x24f   :  { %771 = vmatprep.subr.bf16.mxu1 %v851_v1 }
 0x304   :  { %v262_v7 = vpop.f32.mrb[0].mxu1 }
 0x305   :  { %v263_v8 = vadd.f32 %v262_v7, %v200_v6  ;;  %v749_v9 = vpop.f32.mrb[1].mxu1 }
 0x306   :  { %v265_v10 = vpop.f32.mrb[2].mxu1 }
 0x307   :  { %v634_v11 = vmul.f32 -1.442695, %v263_v8  ;;  %v750_v12 = vpop.f32.mrb[3].mxu1 }
 0x309   :  { %841 = vpow2.f32 %v634_v11 }
 0x313   :  { %v842_v13 = vpop.eup %841 }
 0x314   :  { %v271_v14 = vadd.f32 1.0, %v842_v13 }
 0x316   :  { %843 = vrcp.f32 %v271_v14 }
 0x320   :  { %v844_v15 = vpop.eup %843 }
 0x321   :  { %v274_v16 = vmul.f32 %v844_v15, %v263_v8  ;;  %v522_v8 = vrot.slane %v643_v44, %v294_v18 }
 0x323   :  { %v291_v17 = vpack.c.bf16 %v274_v16, %v274_v16 }
 0x325   :  { %768 = vmatmul.mubr.bf16.vlgmr.msra.gmra.mrb[4].mxu1 %v291_v17 }
 0x326   :  { %779 = vmatprep.mubr.msk.bf16.mxu1 %vm852_vm0, %v851_v1  ;;  %772 = vmatpush3.bf16.msra.mxu1 %v825_v33 }
 0x327   :  { %773 = vmatprep.subr.bf16.mxu1 %v851_v1 }
 0x3f8   :  { %v378_v22 = vpop.f32.mrb[4].mxu1 }
 0x3f9   :  { %v379_v24 = vadd.f32 %v378_v22, %v295_v19  ;;  %v769_v25 = vpop.f32.mrb[5].mxu1 }
 0x3fa   :  { %v381_v26 = vpop.f32.mrb[6].mxu1 }
 0x3fb   :  { %v1027_v27 = vadd.f32 %v379_v24, %v949_v32  ;;  %v770_v28 = vpop.f32.mrb[7].mxu1  ;;  %v826_v32 = vld [vmem:[%s1100_s4 + $0x28] sm:$0xff]  }
 0x3fc   :  { %774 = vmatpush3.bf16.msra.mxu1 %v826_v32 }
 0x3fd   :  { %v387_v29 = vsel %vm158_vm1, %v1027_v27, 0.0  ;;  %v391_v30 = vmul.f32 %v1027_v27, %v1027_v27  ;;  %775 = vmatprep.subr.bf16.mxu1 %v851_v1 }
 0x3fe   :  { %388 = vadd.xlane.f32.xlu0 %v387_v29 }
 0x3ff   :  { %v392_v31 = vsel %vm158_vm1, %v391_v30, 0.0 }
 0x400   :  { %393 = vadd.xlane.f32.xlu1 %v392_v31  ;;  %776 = vmatpush3.bf16.msra.mxu1 %v827_v34 }
 0x401   :  { %777 = vmatprep.subr.bf16.mxu1 %v851_v1 }
 0x404   :  { %778 = vmatpush3.bf16.msra.mxu1 %v828_v35 }
 0x48b   :  { %v389_v36 = vpop.xlane.xlu0 %388 }
 0x48c   :  { %v390_v37 = vmul.f32 0.015625, %v389_v36 }
 0x48d   :  { %v394_v38 = vpop.xlane.xlu1 %393 }
 0x48e   :  { %v396_v39 = vmul.f32 %v390_v37, %v390_v37  ;;  %v395_v40 = vmul.f32 0.015625, %v394_v38  ;;  %v399_v45 = vsub.f32 %v1027_v27, %v390_v37 }
 0x490   :  { %v397_v41 = vsub.f32 %v395_v40, %v396_v39 }
 0x492   :  { %v398_v42 = vmax.f32 %v397_v41, 0.0 }
 0x494   :  { %v400_v43 = vadd.f32 1e-05, %v398_v42 }
 0x496   :  { %845 = vrsqrt.f32 %v400_v43 }
 0x4a0   :  { %v846_v47 = vpop.eup %845 }
 0x4a1   :  { %v402_v48 = vmul.f32 %v846_v47, %v399_v45 }
 0x4a3   :  { %v407_v50 = vmul.f32 %v406_v46, %v402_v48 }
 0x4a5   :  { %v412_v51 = vadd.f32 %v411_v49, %v407_v50 }
 0x4a7   :  { %v422_v52 = vpack.c.bf16 %v412_v51, %v412_v51 }
 0x4a9   :  { %780 = vmatmul.mubr.msk.bf16.vlgmr.msra.gmra.mrb[8].mxu1 %vm158_vm1, %v422_v52 }
 0x57c   :  { %v488_v60 = vpop.f32.mrb[8].mxu1 }
 0x57d   :  { %v489_v61 = vadd.f32 %v488_v60, %v426_v59  ;;  %v781_v62 = vpop.f32.mrb[9].mxu1 }
 0x57e   :  { %v491_v63 = vpop.f32.mrb[10].mxu1 }
 0x57f   :  { %v657_v0 = vmul.f32 -1.442695, %v489_v61  ;;  %v782_v2 = vpop.f32.mrb[11].mxu1 }
 0x581   :  { %847 = vpow2.f32 %v657_v0 }
 0x58b   :  { %v848_v3 = vpop.eup %847 }
 0x58c   :  { %v497_v4 = vadd.f32 1.0, %v848_v3 }
 0x58e   :  { %849 = vrcp.f32 %v497_v4 }
 0x598   :  { %v850_v6 = vpop.eup %849 }
 0x599   :  { %v500_v1 = vmul.f32 %v850_v6, %v489_v61 }
 0x59b   :  { %v518_v7 = vpack.c.bf16 %v500_v1, %v500_v1 }
 0x59d   :  { %800 = vmatmul.mubr.bf16.vlgmr.msra.gmra.mrb[4].mxu0 %v518_v7 }
 0x670   :  { %v605_v9 = vpop.f32.mrb[4].mxu0 }
 0x671   :  { %v606_v10 = vadd.f32 %v605_v9, %v522_v8  ;;  %v801_v5 = vpop.f32.mrb[5].mxu0 }
 0x672   :  { %v608_v11 = vpop.f32.mrb[6].mxu0 }
 0x673   :  { %v611_v12 = vadd.f32 %v606_v10, %v1027_v27  ;;  %v802_v13 = vpop.f32.mrb[7].mxu0 }
 0x675   :  { %612 = vst.msk [vmem:[%s1103_s7] sm:$0xff] %vm158_vm1, %v611_v12 }

// kernel: _lambda_.10
= control target key start
LH: loop header
LB: loop body
LE: loop exit
PB: predicated region body
PF: predicated region fallthrough
CT: control target
= control target key end

     0   :  { %v65_v0 = vlaneseq  ;;  %v1599_v1 = vmov 1983009808   ;;  %vm72_vm0 = vcmask 1041408   ;;  %v1600_v40 = vmov 269488144   ;;  %s2039_s0 = inlined_call_operand.vmem [shape: f32[2,256], index: 0, kind: input, shape index: {}]   ;;  %s2040_s2 = inlined_call_operand.vmem [shape: bf16[256,128], index: 2, kind: input, shape index: {}]   ;;  %s2041_s1 = inlined_call_operand.vmem [shape: f32[2,256], index: 1, kind: input, shape index: {}]   ;;  %s2042_s4 = inlined_call_operand.vmem [shape: bf16[2,128,256], index: 4, kind: input, shape index: {}]   ;;  %s2043_s3 = inlined_call_operand.vmem [shape: f32[2,4,256], index: 3, kind: input, shape index: {}]   ;;  %s2044_s5 = inlined_call_operand.vmem [shape: bf16[2,256,128], index: 5, kind: input, shape index: {}]   ;;  %s2045_s6 = inlined_call_operand.vmem [shape: bf16[128,256], index: 6, kind: input, shape index: {}]   ;;  %s2046_s7 = inlined_call_operand.vmem [shape: f32[2,256], index: 7, kind: output, shape index: {}]  }
   0x1   :  { %v63_v2 = vunpack.c.l.s4 %v1599_v1  ;;  %v1645_v3 = vld [vmem:[%s2039_s0] sm:$0xf]  ;;  %v1459_v20 = vld [vmem:[%s2040_s2 + $0x48] sm:$0xff]   ;;  %v1461_v22 = vld [vmem:[%s2040_s2 + $0x50] sm:$0xff]   ;;  %v103_v41 = vunpack.c.l.s4 %v1600_v40 }
   0x2   :  { %v1647_v4 = vshrl.u32 %v65_v0, 7  ;;  %v80_v6 = vmul.f32 %v1645_v3, %v1645_v3  ;;  %v1457_v18 = vld [vmem:[%s2040_s2 + $0x40] sm:$0xff]   ;;  %v1460_v21 = vld [vmem:[%s2040_s2 + $0x8] sm:$0xff]   ;;  %v1462_v23 = vld [vmem:[%s2040_s2 + $0x10] sm:$0xff]  }
   0x3   :  { %v64_v5 = vunpack.c.0.s8 %v63_v2  ;;  %v1458_v19 = vld [vmem:[%s2040_s2] sm:$0xff]   ;;  %1388 = vmatprep.subr.bf16.mxu0 %v1457_v18  ;;  %v1463_v24 = vld [vmem:[%s2040_s2 + $0x58] sm:$0xff]   ;;  %v1467_v28 = vld [vmem:[%s2040_s2 + $0x68] sm:$0xff]   ;;  %v104_v49 = vunpack.c.0.s8 %v103_v41 }
   0x4   :  { %1389 = vmatpush3.bf16.msra.mxu0 %v1458_v19  ;;  %v1464_v25 = vld [vmem:[%s2040_s2 + $0x18] sm:$0xff]   ;;  %v1465_v26 = vld [vmem:[%s2040_s2 + $0x60] sm:$0xff]   ;;  %v1468_v29 = vld [vmem:[%s2040_s2 + $0x28] sm:$0xff]   ;;  %v1710_v42 = vsub.s32 0, %v1647_v4  ;;  %v1713_v43 = vsub.s32 2, %v1647_v4  ;;  %v1719_v46 = vsub.s32 1, %v1647_v4 }
   0x5   :  { %v1652_v7 = vsub.s32 %v64_v5, %v1647_v4  ;;  %1390 = vmatprep.subr.bf16.mxu0 %v1459_v20  ;;  %v1466_v27 = vld [vmem:[%s2040_s2 + $0x20] sm:$0xff]   ;;  %v1469_v30 = vld [vmem:[%s2040_s2 + $0x70] sm:$0xff]   ;;  %v1471_v32 = vld [vmem:[%s2040_s2 + $0x78] sm:$0xff]   ;;  %v1722_v47 = vsub.s32 3, %v1647_v4  ;;  %v107_v54 = vsub.s32 %v104_v49, %v1647_v4 }
   0x6   :  { %v1470_v31 = vld [vmem:[%s2040_s2 + $0x30] sm:$0xff]   ;;  %v1472_v33 = vld [vmem:[%s2040_s2 + $0x38] sm:$0xff]   ;;  %v28_v45 = vld [vmem:[%s2041_s1] sm:$0xf] }
   0x7   :  { %v68_v8 = vrot.slane %v1645_v3, %v1652_v7  ;;  %v88_v9 = vrot.slane %v80_v6, %v1652_v7  ;;  %v127_v50 = vrot.slane %v28_v45, %v1710_v42  ;;  %v131_v51 = vrot.slane %v28_v45, %v1713_v43  ;;  %v1475_v20 = vld [vmem:[%s2042_s4] ss:$8 sps:$4 sm:$0xff]  }
   0x8   :  { %1391 = vmatpush3.bf16.msra.mxu0 %v1460_v21  ;;  %v157_v52 = vrot.slane %v28_v45, %v1719_v46  ;;  %v161_v53 = vrot.slane %v28_v45, %v1722_v47  ;;  %v1476_v21 = vld [vmem:[%s2042_s4 + $0x14] ss:$8 sps:$4 sm:$0xff]  }
   0x9   :  { %v69_v10 = vcombine.high %v68_v8, %v68_v8  ;;  %v73_v11 = vsel %vm72_vm0, %v68_v8, 0.0  ;;  %v89_v12 = vcombine.high %v88_v9, %v88_v9  ;;  %v92_v14 = vsel %vm72_vm0, %v88_v9, 0.0  ;;  %1392 = vmatprep.subr.bf16.mxu0 %v1461_v22  ;;  %v1478_v22 = vld [vmem:[%s2042_s4 + $0x10] ss:$8 sps:$4 sm:$0xff]  }
   0xa   :  { %v137_v55 = vrot.slane %v127_v50, %v1710_v42  ;;  %v141_v56 = vrot.slane %v131_v51, %v1710_v42  ;;  %v167_v57 = vrot.slane %v157_v52, %v1719_v46  ;;  %v171_v58 = vrot.slane %v161_v53, %v1719_v46 }
   0xb   :  { %v74_v13 = vsel %vm72_vm0, %v69_v10, 0.0  ;;  %v93_v15 = vsel %vm72_vm0, %v89_v12, 0.0 }
   0xc   :  { %v75_v16 = vadd.f32 %v74_v13, %v73_v11  ;;  %v94_v17 = vadd.f32 %v93_v15, %v92_v14  ;;  %1393 = vmatpush3.bf16.msra.mxu0 %v1462_v23  ;;  %v144_v60 = vcombine.low %v137_v55, %v141_v56  ;;  %v174_v61 = vcombine.low %v167_v57, %v171_v58  ;;  %v1473_v13 = vld [vmem:[%s2042_s4 + $0x4] ss:$8 sps:$4 sm:$0xff]  }
   0xd   :  { %1394 = vmatprep.subr.bf16.mxu0 %v1463_v24  ;;  %477 = vmatprep.subr.bf16.mxu1 %v1473_v13  ;;  %v1479_v23 = vld [vmem:[%s2042_s4 + $0x24] ss:$8 sps:$4 sm:$0xff]   ;;  %v1481_v24 = vld [vmem:[%s2042_s4 + $0x20] ss:$8 sps:$4 sm:$0xff]  }
   0xe   :  { %76 = vadd.xlane.f32.xlu0 %v75_v16  ;;  %v151_v1 = vrot.slane %v144_v60, %v1652_v7  ;;  %v181_v5 = vrot.slane %v174_v61, %v1652_v7  ;;  %478 = vmatpush1.bf16.msra.mxu1 %v1475_v20  ;;  %v1497_v57 = vld [vmem:[%s2044_s5 + $0x40] sm:$0xff]   ;;  %v1500_v60 = vld [vmem:[%s2044_s5 + $0x8] sm:$0xff]   ;;  %v1501_v61 = vld [vmem:[%s2044_s5 + $0x50] sm:$0xff]  }
   0xf   :  { %479 = vmatprep.subr.bf16.mxu1 %v1476_v21  ;;  %v1498_v58 = vld [vmem:[%s2044_s5] sm:$0xff]  }
  0x10   :  { %1395 = vmatpush3.bf16.msra.mxu0 %v1464_v25  ;;  %v1482_v25 = vld [vmem:[%s2042_s4 + $0x34] ss:$8 sps:$4 sm:$0xff]  }
  0x11   :  { %1396 = vmatprep.subr.bf16.mxu0 %v1465_v26  ;;  %v1484_v26 = vld [vmem:[%s2042_s4 + $0x30] ss:$8 sps:$4 sm:$0xff]  }
  0x12   :  { %95 = vadd.xlane.f32.xlu0 %v94_v17  ;;  %480 = vmatpush1.bf16.msra.mxu1 %v1478_v22 }
  0x13   :  { %481 = vmatprep.subr.bf16.mxu1 %v1479_v23 }
  0x14   :  { %1397 = vmatpush3.bf16.msra.mxu0 %v1466_v27  ;;  %v1485_v27 = vld [vmem:[%s2042_s4 + $0x44] ss:$8 sps:$4 sm:$0xff]  }
  0x15   :  { %1398 = vmatprep.subr.bf16.mxu0 %v1467_v28  ;;  %v1487_v28 = vld [vmem:[%s2042_s4 + $0x40] ss:$8 sps:$4 sm:$0xff]  }
  0x16   :  { %482 = vmatpush1.bf16.msra.mxu1 %v1481_v24 }
  0x17   :  { %483 = vmatprep.subr.bf16.mxu1 %v1482_v25 }
  0x18   :  { %1399 = vmatpush3.bf16.msra.mxu0 %v1468_v29  ;;  %v1488_v29 = vld [vmem:[%s2042_s4 + $0x54] ss:$8 sps:$4 sm:$0xff]  }
  0x19   :  { %1400 = vmatprep.subr.bf16.mxu0 %v1469_v30  ;;  %v1601_v30 = vmov 0  }
  0x1a   :  { %484 = vmatpush1.bf16.msra.mxu1 %v1484_v26  ;;  %509 = vmatprep.mubr.bf16.mxu1 %v1601_v30 }
  0x1b   :  { %485 = vmatprep.subr.bf16.mxu1 %v1485_v27 }
  0x1c   :  { %1401 = vmatpush3.bf16.msra.mxu0 %v1470_v31  ;;  %v1490_v31 = vld [vmem:[%s2042_s4 + $0x50] ss:$8 sps:$4 sm:$0xff]  }
  0x1d   :  { %1402 = vmatprep.subr.bf16.mxu0 %v1471_v32  ;;  %v1491_v32 = vld [vmem:[%s2042_s4 + $0x64] ss:$8 sps:$4 sm:$0xff]  }
  0x1e   :  { %486 = vmatpush1.bf16.msra.mxu1 %v1487_v28 }
  0x1f   :  { %487 = vmatprep.subr.bf16.mxu1 %v1488_v29 }
  0x20   :  { %1403 = vmatpush3.bf16.msra.mxu0 %v1472_v33  ;;  %v1493_v33 = vld [vmem:[%s2042_s4 + $0x60] ss:$8 sps:$4 sm:$0xff]  }
  0x21   :  { %1410 = vmatprep.subr.bf16.mxu0 %v1497_v57  ;;  %v1522_v57 = vld [vmem:[%s2042_s4 + $0xb0] ss:$8 sps:$4 sm:$0xff]  }
  0x22   :  { %488 = vmatpush1.bf16.msra.mxu1 %v1490_v31 }
  0x23   :  { %489 = vmatprep.subr.bf16.mxu1 %v1491_v32 }
  0x26   :  { %490 = vmatpush1.bf16.msra.mxu1 %v1493_v33 }
  0x9b   :  { %v77_v34 = vpop.xlane.xlu0 %76 }
  0x9c   :  { %v79_v35 = vmul.f32 0.00390625, %v77_v34  ;;  %v1494_v34 = vld [vmem:[%s2042_s4 + $0x74] ss:$8 sps:$4 sm:$0xff]  }
  0x9d   :  { %491 = vmatprep.subr.bf16.mxu1 %v1494_v34 }
  0x9e   :  { %v98_v37 = vmul.f32 %v79_v35, %v79_v35  ;;  %v108_v59 = vrot.slane %v79_v35, %v107_v54  ;;  %v1496_v35 = vld [vmem:[%s2042_s4 + $0x70] ss:$8 sps:$4 sm:$0xff]  }
  0x9f   :  { %v96_v36 = vpop.xlane.xlu0 %95  ;;  %492 = vmatpush1.bf16.msra.mxu1 %v1496_v35  ;;  %v1513_v35 = vld [vmem:[%s2042_s4 + $0x80] ss:$8 sps:$4 sm:$0xff]  }
  0xa0   :  { %v97_v38 = vmul.f32 0.00390625, %v96_v36  ;;  %v110_v63 = vsub.f32 %v1645_v3, %v108_v59  ;;  %v1499_v59 = vld [vmem:[%s2044_s5 + $0x48] sm:$0xff]  }
  0xa2   :  { %v99_v39 = vsub.f32 %v97_v38, %v98_v37 }
  0xa4   :  { %v100_v44 = vmax.f32 %v99_v39, 0.0 }
  0xa6   :  { %v111_v48 = vadd.f32 1e-05, %v100_v44 }
  0xa8   :  { %1577 = vrsqrt.f32 %v111_v48  ;;  %v1796_v48 = vld [vmem:[%s2043_s3] sm:$0xff] }
  0xa9   :  { %v354_v50 = vrot.slane %v1796_v48, %v1710_v42  ;;  %v359_v53 = vrot.slane %v1796_v48, %v1719_v46  ;;  %v382_v13 = vrot.slane %v1796_v48, %v1713_v43 }
  0xb2   :  { %v1578_v62 = vpop.eup %1577 }
  0xb3   :  { %v120_v0 = vrot.slane %v1578_v62, %v107_v54  ;;  %v1502_v62 = vld [vmem:[%s2044_s5 + $0x10] sm:$0xff]  }
  0xb5   :  { %v122_v2 = vmul.f32 %v120_v0, %v110_v63  ;;  %v1503_v63 = vld [vmem:[%s2044_s5 + $0x58] sm:$0xff]  }
  0xb6   :  { %v1504_v0 = vld [vmem:[%s2044_s5 + $0x18] sm:$0xff]  }
  0xb7   :  { %v153_v6 = vmul.f32 %v151_v1, %v122_v2  ;;  %v1505_v1 = vld [vmem:[%s2044_s5 + $0x60] sm:$0xff]  }
  0xb8   :  { %v1506_v2 = vld [vmem:[%s2044_s5 + $0x20] sm:$0xff]  }
  0xb9   :  { %v183_v8 = vadd.f32 %v181_v5, %v153_v6  ;;  %v1507_v5 = vld [vmem:[%s2044_s5 + $0x68] sm:$0xff]  }
  0xba   :  { %v1508_v6 = vld [vmem:[%s2044_s5 + $0x28] sm:$0xff]  }
  0xbb   :  { %v191_v9 = vrot.slane %v183_v8, %v1652_v7  ;;  %v1509_v8 = vld [vmem:[%s2044_s5 + $0x70] sm:$0xff]  }
  0xbd   :  { %v192_v10 = vcombine.high %v191_v9, %v191_v9  ;;  %v195_v12 = vpack.c.bf16 %v191_v9, %v191_v9  ;;  %v1510_v9 = vld [vmem:[%s2044_s5 + $0x30] sm:$0xff]  }
  0xbf   :  { %v196_v11 = vpack.c.bf16 %v192_v10, %v192_v10  ;;  %v1511_v10 = vld [vmem:[%s2044_s5 + $0x78] sm:$0xff]  }
  0xc1   :  { %325 = vmatprep.mubr.bf16.mxu0 %v196_v11  ;;  %v1512_v11 = vld [vmem:[%s2044_s5 + $0x38] sm:$0xff]  }
  0xc2   :  { %326 = vmatmul.mubr.bf16.vlgmr.msra.gmra.mrb[0].mxu0 %v195_v12  ;;  %v385_v12 = vsub.s32 6, %v1647_v4 }
  0xc3   :  { %1411 = vmatpush3.bf16.msra.mxu0 %v1498_v58  ;;  %v1525_v58 = vld [vmem:[%s2042_s4 + $0xc0] ss:$8 sps:$4 sm:$0xff]  }
  0xc4   :  { %1412 = vmatprep.subr.bf16.mxu0 %v1499_v59  ;;  %v1527_v59 = vld [vmem:[%s2042_s4 + $0xc4] ss:$8 sps:$4 sm:$0xff]  }
  0xc7   :  { %1413 = vmatpush3.bf16.msra.mxu0 %v1500_v60  ;;  %v1530_v60 = vld [vmem:[%s2042_s4 + $0xd4] ss:$8 sps:$4 sm:$0xff]  }
  0xc8   :  { %1414 = vmatprep.subr.bf16.mxu0 %v1501_v61  ;;  %v1528_v61 = vld [vmem:[%s2042_s4 + $0xd0] ss:$8 sps:$4 sm:$0xff]  }
  0xcb   :  { %1415 = vmatpush3.bf16.msra.mxu0 %v1502_v62  ;;  %v1533_v62 = vld [vmem:[%s2042_s4 + $0xe4] ss:$8 sps:$4 sm:$0xff]  }
  0xcc   :  { %1416 = vmatprep.subr.bf16.mxu0 %v1503_v63  ;;  %v1531_v63 = vld [vmem:[%s2042_s4 + $0xe0] ss:$8 sps:$4 sm:$0xff]  }
  0xcf   :  { %1417 = vmatpush3.bf16.msra.mxu0 %v1504_v0  ;;  %v1536_v0 = vld [vmem:[%s2042_s4 + $0xf4] ss:$8 sps:$4 sm:$0xff]  }
  0xd0   :  { %1418 = vmatprep.subr.bf16.mxu0 %v1505_v1  ;;  %v1534_v1 = vld [vmem:[%s2042_s4 + $0xf0] ss:$8 sps:$4 sm:$0xff]  }
  0xd3   :  { %1419 = vmatpush3.bf16.msra.mxu0 %v1506_v2 }
  0xd4   :  { %1420 = vmatprep.subr.bf16.mxu0 %v1507_v5 }
  0xd7   :  { %1421 = vmatpush3.bf16.msra.mxu0 %v1508_v6 }
  0xd8   :  { %1422 = vmatprep.subr.bf16.mxu0 %v1509_v8 }
  0xdb   :  { %1423 = vmatpush3.bf16.msra.mxu0 %v1510_v9 }
  0xdc   :  { %1424 = vmatprep.subr.bf16.mxu0 %v1511_v10 }
  0xdf   :  { %1425 = vmatpush3.bf16.msra.mxu0 %v1512_v11 }
 0x195   :  { %v1404_v3 = vpop.f32.mrb[0].mxu0 }
 0x196   :  { %v1405_v14 = vpop.f32.mrb[1].mxu0 }
 0x197   :  { %v1740_v15 = vadd.f32 %v1405_v14, %v1404_v3  ;;  %v1407_v16 = vpop.f32.mrb[2].mxu0  ;;  %v386_v3 = vrot.slane %v1796_v48, %v385_v12  ;;  %v392_v14 = vrot.slane %v382_v13, %v1713_v43 }
 0x198   :  { %v1408_v17 = vpop.f32.mrb[3].mxu0 }
 0x199   :  { %v334_v18 = vsel %vm72_vm0, %v1740_v15, 0.0  ;;  %v339_v7 = vmul.f32 %v1740_v15, %v1740_v15  ;;  %v396_v16 = vrot.slane %v386_v3, %v1713_v43  ;;  %v1921_v3 = vld [vmem:[%s2043_s3 + $0x8] sm:$0xff] }
 0x19a   :  { %335 = vadd.xlane.f32.xlu1 %v334_v18 }
 0x19b   :  { %v340_v19 = vsel %vm72_vm0, %v339_v7, 0.0 }
 0x19e   :  { %341 = vadd.xlane.f32.xlu1 %v340_v19 }
 0x227   :  { %v336_v36 = vpop.xlane.xlu1 %335 }
 0x228   :  { %v338_v37 = vmul.f32 0.0078125, %v336_v36  ;;  %v1515_v36 = vld [vmem:[%s2042_s4 + $0x84] ss:$8 sps:$4 sm:$0xff]  }
 0x229   :  { %852 = vmatprep.subr.bf16.mxu1 %v1515_v36  ;;  %v1553_v36 = vld [vmem:[%s2045_s6] ss:$8 sps:$4 sm:$0xff]  }
 0x22a   :  { %v344_v39 = vmul.f32 %v338_v37, %v338_v37  ;;  %v347_v49 = vsub.f32 %v1740_v15, %v338_v37 }
 0x22b   :  { %v342_v38 = vpop.xlane.xlu1 %341 }
 0x22c   :  { %v343_v40 = vmul.f32 0.0078125, %v342_v38  ;;  %v569_v38 = vrot.slane %v1796_v48, %v1722_v47  ;;  %v1518_v48 = vld [vmem:[%s2042_s4 + $0x94] ss:$8 sps:$4 sm:$0xff]  }
 0x22e   :  { %v345_v41 = vsub.f32 %v343_v40, %v344_v39 }
 0x230   :  { %v346_v44 = vmax.f32 %v345_v41, 0.0 }
 0x232   :  { %v348_v45 = vadd.f32 1e-05, %v346_v44 }
 0x234   :  { %1579 = vrsqrt.f32 %v348_v45 }
 0x23e   :  { %v1580_v51 = vpop.eup %1579 }
 0x23f   :  { %v350_v52 = vmul.f32 %v1580_v51, %v347_v49 }
 0x241   :  { %v355_v54 = vmul.f32 %v354_v50, %v350_v52 }
 0x243   :  { %v360_v55 = vadd.f32 %v359_v53, %v355_v54  ;;  %v1516_v53 = vld [vmem:[%s2042_s4 + $0x90] ss:$8 sps:$4 sm:$0xff]   ;;  %v1521_v54 = vld [vmem:[%s2042_s4 + $0xa4] ss:$8 sps:$4 sm:$0xff]  }
 0x245   :  { %v377_v56 = vpack.c.bf16 %v360_v55, %v360_v55  ;;  %v1519_v55 = vld [vmem:[%s2042_s4 + $0xa0] ss:$8 sps:$4 sm:$0xff]  }
 0x247   :  { %510 = vmatmul.mubr.bf16.vlgmr.msra.gmra.mrb[0].mxu1 %v377_v56  ;;  %v1524_v56 = vld [vmem:[%s2042_s4 + $0xb4] ss:$8 sps:$4 sm:$0xff]  }
 0x248   :  { %884 = vmatprep.mubr.bf16.mxu1 %v1601_v30  ;;  %853 = vmatpush1.bf16.msra.mxu1 %v1513_v35  ;;  %v1552_v35 = vld [vmem:[%s2044_s5 + $0xb8] sm:$0xff]  }
 0x249   :  { %854 = vmatprep.subr.bf16.mxu1 %v1518_v48  ;;  %v761_v48 = vrot.slane %v1921_v3, %v385_v12 }
 0x24c   :  { %855 = vmatpush1.bf16.msra.mxu1 %v1516_v53 }
 0x24d   :  { %856 = vmatprep.subr.bf16.mxu1 %v1521_v54  ;;  %v771_v54 = vrot.slane %v761_v48, %v1713_v43 }
 0x250   :  { %857 = vmatpush1.bf16.msra.mxu1 %v1519_v55 }
 0x251   :  { %858 = vmatprep.subr.bf16.mxu1 %v1524_v56 }
 0x254   :  { %859 = vmatpush1.bf16.msra.mxu1 %v1522_v57 }
 0x255   :  { %860 = vmatprep.subr.bf16.mxu1 %v1527_v59 }
 0x258   :  { %861 = vmatpush1.bf16.msra.mxu1 %v1525_v58 }
 0x259   :  { %862 = vmatprep.subr.bf16.mxu1 %v1530_v60 }
 0x25c   :  { %863 = vmatpush1.bf16.msra.mxu1 %v1528_v61 }
 0x25d   :  { %864 = vmatprep.subr.bf16.mxu1 %v1533_v62 }
 0x260   :  { %865 = vmatpush1.bf16.msra.mxu1 %v1531_v63 }
 0x261   :  { %866 = vmatprep.subr.bf16.mxu1 %v1536_v0 }
 0x264   :  { %867 = vmatpush1.bf16.msra.mxu1 %v1534_v1 }
 0x31a   :  { %v511_v17 = vpop.f32.mrb[0].mxu1 }
 0x31b   :  { %v512_v18 = vadd.f32 %v511_v17, %v392_v14  ;;  %v513_v7 = vpop.f32.mrb[1].mxu1 }
 0x31c   :  { %v514_v19 = vadd.f32 %v513_v7, %v396_v16  ;;  %v515_v20 = vpop.f32.mrb[2].mxu1  ;;  %v728_v16 = vrot.slane %v1921_v3, %v1710_v42  ;;  %v733_v7 = vrot.slane %v1921_v3, %v1719_v46  ;;  %v1539_v42 = vld [vmem:[%s2044_s5 + $0xc8] sm:$0xff]  }
 0x31d   :  { %v1270_v21 = vmul.f32 -1.442695, %v512_v18  ;;  %v516_v22 = vpop.f32.mrb[3].mxu1  ;;  %v1540_v46 = vld [vmem:[%s2044_s5 + $0x88] sm:$0xff]  }
 0x31e   :  { %v1271_v23 = vmul.f32 -1.442695, %v514_v19  ;;  %v1537_v22 = vld [vmem:[%s2044_s5 + $0xc0] sm:$0xff]  }
 0x31f   :  { %1581 = vpow2.f32 %v1270_v21  ;;  %1432 = vmatprep.subr.bf16.mxu0 %v1537_v22 }
 0x320   :  { %1583 = vpow2.f32 %v1271_v23  ;;  %v1538_v23 = vld [vmem:[%s2044_s5 + $0x80] sm:$0xff]  }
 0x329   :  { %v1582_v24 = vpop.eup %1581 }
 0x32a   :  { %v1584_v25 = vpop.eup %1583  ;;  %v524_v26 = vadd.f32 1.0, %v1582_v24  ;;  %v1542_v24 = vld [vmem:[%s2044_s5 + $0x90] sm:$0xff]  }
 0x32b   :  { %v525_v27 = vadd.f32 1.0, %v1584_v25  ;;  %v1543_v25 = vld [vmem:[%s2044_s5 + $0xd8] sm:$0xff]  }
 0x32c   :  { %1585 = vrcp.f32 %v524_v26  ;;  %v1544_v26 = vld [vmem:[%s2044_s5 + $0x98] sm:$0xff]  }
 0x32d   :  { %1587 = vrcp.f32 %v525_v27  ;;  %v1545_v27 = vld [vmem:[%s2044_s5 + $0xe0] sm:$0xff]  }
 0x336   :  { %v1586_v28 = vpop.eup %1585 }
 0x337   :  { %v1588_v29 = vpop.eup %1587  ;;  %v530_v31 = vmul.f32 %v1586_v28, %v512_v18  ;;  %v1546_v28 = vld [vmem:[%s2044_s5 + $0xa0] sm:$0xff]  }
 0x338   :  { %v531_v32 = vmul.f32 %v1588_v29, %v514_v19  ;;  %v1547_v29 = vld [vmem:[%s2044_s5 + $0xe8] sm:$0xff]  }
 0x339   :  { %v564_v34 = vpack.c.bf16 %v530_v31, %v530_v31  ;;  %v1548_v31 = vld [vmem:[%s2044_s5 + $0xa8] sm:$0xff]  }
 0x33a   :  { %v565_v33 = vpack.c.bf16 %v531_v32, %v531_v32  ;;  %v1549_v32 = vld [vmem:[%s2044_s5 + $0xf0] sm:$0xff]  }
 0x33c   :  { %698 = vmatprep.mubr.bf16.mxu0 %v565_v33  ;;  %v1550_v33 = vld [vmem:[%s2044_s5 + $0xb0] sm:$0xff]  }
 0x33d   :  { %699 = vmatmul.mubr.bf16.vlgmr.msra.gmra.mrb[4].mxu0 %v564_v34  ;;  %v1551_v34 = vld [vmem:[%s2044_s5 + $0xf8] sm:$0xff]  }
 0x33e   :  { %1433 = vmatpush3.bf16.msra.mxu0 %v1538_v23 }
 0x33f   :  { %1434 = vmatprep.subr.bf16.mxu0 %v1539_v42 }
 0x342   :  { %1435 = vmatpush3.bf16.msra.mxu0 %v1540_v46 }
 0x410   :  { %v1426_v37 = vpop.f32.mrb[4].mxu0 }
 0x411   :  { %v1427_v39 = vpop.f32.mrb[5].mxu0 }
 0x412   :  { %v1428_v40 = vadd.f32 %v1427_v39, %v1426_v37  ;;  %v1429_v41 = vpop.f32.mrb[6].mxu0  ;;  %v1555_v37 = vld [vmem:[%s2045_s6 + $0x4] ss:$8 sps:$4 sm:$0xff]   ;;  %v1556_v39 = vld [vmem:[%s2045_s6 + $0x10] ss:$8 sps:$4 sm:$0xff]  }
 0x413   :  { %v1430_v44 = vpop.f32.mrb[7].mxu0  ;;  %1181 = vmatprep.subr.bf16.mxu1 %v1555_v37  ;;  %v1559_v41 = vld [vmem:[%s2045_s6 + $0x20] ss:$8 sps:$4 sm:$0xff]  }
 0x414   :  { %v701_v45 = vadd.f32 %v1428_v40, %v569_v38  ;;  %v1558_v38 = vld [vmem:[%s2045_s6 + $0x14] ss:$8 sps:$4 sm:$0xff]   ;;  %v1561_v40 = vld [vmem:[%s2045_s6 + $0x24] ss:$8 sps:$4 sm:$0xff]  }
 0x415   :  { %v1564_v44 = vld [vmem:[%s2045_s6 + $0x34] ss:$8 sps:$4 sm:$0xff]  }
 0x416   :  { %v1869_v49 = vadd.f32 %v1740_v15, %v701_v45  ;;  %v1562_v45 = vld [vmem:[%s2045_s6 + $0x30] ss:$8 sps:$4 sm:$0xff]  }
 0x418   :  { %v709_v50 = vsel %vm72_vm0, %v1869_v49, 0.0  ;;  %v713_v51 = vmul.f32 %v1869_v49, %v1869_v49 }
 0x419   :  { %710 = vadd.xlane.f32.xlu0 %v709_v50  ;;  %v1567_v50 = vld [vmem:[%s2045_s6 + $0x44] ss:$8 sps:$4 sm:$0xff]  }
 0x41a   :  { %v714_v52 = vsel %vm72_vm0, %v713_v51, 0.0  ;;  %v1565_v51 = vld [vmem:[%s2045_s6 + $0x40] ss:$8 sps:$4 sm:$0xff]  }
 0x41b   :  { %715 = vadd.xlane.f32.xlu1 %v714_v52  ;;  %v757_v52 = vrot.slane %v1921_v3, %v1713_v43 }
 0x41d   :  { %v767_v53 = vrot.slane %v757_v52, %v1713_v43 }
 0x4a6   :  { %v711_v2 = vpop.xlane.xlu0 %710 }
 0x4a7   :  { %v712_v5 = vmul.f32 0.0078125, %v711_v2 }
 0x4a8   :  { %v716_v6 = vpop.xlane.xlu1 %715 }
 0x4a9   :  { %v718_v8 = vmul.f32 %v712_v5, %v712_v5  ;;  %v717_v9 = vmul.f32 0.0078125, %v716_v6  ;;  %v721_v14 = vsub.f32 %v1869_v49, %v712_v5 }
 0x4ab   :  { %v719_v10 = vsub.f32 %v717_v9, %v718_v8  ;;  %v1570_v9 = vld [vmem:[%s2045_s6 + $0x54] ss:$8 sps:$4 sm:$0xff]  }
 0x4ad   :  { %v720_v11 = vmax.f32 %v719_v10, 0.0  ;;  %v1568_v10 = vld [vmem:[%s2045_s6 + $0x50] ss:$8 sps:$4 sm:$0xff]  }
 0x4af   :  { %v722_v13 = vadd.f32 1e-05, %v720_v11  ;;  %v1573_v11 = vld [vmem:[%s2045_s6 + $0x64] ss:$8 sps:$4 sm:$0xff]  }
 0x4b1   :  { %1589 = vrsqrt.f32 %v722_v13  ;;  %v1571_v13 = vld [vmem:[%s2045_s6 + $0x60] ss:$8 sps:$4 sm:$0xff]  }
 0x4bb   :  { %v1590_v17 = vpop.eup %1589 }
 0x4bc   :  { %v724_v18 = vmul.f32 %v1590_v17, %v721_v14  ;;  %v1576_v14 = vld [vmem:[%s2045_s6 + $0x74] ss:$8 sps:$4 sm:$0xff]  }
 0x4be   :  { %v729_v19 = vmul.f32 %v728_v16, %v724_v18  ;;  %v1574_v16 = vld [vmem:[%s2045_s6 + $0x70] ss:$8 sps:$4 sm:$0xff]   ;;  %v945_v18 = vrot.slane %v1921_v3, %v1722_v47 }
 0x4c0   :  { %v734_v20 = vadd.f32 %v733_v7, %v729_v19 }
 0x4c2   :  { %v752_v21 = vpack.c.bf16 %v734_v20, %v734_v20 }
 0x4c4   :  { %885 = vmatmul.mubr.bf16.vlgmr.msra.gmra.mrb[4].mxu1 %v752_v21 }
 0x4c5   :  { %1213 = vmatprep.mubr.bf16.mxu1 %v1601_v30  ;;  %v1541_v30 = vld [vmem:[%s2044_s5 + $0xd0] sm:$0xff]   ;;  %1182 = vmatpush1.bf16.msra.mxu1 %v1553_v36 }
 0x4c6   :  { %1436 = vmatprep.subr.bf16.mxu0 %v1541_v30  ;;  %1183 = vmatprep.subr.bf16.mxu1 %v1558_v38 }
 0x4c7   :  { %1437 = vmatpush3.bf16.msra.mxu0 %v1542_v24 }
 0x4c8   :  { %1438 = vmatprep.subr.bf16.mxu0 %v1543_v25 }
 0x4c9   :  { %1184 = vmatpush1.bf16.msra.mxu1 %v1556_v39 }
 0x4ca   :  { %1185 = vmatprep.subr.bf16.mxu1 %v1561_v40 }
 0x4cb   :  { %1439 = vmatpush3.bf16.msra.mxu0 %v1544_v26 }
 0x4cc   :  { %1440 = vmatprep.subr.bf16.mxu0 %v1545_v27 }
 0x4cd   :  { %1186 = vmatpush1.bf16.msra.mxu1 %v1559_v41 }
 0x4ce   :  { %1187 = vmatprep.subr.bf16.mxu1 %v1564_v44 }
 0x4cf   :  { %1441 = vmatpush3.bf16.msra.mxu0 %v1546_v28 }
 0x4d0   :  { %1442 = vmatprep.subr.bf16.mxu0 %v1547_v29 }
 0x4d1   :  { %1188 = vmatpush1.bf16.msra.mxu1 %v1562_v45 }
 0x4d2   :  { %1189 = vmatprep.subr.bf16.mxu1 %v1567_v50 }
 0x4d3   :  { %1443 = vmatpush3.bf16.msra.mxu0 %v1548_v31 }
 0x4d4   :  { %1444 = vmatprep.subr.bf16.mxu0 %v1549_v32 }
 0x4d5   :  { %1190 = vmatpush1.bf16.msra.mxu1 %v1565_v51 }
 0x4d6   :  { %1191 = vmatprep.subr.bf16.mxu1 %v1570_v9 }
 0x4d7   :  { %1445 = vmatpush3.bf16.msra.mxu0 %v1550_v33 }
 0x4d8   :  { %1446 = vmatprep.subr.bf16.mxu0 %v1551_v34 }
 0x4d9   :  { %1192 = vmatpush1.bf16.msra.mxu1 %v1568_v10 }
 0x4da   :  { %1193 = vmatprep.subr.bf16.mxu1 %v1573_v11 }
 0x4db   :  { %1447 = vmatpush3.bf16.msra.mxu0 %v1552_v35 }
 0x4dd   :  { %1194 = vmatpush1.bf16.msra.mxu1 %v1571_v13 }
 0x4de   :  { %1195 = vmatprep.subr.bf16.mxu1 %v1576_v14 }
 0x4e1   :  { %1196 = vmatpush1.bf16.msra.mxu1 %v1574_v16 }
 0x597   :  { %v886_v55 = vpop.f32.mrb[4].mxu1 }
 0x598   :  { %v887_v56 = vadd.f32 %v886_v55, %v767_v53  ;;  %v888_v57 = vpop.f32.mrb[5].mxu1 }
 0x599   :  { %v889_v58 = vadd.f32 %v888_v57, %v771_v54  ;;  %v890_v59 = vpop.f32.mrb[6].mxu1 }
 0x59a   :  { %v1321_v60 = vmul.f32 -1.442695, %v887_v56  ;;  %v891_v61 = vpop.f32.mrb[7].mxu1 }
 0x59b   :  { %v1322_v62 = vmul.f32 -1.442695, %v889_v58 }
 0x59c   :  { %1591 = vpow2.f32 %v1321_v60 }
 0x59d   :  { %1593 = vpow2.f32 %v1322_v62 }
 0x5a6   :  { %v1592_v63 = vpop.eup %1591 }
 0x5a7   :  { %v1594_v0 = vpop.eup %1593  ;;  %v899_v1 = vadd.f32 1.0, %v1592_v63 }
 0x5a8   :  { %v900_v4 = vadd.f32 1.0, %v1594_v0 }
 0x5a9   :  { %1595 = vrcp.f32 %v899_v1 }
 0x5aa   :  { %1597 = vrcp.f32 %v900_v4 }
 0x5b3   :  { %v1596_v12 = vpop.eup %1595 }
 0x5b4   :  { %v1598_v2 = vpop.eup %1597  ;;  %v905_v5 = vmul.f32 %v1596_v12, %v887_v56 }
 0x5b5   :  { %v906_v43 = vmul.f32 %v1598_v2, %v889_v58 }
 0x5b6   :  { %v940_v8 = vpack.c.bf16 %v905_v5, %v905_v5 }
 0x5b7   :  { %v941_v6 = vpack.c.bf16 %v906_v43, %v906_v43 }
 0x5b9   :  { %1074 = vmatprep.mubr.bf16.mxu0 %v941_v6 }
 0x5ba   :  { %1075 = vmatmul.mubr.bf16.vlgmr.msra.gmra.mrb[8].mxu0 %v940_v8 }
 0x68d   :  { %v1448_v17 = vpop.f32.mrb[8].mxu0 }
 0x68e   :  { %v1449_v7 = vpop.f32.mrb[9].mxu0 }
 0x68f   :  { %v1450_v19 = vadd.f32 %v1449_v7, %v1448_v17  ;;  %v1451_v20 = vpop.f32.mrb[10].mxu0 }
 0x690   :  { %v1452_v21 = vpop.f32.mrb[11].mxu0 }
 0x691   :  { %v1077_v22 = vadd.f32 %v1450_v19, %v945_v18 }
 0x693   :  { %v1082_v23 = vadd.f32 %v1077_v22, %v1869_v49 }
 0x695   :  { %v1083_v42 = vadd.f32 %v1740_v15, %v1082_v23 }
 0x697   :  { %v1100_v46 = vpack.c.bf16 %v1083_v42, %v1083_v42 }
 0x699   :  { %1214 = vmatmul.mubr.bf16.vlgmr.msra.gmra.mrb[8].mxu1 %v1100_v46 }
 0x76c   :  { %v1215_v30 = vpop.f32.mrb[8].mxu1 }
 0x76d   :  { %v1217_v24 = vpop.f32.mrb[9].mxu1 }
 0x76e   :  { %v1224_v25 = vcombine.low %v1215_v30, %v1217_v24  ;;  %v1219_v26 = vpop.f32.mrb[10].mxu1 }
 0x76f   :  { %v1220_v27 = vpop.f32.mrb[11].mxu1 }
 0x770   :  { %1387 = vst.sshfl [vmem:[%s2046_s7] sm:$0x33 pattern:$0x76325410] %v1224_v25 }

// kernel: _lambda_.11
= control target key start
LH: loop header
LB: loop body
LE: loop exit
PB: predicated region body
PF: predicated region fallthrough
CT: control target
= control target key end

     0   :  { %vm30_vm0 = vcmask 523264   ;;  %v48_v11 = vlaneseq  ;;  %v802_v27 = vmov 0.0   ;;  %vm803_vm1 = vmmov 0   ;;  %s1031_s0 = inlined_call_operand.vmem [shape: f32[8,64], index: 0, kind: input, shape index: {}]   ;;  %s1032_s2 = inlined_call_operand.vmem [shape: f32[2,64], index: 2, kind: input, shape index: {}]   ;;  %s1033_s4 = inlined_call_operand.vmem [shape: bf16[2,64,128], index: 4, kind: input, shape index: {}]   ;;  %s1034_s3 = inlined_call_operand.vmem [shape: f32[2,4,128], index: 3, kind: input, shape index: {}]   ;;  %s1035_s5 = inlined_call_operand.vmem [shape: bf16[2,128,64], index: 5, kind: input, shape index: {}]   ;;  %s1036_s6 = inlined_call_operand.vmem [shape: bf16[64,128], index: 6, kind: input, shape index: {}]   ;;  %s1037_s1 = inlined_call_operand.vmem [shape: f32[8,64], index: 1, kind: input, shape index: {}]   ;;  %s1038_s7 = inlined_call_operand.vmem [shape: f32[8,128], index: 7, kind: output, shape index: {}]  }
   0x1   :  { %v27_v0 = vld [vmem:[%s1031_s0] sm:$0xff]  ;;  %682 = vmatprep.subr.bf16.mxu0 %v802_v27  ;;  %690 = vmatprep.mubr.msk.bf16.mxu0 %vm803_vm1, %v802_v27  ;;  %v761_v29 = vld [vmem:[%s1033_s4 + $0x8] sm:$0xff]   ;;  %v762_v30 = vld [vmem:[%s1033_s4 + $0x10] sm:$0xff]  }
   0x2   :  { %v31_v1 = vsel %vm30_vm0, %v27_v0, 0.0  ;;  %v36_v2 = vmul.f32 %v27_v0, %v27_v0  ;;  %v849_v13 = vshrl.u32 %v48_v11, 7  ;;  %v29_v15 = vld [vmem:[%s1032_s2] sm:$0x3]  ;;  %694 = vmatprep.subr.bf16.mxu1 %v802_v27  ;;  %710 = vmatprep.mubr.msk.bf16.mxu1 %vm803_vm1, %v802_v27  ;;  %v763_v31 = vld [vmem:[%s1033_s4 + $0x18] sm:$0xff]   ;;  %v765_v50 = vld [vmem:[%s1035_s5 + $0x8] sm:$0xff]  }
   0x3   :  { %32 = vadd.xlane.f32.xlu0 %v31_v1  ;;  %v760_v28 = vld [vmem:[%s1033_s4] sm:$0xff]   ;;  %v766_v51 = vld [vmem:[%s1035_s5 + $0x10] sm:$0xff]   ;;  %v767_v52 = vld [vmem:[%s1035_s5 + $0x18] sm:$0xff]  }
   0x4   :  { %v37_v3 = vsel %vm30_vm0, %v36_v2, 0.0  ;;  %v852_v14 = vsub.s32 0, %v849_v13  ;;  %v858_v16 = vsub.s32 1, %v849_v13  ;;  %683 = vmatpush3.bf16.msra.mxu0 %v760_v28  ;;  %v58_v40 = vld [vmem:[%s1034_s3] sm:$0xf]  ;;  %v769_v54 = vld [vmem:[%s1035_s5 + $0x28] sm:$0xff]  }
   0x5   :  { %684 = vmatprep.subr.bf16.mxu0 %v802_v27  ;;  %v764_v49 = vld [vmem:[%s1035_s5] sm:$0xff]   ;;  %v770_v55 = vld [vmem:[%s1035_s5 + $0x30] sm:$0xff]   ;;  %v771_v56 = vld [vmem:[%s1035_s5 + $0x38] sm:$0xff]   ;;  %v96_v57 = vsub.s32 2, %v849_v13 }
   0x6   :  { %v51_v18 = vrot.slane %v29_v15, %v852_v14  ;;  %v56_v21 = vrot.slane %v29_v15, %v858_v16  ;;  %v78_v42 = vrot.slane %v58_v40, %v852_v14  ;;  %v83_v45 = vrot.slane %v58_v40, %v858_v16  ;;  %695 = vmatpush3.bf16.msra.mxu1 %v764_v49  ;;  %v768_v53 = vld [vmem:[%s1035_s5 + $0x20] sm:$0xff]   ;;  %v785_v49 = vld [vmem:[%s1036_s6 + $0x8] sm:$0xff]  }
   0x7   :  { %38 = vadd.xlane.f32.xlu0 %v37_v3  ;;  %696 = vmatprep.subr.bf16.mxu1 %v802_v27  ;;  %v97_v58 = vrot.slane %v58_v40, %v96_v57 }
   0x8   :  { %685 = vmatpush3.bf16.msra.mxu0 %v761_v29 }
   0x9   :  { %686 = vmatprep.subr.bf16.mxu0 %v802_v27 }
   0xa   :  { %697 = vmatpush3.bf16.msra.mxu1 %v765_v50 }
   0xb   :  { %698 = vmatprep.subr.bf16.mxu1 %v802_v27 }
   0xc   :  { %687 = vmatpush3.bf16.msra.mxu0 %v762_v30 }
   0xd   :  { %688 = vmatprep.subr.bf16.mxu0 %v802_v27 }
   0xe   :  { %699 = vmatpush3.bf16.msra.mxu1 %v766_v51 }
   0xf   :  { %700 = vmatprep.subr.bf16.mxu1 %v802_v27 }
  0x10   :  { %689 = vmatpush3.bf16.msra.mxu0 %v763_v31 }
  0x11   :  { %714 = vmatprep.subr.bf16.mxu0 %v802_v27 }
  0x12   :  { %701 = vmatpush3.bf16.msra.mxu1 %v767_v52 }
  0x13   :  { %702 = vmatprep.subr.bf16.mxu1 %v802_v27 }
  0x16   :  { %703 = vmatpush3.bf16.msra.mxu1 %v768_v53 }
  0x17   :  { %704 = vmatprep.subr.bf16.mxu1 %v802_v27 }
  0x1a   :  { %705 = vmatpush3.bf16.msra.mxu1 %v769_v54 }
  0x1b   :  { %706 = vmatprep.subr.bf16.mxu1 %v802_v27 }
  0x1e   :  { %707 = vmatpush3.bf16.msra.mxu1 %v770_v55 }
  0x1f   :  { %708 = vmatprep.subr.bf16.mxu1 %v802_v27 }
  0x22   :  { %709 = vmatpush3.bf16.msra.mxu1 %v771_v56 }
  0x23   :  { %746 = vmatprep.subr.bf16.mxu1 %v802_v27 }
  0x90   :  { %v33_v4 = vpop.xlane.xlu0 %32 }
  0x91   :  { %v35_v5 = vmul.f32 0.015625, %v33_v4 }
  0x93   :  { %v41_v7 = vmul.f32 %v35_v5, %v35_v5  ;;  %v44_v17 = vsub.f32 %v27_v0, %v35_v5 }
  0x94   :  { %v39_v6 = vpop.xlane.xlu0 %38 }
  0x95   :  { %v40_v8 = vmul.f32 0.015625, %v39_v6  ;;  %v191_v6 = vsub.s32 3, %v849_v13 }
  0x97   :  { %v42_v9 = vsub.f32 %v40_v8, %v41_v7  ;;  %v192_v7 = vrot.slane %v58_v40, %v191_v6 }
  0x99   :  { %v43_v10 = vmax.f32 %v42_v9, 0.0 }
  0x9b   :  { %v45_v12 = vadd.f32 1e-05, %v43_v10 }
  0x9d   :  { %788 = vrsqrt.f32 %v45_v12 }
  0xa7   :  { %v789_v19 = vpop.eup %788 }
  0xa8   :  { %v47_v20 = vmul.f32 %v789_v19, %v44_v17 }
  0xaa   :  { %v52_v22 = vmul.f32 %v51_v18, %v47_v20  ;;  %v772_v20 = vld [vmem:[%s1033_s4 + $0x20] sm:$0xff]  }
  0xac   :  { %v862_v23 = vadd.f32 %v56_v21, %v52_v22  ;;  %v773_v21 = vld [vmem:[%s1033_s4 + $0x28] sm:$0xff]   ;;  %v774_v22 = vld [vmem:[%s1033_s4 + $0x30] sm:$0xff]  }
  0xae   :  { %v59_v24 = vsel %vm30_vm0, %v862_v23, 0.0  ;;  %v63_v25 = vmul.f32 %v862_v23, %v862_v23 }
  0xaf   :  { %60 = vadd.xlane.f32.xlu1 %v59_v24 }
  0xb0   :  { %v64_v26 = vsel %vm30_vm0, %v63_v25, 0.0 }
  0xb3   :  { %65 = vadd.xlane.f32.xlu1 %v64_v26 }
 0x13c   :  { %v61_v32 = vpop.xlane.xlu1 %60 }
 0x13d   :  { %v62_v33 = vmul.f32 0.015625, %v61_v32 }
 0x13f   :  { %v68_v35 = vmul.f32 %v62_v33, %v62_v33  ;;  %v71_v41 = vsub.f32 %v862_v23, %v62_v33  ;;  %v605_v33 = vld [vmem:[%s1034_s3 + $0x4] sm:$0xf] }
 0x140   :  { %v66_v34 = vpop.xlane.xlu1 %65  ;;  %v323_v50 = vrot.slane %v605_v33, %v96_v57  ;;  %v787_v57 = vld [vmem:[%s1036_s6 + $0x18] sm:$0xff]  }
 0x141   :  { %v67_v36 = vmul.f32 0.015625, %v66_v34 }
 0x143   :  { %v69_v37 = vsub.f32 %v67_v36, %v68_v35  ;;  %v303_v35 = vrot.slane %v605_v33, %v852_v14  ;;  %v777_v14 = vld [vmem:[%s1035_s5 + $0x48] sm:$0xff]  }
 0x145   :  { %v70_v38 = vmax.f32 %v69_v37, 0.0 }
 0x147   :  { %v72_v39 = vadd.f32 1e-05, %v70_v38  ;;  %v308_v38 = vrot.slane %v605_v33, %v858_v16  ;;  %v778_v16 = vld [vmem:[%s1035_s5 + $0x50] sm:$0xff]  }
 0x149   :  { %790 = vrsqrt.f32 %v72_v39 }
 0x153   :  { %v791_v43 = vpop.eup %790 }
 0x154   :  { %v74_v44 = vmul.f32 %v791_v43, %v71_v41  ;;  %v779_v43 = vld [vmem:[%s1035_s5 + $0x58] sm:$0xff]  }
 0x156   :  { %v79_v46 = vmul.f32 %v78_v42, %v74_v44  ;;  %v776_v42 = vld [vmem:[%s1035_s5 + $0x40] sm:$0xff]  }
 0x157   :  { %v780_v44 = vld [vmem:[%s1035_s5 + $0x60] sm:$0xff]  }
 0x158   :  { %v84_v47 = vadd.f32 %v83_v45, %v79_v46  ;;  %v781_v45 = vld [vmem:[%s1035_s5 + $0x68] sm:$0xff]   ;;  %v782_v46 = vld [vmem:[%s1035_s5 + $0x70] sm:$0xff]  }
 0x15a   :  { %v93_v48 = vpack.c.bf16 %v84_v47, %v84_v47  ;;  %v783_v47 = vld [vmem:[%s1035_s5 + $0x78] sm:$0xff]  }
 0x15c   :  { %691 = vmatmul.mubr.msk.bf16.vlgmr.msra.gmra.mrb[0].mxu0 %vm30_vm0, %v93_v48  ;;  %v784_v48 = vld [vmem:[%s1036_s6] sm:$0xff]  }
 0x15d   :  { %722 = vmatprep.mubr.msk.bf16.mxu0 %vm803_vm1, %v802_v27  ;;  %715 = vmatpush3.bf16.msra.mxu0 %v772_v20 }
 0x15e   :  { %716 = vmatprep.subr.bf16.mxu0 %v802_v27 }
 0x161   :  { %717 = vmatpush3.bf16.msra.mxu0 %v773_v21 }
 0x162   :  { %718 = vmatprep.subr.bf16.mxu0 %v802_v27 }
 0x165   :  { %719 = vmatpush3.bf16.msra.mxu0 %v774_v22 }
 0x166   :  { %720 = vmatprep.subr.bf16.mxu0 %v802_v27 }
 0x22f   :  { %v159_v59 = vpop.f32.mrb[0].mxu0 }
 0x230   :  { %v160_v60 = vadd.f32 %v159_v59, %v97_v58  ;;  %v692_v61 = vpop.f32.mrb[1].mxu0 }
 0x231   :  { %v162_v62 = vpop.f32.mrb[2].mxu0 }
 0x232   :  { %v596_v63 = vmul.f32 -1.442695, %v160_v60  ;;  %v693_v0 = vpop.f32.mrb[3].mxu0 }
 0x233   :  { %v419_v0 = vrot.slane %v605_v33, %v191_v6 }
 0x234   :  { %792 = vpow2.f32 %v596_v63  ;;  %v786_v63 = vld [vmem:[%s1036_s6 + $0x10] sm:$0xff]  }
 0x23e   :  { %v793_v1 = vpop.eup %792 }
 0x23f   :  { %v168_v2 = vadd.f32 1.0, %v793_v1 }
 0x241   :  { %794 = vrcp.f32 %v168_v2 }
 0x24b   :  { %v795_v3 = vpop.eup %794 }
 0x24c   :  { %v171_v4 = vmul.f32 %v795_v3, %v160_v60 }
 0x24e   :  { %v188_v5 = vpack.c.bf16 %v171_v4, %v171_v4  ;;  %v28_v4 = vld [vmem:[%s1037_s1] sm:$0xff] }
 0x250   :  { %711 = vmatmul.mubr.bf16.vlgmr.msra.gmra.mrb[0].mxu1 %v188_v5 }
 0x251   :  { %754 = vmatprep.mubr.msk.bf16.mxu1 %vm803_vm1, %v802_v27  ;;  %747 = vmatpush3.bf16.msra.mxu1 %v784_v48 }
 0x252   :  { %748 = vmatprep.subr.bf16.mxu1 %v802_v27 }
 0x255   :  { %749 = vmatpush3.bf16.msra.mxu1 %v785_v49 }
 0x256   :  { %750 = vmatprep.subr.bf16.mxu1 %v802_v27 }
 0x259   :  { %751 = vmatpush3.bf16.msra.mxu1 %v786_v63 }
 0x25a   :  { %752 = vmatprep.subr.bf16.mxu1 %v802_v27 }
 0x25d   :  { %753 = vmatpush3.bf16.msra.mxu1 %v787_v57 }
 0x323   :  { %v275_v8 = vpop.f32.mrb[0].mxu1 }
 0x324   :  { %v276_v9 = vadd.f32 %v275_v8, %v192_v7  ;;  %v712_v10 = vpop.f32.mrb[1].mxu1 }
 0x325   :  { %v278_v11 = vpop.f32.mrb[2].mxu1 }
 0x326   :  { %v941_v12 = vadd.f32 %v276_v9, %v862_v23  ;;  %v713_v15 = vpop.f32.mrb[3].mxu1  ;;  %v775_v23 = vld [vmem:[%s1033_s4 + $0x38] sm:$0xff]  }
 0x327   :  { %721 = vmatpush3.bf16.msra.mxu0 %v775_v23 }
 0x328   :  { %v284_v17 = vsel %vm30_vm0, %v941_v12, 0.0  ;;  %v288_v18 = vmul.f32 %v941_v12, %v941_v12  ;;  %726 = vmatprep.subr.bf16.mxu0 %v802_v27 }
 0x329   :  { %285 = vadd.xlane.f32.xlu0 %v284_v17 }
 0x32a   :  { %v289_v19 = vsel %vm30_vm0, %v288_v18, 0.0 }
 0x32b   :  { %290 = vadd.xlane.f32.xlu1 %v289_v19 }
 0x3b6   :  { %v286_v24 = vpop.xlane.xlu0 %285 }
 0x3b7   :  { %v287_v25 = vmul.f32 0.015625, %v286_v24 }
 0x3b8   :  { %v291_v26 = vpop.xlane.xlu1 %290 }
 0x3b9   :  { %v293_v28 = vmul.f32 %v287_v25, %v287_v25  ;;  %v292_v29 = vmul.f32 0.015625, %v291_v26  ;;  %v296_v34 = vsub.f32 %v941_v12, %v287_v25 }
 0x3bb   :  { %v294_v30 = vsub.f32 %v292_v29, %v293_v28 }
 0x3bd   :  { %v295_v31 = vmax.f32 %v294_v30, 0.0 }
 0x3bf   :  { %v297_v32 = vadd.f32 1e-05, %v295_v31 }
 0x3c1   :  { %796 = vrsqrt.f32 %v297_v32 }
 0x3cb   :  { %v797_v36 = vpop.eup %796 }
 0x3cc   :  { %v299_v37 = vmul.f32 %v797_v36, %v296_v34 }
 0x3ce   :  { %v304_v39 = vmul.f32 %v303_v35, %v299_v37 }
 0x3d0   :  { %v309_v40 = vadd.f32 %v308_v38, %v304_v39 }
 0x3d2   :  { %v319_v41 = vpack.c.bf16 %v309_v40, %v309_v40 }
 0x3d4   :  { %723 = vmatmul.mubr.msk.bf16.vlgmr.msra.gmra.mrb[4].mxu0 %vm30_vm0, %v319_v41 }
 0x3d5   :  { %742 = vmatprep.mubr.msk.bf16.mxu0 %vm803_vm1, %v802_v27  ;;  %727 = vmatpush3.bf16.msra.mxu0 %v776_v42 }
 0x3d6   :  { %728 = vmatprep.subr.bf16.mxu0 %v802_v27 }
 0x3d9   :  { %729 = vmatpush3.bf16.msra.mxu0 %v777_v14 }
 0x3da   :  { %730 = vmatprep.subr.bf16.mxu0 %v802_v27 }
 0x3dd   :  { %731 = vmatpush3.bf16.msra.mxu0 %v778_v16 }
 0x3de   :  { %732 = vmatprep.subr.bf16.mxu0 %v802_v27 }
 0x3e1   :  { %733 = vmatpush3.bf16.msra.mxu0 %v779_v43 }
 0x3e2   :  { %734 = vmatprep.subr.bf16.mxu0 %v802_v27 }
 0x3e5   :  { %735 = vmatpush3.bf16.msra.mxu0 %v780_v44 }
 0x3e6   :  { %736 = vmatprep.subr.bf16.mxu0 %v802_v27 }
 0x3e9   :  { %737 = vmatpush3.bf16.msra.mxu0 %v781_v45 }
 0x3ea   :  { %738 = vmatprep.subr.bf16.mxu0 %v802_v27 }
 0x3ed   :  { %739 = vmatpush3.bf16.msra.mxu0 %v782_v46 }
 0x3ee   :  { %740 = vmatprep.subr.bf16.mxu0 %v802_v27 }
 0x3f1   :  { %741 = vmatpush3.bf16.msra.mxu0 %v783_v47 }
 0x4a7   :  { %v385_v51 = vpop.f32.mrb[4].mxu0 }
 0x4a8   :  { %v386_v52 = vadd.f32 %v385_v51, %v323_v50  ;;  %v724_v53 = vpop.f32.mrb[5].mxu0 }
 0x4a9   :  { %v388_v54 = vpop.f32.mrb[6].mxu0 }
 0x4aa   :  { %v619_v55 = vmul.f32 -1.442695, %v386_v52  ;;  %v725_v56 = vpop.f32.mrb[7].mxu0 }
 0x4ac   :  { %798 = vpow2.f32 %v619_v55 }
 0x4b6   :  { %v799_v58 = vpop.eup %798 }
 0x4b7   :  { %v394_v59 = vadd.f32 1.0, %v799_v58 }
 0x4b9   :  { %800 = vrcp.f32 %v394_v59 }
 0x4c3   :  { %v801_v60 = vpop.eup %800 }
 0x4c4   :  { %v397_v61 = vmul.f32 %v801_v60, %v386_v52 }
 0x4c6   :  { %v415_v62 = vpack.c.bf16 %v397_v61, %v397_v61 }
 0x4c8   :  { %743 = vmatmul.mubr.bf16.vlgmr.msra.gmra.mrb[8].mxu0 %v415_v62 }
 0x59b   :  { %v502_v1 = vpop.f32.mrb[8].mxu0 }
 0x59c   :  { %v503_v2 = vadd.f32 %v502_v1, %v419_v0  ;;  %v744_v3 = vpop.f32.mrb[9].mxu0 }
 0x59d   :  { %v505_v5 = vpop.f32.mrb[10].mxu0 }
 0x59e   :  { %v508_v7 = vadd.f32 %v503_v2, %v941_v12  ;;  %v745_v8 = vpop.f32.mrb[11].mxu0 }
 0x5a0   :  { %v509_v27 = vadd.f32 %v508_v7, %v28_v4 }
 0x5a2   :  { %v518_v9 = vpack.c.bf16 %v509_v27, %v509_v27 }
 0x5a4   :  { %755 = vmatmul.mubr.msk.bf16.vlgmr.msra.gmra.mrb[4].mxu1 %vm30_vm0, %v518_v9 }
 0x677   :  { %v580_v10 = vpop.f32.mrb[4].mxu1 }
 0x678   :  { %586 = vst [vmem:[%s1038_s7] sm:$0xff] %v580_v10  ;;  %v756_v13 = vpop.f32.mrb[5].mxu1 }
 0x679   :  { %v583_v6 = vpop.f32.mrb[6].mxu1 }
 0x67a   :  { %v757_v11 = vpop.f32.mrb[7].mxu1 }

// kernel: _lambda_.12
= control target key start
LH: loop header
LB: loop body
LE: loop exit
PB: predicated region body
PF: predicated region fallthrough
CT: control target
= control target key end

     0   :  { %vm36_vm0 = vcmask 261120   ;;  %v102_v40 = vlaneseq  ;;  %vm342_vm1 = vcmask 523264   ;;  %s791_s0 = inlined_call_operand.vmem [shape: f32[32,32], index: 0, kind: input, shape index: {}]   ;;  %s792_s2 = inlined_call_operand.vmem [shape: f32[2,32], index: 2, kind: input, shape index: {}]   ;;  %s793_s4 = inlined_call_operand.vmem [shape: bf16[1,32,64], index: 4, kind: input, shape index: {}]   ;;  %s794_s3 = inlined_call_operand.vmem [shape: f32[1,4,64], index: 3, kind: input, shape index: {}]   ;;  %s795_s5 = inlined_call_operand.vmem [shape: bf16[1,64,32], index: 5, kind: input, shape index: {}]   ;;  %s796_s6 = inlined_call_operand.vmem [shape: bf16[32,64], index: 6, kind: input, shape index: {}]   ;;  %s797_s1 = inlined_call_operand.vmem [shape: f32[32,32], index: 1, kind: input, shape index: {}]   ;;  %s798_s7 = inlined_call_operand.vmem [shape: f32[32,64], index: 7, kind: output, shape index: {}]  }
   0x1   :  { %v630_v0 = vld [vmem:[%s791_s0 + $0x10] sm:$0xff]  ;;  %v635_v1 = vld [vmem:[%s791_s0] sm:$0xff]  ;;  %v640_v2 = vld [vmem:[%s791_s0 + $0x18] sm:$0xff] }
   0x2   :  { %v43_v3 = vsel %vm36_vm0, %v630_v0, 0.0  ;;  %v37_v4 = vsel %vm36_vm0, %v635_v1, 0.0  ;;  %v649_v5 = vld [vmem:[%s791_s0 + $0x8] sm:$0xff]  ;;  %v46_v6 = vsel %vm36_vm0, %v640_v2, 0.0  ;;  %v54_v9 = vmul.f32 %v635_v1, %v635_v1  ;;  %v35_v51 = vld [vmem:[%s792_s2] sm:$0x3] }
   0x3   :  { %44 = vadd.xlane.f32.xlu1 %v43_v3  ;;  %38 = vadd.xlane.f32.xlu0 %v37_v4  ;;  %v40_v7 = vsel %vm36_vm0, %v649_v5, 0.0  ;;  %v55_v8 = vmul.f32 %v649_v5, %v649_v5  ;;  %v57_v12 = vmul.f32 %v640_v2, %v640_v2  ;;  %v56_v13 = vmul.f32 %v630_v0, %v630_v0 }
   0x4   :  { %v58_v11 = vsel %vm36_vm0, %v54_v9, 0.0  ;;  %v667_v47 = vshrl.u32 %v102_v40, 7 }
   0x5   :  { %v61_v10 = vsel %vm36_vm0, %v55_v8, 0.0  ;;  %v67_v14 = vsel %vm36_vm0, %v57_v12, 0.0  ;;  %v64_v15 = vsel %vm36_vm0, %v56_v13, 0.0 }
   0x6   :  { %v104_v50 = vsub.s32 0, %v667_v47  ;;  %v112_v52 = vsub.s32 1, %v667_v47 }
   0x7   :  { %47 = vadd.xlane.f32.xlu1 %v46_v6  ;;  %41 = vadd.xlane.f32.xlu0 %v40_v7 }
   0x8   :  { %v105_v54 = vrot.slane %v35_v51, %v104_v50  ;;  %v113_v59 = vrot.slane %v35_v51, %v112_v52 }
   0xb   :  { %62 = vadd.xlane.f32.xlu1 %v61_v10  ;;  %59 = vadd.xlane.f32.xlu0 %v58_v11 }
   0xf   :  { %68 = vadd.xlane.f32.xlu1 %v67_v14  ;;  %65 = vadd.xlane.f32.xlu0 %v64_v15 }
  0x90   :  { %v45_v16 = vpop.xlane.xlu1 %44  ;;  %v39_v17 = vpop.xlane.xlu0 %38 }
  0x91   :  { %v50_v20 = vmul.f32 0.03125, %v39_v17  ;;  %v52_v22 = vmul.f32 0.03125, %v45_v16 }
  0x93   :  { %v74_v26 = vmul.f32 %v50_v20, %v50_v20  ;;  %v76_v32 = vmul.f32 %v52_v22, %v52_v22  ;;  %v86_v56 = vsub.f32 %v635_v1, %v50_v20  ;;  %v88_v3 = vsub.f32 %v630_v0, %v52_v22 }
  0x94   :  { %v48_v18 = vpop.xlane.xlu1 %47  ;;  %v42_v19 = vpop.xlane.xlu0 %41 }
  0x95   :  { %v51_v21 = vmul.f32 0.03125, %v42_v19  ;;  %v53_v23 = vmul.f32 0.03125, %v48_v18 }
  0x97   :  { %v75_v27 = vmul.f32 %v51_v21, %v51_v21  ;;  %v77_v33 = vmul.f32 %v53_v23, %v53_v23  ;;  %v87_v53 = vsub.f32 %v649_v5, %v51_v21  ;;  %v89_v61 = vsub.f32 %v640_v2, %v53_v23  ;;  %v547_v23 = vld [vmem:[%s793_s4] sm:$0xff]  }
  0x98   :  { %v63_v24 = vpop.xlane.xlu1 %62  ;;  %v60_v25 = vpop.xlane.xlu0 %59  ;;  %519 = vmatprep.subr.bf16.mxu0 %v547_v23 }
  0x99   :  { %v71_v28 = vmul.f32 0.03125, %v63_v24  ;;  %v70_v29 = vmul.f32 0.03125, %v60_v25  ;;  %v548_v24 = vld [vmem:[%s793_s4 + $0x8] sm:$0xff]   ;;  %520 = vmatpush3.bf16.msra.mxu0 %v547_v23  ;;  %v549_v23 = vld [vmem:[%s795_s5] sm:$0xff]  }
  0x9a   :  { %521 = vmatprep.subr.bf16.mxu0 %v548_v24  ;;  %527 = vmatprep.subr.bf16.mxu1 %v549_v23 }
  0x9b   :  { %v79_v30 = vsub.f32 %v71_v28, %v75_v27  ;;  %v78_v31 = vsub.f32 %v70_v29, %v74_v26  ;;  %528 = vmatpush3.bf16.msra.mxu1 %v549_v23 }
  0x9c   :  { %v69_v34 = vpop.xlane.xlu1 %68  ;;  %v66_v35 = vpop.xlane.xlu0 %65 }
  0x9d   :  { %v83_v36 = vmax.f32 %v79_v30, 0.0  ;;  %v82_v37 = vmax.f32 %v78_v31, 0.0  ;;  %v73_v38 = vmul.f32 0.03125, %v69_v34  ;;  %v72_v39 = vmul.f32 0.03125, %v66_v35  ;;  %522 = vmatpush3.bf16.msra.mxu0 %v548_v24  ;;  %v550_v24 = vld [vmem:[%s795_s5 + $0x8] sm:$0xff]  }
  0x9e   :  { %529 = vmatprep.subr.bf16.mxu1 %v550_v24 }
  0x9f   :  { %v91_v41 = vadd.f32 1e-05, %v83_v36  ;;  %v90_v42 = vadd.f32 1e-05, %v82_v37  ;;  %v81_v43 = vsub.f32 %v73_v38, %v77_v33  ;;  %v80_v44 = vsub.f32 %v72_v39, %v76_v32  ;;  %530 = vmatpush3.bf16.msra.mxu1 %v550_v24 }
  0xa1   :  { %555 = vrsqrt.f32 %v91_v41  ;;  %v85_v45 = vmax.f32 %v81_v43, 0.0  ;;  %v84_v46 = vmax.f32 %v80_v44, 0.0 }
  0xa2   :  { %557 = vrsqrt.f32 %v90_v42 }
  0xa3   :  { %v93_v48 = vadd.f32 1e-05, %v85_v45  ;;  %v92_v49 = vadd.f32 1e-05, %v84_v46 }
  0xa5   :  { %559 = vrsqrt.f32 %v93_v48 }
  0xa6   :  { %561 = vrsqrt.f32 %v92_v49 }
  0xab   :  { %v556_v55 = vpop.eup %555 }
  0xac   :  { %v558_v57 = vpop.eup %557  ;;  %v99_v58 = vmul.f32 %v556_v55, %v87_v53 }
  0xad   :  { %v98_v60 = vmul.f32 %v558_v57, %v86_v56 }
  0xae   :  { %v107_v62 = vmul.f32 %v105_v54, %v99_v58 }
  0xaf   :  { %v560_v63 = vpop.eup %559  ;;  %v106_v4 = vmul.f32 %v105_v54, %v98_v60  ;;  %v719_v60 = vld [vmem:[%s794_s3] sm:$0xf] }
  0xb0   :  { %v562_v5 = vpop.eup %561  ;;  %v682_v6 = vadd.f32 %v113_v59, %v107_v62  ;;  %v101_v7 = vmul.f32 %v560_v63, %v89_v61  ;;  %v186_v62 = vrot.slane %v719_v60, %v104_v50 }
  0xb1   :  { %v684_v8 = vadd.f32 %v113_v59, %v106_v4  ;;  %v100_v1 = vmul.f32 %v562_v5, %v88_v3 }
  0xb2   :  { %v122_v9 = vsel %vm36_vm0, %v682_v6, 0.0  ;;  %v109_v10 = vmul.f32 %v105_v54, %v101_v7  ;;  %v136_v14 = vmul.f32 %v682_v6, %v682_v6  ;;  %v194_v7 = vrot.slane %v719_v60, %v112_v52 }
  0xb3   :  { %123 = vadd.xlane.f32.xlu1 %v122_v9  ;;  %v119_v2 = vsel %vm36_vm0, %v684_v8, 0.0  ;;  %v108_v11 = vmul.f32 %v105_v54, %v100_v1  ;;  %v135_v16 = vmul.f32 %v684_v8, %v684_v8 }
  0xb4   :  { %120 = vadd.xlane.f32.xlu0 %v119_v2  ;;  %v690_v12 = vadd.f32 %v113_v59, %v109_v10  ;;  %v142_v17 = vsel %vm36_vm0, %v136_v14, 0.0 }
  0xb5   :  { %v692_v0 = vadd.f32 %v113_v59, %v108_v11  ;;  %v139_v19 = vsel %vm36_vm0, %v135_v16, 0.0 }
  0xb6   :  { %v128_v13 = vsel %vm36_vm0, %v690_v12, 0.0  ;;  %v138_v18 = vmul.f32 %v690_v12, %v690_v12 }
  0xb7   :  { %129 = vadd.xlane.f32.xlu1 %v128_v13  ;;  %v125_v15 = vsel %vm36_vm0, %v692_v0, 0.0  ;;  %v137_v20 = vmul.f32 %v692_v0, %v692_v0 }
  0xb8   :  { %126 = vadd.xlane.f32.xlu0 %v125_v15  ;;  %v148_v21 = vsel %vm36_vm0, %v138_v18, 0.0 }
  0xb9   :  { %v145_v22 = vsel %vm36_vm0, %v137_v20, 0.0 }
  0xbb   :  { %143 = vadd.xlane.f32.xlu1 %v142_v17 }
  0xbc   :  { %140 = vadd.xlane.f32.xlu0 %v139_v19 }
  0xbf   :  { %149 = vadd.xlane.f32.xlu1 %v148_v21 }
  0xc0   :  { %146 = vadd.xlane.f32.xlu0 %v145_v22 }
 0x140   :  { %v124_v25 = vpop.xlane.xlu1 %123 }
 0x141   :  { %v121_v26 = vpop.xlane.xlu0 %120  ;;  %v132_v28 = vmul.f32 0.03125, %v124_v25  ;;  %v551_v25 = vld [vmem:[%s795_s5 + $0x10] sm:$0xff]  }
 0x142   :  { %v131_v30 = vmul.f32 0.03125, %v121_v26  ;;  %531 = vmatprep.subr.bf16.mxu1 %v551_v25  ;;  %v552_v26 = vld [vmem:[%s795_s5 + $0x18] sm:$0xff]  }
 0x143   :  { %v156_v32 = vmul.f32 %v132_v28, %v132_v28  ;;  %v168_v61 = vsub.f32 %v682_v6, %v132_v28  ;;  %532 = vmatpush3.bf16.msra.mxu1 %v551_v25 }
 0x144   :  { %v130_v27 = vpop.xlane.xlu1 %129  ;;  %v155_v36 = vmul.f32 %v131_v30, %v131_v30  ;;  %v167_v3 = vsub.f32 %v684_v8, %v131_v30  ;;  %533 = vmatprep.subr.bf16.mxu1 %v552_v26 }
 0x145   :  { %v127_v29 = vpop.xlane.xlu0 %126  ;;  %v134_v33 = vmul.f32 0.03125, %v130_v27  ;;  %v207_v27 = vsub.s32 2, %v667_v47 }
 0x146   :  { %v133_v37 = vmul.f32 0.03125, %v127_v29 }
 0x147   :  { %v158_v42 = vmul.f32 %v134_v33, %v134_v33  ;;  %v170_v9 = vsub.f32 %v690_v12, %v134_v33  ;;  %534 = vmatpush3.bf16.msra.mxu1 %v552_v26  ;;  %v208_v28 = vrot.slane %v719_v60, %v207_v27 }
 0x148   :  { %v144_v31 = vpop.xlane.xlu1 %143  ;;  %v157_v46 = vmul.f32 %v133_v37, %v133_v37  ;;  %v169_v11 = vsub.f32 %v692_v0, %v133_v37 }
 0x149   :  { %v152_v34 = vmul.f32 0.03125, %v144_v31  ;;  %v141_v35 = vpop.xlane.xlu0 %140 }
 0x14a   :  { %v151_v38 = vmul.f32 0.03125, %v141_v35 }
 0x14b   :  { %v160_v39 = vsub.f32 %v152_v34, %v156_v32 }
 0x14c   :  { %v159_v40 = vsub.f32 %v151_v38, %v155_v36  ;;  %v150_v41 = vpop.xlane.xlu1 %149 }
 0x14d   :  { %v164_v43 = vmax.f32 %v160_v39, 0.0  ;;  %v154_v44 = vmul.f32 0.03125, %v150_v41  ;;  %v147_v45 = vpop.xlane.xlu0 %146 }
 0x14e   :  { %v163_v48 = vmax.f32 %v159_v40, 0.0  ;;  %v153_v49 = vmul.f32 0.03125, %v147_v45 }
 0x14f   :  { %v172_v51 = vadd.f32 1e-05, %v164_v43  ;;  %v162_v53 = vsub.f32 %v154_v44, %v158_v42 }
 0x150   :  { %v171_v54 = vadd.f32 1e-05, %v163_v48  ;;  %v161_v55 = vsub.f32 %v153_v49, %v157_v46 }
 0x151   :  { %563 = vrsqrt.f32 %v172_v51  ;;  %v166_v56 = vmax.f32 %v162_v53, 0.0 }
 0x152   :  { %565 = vrsqrt.f32 %v171_v54  ;;  %v165_v57 = vmax.f32 %v161_v55, 0.0 }
 0x153   :  { %v174_v58 = vadd.f32 1e-05, %v166_v56 }
 0x154   :  { %v173_v59 = vadd.f32 1e-05, %v165_v57 }
 0x155   :  { %567 = vrsqrt.f32 %v174_v58 }
 0x156   :  { %569 = vrsqrt.f32 %v173_v59 }
 0x15b   :  { %v564_v63 = vpop.eup %563 }
 0x15c   :  { %v566_v4 = vpop.eup %565  ;;  %v180_v5 = vmul.f32 %v564_v63, %v168_v61  ;;  %v553_v63 = vld [vmem:[%s796_s6] sm:$0xff]  }
 0x15d   :  { %v179_v1 = vmul.f32 %v566_v4, %v167_v3  ;;  %539 = vmatprep.subr.bf16.mxu0 %v553_v63  ;;  %v554_v3 = vld [vmem:[%s796_s6 + $0x8] sm:$0xff]   ;;  %v316_v4 = vsub.s32 3, %v667_v47  ;;  %v34_v47 = vld [vmem:[%s797_s1 + $0x18] sm:$0xff] }
 0x15e   :  { %v188_v10 = vmul.f32 %v186_v62, %v180_v5 }
 0x15f   :  { %v568_v2 = vpop.eup %567  ;;  %v187_v13 = vmul.f32 %v186_v62, %v179_v1  ;;  %v317_v5 = vrot.slane %v719_v60, %v316_v4 }
 0x160   :  { %v570_v14 = vpop.eup %569  ;;  %v196_v15 = vadd.f32 %v194_v7, %v188_v10  ;;  %v182_v50 = vmul.f32 %v568_v2, %v170_v9 }
 0x161   :  { %v195_v16 = vadd.f32 %v194_v7, %v187_v13  ;;  %v181_v17 = vmul.f32 %v570_v14, %v169_v11 }
 0x162   :  { %v190_v18 = vmul.f32 %v186_v62, %v182_v50 }
 0x163   :  { %v203_v19 = vpack.c.bf16 %v196_v15, %v195_v16  ;;  %v189_v20 = vmul.f32 %v186_v62, %v181_v17  ;;  %v33_v15 = vld [vmem:[%s797_s1 + $0x10] sm:$0xff]  ;;  %v31_v16 = vld [vmem:[%s797_s1] sm:$0xff] }
 0x164   :  { %v198_v21 = vadd.f32 %v194_v7, %v190_v18 }
 0x165   :  { %523 = vmatprep.mubr.msk.bf16.mxu0 %vm36_vm0, %v203_v19  ;;  %v197_v52 = vadd.f32 %v194_v7, %v189_v20 }
 0x167   :  { %v204_v22 = vpack.c.bf16 %v198_v21, %v197_v52 }
 0x169   :  { %524 = vmatmul.mubr.msk.bf16.vlgmr.msra.gmra.mrb[0].mxu0 %vm36_vm0, %v204_v22 }
 0x16a   :  { %540 = vmatpush3.bf16.msra.mxu0 %v553_v63 }
 0x16b   :  { %541 = vmatprep.subr.bf16.mxu0 %v554_v3 }
 0x16e   :  { %542 = vmatpush3.bf16.msra.mxu0 %v554_v3 }
 0x23c   :  { %v525_v29 = vpop.f32.mrb[0].mxu0 }
 0x23d   :  { %v270_v30 = vadd.f32 %v525_v29, %v208_v28  ;;  %v261_v31 = vpop.f32.mrb[1].mxu0 }
 0x23e   :  { %v262_v32 = vadd.f32 %v261_v31, %v208_v28  ;;  %v526_v33 = vpop.f32.mrb[2].mxu0 }
 0x23f   :  { %v493_v34 = vmul.f32 -1.442695, %v270_v30  ;;  %v273_v35 = vadd.f32 %v526_v33, %v208_v28  ;;  %v264_v36 = vpop.f32.mrb[3].mxu0 }
 0x240   :  { %v491_v37 = vmul.f32 -1.442695, %v262_v32  ;;  %v265_v38 = vadd.f32 %v264_v36, %v208_v28 }
 0x241   :  { %571 = vpow2.f32 %v493_v34  ;;  %v494_v39 = vmul.f32 -1.442695, %v273_v35 }
 0x242   :  { %573 = vpow2.f32 %v491_v37  ;;  %v492_v40 = vmul.f32 -1.442695, %v265_v38 }
 0x243   :  { %575 = vpow2.f32 %v494_v39 }
 0x244   :  { %577 = vpow2.f32 %v492_v40 }
 0x24b   :  { %v572_v41 = vpop.eup %571 }
 0x24c   :  { %v574_v42 = vpop.eup %573  ;;  %v290_v43 = vadd.f32 1.0, %v572_v41 }
 0x24d   :  { %v576_v44 = vpop.eup %575  ;;  %v288_v45 = vadd.f32 1.0, %v574_v42 }
 0x24e   :  { %v578_v46 = vpop.eup %577  ;;  %579 = vrcp.f32 %v290_v43  ;;  %v291_v48 = vadd.f32 1.0, %v576_v44 }
 0x24f   :  { %581 = vrcp.f32 %v288_v45  ;;  %v289_v49 = vadd.f32 1.0, %v578_v46 }
 0x250   :  { %583 = vrcp.f32 %v291_v48 }
 0x251   :  { %585 = vrcp.f32 %v289_v49 }
 0x258   :  { %v580_v51 = vpop.eup %579 }
 0x259   :  { %v582_v53 = vpop.eup %581  ;;  %v302_v56 = vmul.f32 %v580_v51, %v270_v30 }
 0x25a   :  { %v584_v54 = vpop.eup %583  ;;  %v300_v58 = vmul.f32 %v582_v53, %v262_v32 }
 0x25b   :  { %v586_v55 = vpop.eup %585  ;;  %v303_v57 = vmul.f32 %v584_v54, %v273_v35 }
 0x25c   :  { %v301_v59 = vmul.f32 %v586_v55, %v265_v38 }
 0x25d   :  { %v313_v61 = vpack.c.bf16 %v303_v57, %v302_v56 }
 0x25e   :  { %v312_v62 = vpack.c.bf16 %v301_v59, %v300_v58 }
 0x260   :  { %535 = vmatprep.mubr.msk.bf16.mxu1 %vm342_vm1, %v312_v62 }
 0x261   :  { %536 = vmatmul.mubr.msk.bf16.vlgmr.msra.gmra.mrb[0].mxu1 %vm342_vm1, %v313_v61 }
 0x334   :  { %v537_v7 = vpop.f32.mrb[0].mxu1 }
 0x335   :  { %v392_v1 = vadd.f32 %v537_v7, %v317_v5  ;;  %v383_v9 = vpop.f32.mrb[1].mxu1 }
 0x336   :  { %v384_v10 = vadd.f32 %v383_v9, %v317_v5  ;;  %v538_v2 = vpop.f32.mrb[2].mxu1 }
 0x337   :  { %v400_v11 = vadd.f32 %v392_v1, %v692_v0  ;;  %v395_v13 = vadd.f32 %v538_v2, %v317_v5  ;;  %v386_v14 = vpop.f32.mrb[3].mxu1  ;;  %v32_v0 = vld [vmem:[%s797_s1 + $0x8] sm:$0xff] }
 0x338   :  { %v398_v50 = vadd.f32 %v384_v10, %v684_v8  ;;  %v387_v60 = vadd.f32 %v386_v14, %v317_v5 }
 0x339   :  { %v401_v17 = vadd.f32 %v395_v13, %v690_v12  ;;  %v404_v19 = vadd.f32 %v400_v11, %v33_v15 }
 0x33a   :  { %v399_v18 = vadd.f32 %v387_v60, %v682_v6  ;;  %v402_v8 = vadd.f32 %v398_v50, %v31_v16 }
 0x33b   :  { %v405_v20 = vadd.f32 %v401_v17, %v34_v47 }
 0x33c   :  { %v403_v21 = vadd.f32 %v399_v18, %v32_v0 }
 0x33d   :  { %v411_v52 = vpack.c.bf16 %v405_v20, %v404_v19 }
 0x33e   :  { %v410_v22 = vpack.c.bf16 %v403_v21, %v402_v8 }
 0x340   :  { %543 = vmatprep.mubr.msk.bf16.mxu0 %vm36_vm0, %v410_v22 }
 0x341   :  { %544 = vmatmul.mubr.msk.bf16.vlgmr.msra.gmra.mrb[4].mxu0 %vm36_vm0, %v411_v52 }
 0x414   :  { %v545_v23 = vpop.f32.mrb[4].mxu0 }
 0x415   :  { %481 = vst.msk [vmem:[%s798_s7 + $0x10] sm:$0xff] %vm342_vm1, %v545_v23  ;;  %v464_v12 = vpop.f32.mrb[5].mxu0 }
 0x416   :  { %479 = vst.msk [vmem:[%s798_s7] sm:$0xff] %vm342_vm1, %v464_v12  ;;  %v546_v6 = vpop.f32.mrb[6].mxu0 }
 0x417   :  { %482 = vst.msk [vmem:[%s798_s7 + $0x18] sm:$0xff] %vm342_vm1, %v546_v6  ;;  %v467_v24 = vpop.f32.mrb[7].mxu0 }
 0x418   :  { %480 = vst.msk [vmem:[%s798_s7 + $0x8] sm:$0xff] %vm342_vm1, %v467_v24 }

// kernel: _lambda_.13
= control target key start
LH: loop header
LB: loop body
LE: loop exit
PB: predicated region body
PF: predicated region fallthrough
CT: control target
= control target key end

     0   :  { %vm50_vm0 = vcmask 130048   ;;  %vm926_vm1 = vcmask 261120   ;;  %vm1219_vm2 = vcmask 523264   ;;  %s3812_s0 = inlined_call_operand.vmem [shape: f32[128,16], index: 0, kind: input, shape index: {}]   ;;  %s3813_s1 = inlined_call_operand.vmem [shape: f32[2,16], index: 1, kind: input, shape index: {}]   ;;  %s3814_s3 = inlined_call_operand.vmem [shape: bf16[1,16,32], index: 3, kind: input, shape index: {}]   ;;  %s3815_s2 = inlined_call_operand.vmem [shape: f32[1,4,32], index: 2, kind: input, shape index: {}]   ;;  %s3816_s4 = inlined_call_operand.vmem [shape: bf16[1,32,16], index: 4, kind: input, shape index: {}]   ;;  %s3817_s5 = inlined_call_operand.vmem [shape: bf16[16,64], index: 5, kind: input, shape index: {}]   ;;  %s3818_s6 = inlined_call_operand.vmem [shape: f32[64,64], index: 6, kind: input, shape index: {}]   ;;  %s3819_s8 = inlined_call_operand.vmem [shape: f32[65,64], index: 8, kind: input, shape index: {}]   ;;  %s3820_s7 = inlined_call_operand.vmem [shape: f32[2,64], index: 7, kind: input, shape index: {}]   ;;  %s3821_s9 = inlined_call_operand.vmem [shape: f32[128,64], index: 9, kind: output, shape index: {}]  }
   0x1   :  { %v2625_v0 = vld [vmem:[%s3812_s0 + $0x10] sm:$0xff]  ;;  %v2630_v1 = vld [vmem:[%s3812_s0] sm:$0xff]  ;;  %v2635_v2 = vld [vmem:[%s3812_s0 + $0x18] sm:$0xff] }
   0x2   :  { %v57_v3 = vsel %vm50_vm0, %v2625_v0, 0.0  ;;  %v51_v4 = vsel %vm50_vm0, %v2630_v1, 0.0  ;;  %v2644_v5 = vld [vmem:[%s3812_s0 + $0x8] sm:$0xff]  ;;  %v60_v6 = vsel %vm50_vm0, %v2635_v2, 0.0  ;;  %v116_v9 = vmul.f32 %v2630_v1, %v2630_v1  ;;  %v2670_v17 = vld [vmem:[%s3812_s0 + $0x20] sm:$0xff]  ;;  %v2679_v20 = vld [vmem:[%s3812_s0 + $0x38] sm:$0xff] }
   0x3   :  { %58 = vadd.xlane.f32.xlu1 %v57_v3  ;;  %52 = vadd.xlane.f32.xlu0 %v51_v4  ;;  %v54_v7 = vsel %vm50_vm0, %v2644_v5, 0.0  ;;  %v117_v8 = vmul.f32 %v2644_v5, %v2644_v5  ;;  %v119_v12 = vmul.f32 %v2635_v2, %v2635_v2  ;;  %v118_v13 = vmul.f32 %v2625_v0, %v2625_v0  ;;  %v2665_v16 = vld [vmem:[%s3812_s0 + $0x28] sm:$0xff]  ;;  %v2684_v21 = vld [vmem:[%s3812_s0 + $0x30] sm:$0xff]  ;;  %v2710_v33 = vld [vmem:[%s3812_s0 + $0x40] sm:$0xff] }
   0x4   :  { %v132_v11 = vsel %vm50_vm0, %v116_v9, 0.0  ;;  %v66_v18 = vsel %vm50_vm0, %v2665_v16, 0.0  ;;  %v63_v19 = vsel %vm50_vm0, %v2670_v17, 0.0  ;;  %v72_v22 = vsel %vm50_vm0, %v2679_v20, 0.0  ;;  %v2705_v32 = vld [vmem:[%s3812_s0 + $0x48] sm:$0xff]  ;;  %v2719_v36 = vld [vmem:[%s3812_s0 + $0x58] sm:$0xff] }
   0x5   :  { %v135_v10 = vsel %vm50_vm0, %v117_v8, 0.0  ;;  %v141_v14 = vsel %vm50_vm0, %v119_v12, 0.0  ;;  %v138_v15 = vsel %vm50_vm0, %v118_v13, 0.0  ;;  %v69_v23 = vsel %vm50_vm0, %v2684_v21, 0.0  ;;  %v2724_v37 = vld [vmem:[%s3812_s0 + $0x50] sm:$0xff]  ;;  %v2745_v48 = vld [vmem:[%s3812_s0 + $0x68] sm:$0xff] }
   0x6   :  { %v121_v24 = vmul.f32 %v2665_v16, %v2665_v16  ;;  %v120_v25 = vmul.f32 %v2670_v17, %v2670_v17  ;;  %v123_v28 = vmul.f32 %v2679_v20, %v2679_v20  ;;  %v122_v29 = vmul.f32 %v2684_v21, %v2684_v21  ;;  %v2750_v49 = vld [vmem:[%s3812_s0 + $0x60] sm:$0xff]  ;;  %v2759_v52 = vld [vmem:[%s3812_s0 + $0x78] sm:$0xff]  ;;  %v2764_v53 = vld [vmem:[%s3812_s0 + $0x70] sm:$0xff] }
   0x7   :  { %61 = vadd.xlane.f32.xlu1 %v60_v6  ;;  %55 = vadd.xlane.f32.xlu0 %v54_v7  ;;  %v78_v34 = vsel %vm50_vm0, %v2705_v32, 0.0  ;;  %v75_v35 = vsel %vm50_vm0, %v2710_v33, 0.0  ;;  %v84_v38 = vsel %vm50_vm0, %v2719_v36, 0.0  ;;  %v81_v39 = vsel %vm50_vm0, %v2724_v37, 0.0 }
   0x8   :  { %v147_v26 = vsel %vm50_vm0, %v121_v24, 0.0  ;;  %v144_v27 = vsel %vm50_vm0, %v120_v25, 0.0  ;;  %v153_v30 = vsel %vm50_vm0, %v123_v28, 0.0  ;;  %v150_v31 = vsel %vm50_vm0, %v122_v29, 0.0 }
   0x9   :  { %v125_v40 = vmul.f32 %v2705_v32, %v2705_v32  ;;  %v124_v41 = vmul.f32 %v2710_v33, %v2710_v33  ;;  %v127_v44 = vmul.f32 %v2719_v36, %v2719_v36  ;;  %v126_v45 = vmul.f32 %v2724_v37, %v2724_v37 }
   0xa   :  { %v90_v50 = vsel %vm50_vm0, %v2745_v48, 0.0  ;;  %v87_v51 = vsel %vm50_vm0, %v2750_v49, 0.0  ;;  %v96_v54 = vsel %vm50_vm0, %v2759_v52, 0.0  ;;  %v93_v55 = vsel %vm50_vm0, %v2764_v53, 0.0 }
   0xb   :  { %136 = vadd.xlane.f32.xlu1 %v135_v10  ;;  %133 = vadd.xlane.f32.xlu0 %v132_v11  ;;  %v159_v42 = vsel %vm50_vm0, %v125_v40, 0.0  ;;  %v156_v43 = vsel %vm50_vm0, %v124_v41, 0.0  ;;  %v165_v46 = vsel %vm50_vm0, %v127_v44, 0.0  ;;  %v162_v47 = vsel %vm50_vm0, %v126_v45, 0.0 }
   0xc   :  { %v129_v56 = vmul.f32 %v2745_v48, %v2745_v48  ;;  %v128_v57 = vmul.f32 %v2750_v49, %v2750_v49  ;;  %v131_v60 = vmul.f32 %v2759_v52, %v2759_v52  ;;  %v130_v61 = vmul.f32 %v2764_v53, %v2764_v53 }
   0xe   :  { %v171_v58 = vsel %vm50_vm0, %v129_v56, 0.0  ;;  %v168_v59 = vsel %vm50_vm0, %v128_v57, 0.0  ;;  %v177_v62 = vsel %vm50_vm0, %v131_v60, 0.0  ;;  %v174_v63 = vsel %vm50_vm0, %v130_v61, 0.0  ;;  %v49_v57 = vld [vmem:[%s3813_s1] sm:$0x3] }
   0xf   :  { %142 = vadd.xlane.f32.xlu1 %v141_v14  ;;  %139 = vadd.xlane.f32.xlu0 %v138_v15 }
  0x13   :  { %67 = vadd.xlane.f32.xlu1 %v66_v18  ;;  %64 = vadd.xlane.f32.xlu0 %v63_v19 }
  0x17   :  { %73 = vadd.xlane.f32.xlu1 %v72_v22  ;;  %70 = vadd.xlane.f32.xlu0 %v69_v23 }
  0x1b   :  { %148 = vadd.xlane.f32.xlu1 %v147_v26  ;;  %145 = vadd.xlane.f32.xlu0 %v144_v27 }
  0x1f   :  { %154 = vadd.xlane.f32.xlu1 %v153_v30  ;;  %151 = vadd.xlane.f32.xlu0 %v150_v31 }
  0x23   :  { %79 = vadd.xlane.f32.xlu1 %v78_v34  ;;  %76 = vadd.xlane.f32.xlu0 %v75_v35  ;;  %v308_v34 = vlaneseq }
  0x25   :  { %v2798_v45 = vshrl.u32 %v308_v34, 7 }
  0x27   :  { %85 = vadd.xlane.f32.xlu1 %v84_v38  ;;  %82 = vadd.xlane.f32.xlu0 %v81_v39  ;;  %v2805_v56 = vsub.s32 0, %v2798_v45 }
  0x2b   :  { %160 = vadd.xlane.f32.xlu1 %v159_v42  ;;  %157 = vadd.xlane.f32.xlu0 %v156_v43 }
  0x2f   :  { %166 = vadd.xlane.f32.xlu1 %v165_v46  ;;  %163 = vadd.xlane.f32.xlu0 %v162_v47 }
  0x33   :  { %91 = vadd.xlane.f32.xlu1 %v90_v50  ;;  %88 = vadd.xlane.f32.xlu0 %v87_v51 }
  0x37   :  { %97 = vadd.xlane.f32.xlu1 %v96_v54  ;;  %94 = vadd.xlane.f32.xlu0 %v93_v55 }
  0x3b   :  { %172 = vadd.xlane.f32.xlu1 %v171_v58  ;;  %169 = vadd.xlane.f32.xlu0 %v168_v59  ;;  %v2811_v58 = vsub.s32 1, %v2798_v45 }
  0x3f   :  { %178 = vadd.xlane.f32.xlu1 %v177_v62  ;;  %175 = vadd.xlane.f32.xlu0 %v174_v63 }
  0x90   :  { %v59_v3 = vpop.xlane.xlu1 %58  ;;  %v53_v4 = vpop.xlane.xlu0 %52 }
  0x91   :  { %v2782_v8 = vmul.f32 0.0625, %v53_v4  ;;  %v2786_v10 = vmul.f32 0.0625, %v59_v3 }
  0x93   :  { %v196_v14 = vmul.f32 %v2782_v8, %v2782_v8  ;;  %v198_v24 = vmul.f32 %v2786_v10, %v2786_v10 }
  0x94   :  { %v62_v6 = vpop.xlane.xlu1 %61  ;;  %v56_v7 = vpop.xlane.xlu0 %55 }
  0x95   :  { %v2784_v9 = vmul.f32 0.0625, %v56_v7  ;;  %v2788_v11 = vmul.f32 0.0625, %v62_v6 }
  0x97   :  { %v197_v15 = vmul.f32 %v2784_v9, %v2784_v9  ;;  %v199_v25 = vmul.f32 %v2788_v11, %v2788_v11  ;;  %v245_v7 = vsub.f32 %v2644_v5, %v2784_v9 }
  0x98   :  { %v137_v12 = vpop.xlane.xlu1 %136  ;;  %v134_v13 = vpop.xlane.xlu0 %133 }
  0x99   :  { %v181_v18 = vmul.f32 0.0625, %v137_v12  ;;  %v180_v19 = vmul.f32 0.0625, %v134_v13  ;;  %v2824_v12 = vrot.slane %v49_v57, %v2805_v56 }
  0x9b   :  { %v213_v22 = vsub.f32 %v181_v18, %v197_v15  ;;  %v212_v23 = vsub.f32 %v180_v19, %v196_v14  ;;  %v2827_v18 = vrot.slane %v49_v57, %v2811_v58 }
  0x9c   :  { %v143_v26 = vpop.xlane.xlu1 %142  ;;  %v140_v27 = vpop.xlane.xlu0 %139 }
  0x9d   :  { %v229_v28 = vmax.f32 %v213_v22, 0.0  ;;  %v228_v29 = vmax.f32 %v212_v23, 0.0  ;;  %v183_v30 = vmul.f32 0.0625, %v143_v26  ;;  %v182_v31 = vmul.f32 0.0625, %v140_v27 }
  0x9e   :  { %v244_v22 = vsub.f32 %v2630_v1, %v2782_v8 }
  0x9f   :  { %v261_v35 = vadd.f32 1e-05, %v229_v28  ;;  %v260_v38 = vadd.f32 1e-05, %v228_v29  ;;  %v215_v39 = vsub.f32 %v183_v30, %v199_v25  ;;  %v214_v40 = vsub.f32 %v182_v31, %v198_v24 }
  0xa0   :  { %v68_v41 = vpop.xlane.xlu1 %67  ;;  %v65_v42 = vpop.xlane.xlu0 %64  ;;  %v247_v30 = vsub.f32 %v2635_v2, %v2788_v11 }
  0xa1   :  { %2412 = vrsqrt.f32 %v261_v35  ;;  %v231_v43 = vmax.f32 %v215_v39, 0.0  ;;  %v230_v44 = vmax.f32 %v214_v40, 0.0  ;;  %v2800_v54 = vmul.f32 0.0625, %v68_v41 }
  0xa2   :  { %2414 = vrsqrt.f32 %v260_v38  ;;  %v2802_v55 = vmul.f32 0.0625, %v65_v42 }
  0xa3   :  { %v263_v46 = vadd.f32 1e-05, %v231_v43  ;;  %v262_v47 = vadd.f32 1e-05, %v230_v44  ;;  %v201_v63 = vmul.f32 %v2800_v54, %v2800_v54 }
  0xa4   :  { %v74_v50 = vpop.xlane.xlu1 %73  ;;  %v71_v51 = vpop.xlane.xlu0 %70  ;;  %v200_v3 = vmul.f32 %v2802_v55, %v2802_v55 }
  0xa5   :  { %2416 = vrsqrt.f32 %v263_v46  ;;  %v2813_v59 = vmul.f32 0.0625, %v74_v50  ;;  %v2815_v60 = vmul.f32 0.0625, %v71_v51  ;;  %v246_v51 = vsub.f32 %v2625_v0, %v2786_v10 }
  0xa6   :  { %2418 = vrsqrt.f32 %v262_v47 }
  0xa7   :  { %v203_v23 = vmul.f32 %v2813_v59, %v2813_v59  ;;  %v202_v24 = vmul.f32 %v2815_v60, %v2815_v60 }
  0xa8   :  { %v149_v61 = vpop.xlane.xlu1 %148  ;;  %v146_v62 = vpop.xlane.xlu0 %145 }
  0xa9   :  { %v185_v4 = vmul.f32 0.0625, %v149_v61  ;;  %v184_v6 = vmul.f32 0.0625, %v146_v62 }
  0xab   :  { %v2413_v13 = vpop.eup %2412  ;;  %v217_v14 = vsub.f32 %v185_v4, %v201_v63  ;;  %v216_v15 = vsub.f32 %v184_v6, %v200_v3 }
  0xac   :  { %v2415_v19 = vpop.eup %2414  ;;  %v155_v5 = vpop.xlane.xlu1 %154  ;;  %v293_v25 = vmul.f32 %v2413_v13, %v245_v7 }
  0xad   :  { %v152_v9 = vpop.xlane.xlu0 %151  ;;  %v233_v26 = vmax.f32 %v217_v14, 0.0  ;;  %v232_v27 = vmax.f32 %v216_v15, 0.0  ;;  %v187_v28 = vmul.f32 0.0625, %v155_v5  ;;  %v292_v34 = vmul.f32 %v2415_v19, %v244_v22 }
  0xae   :  { %v186_v29 = vmul.f32 0.0625, %v152_v9  ;;  %v313_v31 = vmul.f32 %v2824_v12, %v293_v25 }
  0xaf   :  { %v2417_v1 = vpop.eup %2416  ;;  %v265_v8 = vadd.f32 1e-05, %v233_v26  ;;  %v264_v35 = vadd.f32 1e-05, %v232_v27  ;;  %v219_v38 = vsub.f32 %v187_v28, %v203_v23  ;;  %v312_v43 = vmul.f32 %v2824_v12, %v292_v34 }
  0xb0   :  { %v218_v39 = vsub.f32 %v186_v29, %v202_v24  ;;  %v80_v40 = vpop.xlane.xlu1 %79  ;;  %v2839_v42 = vadd.f32 %v2827_v18, %v313_v31  ;;  %v295_v44 = vmul.f32 %v2417_v1, %v247_v30  ;;  %v2419_v2 = vpop.eup %2418  ;;  %v249_v26 = vsub.f32 %v2665_v16, %v2800_v54 }
  0xb1   :  { %v77_v41 = vpop.xlane.xlu0 %76  ;;  %2420 = vrsqrt.f32 %v265_v8  ;;  %v235_v46 = vmax.f32 %v219_v38, 0.0  ;;  %v2845_v50 = vadd.f32 %v2827_v18, %v312_v43  ;;  %v2852_v6 = vmul.f32 0.0625, %v80_v40 }
  0xb2   :  { %v234_v47 = vmax.f32 %v218_v39, 0.0  ;;  %2422 = vrsqrt.f32 %v264_v35  ;;  %v352_v11 = vsel %vm50_vm0, %v2839_v42, 0.0  ;;  %v315_v4 = vmul.f32 %v2824_v12, %v295_v44 }
  0xb3   :  { %v267_v57 = vadd.f32 1e-05, %v235_v46  ;;  %353 = vadd.xlane.f32.xlu1 %v352_v11  ;;  %v349_v62 = vsel %vm50_vm0, %v2845_v50, 0.0  ;;  %v2854_v7 = vmul.f32 0.0625, %v77_v41  ;;  %v294_v13 = vmul.f32 %v2419_v2, %v246_v51 }
  0xb4   :  { %v266_v61 = vadd.f32 1e-05, %v234_v47  ;;  %v86_v63 = vpop.xlane.xlu1 %85  ;;  %350 = vadd.xlane.f32.xlu0 %v349_v62  ;;  %v2857_v14 = vadd.f32 %v2827_v18, %v315_v4  ;;  %v205_v24 = vmul.f32 %v2852_v6, %v2852_v6  ;;  %v248_v29 = vsub.f32 %v2670_v17, %v2802_v55 }
  0xb5   :  { %v83_v3 = vpop.xlane.xlu0 %82  ;;  %2424 = vrsqrt.f32 %v267_v57  ;;  %v2859_v0 = vmul.f32 0.0625, %v86_v63  ;;  %v314_v19 = vmul.f32 %v2824_v12, %v294_v13  ;;  %v204_v5 = vmul.f32 %v2854_v7, %v2854_v7 }
  0xb6   :  { %2426 = vrsqrt.f32 %v266_v61  ;;  %v2861_v10 = vmul.f32 0.0625, %v83_v3  ;;  %v358_v15 = vsel %vm50_vm0, %v2857_v14, 0.0  ;;  %v251_v55 = vsub.f32 %v2679_v20, %v2813_v59 }
  0xb7   :  { %359 = vadd.xlane.f32.xlu1 %v358_v15  ;;  %v2873_v27 = vadd.f32 %v2827_v18, %v314_v19  ;;  %v207_v1 = vmul.f32 %v2859_v0, %v2859_v0  ;;  %v250_v19 = vsub.f32 %v2684_v21, %v2815_v60 }
  0xb8   :  { %v161_v22 = vpop.xlane.xlu1 %160  ;;  %v206_v8 = vmul.f32 %v2861_v10, %v2861_v10 }
  0xb9   :  { %v158_v23 = vpop.xlane.xlu0 %157  ;;  %v189_v9 = vmul.f32 0.0625, %v161_v22  ;;  %v355_v35 = vsel %vm50_vm0, %v2873_v27, 0.0 }
  0xba   :  { %v188_v25 = vmul.f32 0.0625, %v158_v23  ;;  %356 = vadd.xlane.f32.xlu0 %v355_v35 }
  0xbb   :  { %v2421_v28 = vpop.eup %2420  ;;  %v221_v30 = vsub.f32 %v189_v9, %v205_v24 }
  0xbc   :  { %v220_v31 = vsub.f32 %v188_v25, %v204_v5  ;;  %v2423_v34 = vpop.eup %2422  ;;  %v167_v16 = vpop.xlane.xlu1 %166  ;;  %v297_v38 = vmul.f32 %v2421_v28, %v249_v26 }
  0xbd   :  { %v164_v54 = vpop.xlane.xlu0 %163  ;;  %v237_v39 = vmax.f32 %v221_v30, 0.0  ;;  %v191_v41 = vmul.f32 0.0625, %v167_v16  ;;  %v296_v44 = vmul.f32 %v2423_v34, %v248_v29 }
  0xbe   :  { %v236_v40 = vmax.f32 %v220_v31, 0.0  ;;  %v190_v17 = vmul.f32 0.0625, %v164_v54  ;;  %v317_v43 = vmul.f32 %v2824_v12, %v297_v38 }
  0xbf   :  { %v2425_v46 = vpop.eup %2424  ;;  %v269_v47 = vadd.f32 1e-05, %v237_v39  ;;  %v223_v11 = vsub.f32 %v191_v41, %v207_v1  ;;  %v316_v63 = vmul.f32 %v2824_v12, %v296_v44  ;;  %v253_v39 = vsub.f32 %v2705_v32, %v2852_v6 }
  0xc0   :  { %v268_v2 = vadd.f32 1e-05, %v236_v40  ;;  %v222_v51 = vsub.f32 %v190_v17, %v206_v8  ;;  %v92_v57 = vpop.xlane.xlu1 %91  ;;  %v2887_v62 = vadd.f32 %v2827_v18, %v317_v43  ;;  %v299_v3 = vmul.f32 %v2425_v46, %v251_v55  ;;  %v2427_v20 = vpop.eup %2426 }
  0xc1   :  { %v89_v61 = vpop.xlane.xlu0 %88  ;;  %2428 = vrsqrt.f32 %v269_v47  ;;  %v239_v4 = vmax.f32 %v223_v11, 0.0  ;;  %v2893_v15 = vadd.f32 %v2827_v18, %v316_v63  ;;  %v2900_v26 = vmul.f32 0.0625, %v92_v57 }
  0xc2   :  { %v238_v13 = vmax.f32 %v222_v51, 0.0  ;;  %2430 = vrsqrt.f32 %v268_v2  ;;  %v364_v59 = vsel %vm50_vm0, %v2887_v62, 0.0  ;;  %v319_v25 = vmul.f32 %v2824_v12, %v299_v3 }
  0xc3   :  { %v271_v22 = vadd.f32 1e-05, %v239_v4  ;;  %365 = vadd.xlane.f32.xlu1 %v364_v59  ;;  %v361_v24 = vsel %vm50_vm0, %v2893_v15, 0.0  ;;  %v2902_v28 = vmul.f32 0.0625, %v89_v61  ;;  %v298_v29 = vmul.f32 %v2427_v20, %v250_v19 }
  0xc4   :  { %v270_v23 = vadd.f32 1e-05, %v238_v13  ;;  %v98_v5 = vpop.xlane.xlu1 %97  ;;  %362 = vadd.xlane.f32.xlu0 %v361_v24  ;;  %v2905_v21 = vadd.f32 %v2827_v18, %v319_v25  ;;  %v209_v35 = vmul.f32 %v2900_v26, %v2900_v26  ;;  %v252_v17 = vsub.f32 %v2710_v33, %v2854_v7 }
  0xc5   :  { %v95_v9 = vpop.xlane.xlu0 %94  ;;  %2432 = vrsqrt.f32 %v271_v22  ;;  %v2907_v60 = vmul.f32 0.0625, %v98_v5  ;;  %v318_v34 = vmul.f32 %v2824_v12, %v298_v29  ;;  %v208_v16 = vmul.f32 %v2902_v28, %v2902_v28 }
  0xc6   :  { %2434 = vrsqrt.f32 %v270_v23  ;;  %v2909_v30 = vmul.f32 0.0625, %v95_v9  ;;  %v370_v31 = vsel %vm50_vm0, %v2905_v21, 0.0  ;;  %v255_v7 = vsub.f32 %v2719_v36, %v2859_v0 }
  0xc7   :  { %371 = vadd.xlane.f32.xlu1 %v370_v31  ;;  %v2921_v40 = vadd.f32 %v2827_v18, %v318_v34  ;;  %v211_v46 = vmul.f32 %v2907_v60, %v2907_v60  ;;  %v254_v63 = vsub.f32 %v2724_v37, %v2861_v10 }
  0xc8   :  { %v173_v1 = vpop.xlane.xlu1 %172  ;;  %v210_v47 = vmul.f32 %v2909_v30, %v2909_v30 }
  0xc9   :  { %v170_v8 = vpop.xlane.xlu0 %169  ;;  %v193_v54 = vmul.f32 0.0625, %v173_v1  ;;  %v367_v2 = vsel %vm50_vm0, %v2921_v40, 0.0 }
  0xca   :  { %v192_v38 = vmul.f32 0.0625, %v170_v8  ;;  %368 = vadd.xlane.f32.xlu0 %v367_v2 }
  0xcb   :  { %v2429_v41 = vpop.eup %2428  ;;  %v225_v55 = vsub.f32 %v193_v54, %v209_v35 }
  0xcc   :  { %v224_v43 = vsub.f32 %v192_v38, %v208_v16  ;;  %v2431_v44 = vpop.eup %2430  ;;  %v179_v32 = vpop.xlane.xlu1 %178  ;;  %v301_v11 = vmul.f32 %v2429_v41, %v253_v39  ;;  %v257_v39 = vsub.f32 %v2745_v48, %v2900_v26 }
  0xcd   :  { %v176_v6 = vpop.xlane.xlu0 %175  ;;  %v241_v51 = vmax.f32 %v225_v55, 0.0  ;;  %v195_v61 = vmul.f32 0.0625, %v179_v32  ;;  %v300_v4 = vmul.f32 %v2431_v44, %v252_v17  ;;  %v256_v17 = vsub.f32 %v2750_v49, %v2902_v28 }
  0xce   :  { %v240_v57 = vmax.f32 %v224_v43, 0.0  ;;  %v194_v33 = vmul.f32 0.0625, %v176_v6  ;;  %v321_v3 = vmul.f32 %v2824_v12, %v301_v11  ;;  %v258_v32 = vsub.f32 %v2764_v53, %v2909_v30 }
  0xcf   :  { %v2433_v13 = vpop.eup %2432  ;;  %v273_v20 = vadd.f32 1e-05, %v241_v51  ;;  %v227_v19 = vsub.f32 %v195_v61, %v211_v46  ;;  %v320_v5 = vmul.f32 %v2824_v12, %v300_v4  ;;  %v259_v46 = vsub.f32 %v2759_v52, %v2907_v60 }
  0xd0   :  { %v272_v59 = vadd.f32 1e-05, %v240_v57  ;;  %v226_v22 = vsub.f32 %v194_v33, %v210_v47  ;;  %v2435_v23 = vpop.eup %2434  ;;  %v2937_v24 = vadd.f32 %v2827_v18, %v321_v3  ;;  %v303_v9 = vmul.f32 %v2433_v13, %v255_v7 }
  0xd1   :  { %2436 = vrsqrt.f32 %v273_v20  ;;  %v243_v36 = vmax.f32 %v227_v19, 0.0  ;;  %v302_v25 = vmul.f32 %v2435_v23, %v254_v63  ;;  %v2943_v10 = vadd.f32 %v2827_v18, %v320_v5 }
  0xd2   :  { %v242_v0 = vmax.f32 %v226_v22, 0.0  ;;  %2438 = vrsqrt.f32 %v272_v59  ;;  %v376_v37 = vsel %vm50_vm0, %v2937_v24, 0.0  ;;  %v323_v29 = vmul.f32 %v2824_v12, %v303_v9 }
  0xd3   :  { %v275_v31 = vadd.f32 1e-05, %v243_v36  ;;  %377 = vadd.xlane.f32.xlu1 %v376_v37  ;;  %v322_v1 = vmul.f32 %v2824_v12, %v302_v25  ;;  %v373_v8 = vsel %vm50_vm0, %v2943_v10, 0.0  ;;  %v414_v33 = vmul.f32 %v2839_v42, %v2839_v42 }
  0xd4   :  { %v274_v34 = vadd.f32 1e-05, %v242_v0  ;;  %v2950_v35 = vadd.f32 %v2827_v18, %v323_v29  ;;  %374 = vadd.xlane.f32.xlu0 %v373_v8  ;;  %v415_v4 = vmul.f32 %v2873_v27, %v2873_v27  ;;  %v418_v20 = vmul.f32 %v2887_v62, %v2887_v62 }
  0xd5   :  { %2440 = vrsqrt.f32 %v275_v31  ;;  %v2953_v16 = vadd.f32 %v2827_v18, %v322_v1  ;;  %v432_v63 = vsel %vm50_vm0, %v414_v33, 0.0  ;;  %v417_v19 = vmul.f32 %v2893_v15, %v2893_v15 }
  0xd6   :  { %2442 = vrsqrt.f32 %v274_v34  ;;  %v382_v54 = vsel %vm50_vm0, %v2950_v35, 0.0  ;;  %v435_v59 = vsel %vm50_vm0, %v415_v4, 0.0  ;;  %v444_v22 = vsel %vm50_vm0, %v418_v20, 0.0  ;;  %v3059_v4 = vld [vmem:[%s3815_s2] sm:$0xf] }
  0xd7   :  { %383 = vadd.xlane.f32.xlu1 %v382_v54  ;;  %v379_v38 = vsel %vm50_vm0, %v2953_v16, 0.0  ;;  %v420_v23 = vmul.f32 %v2905_v21, %v2905_v21  ;;  %v441_v5 = vsel %vm50_vm0, %v417_v19, 0.0  ;;  %v419_v9 = vmul.f32 %v2921_v40, %v2921_v40 }
  0xd8   :  { %380 = vadd.xlane.f32.xlu0 %v379_v38  ;;  %v422_v0 = vmul.f32 %v2937_v24, %v2937_v24  ;;  %v421_v37 = vmul.f32 %v2943_v10, %v2943_v10  ;;  %v424_v31 = vmul.f32 %v2950_v35, %v2950_v35  ;;  %v423_v1 = vmul.f32 %v2953_v16, %v2953_v16 }
  0xd9   :  { %v450_v36 = vsel %vm50_vm0, %v420_v23, 0.0  ;;  %v447_v25 = vsel %vm50_vm0, %v419_v9, 0.0 }
  0xda   :  { %v456_v29 = vsel %vm50_vm0, %v422_v0, 0.0  ;;  %v453_v34 = vsel %vm50_vm0, %v421_v37, 0.0  ;;  %v462_v8 = vsel %vm50_vm0, %v424_v31, 0.0  ;;  %v459_v38 = vsel %vm50_vm0, %v423_v1, 0.0 }
  0xdb   :  { %v2437_v41 = vpop.eup %2436  ;;  %v3077_v0 = vrot.slane %v3059_v4, %v2811_v58 }
  0xdc   :  { %v2439_v55 = vpop.eup %2438  ;;  %v305_v43 = vmul.f32 %v2437_v41, %v257_v39 }
  0xdd   :  { %v304_v44 = vmul.f32 %v2439_v55, %v256_v17 }
  0xde   :  { %v325_v47 = vmul.f32 %v2824_v12, %v305_v43 }
  0xdf   :  { %v2441_v2 = vpop.eup %2440  ;;  %v324_v6 = vmul.f32 %v2824_v12, %v304_v44 }
  0xe0   :  { %v2443_v11 = vpop.eup %2442  ;;  %v2970_v48 = vadd.f32 %v2827_v18, %v325_v47  ;;  %v307_v26 = vmul.f32 %v2441_v2, %v259_v46  ;;  %v2408_v47 = vld [vmem:[%s3814_s3] sm:$0xff]  }
  0xe1   :  { %v2973_v49 = vadd.f32 %v2827_v18, %v324_v6  ;;  %v306_v28 = vmul.f32 %v2443_v11, %v258_v32  ;;  %2184 = vmatprep.subr.bf16.mxu0 %v2408_v47 }
  0xe2   :  { %v388_v52 = vsel %vm50_vm0, %v2970_v48, 0.0  ;;  %v327_v60 = vmul.f32 %v2824_v12, %v307_v26  ;;  %v426_v54 = vmul.f32 %v2970_v48, %v2970_v48  ;;  %2185 = vmatpush3.bf16.msra.mxu0 %v2408_v47 }
  0xe3   :  { %389 = vadd.xlane.f32.xlu1 %v388_v52  ;;  %v385_v53 = vsel %vm50_vm0, %v2973_v49, 0.0  ;;  %v326_v30 = vmul.f32 %v2824_v12, %v306_v28  ;;  %v413_v12 = vmul.f32 %v2845_v50, %v2845_v50  ;;  %v425_v39 = vmul.f32 %v2973_v49, %v2973_v49 }
  0xe4   :  { %386 = vadd.xlane.f32.xlu0 %v385_v53  ;;  %v2982_v51 = vadd.f32 %v2827_v18, %v327_v60  ;;  %v468_v41 = vsel %vm50_vm0, %v426_v54, 0.0 }
  0xe5   :  { %v2985_v57 = vadd.f32 %v2827_v18, %v326_v30  ;;  %v416_v18 = vmul.f32 %v2857_v14, %v2857_v14  ;;  %v429_v3 = vsel %vm50_vm0, %v413_v12, 0.0  ;;  %v465_v55 = vsel %vm50_vm0, %v425_v39, 0.0 }
  0xe6   :  { %v394_v61 = vsel %vm50_vm0, %v2982_v51, 0.0  ;;  %v428_v17 = vmul.f32 %v2982_v51, %v2982_v51 }
  0xe7   :  { %395 = vadd.xlane.f32.xlu1 %v394_v61  ;;  %v391_v7 = vsel %vm50_vm0, %v2985_v57, 0.0  ;;  %v438_v13 = vsel %vm50_vm0, %v416_v18, 0.0  ;;  %v427_v43 = vmul.f32 %v2985_v57, %v2985_v57 }
  0xe8   :  { %392 = vadd.xlane.f32.xlu0 %v391_v7  ;;  %v474_v44 = vsel %vm50_vm0, %v428_v17, 0.0 }
  0xe9   :  { %v471_v46 = vsel %vm50_vm0, %v427_v43, 0.0 }
  0xeb   :  { %433 = vadd.xlane.f32.xlu1 %v432_v63 }
  0xec   :  { %430 = vadd.xlane.f32.xlu0 %v429_v3 }
  0xef   :  { %439 = vadd.xlane.f32.xlu1 %v438_v13 }
  0xf0   :  { %436 = vadd.xlane.f32.xlu0 %v435_v59 }
  0xf3   :  { %445 = vadd.xlane.f32.xlu1 %v444_v22  ;;  %v3069_v22 = vrot.slane %v3059_v4, %v2805_v56 }
  0xf4   :  { %442 = vadd.xlane.f32.xlu0 %v441_v5 }
  0xf7   :  { %451 = vadd.xlane.f32.xlu1 %v450_v36 }
  0xf8   :  { %448 = vadd.xlane.f32.xlu0 %v447_v25 }
  0xfb   :  { %457 = vadd.xlane.f32.xlu1 %v456_v29 }
  0xfc   :  { %454 = vadd.xlane.f32.xlu0 %v453_v34 }
  0xff   :  { %463 = vadd.xlane.f32.xlu1 %v462_v8 }
 0x100   :  { %460 = vadd.xlane.f32.xlu0 %v459_v38 }
 0x103   :  { %469 = vadd.xlane.f32.xlu1 %v468_v41 }
 0x104   :  { %466 = vadd.xlane.f32.xlu0 %v465_v55 }
 0x107   :  { %475 = vadd.xlane.f32.xlu1 %v474_v44 }
 0x108   :  { %472 = vadd.xlane.f32.xlu0 %v471_v46 }
 0x140   :  { %v354_v2 = vpop.xlane.xlu1 %353 }
 0x141   :  { %v351_v32 = vpop.xlane.xlu0 %350  ;;  %v3052_v18 = vmul.f32 0.0625, %v354_v2 }
 0x142   :  { %v3061_v13 = vmul.f32 0.0625, %v351_v32 }
 0x143   :  { %v494_v23 = vmul.f32 %v3052_v18, %v3052_v18  ;;  %v542_v25 = vsub.f32 %v2839_v42, %v3052_v18 }
 0x144   :  { %v360_v6 = vpop.xlane.xlu1 %359  ;;  %v493_v37 = vmul.f32 %v3061_v13, %v3061_v13  ;;  %v541_v34 = vsub.f32 %v2845_v50, %v3061_v13 }
 0x145   :  { %v3063_v20 = vmul.f32 0.0625, %v360_v6 }
 0x147   :  { %v357_v11 = vpop.xlane.xlu0 %356  ;;  %v496_v1 = vmul.f32 %v3063_v20, %v3063_v20  ;;  %v544_v8 = vsub.f32 %v2857_v14, %v3063_v20 }
 0x148   :  { %v3065_v59 = vmul.f32 0.0625, %v357_v11 }
 0x14a   :  { %v495_v38 = vmul.f32 %v3065_v59, %v3065_v59 }
 0x150   :  { %v366_v26 = vpop.xlane.xlu1 %365 }
 0x151   :  { %v363_v28 = vpop.xlane.xlu0 %362  ;;  %v3073_v5 = vmul.f32 0.0625, %v366_v26 }
 0x152   :  { %v3083_v29 = vmul.f32 0.0625, %v363_v28 }
 0x153   :  { %v498_v43 = vmul.f32 %v3073_v5, %v3073_v5 }
 0x154   :  { %v372_v52 = vpop.xlane.xlu1 %371  ;;  %v497_v6 = vmul.f32 %v3083_v29, %v3083_v29 }
 0x155   :  { %v3095_v41 = vmul.f32 0.0625, %v372_v52 }
 0x157   :  { %v369_v60 = vpop.xlane.xlu0 %368 }
 0x158   :  { %v3099_v44 = vmul.f32 0.0625, %v369_v60  ;;  %v500_v60 = vmul.f32 %v3095_v41, %v3095_v41 }
 0x160   :  { %v378_v53 = vpop.xlane.xlu1 %377 }
 0x161   :  { %v375_v30 = vpop.xlane.xlu0 %374  ;;  %v3107_v52 = vmul.f32 0.0625, %v378_v53 }
 0x164   :  { %v3042_v61 = vpop.xlane.xlu1 %383 }
 0x165   :  { %v3044_v33 = vpop.xlane.xlu0 %380 }
 0x170   :  { %v3046_v7 = vpop.xlane.xlu1 %389 }
 0x171   :  { %v3048_v12 = vpop.xlane.xlu0 %386 }
 0x174   :  { %v3050_v63 = vpop.xlane.xlu1 %395 }
 0x175   :  { %v3054_v3 = vpop.xlane.xlu0 %392 }
 0x178   :  { %v434_v19 = vpop.xlane.xlu1 %433 }
 0x179   :  { %v478_v9 = vmul.f32 0.0625, %v434_v19  ;;  %v431_v36 = vpop.xlane.xlu0 %430 }
 0x17a   :  { %v477_v31 = vmul.f32 0.0625, %v431_v36 }
 0x17b   :  { %v510_v54 = vsub.f32 %v478_v9, %v494_v23  ;;  %v3119_v9 = vmul.f32 0.0625, %v375_v30  ;;  %v3130_v30 = vmul.f32 0.0625, %v3046_v7 }
 0x17c   :  { %v509_v17 = vsub.f32 %v477_v31, %v493_v37  ;;  %v440_v55 = vpop.xlane.xlu1 %439 }
 0x17d   :  { %v526_v46 = vmax.f32 %v510_v54, 0.0  ;;  %v480_v47 = vmul.f32 0.0625, %v440_v55  ;;  %v437_v2 = vpop.xlane.xlu0 %436  ;;  %v499_v54 = vmul.f32 %v3099_v44, %v3099_v44 }
 0x17e   :  { %v525_v11 = vmax.f32 %v509_v17, 0.0  ;;  %v479_v26 = vmul.f32 0.0625, %v437_v2 }
 0x17f   :  { %v558_v19 = vadd.f32 1e-05, %v526_v46  ;;  %v512_v23 = vsub.f32 %v480_v47, %v496_v1  ;;  %v502_v47 = vmul.f32 %v3107_v52, %v3107_v52 }
 0x180   :  { %v557_v36 = vadd.f32 1e-05, %v525_v11  ;;  %v511_v37 = vsub.f32 %v479_v26, %v495_v38  ;;  %v446_v31 = vpop.xlane.xlu1 %445 }
 0x181   :  { %2444 = vrsqrt.f32 %v558_v19  ;;  %v528_v17 = vmax.f32 %v512_v23, 0.0  ;;  %v482_v55 = vmul.f32 0.0625, %v446_v31  ;;  %v443_v2 = vpop.xlane.xlu0 %442  ;;  %v3124_v19 = vmul.f32 0.0625, %v3042_v61 }
 0x182   :  { %2446 = vrsqrt.f32 %v557_v36  ;;  %v527_v1 = vmax.f32 %v511_v37, 0.0  ;;  %v481_v46 = vmul.f32 0.0625, %v443_v2  ;;  %v3127_v36 = vmul.f32 0.0625, %v3044_v33 }
 0x183   :  { %v560_v38 = vadd.f32 1e-05, %v528_v17  ;;  %v514_v11 = vsub.f32 %v482_v55, %v498_v43  ;;  %v501_v61 = vmul.f32 %v3119_v9, %v3119_v9  ;;  %v3135_v55 = vmul.f32 0.0625, %v3048_v12 }
 0x184   :  { %v559_v23 = vadd.f32 1e-05, %v527_v1  ;;  %v513_v31 = vsub.f32 %v481_v46, %v497_v6  ;;  %v452_v28 = vpop.xlane.xlu1 %451  ;;  %v504_v33 = vmul.f32 %v3124_v19, %v3124_v19  ;;  %v506_v12 = vmul.f32 %v3130_v30, %v3130_v30 }
 0x185   :  { %2448 = vrsqrt.f32 %v560_v38  ;;  %v530_v37 = vmax.f32 %v514_v11, 0.0  ;;  %v484_v2 = vmul.f32 0.0625, %v452_v28  ;;  %v449_v53 = vpop.xlane.xlu0 %448  ;;  %v3140_v28 = vmul.f32 0.0625, %v3050_v63 }
 0x186   :  { %2450 = vrsqrt.f32 %v559_v23  ;;  %v529_v43 = vmax.f32 %v513_v31, 0.0  ;;  %v483_v17 = vmul.f32 0.0625, %v449_v53  ;;  %v503_v53 = vmul.f32 %v3127_v36, %v3127_v36 }
 0x187   :  { %v562_v6 = vadd.f32 1e-05, %v530_v37  ;;  %v516_v1 = vsub.f32 %v484_v2, %v500_v60  ;;  %v505_v63 = vmul.f32 %v3135_v55, %v3135_v55 }
 0x188   :  { %v561_v46 = vadd.f32 1e-05, %v529_v43  ;;  %v515_v7 = vsub.f32 %v483_v17, %v499_v54  ;;  %v458_v38 = vpop.xlane.xlu1 %457  ;;  %v3149_v54 = vmul.f32 0.0625, %v3054_v3 }
 0x189   :  { %2452 = vrsqrt.f32 %v562_v6  ;;  %v532_v11 = vmax.f32 %v516_v1, 0.0  ;;  %v486_v23 = vmul.f32 0.0625, %v458_v38  ;;  %v455_v31 = vpop.xlane.xlu0 %454  ;;  %v3153_v6 = vmul.f32 %v3140_v28, %v3140_v28 }
 0x18a   :  { %2454 = vrsqrt.f32 %v561_v46  ;;  %v531_v60 = vmax.f32 %v515_v7, 0.0  ;;  %v485_v37 = vmul.f32 0.0625, %v455_v31 }
 0x18b   :  { %v2445_v2 = vpop.eup %2444  ;;  %v564_v43 = vadd.f32 1e-05, %v532_v11  ;;  %v518_v17 = vsub.f32 %v486_v23, %v502_v47 }
 0x18c   :  { %v2447_v26 = vpop.eup %2446  ;;  %v563_v1 = vadd.f32 1e-05, %v531_v60  ;;  %v517_v38 = vsub.f32 %v485_v37, %v501_v61  ;;  %v464_v32 = vpop.xlane.xlu1 %463  ;;  %v590_v46 = vmul.f32 %v2445_v2, %v542_v25  ;;  %v507_v61 = vmul.f32 %v3149_v54, %v3149_v54 }
 0x18d   :  { %2456 = vrsqrt.f32 %v564_v43  ;;  %v534_v7 = vmax.f32 %v518_v17, 0.0  ;;  %v488_v31 = vmul.f32 0.0625, %v464_v32  ;;  %v461_v39 = vpop.xlane.xlu0 %460  ;;  %v589_v3 = vmul.f32 %v2447_v26, %v541_v34 }
 0x18e   :  { %2458 = vrsqrt.f32 %v563_v1  ;;  %v533_v47 = vmax.f32 %v517_v38, 0.0  ;;  %v487_v11 = vmul.f32 0.0625, %v461_v39  ;;  %v610_v23 = vmul.f32 %v3069_v22, %v590_v46 }
 0x18f   :  { %v2449_v60 = vpop.eup %2448  ;;  %v566_v37 = vadd.f32 1e-05, %v534_v7  ;;  %v520_v18 = vsub.f32 %v488_v31, %v504_v33  ;;  %v609_v25 = vmul.f32 %v3069_v22, %v589_v3  ;;  %v3822_v7 = vsub.f32 %v2873_v27, %v3065_v59 }
 0x190   :  { %v2451_v2 = vpop.eup %2450  ;;  %v565_v32 = vadd.f32 1e-05, %v533_v47  ;;  %v519_v43 = vsub.f32 %v487_v11, %v503_v53  ;;  %v470_v17 = vpop.xlane.xlu1 %469  ;;  %v630_v13 = vadd.f32 %v3077_v0, %v610_v23  ;;  %v592_v34 = vmul.f32 %v2449_v60, %v544_v8 }
 0x191   :  { %2460 = vrsqrt.f32 %v566_v37  ;;  %v536_v39 = vmax.f32 %v520_v18, 0.0  ;;  %v490_v26 = vmul.f32 0.0625, %v470_v17  ;;  %v467_v1 = vpop.xlane.xlu0 %466  ;;  %v629_v38 = vadd.f32 %v3077_v0, %v609_v25 }
 0x192   :  { %2462 = vrsqrt.f32 %v565_v32  ;;  %v535_v33 = vmax.f32 %v519_v43, 0.0  ;;  %v489_v46 = vmul.f32 0.0625, %v467_v1  ;;  %v591_v53 = vmul.f32 %v2451_v2, %v3822_v7 }
 0x193   :  { %v2453_v31 = vpop.eup %2452  ;;  %v568_v3 = vadd.f32 1e-05, %v536_v39  ;;  %v522_v47 = vsub.f32 %v490_v26, %v506_v12  ;;  %v647_v11 = vpack.c.bf16 %v630_v13, %v629_v38  ;;  %v612_v20 = vmul.f32 %v3069_v22, %v592_v34 }
 0x194   :  { %v2455_v8 = vpop.eup %2454  ;;  %v567_v23 = vadd.f32 1e-05, %v535_v33  ;;  %v521_v60 = vsub.f32 %v489_v46, %v505_v63  ;;  %v476_v37 = vpop.xlane.xlu1 %475  ;;  %v611_v18 = vmul.f32 %v3069_v22, %v591_v53  ;;  %v3823_v25 = vsub.f32 %v2887_v62, %v3073_v5 }
 0x195   :  { %2464 = vrsqrt.f32 %v568_v3  ;;  %v538_v43 = vmax.f32 %v522_v47, 0.0  ;;  %v492_v59 = vmul.f32 0.0625, %v476_v37  ;;  %2186 = vmatprep.mubr.msk.bf16.mxu0 %vm50_vm0, %v647_v11  ;;  %v473_v2 = vpop.xlane.xlu0 %472  ;;  %v632_v12 = vadd.f32 %v3077_v0, %v612_v20 }
 0x196   :  { %v594_v32 = vmul.f32 %v2453_v31, %v3823_v25  ;;  %2466 = vrsqrt.f32 %v567_v23  ;;  %v537_v17 = vmax.f32 %v521_v60, 0.0  ;;  %v491_v13 = vmul.f32 0.0625, %v473_v2 }
 0x197   :  { %v631_v63 = vadd.f32 %v3077_v0, %v611_v18  ;;  %v2457_v34 = vpop.eup %2456  ;;  %v570_v39 = vadd.f32 1e-05, %v538_v43  ;;  %v524_v26 = vsub.f32 %v492_v59, %v3153_v6  ;;  %v3824_v5 = vsub.f32 %v2893_v15, %v3083_v29 }
 0x198   :  { %v614_v38 = vmul.f32 %v3069_v22, %v594_v32  ;;  %v2459_v33 = vpop.eup %2458  ;;  %v569_v46 = vadd.f32 1e-05, %v537_v17  ;;  %v523_v7 = vsub.f32 %v491_v13, %v507_v61  ;;  %v3825_v31 = vsub.f32 %v2905_v21, %v3095_v41 }
 0x199   :  { %v593_v1 = vmul.f32 %v2455_v8, %v3824_v5  ;;  %v648_v53 = vpack.c.bf16 %v632_v12, %v631_v63  ;;  %2468 = vrsqrt.f32 %v570_v39  ;;  %v540_v47 = vmax.f32 %v524_v26, 0.0 }
 0x19a   :  { %v596_v3 = vmul.f32 %v2457_v34, %v3825_v31  ;;  %v634_v6 = vadd.f32 %v3077_v0, %v614_v38  ;;  %2470 = vrsqrt.f32 %v569_v46  ;;  %v539_v20 = vmax.f32 %v523_v7, 0.0 }
 0x19b   :  { %v613_v11 = vmul.f32 %v3069_v22, %v593_v1  ;;  %2187 = vmatmul.mubr.msk.bf16.vlgmr.msra.gmra.mrb[0].mxu0 %vm50_vm0, %v648_v53  ;;  %v3826_v29 = vsub.f32 %v2921_v40, %v3099_v44  ;;  %v2461_v23 = vpop.eup %2460  ;;  %v549_v41 = vsub.f32 %v2943_v10, %v3119_v9  ;;  %v572_v60 = vadd.f32 1e-05, %v540_v47 }
 0x19c   :  { %v616_v61 = vmul.f32 %v3069_v22, %v596_v3  ;;  %v2463_v18 = vpop.eup %2462  ;;  %v571_v25 = vadd.f32 1e-05, %v539_v20  ;;  %v3827_v59 = vsub.f32 %v2937_v24, %v3107_v52  ;;  %v552_v17 = vsub.f32 %v2950_v35, %v3124_v19 }
 0x19d   :  { %v595_v8 = vmul.f32 %v2459_v33, %v3826_v29  ;;  %v633_v37 = vadd.f32 %v3077_v0, %v613_v11  ;;  %2472 = vrsqrt.f32 %v572_v60  ;;  %v597_v12 = vmul.f32 %v2463_v18, %v549_v41 }
 0x19e   :  { %v636_v43 = vadd.f32 %v3077_v0, %v616_v61  ;;  %v598_v44 = vmul.f32 %v2461_v23, %v3827_v59  ;;  %2474 = vrsqrt.f32 %v571_v25  ;;  %v551_v34 = vsub.f32 %v2953_v16, %v3127_v36 }
 0x19f   :  { %v615_v32 = vmul.f32 %v3069_v22, %v595_v8  ;;  %v649_v2 = vpack.c.bf16 %v634_v6, %v633_v37  ;;  %v2465_v63 = vpop.eup %2464  ;;  %v617_v52 = vmul.f32 %v3069_v22, %v597_v12  ;;  %v554_v33 = vsub.f32 %v2970_v48, %v3130_v30  ;;  %v2410_v12 = vld [vmem:[%s3816_s4 + $0x8] sm:$0xff]  }
 0x1a0   :  { %v618_v13 = vmul.f32 %v3069_v22, %v598_v44  ;;  %v2467_v39 = vpop.eup %2466  ;;  %v600_v1 = vmul.f32 %v2465_v63, %v552_v17  ;;  %v553_v7 = vsub.f32 %v2973_v49, %v3135_v55  ;;  %v556_v20 = vsub.f32 %v2982_v51, %v3140_v28 }
 0x1a1   :  { %v635_v9 = vadd.f32 %v3077_v0, %v615_v32  ;;  %2190 = vmatprep.mubr.msk.bf16.mxu0 %vm50_vm0, %v649_v2  ;;  %v637_v19 = vadd.f32 %v3077_v0, %v617_v52  ;;  %v599_v38 = vmul.f32 %v2467_v39, %v551_v34  ;;  %v555_v55 = vsub.f32 %v2985_v57, %v3149_v54  ;;  %v2409_v2 = vld [vmem:[%s3816_s4] sm:$0xff]  }
 0x1a2   :  { %v638_v5 = vadd.f32 %v3077_v0, %v618_v13  ;;  %v620_v46 = vmul.f32 %v3069_v22, %v600_v1  ;;  %2202 = vmatprep.subr.bf16.mxu1 %v2409_v2 }
 0x1a3   :  { %v650_v26 = vpack.c.bf16 %v636_v43, %v635_v9  ;;  %v2469_v36 = vpop.eup %2468  ;;  %v619_v31 = vmul.f32 %v3069_v22, %v599_v38  ;;  %2203 = vmatpush3.bf16.msra.mxu1 %v2409_v2 }
 0x1a4   :  { %v651_v53 = vpack.c.bf16 %v638_v5, %v637_v19  ;;  %v2471_v3 = vpop.eup %2470  ;;  %v640_v47 = vadd.f32 %v3077_v0, %v620_v46  ;;  %v602_v11 = vmul.f32 %v2469_v36, %v554_v33  ;;  %2204 = vmatprep.subr.bf16.mxu1 %v2410_v12 }
 0x1a5   :  { %2191 = vmatmul.mubr.msk.bf16.gmra.mrb[4].mxu0 %vm50_vm0, %v650_v26  ;;  %v639_v6 = vadd.f32 %v3077_v0, %v619_v31  ;;  %v601_v30 = vmul.f32 %v2471_v3, %v553_v7 }
 0x1a6   :  { %2194 = vmatprep.mubr.msk.bf16.mxu0 %vm50_vm0, %v651_v53  ;;  %v622_v29 = vmul.f32 %v3069_v22, %v602_v11 }
 0x1a7   :  { %v2473_v8 = vpop.eup %2472  ;;  %v652_v61 = vpack.c.bf16 %v640_v47, %v639_v6  ;;  %v621_v23 = vmul.f32 %v3069_v22, %v601_v30  ;;  %2205 = vmatpush3.bf16.msra.mxu1 %v2410_v12 }
 0x1a8   :  { %v2475_v41 = vpop.eup %2474  ;;  %v642_v60 = vadd.f32 %v3077_v0, %v622_v29  ;;  %v604_v37 = vmul.f32 %v2473_v8, %v556_v20 }
 0x1a9   :  { %v641_v18 = vadd.f32 %v3077_v0, %v621_v23  ;;  %v603_v25 = vmul.f32 %v2475_v41, %v555_v55 }
 0x1aa   :  { %v624_v28 = vmul.f32 %v3069_v22, %v604_v37 }
 0x1ab   :  { %v653_v32 = vpack.c.bf16 %v642_v60, %v641_v18  ;;  %v623_v43 = vmul.f32 %v3069_v22, %v603_v25  ;;  %v2411_v22 = vld [vmem:[%s3817_s5] sm:$0xff]  }
 0x1ac   :  { %v644_v59 = vadd.f32 %v3077_v0, %v624_v28  ;;  %2222 = vmatprep.subr.bf16.mxu0 %v2411_v22 }
 0x1ad   :  { %2195 = vmatmul.mubr.msk.bf16.gmra.mrb[8].mxu0 %vm50_vm0, %v652_v61  ;;  %v643_v54 = vadd.f32 %v3077_v0, %v623_v43  ;;  %v657_v0 = vsub.s32 2, %v2798_v45 }
 0x1ae   :  { %2198 = vmatprep.mubr.msk.bf16.mxu0 %vm50_vm0, %v653_v32  ;;  %2223 = vmatpush3.bf16.msra.mxu0 %v2411_v22 }
 0x1af   :  { %v654_v44 = vpack.c.bf16 %v644_v59, %v643_v54  ;;  %v3250_v17 = vrot.slane %v3059_v4, %v657_v0 }
 0x1b5   :  { %2199 = vmatmul.mubr.msk.bf16.gmra.mrb[12].mxu0 %vm50_vm0, %v654_v44 }
 0x26e   :  { %v2188_v9 = vpop.f32.mrb[0].mxu0 }
 0x26f   :  { %v3253_v13 = vadd.f32 %v2188_v9, %v3250_v17  ;;  %v723_v63 = vpop.f32.mrb[1].mxu0 }
 0x270   :  { %v3256_v34 = vadd.f32 %v723_v63, %v3250_v17  ;;  %v2189_v52 = vpop.f32.mrb[2].mxu0 }
 0x271   :  { %v2002_v39 = vmul.f32 -1.442695, %v3253_v13  ;;  %v3260_v26 = vadd.f32 %v2189_v52, %v3250_v17  ;;  %v726_v5 = vpop.f32.mrb[3].mxu0 }
 0x272   :  { %v2000_v1 = vmul.f32 -1.442695, %v3256_v34  ;;  %v3264_v19 = vadd.f32 %v726_v5, %v3250_v17 }
 0x273   :  { %2476 = vpow2.f32 %v2002_v39  ;;  %v2003_v38 = vmul.f32 -1.442695, %v3260_v26 }
 0x274   :  { %2478 = vpow2.f32 %v2000_v1  ;;  %v2001_v33 = vmul.f32 -1.442695, %v3264_v19 }
 0x275   :  { %2480 = vpow2.f32 %v2003_v38 }
 0x276   :  { %2482 = vpow2.f32 %v2001_v33 }
 0x278   :  { %v2192_v46 = vpop.f32.mrb[4].mxu0 }
 0x279   :  { %v3269_v36 = vadd.f32 %v2192_v46, %v3250_v17  ;;  %v739_v7 = vpop.f32.mrb[5].mxu0 }
 0x27a   :  { %v3272_v53 = vadd.f32 %v739_v7, %v3250_v17  ;;  %v2193_v31 = vpop.f32.mrb[6].mxu0 }
 0x27b   :  { %v2006_v3 = vmul.f32 -1.442695, %v3269_v36  ;;  %v3276_v47 = vadd.f32 %v2193_v31, %v3250_v17  ;;  %v742_v11 = vpop.f32.mrb[7].mxu0 }
 0x27c   :  { %v2004_v6 = vmul.f32 -1.442695, %v3272_v53  ;;  %v3280_v30 = vadd.f32 %v742_v11, %v3250_v17 }
 0x27d   :  { %2484 = vpow2.f32 %v2006_v3  ;;  %v2007_v20 = vmul.f32 -1.442695, %v3276_v47  ;;  %v2477_v8 = vpop.eup %2476 }
 0x27e   :  { %2486 = vpow2.f32 %v2004_v6  ;;  %v2005_v29 = vmul.f32 -1.442695, %v3280_v30  ;;  %v2479_v55 = vpop.eup %2478  ;;  %v836_v61 = vadd.f32 1.0, %v2477_v8 }
 0x27f   :  { %2488 = vpow2.f32 %v2007_v20  ;;  %v2481_v41 = vpop.eup %2480  ;;  %v834_v60 = vadd.f32 1.0, %v2479_v55 }
 0x280   :  { %2490 = vpow2.f32 %v2005_v29  ;;  %v2196_v23 = vpop.f32.mrb[8].mxu0  ;;  %v2483_v25 = vpop.eup %2482  ;;  %v837_v28 = vadd.f32 1.0, %v2481_v41 }
 0x281   :  { %v3285_v37 = vadd.f32 %v2196_v23, %v3250_v17  ;;  %v755_v18 = vpop.f32.mrb[9].mxu0  ;;  %2492 = vrcp.f32 %v836_v61  ;;  %v835_v59 = vadd.f32 1.0, %v2483_v25 }
 0x282   :  { %v3288_v32 = vadd.f32 %v755_v18, %v3250_v17  ;;  %v2197_v43 = vpop.f32.mrb[10].mxu0  ;;  %2494 = vrcp.f32 %v834_v60 }
 0x283   :  { %v2010_v54 = vmul.f32 -1.442695, %v3285_v37  ;;  %v3292_v44 = vadd.f32 %v2197_v43, %v3250_v17  ;;  %v758_v2 = vpop.f32.mrb[11].mxu0  ;;  %2496 = vrcp.f32 %v837_v28 }
 0x284   :  { %v2008_v12 = vmul.f32 -1.442695, %v3288_v32  ;;  %v3296_v22 = vadd.f32 %v758_v2, %v3250_v17  ;;  %2498 = vrcp.f32 %v835_v59 }
 0x285   :  { %v2011_v0 = vmul.f32 -1.442695, %v3292_v44  ;;  %2500 = vpow2.f32 %v2010_v54 }
 0x286   :  { %v2009_v9 = vmul.f32 -1.442695, %v3296_v22  ;;  %2502 = vpow2.f32 %v2008_v12 }
 0x287   :  { %v2485_v63 = vpop.eup %2484  ;;  %2504 = vpow2.f32 %v2011_v0 }
 0x288   :  { %v2487_v52 = vpop.eup %2486  ;;  %v840_v39 = vadd.f32 1.0, %v2485_v63  ;;  %v2200_v5 = vpop.f32.mrb[12].mxu0  ;;  %2506 = vpow2.f32 %v2009_v9 }
 0x289   :  { %v2489_v1 = vpop.eup %2488  ;;  %v838_v38 = vadd.f32 1.0, %v2487_v52  ;;  %v3301_v33 = vadd.f32 %v2200_v5, %v3250_v17  ;;  %v771_v46 = vpop.f32.mrb[13].mxu0 }
 0x28a   :  { %v2491_v7 = vpop.eup %2490  ;;  %2508 = vrcp.f32 %v840_v39  ;;  %v841_v31 = vadd.f32 1.0, %v2489_v1  ;;  %v3304_v3 = vadd.f32 %v771_v46, %v3250_v17  ;;  %v2201_v11 = vpop.f32.mrb[14].mxu0 }
 0x28b   :  { %2510 = vrcp.f32 %v838_v38  ;;  %v839_v6 = vadd.f32 1.0, %v2491_v7  ;;  %v2014_v20 = vmul.f32 -1.442695, %v3301_v33  ;;  %v3308_v29 = vadd.f32 %v2201_v11, %v3250_v17  ;;  %v774_v8 = vpop.f32.mrb[15].mxu0  ;;  %v2493_v55 = vpop.eup %2492 }
 0x28c   :  { %2512 = vrcp.f32 %v841_v31  ;;  %v2012_v61 = vmul.f32 -1.442695, %v3304_v3  ;;  %v3312_v23 = vadd.f32 %v774_v8, %v3250_v17  ;;  %v2495_v41 = vpop.eup %2494  ;;  %v884_v43 = vmul.f32 %v2493_v55, %v3253_v13 }
 0x28d   :  { %2514 = vrcp.f32 %v839_v6  ;;  %v2015_v60 = vmul.f32 -1.442695, %v3308_v29  ;;  %v2497_v18 = vpop.eup %2496  ;;  %v882_v2 = vmul.f32 %v2495_v41, %v3256_v34 }
 0x28e   :  { %2516 = vpow2.f32 %v2014_v20  ;;  %v2013_v25 = vmul.f32 -1.442695, %v3312_v23  ;;  %v2499_v28 = vpop.eup %2498  ;;  %v885_v59 = vmul.f32 %v2497_v18, %v3260_v26 }
 0x28f   :  { %2518 = vpow2.f32 %v2012_v61  ;;  %v2501_v54 = vpop.eup %2500  ;;  %v883_v17 = vmul.f32 %v2499_v28, %v3264_v19 }
 0x290   :  { %2520 = vpow2.f32 %v2015_v60  ;;  %v2503_v12 = vpop.eup %2502  ;;  %v903_v0 = vpack.c.bf16 %v885_v59, %v884_v43  ;;  %v844_v9 = vadd.f32 1.0, %v2501_v54 }
 0x291   :  { %2522 = vpow2.f32 %v2013_v25  ;;  %v2505_v63 = vpop.eup %2504  ;;  %v842_v52 = vadd.f32 1.0, %v2503_v12  ;;  %v902_v39 = vpack.c.bf16 %v883_v17, %v882_v2 }
 0x292   :  { %v2507_v5 = vpop.eup %2506  ;;  %2524 = vrcp.f32 %v844_v9  ;;  %v845_v13 = vadd.f32 1.0, %v2505_v63 }
 0x293   :  { %2526 = vrcp.f32 %v842_v52  ;;  %v843_v26 = vadd.f32 1.0, %v2507_v5  ;;  %2206 = vmatprep.mubr.msk.bf16.mxu1 %vm926_vm1, %v902_v39 }
 0x294   :  { %v2509_v1 = vpop.eup %2508  ;;  %2528 = vrcp.f32 %v845_v13  ;;  %2207 = vmatmul.mubr.msk.bf16.vlgmr.msra.gmra.mrb[0].mxu1 %vm926_vm1, %v903_v0  ;;  %v1201_v13 = vld [vmem:[%s3818_s6] sm:$0xff] }
 0x295   :  { %v2511_v34 = vpop.eup %2510  ;;  %2530 = vrcp.f32 %v843_v26  ;;  %v888_v46 = vmul.f32 %v2509_v1, %v3269_v36  ;;  %v1205_v26 = vld [vmem:[%s3818_s6 + $0x20] sm:$0xff] }
 0x296   :  { %v2513_v19 = vpop.eup %2512  ;;  %v886_v11 = vmul.f32 %v2511_v34, %v3272_v53  ;;  %v1206_v34 = vld [vmem:[%s3818_s6 + $0x28] sm:$0xff] }
 0x297   :  { %v2515_v38 = vpop.eup %2514  ;;  %v889_v7 = vmul.f32 %v2513_v19, %v3276_v47  ;;  %v2368_v19 = vpack.c.bf16 %v1206_v34, %v1205_v26 }
 0x298   :  { %v2517_v31 = vpop.eup %2516  ;;  %v887_v6 = vmul.f32 %v2515_v38, %v3280_v30  ;;  %v1207_v38 = vld [vmem:[%s3818_s6 + $0x30] sm:$0xff] }
 0x299   :  { %v2519_v20 = vpop.eup %2518  ;;  %v905_v8 = vpack.c.bf16 %v889_v7, %v888_v46  ;;  %v848_v55 = vadd.f32 1.0, %v2517_v31  ;;  %v1208_v46 = vld [vmem:[%s3818_s6 + $0x38] sm:$0xff]  ;;  %v912_v31 = vsub.s32 3, %v2798_v45 }
 0x29a   :  { %v2521_v61 = vpop.eup %2520  ;;  %v904_v41 = vpack.c.bf16 %v887_v6, %v886_v11  ;;  %v846_v60 = vadd.f32 1.0, %v2519_v20  ;;  %v2372_v7 = vpack.c.bf16 %v1208_v46, %v1207_v38 }
 0x29b   :  { %v2523_v18 = vpop.eup %2522  ;;  %2532 = vrcp.f32 %v848_v55  ;;  %v849_v25 = vadd.f32 1.0, %v2521_v61  ;;  %v3366_v11 = vrot.slane %v3059_v4, %v912_v31  ;;  %v1210_v31 = vld [vmem:[%s3819_s8] sm:$0xff] }
 0x29c   :  { %2534 = vrcp.f32 %v846_v60  ;;  %v847_v28 = vadd.f32 1.0, %v2523_v18  ;;  %2210 = vmatprep.mubr.msk.bf16.mxu1 %vm926_vm1, %v904_v41  ;;  %v2525_v36 = vpop.eup %2524 }
 0x29d   :  { %2536 = vrcp.f32 %v849_v25  ;;  %2211 = vmatmul.mubr.msk.bf16.gmra.mrb[4].mxu1 %vm926_vm1, %v905_v8  ;;  %v2527_v53 = vpop.eup %2526  ;;  %v892_v43 = vmul.f32 %v2525_v36, %v3285_v37 }
 0x29e   :  { %2538 = vrcp.f32 %v847_v28  ;;  %v2529_v47 = vpop.eup %2528  ;;  %v890_v54 = vmul.f32 %v2527_v53, %v3288_v32 }
 0x29f   :  { %v2531_v30 = vpop.eup %2530  ;;  %v893_v59 = vmul.f32 %v2529_v47, %v3292_v44 }
 0x2a0   :  { %v891_v2 = vmul.f32 %v2531_v30, %v3296_v22 }
 0x2a1   :  { %v907_v17 = vpack.c.bf16 %v893_v59, %v892_v43 }
 0x2a2   :  { %v906_v12 = vpack.c.bf16 %v891_v2, %v890_v54 }
 0x2a4   :  { %2214 = vmatprep.mubr.msk.bf16.mxu1 %vm926_vm1, %v906_v12 }
 0x2a5   :  { %v2533_v0 = vpop.eup %2532  ;;  %2215 = vmatmul.mubr.msk.bf16.gmra.mrb[8].mxu1 %vm926_vm1, %v907_v17 }
 0x2a6   :  { %v2535_v9 = vpop.eup %2534  ;;  %v896_v39 = vmul.f32 %v2533_v0, %v3301_v33  ;;  %v1202_v33 = vld [vmem:[%s3818_s6 + $0x8] sm:$0xff] }
 0x2a7   :  { %v2537_v63 = vpop.eup %2536  ;;  %v894_v44 = vmul.f32 %v2535_v9, %v3304_v3  ;;  %v1203_v3 = vld [vmem:[%s3818_s6 + $0x10] sm:$0xff] }
 0x2a8   :  { %v2539_v52 = vpop.eup %2538  ;;  %v897_v37 = vmul.f32 %v2537_v63, %v3308_v29  ;;  %v2360_v29 = vpack.c.bf16 %v1202_v33, %v1201_v13 }
 0x2a9   :  { %v895_v32 = vmul.f32 %v2539_v52, %v3312_v23  ;;  %v1204_v23 = vld [vmem:[%s3818_s6 + $0x18] sm:$0xff] }
 0x2aa   :  { %v909_v5 = vpack.c.bf16 %v897_v37, %v896_v39  ;;  %v2364_v1 = vpack.c.bf16 %v1204_v23, %v1203_v3  ;;  %2361 = vmatprep.subr.bf16.mxu1 %v2360_v29  ;;  %2377 = vmatprep.subr.bf16.mxu0 %v2360_v29 }
 0x2ab   :  { %v908_v22 = vpack.c.bf16 %v895_v32, %v894_v44  ;;  %2363 = vmatpush3.bf16.msra.mxu1 %v2360_v29 }
 0x2ac   :  { %2365 = vmatprep.subr.bf16.mxu1 %v2364_v1 }
 0x2ad   :  { %2218 = vmatprep.mubr.msk.bf16.mxu1 %vm926_vm1, %v908_v22 }
 0x2ae   :  { %2219 = vmatmul.mubr.msk.bf16.gmra.mrb[12].mxu1 %vm926_vm1, %v909_v5 }
 0x2af   :  { %2367 = vmatpush3.bf16.msra.mxu1 %v2364_v1 }
 0x2b0   :  { %2369 = vmatprep.subr.bf16.mxu1 %v2368_v19 }
 0x2b3   :  { %2371 = vmatpush3.bf16.msra.mxu1 %v2368_v19 }
 0x2b4   :  { %2373 = vmatprep.subr.bf16.mxu1 %v2372_v7 }
 0x2b7   :  { %2375 = vmatpush3.bf16.msra.mxu1 %v2372_v7 }
 0x367   :  { %v2208_v6 = vpop.f32.mrb[0].mxu1 }
 0x368   :  { %v994_v20 = vadd.f32 %v2208_v6, %v3366_v11  ;;  %v985_v8 = vpop.f32.mrb[1].mxu1 }
 0x369   :  { %v986_v55 = vadd.f32 %v985_v8, %v3366_v11  ;;  %v2209_v61 = vpop.f32.mrb[2].mxu1 }
 0x36a   :  { %v997_v41 = vadd.f32 %v2209_v61, %v3366_v11  ;;  %v988_v60 = vpop.f32.mrb[3].mxu1  ;;  %v1050_v25 = vadd.f32 %v994_v20, %v2873_v27 }
 0x36b   :  { %v989_v18 = vadd.f32 %v988_v60, %v3366_v11  ;;  %v1048_v45 = vadd.f32 %v986_v55, %v2845_v50 }
 0x36c   :  { %v1051_v28 = vadd.f32 %v997_v41, %v2857_v14 }
 0x36d   :  { %v1049_v4 = vadd.f32 %v989_v18, %v2839_v42 }
 0x36e   :  { %v1067_v36 = vpack.c.bf16 %v1051_v28, %v1050_v25 }
 0x36f   :  { %v1066_v53 = vpack.c.bf16 %v1049_v4, %v1048_v45 }
 0x370   :  { %v2212_v47 = vpop.f32.mrb[4].mxu1 }
 0x371   :  { %v1010_v30 = vadd.f32 %v2212_v47, %v3366_v11  ;;  %v1001_v43 = vpop.f32.mrb[5].mxu1  ;;  %2224 = vmatprep.mubr.msk.bf16.mxu0 %vm50_vm0, %v1066_v53 }
 0x372   :  { %v1002_v59 = vadd.f32 %v1001_v43, %v3366_v11  ;;  %v2213_v54 = vpop.f32.mrb[6].mxu1  ;;  %2225 = vmatmul.mubr.msk.bf16.vlgmr.msra.gmra.mrb[16].mxu0 %vm50_vm0, %v1067_v36 }
 0x373   :  { %v1013_v2 = vadd.f32 %v2213_v54, %v3366_v11  ;;  %v1004_v27 = vpop.f32.mrb[7].mxu1  ;;  %2379 = vmatpush3.bf16.msra.mxu0 %v2360_v29  ;;  %v1054_v42 = vadd.f32 %v1010_v30, %v2921_v40 }
 0x374   :  { %v1005_v50 = vadd.f32 %v1004_v27, %v3366_v11  ;;  %2381 = vmatprep.subr.bf16.mxu0 %v2364_v1  ;;  %v1052_v17 = vadd.f32 %v1002_v59, %v2893_v15 }
 0x375   :  { %v1055_v14 = vadd.f32 %v1013_v2, %v2905_v21 }
 0x376   :  { %v1053_v12 = vadd.f32 %v1005_v50, %v2887_v62 }
 0x377   :  { %v1069_v0 = vpack.c.bf16 %v1055_v14, %v1054_v42  ;;  %2383 = vmatpush3.bf16.msra.mxu0 %v2364_v1 }
 0x378   :  { %v1068_v9 = vpack.c.bf16 %v1053_v12, %v1052_v17  ;;  %v2216_v63 = vpop.f32.mrb[8].mxu1  ;;  %2385 = vmatprep.subr.bf16.mxu0 %v2368_v19 }
 0x379   :  { %v1026_v52 = vadd.f32 %v2216_v63, %v3366_v11  ;;  %v1017_v39 = vpop.f32.mrb[9].mxu1 }
 0x37a   :  { %2228 = vmatprep.mubr.msk.bf16.mxu0 %vm50_vm0, %v1068_v9  ;;  %v1018_v37 = vadd.f32 %v1017_v39, %v3366_v11  ;;  %v2217_v40 = vpop.f32.mrb[10].mxu1  ;;  %v1213_v39 = vld [vmem:[%s3819_s8 + $0x18] sm:$0xff] }
 0x37b   :  { %2229 = vmatmul.mubr.msk.bf16.gmra.mrb[20].mxu0 %vm50_vm0, %v1069_v0  ;;  %v1029_v21 = vadd.f32 %v2217_v40, %v3366_v11  ;;  %v1020_v15 = vpop.f32.mrb[11].mxu1  ;;  %v1058_v44 = vadd.f32 %v1026_v52, %v2953_v16  ;;  %v1212_v52 = vld [vmem:[%s3819_s8 + $0x10] sm:$0xff]  ;;  %v1214_v40 = vld [vmem:[%s3819_s8 + $0x20] sm:$0xff] }
 0x37c   :  { %2387 = vmatpush3.bf16.msra.mxu0 %v2368_v19  ;;  %v1021_v62 = vadd.f32 %v1020_v15, %v3366_v11  ;;  %v1056_v5 = vadd.f32 %v1018_v37, %v2943_v10  ;;  %v2396_v37 = vpack.c.bf16 %v1213_v39, %v1212_v52 }
 0x37d   :  { %2389 = vmatprep.subr.bf16.mxu0 %v2372_v7  ;;  %v1059_v32 = vadd.f32 %v1029_v21, %v2950_v35  ;;  %v1215_v21 = vld [vmem:[%s3819_s8 + $0x28] sm:$0xff] }
 0x37e   :  { %v1057_v22 = vadd.f32 %v1021_v62, %v2937_v24  ;;  %v2400_v15 = vpack.c.bf16 %v1215_v21, %v1214_v40  ;;  %v1216_v62 = vld [vmem:[%s3819_s8 + $0x30] sm:$0xff] }
 0x37f   :  { %v1071_v13 = vpack.c.bf16 %v1059_v32, %v1058_v44  ;;  %v1217_v44 = vld [vmem:[%s3819_s8 + $0x38] sm:$0xff] }
 0x380   :  { %2391 = vmatpush3.bf16.msra.mxu0 %v2372_v7  ;;  %v1070_v33 = vpack.c.bf16 %v1057_v22, %v1056_v5  ;;  %v2404_v32 = vpack.c.bf16 %v1217_v44, %v1216_v62  ;;  %v1209_v62 = vld [vmem:[%s3820_s7] sm:$0x3] }
 0x381   :  { %v2220_v3 = vpop.f32.mrb[12].mxu1 }
 0x382   :  { %v1042_v29 = vadd.f32 %v2220_v3, %v3366_v11  ;;  %v1033_v23 = vpop.f32.mrb[13].mxu1  ;;  %2232 = vmatprep.mubr.msk.bf16.mxu0 %vm50_vm0, %v1070_v33 }
 0x383   :  { %v1034_v1 = vadd.f32 %v1033_v23, %v3366_v11  ;;  %v2221_v26 = vpop.f32.mrb[14].mxu1  ;;  %2233 = vmatmul.mubr.msk.bf16.gmra.mrb[24].mxu0 %vm50_vm0, %v1071_v13 }
 0x384   :  { %v1045_v16 = vadd.f32 %v2221_v26, %v3366_v11  ;;  %v1036_v34 = vpop.f32.mrb[15].mxu1  ;;  %v1062_v24 = vadd.f32 %v1042_v29, %v2985_v57  ;;  %v1211_v57 = vld [vmem:[%s3819_s8 + $0x8] sm:$0xff] }
 0x385   :  { %v1037_v10 = vadd.f32 %v1036_v34, %v3366_v11  ;;  %v1060_v19 = vadd.f32 %v1034_v1, %v2973_v49  ;;  %v2392_v11 = vpack.c.bf16 %v1211_v57, %v1210_v31 }
 0x386   :  { %v1063_v35 = vadd.f32 %v1045_v16, %v2982_v51 }
 0x387   :  { %v1061_v38 = vadd.f32 %v1037_v10, %v2970_v48  ;;  %2393 = vmatprep.subr.bf16.mxu1 %v2392_v11 }
 0x388   :  { %v1073_v46 = vpack.c.bf16 %v1063_v35, %v1062_v24 }
 0x389   :  { %v1072_v7 = vpack.c.bf16 %v1061_v38, %v1060_v19 }
 0x38b   :  { %2236 = vmatprep.mubr.msk.bf16.mxu0 %vm50_vm0, %v1072_v7 }
 0x38c   :  { %2237 = vmatmul.mubr.msk.bf16.gmra.mrb[28].mxu0 %vm50_vm0, %v1073_v46 }
 0x445   :  { %v3414_v49 = vpop.f32.mrb[16].mxu0 }
 0x446   :  { %v3416_v48 = vpop.f32.mrb[17].mxu0  ;;  %v1415_v55 = vmul.f32 %v3414_v49, %v3414_v49 }
 0x447   :  { %v1413_v51 = vmul.f32 %v3416_v48, %v3416_v48  ;;  %v3420_v6 = vpop.f32.mrb[18].mxu0  ;;  %2256 = vmatprep.mubr.msk.f32.mxu1 %vm1219_vm2, %v3416_v48 }
 0x448   :  { %v3424_v20 = vpop.f32.mrb[19].mxu0  ;;  %v1416_v61 = vmul.f32 %v3420_v6, %v3420_v6 }
 0x449   :  { %v1414_v8 = vmul.f32 %v3424_v20, %v3424_v20  ;;  %2257 = vmatmul.mubr.msk.f32.vlgmr.msra.gmra.mrb[16].mxu1 %vm1219_vm2, %v3424_v20  ;;  %2296 = vmatprep.mubr.msk.f32.mxu0 %vm1219_vm2, %v1413_v51 }
 0x44a   :  { %2259 = vmatprep.mubr.msk.f32.mxu1 %vm1219_vm2, %v3414_v49  ;;  %2395 = vmatpush3.bf16.msra.mxu1 %v2392_v11 }
 0x44b   :  { %2297 = vmatmul.mubr.msk.f32.vlgmr.msra.gmra.mrb[32].mxu0 %vm1219_vm2, %v1414_v8  ;;  %2397 = vmatprep.subr.bf16.mxu1 %v2396_v37 }
 0x44c   :  { %2299 = vmatprep.mubr.msk.f32.mxu0 %vm1219_vm2, %v1415_v55 }
 0x44d   :  { %2260 = vmatmul.mubr.msk.f32.gmra.mrb[18].mxu1 %vm1219_vm2, %v3420_v6 }
 0x44e   :  { %v3439_v41 = vpop.f32.mrb[20].mxu0  ;;  %2399 = vmatpush3.bf16.msra.mxu1 %v2396_v37 }
 0x44f   :  { %v3443_v60 = vpop.f32.mrb[21].mxu0  ;;  %2300 = vmatmul.mubr.msk.f32.gmra.mrb[34].mxu0 %vm1219_vm2, %v1416_v61  ;;  %v1419_v4 = vmul.f32 %v3439_v41, %v3439_v41  ;;  %2401 = vmatprep.subr.bf16.mxu1 %v2400_v15 }
 0x450   :  { %v1417_v18 = vmul.f32 %v3443_v60, %v3443_v60  ;;  %v3447_v25 = vpop.f32.mrb[22].mxu0  ;;  %2262 = vmatprep.mubr.msk.f32.mxu1 %vm1219_vm2, %v3443_v60 }
 0x451   :  { %v3452_v28 = vpop.f32.mrb[23].mxu0  ;;  %v1420_v36 = vmul.f32 %v3447_v25, %v3447_v25 }
 0x452   :  { %v1418_v45 = vmul.f32 %v3452_v28, %v3452_v28  ;;  %2263 = vmatmul.mubr.msk.f32.gmra.mrb[20].mxu1 %vm1219_vm2, %v3452_v28  ;;  %2302 = vmatprep.mubr.msk.f32.mxu0 %vm1219_vm2, %v1417_v18 }
 0x453   :  { %2265 = vmatprep.mubr.msk.f32.mxu1 %vm1219_vm2, %v3439_v41  ;;  %2403 = vmatpush3.bf16.msra.mxu1 %v2400_v15 }
 0x454   :  { %2303 = vmatmul.mubr.msk.f32.gmra.mrb[36].mxu0 %vm1219_vm2, %v1418_v45  ;;  %2405 = vmatprep.subr.bf16.mxu1 %v2404_v32 }
 0x455   :  { %2305 = vmatprep.mubr.msk.f32.mxu0 %vm1219_vm2, %v1419_v4 }
 0x456   :  { %2266 = vmatmul.mubr.msk.f32.gmra.mrb[22].mxu1 %vm1219_vm2, %v3447_v25  ;;  %v3469_v53 = vpop.f32.mrb[24].mxu0 }
 0x457   :  { %v3471_v47 = vpop.f32.mrb[25].mxu0  ;;  %v1423_v2 = vmul.f32 %v3469_v53, %v3469_v53  ;;  %2407 = vmatpush3.bf16.msra.mxu1 %v2404_v32 }
 0x458   :  { %2306 = vmatmul.mubr.msk.f32.gmra.mrb[38].mxu0 %vm1219_vm2, %v1420_v36  ;;  %v1421_v30 = vmul.f32 %v3471_v47, %v3471_v47  ;;  %v3476_v43 = vpop.f32.mrb[26].mxu0  ;;  %2268 = vmatprep.mubr.msk.f32.mxu1 %vm1219_vm2, %v3471_v47 }
 0x459   :  { %v3480_v59 = vpop.f32.mrb[27].mxu0  ;;  %v1424_v27 = vmul.f32 %v3476_v43, %v3476_v43 }
 0x45a   :  { %v1422_v54 = vmul.f32 %v3480_v59, %v3480_v59  ;;  %2269 = vmatmul.mubr.msk.f32.gmra.mrb[24].mxu1 %vm1219_vm2, %v3480_v59  ;;  %2308 = vmatprep.mubr.msk.f32.mxu0 %vm1219_vm2, %v1421_v30 }
 0x45b   :  { %2271 = vmatprep.mubr.msk.f32.mxu1 %vm1219_vm2, %v3469_v53 }
 0x45c   :  { %2309 = vmatmul.mubr.msk.f32.gmra.mrb[40].mxu0 %vm1219_vm2, %v1422_v54 }
 0x45d   :  { %2311 = vmatprep.mubr.msk.f32.mxu0 %vm1219_vm2, %v1423_v2 }
 0x45e   :  { %2272 = vmatmul.mubr.msk.f32.gmra.mrb[26].mxu1 %vm1219_vm2, %v3476_v43 }
 0x45f   :  { %v3495_v50 = vpop.f32.mrb[28].mxu0 }
 0x460   :  { %v3499_v42 = vpop.f32.mrb[29].mxu0  ;;  %2312 = vmatmul.mubr.msk.f32.gmra.mrb[42].mxu0 %vm1219_vm2, %v1424_v27  ;;  %v1427_v9 = vmul.f32 %v3495_v50, %v3495_v50 }
 0x461   :  { %v1425_v14 = vmul.f32 %v3499_v42, %v3499_v42  ;;  %v3503_v17 = vpop.f32.mrb[30].mxu0  ;;  %2274 = vmatprep.mubr.msk.f32.mxu1 %vm1219_vm2, %v3499_v42 }
 0x462   :  { %v3508_v12 = vpop.f32.mrb[31].mxu0  ;;  %v1428_v63 = vmul.f32 %v3503_v17, %v3503_v17 }
 0x463   :  { %v1426_v0 = vmul.f32 %v3508_v12, %v3508_v12  ;;  %2275 = vmatmul.mubr.msk.f32.gmra.mrb[28].mxu1 %vm1219_vm2, %v3508_v12  ;;  %2314 = vmatprep.mubr.msk.f32.mxu0 %vm1219_vm2, %v1425_v14 }
 0x464   :  { %2277 = vmatprep.mubr.msk.f32.mxu1 %vm1219_vm2, %v3495_v50 }
 0x465   :  { %2315 = vmatmul.mubr.msk.f32.gmra.mrb[44].mxu0 %vm1219_vm2, %v1426_v0 }
 0x466   :  { %2317 = vmatprep.mubr.msk.f32.mxu0 %vm1219_vm2, %v1427_v9 }
 0x467   :  { %2278 = vmatmul.mubr.msk.f32.gmra.mrb[30].mxu1 %vm1219_vm2, %v3503_v17 }
 0x469   :  { %2318 = vmatmul.mubr.msk.f32.gmra.mrb[46].mxu0 %vm1219_vm2, %v1428_v63 }
 0x51c   :  { %v3544_v5 = vpop.f32.mrb[16].mxu1 }
 0x51d   :  { %v1623_v22 = vmul.f32 %v3544_v5, %v3544_v5  ;;  %v1655_v13 = vsub.f32 %v3424_v20, %v3544_v5  ;;  %v3550_v33 = vpop.f32.mrb[17].mxu1 }
 0x51e   :  { %v1622_v3 = vmul.f32 %v3550_v33, %v3550_v33  ;;  %v1654_v29 = vsub.f32 %v3416_v48, %v3550_v33  ;;  %v2298_v23 = vpop.f32.mrb[32].mxu0 }
 0x51f   :  { %v1639_v1 = vsub.f32 %v2298_v23, %v1623_v22  ;;  %v1543_v26 = vpop.f32.mrb[33].mxu0 }
 0x520   :  { %v1638_v16 = vsub.f32 %v1543_v26, %v1622_v3  ;;  %v3556_v34 = vpop.f32.mrb[18].mxu1 }
 0x521   :  { %v1671_v10 = vmax.f32 %v1639_v1, 0.0  ;;  %v1625_v24 = vmul.f32 %v3556_v34, %v3556_v34  ;;  %v1657_v35 = vsub.f32 %v3420_v6, %v3556_v34  ;;  %v3562_v19 = vpop.f32.mrb[19].mxu1 }
 0x522   :  { %v1670_v38 = vmax.f32 %v1638_v16, 0.0  ;;  %v1624_v46 = vmul.f32 %v3562_v19, %v3562_v19  ;;  %v1656_v7 = vsub.f32 %v3414_v49, %v3562_v19  ;;  %v2301_v31 = vpop.f32.mrb[34].mxu0 }
 0x523   :  { %v1687_v57 = vadd.f32 1e-05, %v1671_v10  ;;  %v1641_v11 = vsub.f32 %v2301_v31, %v1625_v24  ;;  %v1553_v51 = vpop.f32.mrb[35].mxu0  ;;  %v3596_v24 = vrot.slane %v1209_v62, %v2805_v56 }
 0x524   :  { %v1686_v8 = vadd.f32 1e-05, %v1670_v38  ;;  %v1640_v55 = vsub.f32 %v1553_v51, %v1624_v46 }
 0x525   :  { %v3568_v61 = vpop.f32.mrb[20].mxu1  ;;  %2540 = vrsqrt.f32 %v1687_v57  ;;  %v1673_v18 = vmax.f32 %v1641_v11, 0.0 }
 0x526   :  { %v1627_v45 = vmul.f32 %v3568_v61, %v3568_v61  ;;  %v1659_v4 = vsub.f32 %v3452_v28, %v3568_v61  ;;  %v3574_v36 = vpop.f32.mrb[21].mxu1  ;;  %2542 = vrsqrt.f32 %v1686_v8  ;;  %v1672_v30 = vmax.f32 %v1640_v55, 0.0 }
 0x527   :  { %v1626_v54 = vmul.f32 %v3574_v36, %v3574_v36  ;;  %v1658_v2 = vsub.f32 %v3443_v60, %v3574_v36  ;;  %v2304_v27 = vpop.f32.mrb[36].mxu0  ;;  %v1689_v14 = vadd.f32 1e-05, %v1673_v18  ;;  %v3607_v55 = vrot.slane %v1209_v62, %v2811_v58 }
 0x528   :  { %v1643_v0 = vsub.f32 %v2304_v27, %v1627_v45  ;;  %v1563_v9 = vpop.f32.mrb[37].mxu0  ;;  %v1688_v63 = vadd.f32 1e-05, %v1672_v30 }
 0x529   :  { %v1642_v52 = vsub.f32 %v1563_v9, %v1626_v54  ;;  %v3580_v39 = vpop.f32.mrb[22].mxu1  ;;  %2544 = vrsqrt.f32 %v1689_v14 }
 0x52a   :  { %v1675_v37 = vmax.f32 %v1643_v0, 0.0  ;;  %v1629_v40 = vmul.f32 %v3580_v39, %v3580_v39  ;;  %v1661_v21 = vsub.f32 %v3447_v25, %v3580_v39  ;;  %v3586_v15 = vpop.f32.mrb[23].mxu1  ;;  %2546 = vrsqrt.f32 %v1688_v63 }
 0x52b   :  { %v1674_v44 = vmax.f32 %v1642_v52, 0.0  ;;  %v1628_v32 = vmul.f32 %v3586_v15, %v3586_v15  ;;  %v1660_v22 = vsub.f32 %v3439_v41, %v3586_v15  ;;  %v2307_v3 = vpop.f32.mrb[38].mxu0 }
 0x52c   :  { %v1645_v23 = vsub.f32 %v2307_v3, %v1629_v40  ;;  %v1573_v1 = vpop.f32.mrb[39].mxu0  ;;  %v1691_v26 = vadd.f32 1e-05, %v1675_v37 }
 0x52d   :  { %v1690_v16 = vadd.f32 1e-05, %v1674_v44  ;;  %v1644_v10 = vsub.f32 %v1573_v1, %v1628_v32  ;;  %v3598_v46 = vpop.f32.mrb[24].mxu1 }
 0x52e   :  { %v1677_v38 = vmax.f32 %v1645_v23, 0.0  ;;  %v1631_v57 = vmul.f32 %v3598_v46, %v3598_v46  ;;  %v1663_v11 = vsub.f32 %v3480_v59, %v3598_v46  ;;  %v3604_v51 = vpop.f32.mrb[25].mxu1 }
 0x52f   :  { %2548 = vrsqrt.f32 %v1690_v16  ;;  %v1676_v31 = vmax.f32 %v1644_v10, 0.0  ;;  %v2541_v8 = vpop.eup %2540  ;;  %v1630_v56 = vmul.f32 %v3604_v51, %v3604_v51  ;;  %v1662_v45 = vsub.f32 %v3471_v47, %v3604_v51  ;;  %v2310_v30 = vpop.f32.mrb[40].mxu0 }
 0x530   :  { %v1693_v18 = vadd.f32 1e-05, %v1677_v38  ;;  %v2543_v54 = vpop.eup %2542  ;;  %v1719_v27 = vmul.f32 %v2541_v8, %v1655_v13  ;;  %2550 = vrsqrt.f32 %v1691_v26  ;;  %v1647_v0 = vsub.f32 %v2310_v30, %v1631_v57  ;;  %v1583_v9 = vpop.f32.mrb[41].mxu0 }
 0x531   :  { %v1692_v14 = vadd.f32 1e-05, %v1676_v31  ;;  %v1646_v58 = vsub.f32 %v1583_v9, %v1630_v56  ;;  %v3616_v63 = vpop.f32.mrb[26].mxu1  ;;  %v1718_v52 = vmul.f32 %v2543_v54, %v1654_v29 }
 0x532   :  { %2552 = vrsqrt.f32 %v1693_v18  ;;  %v1739_v37 = vmul.f32 %v3596_v24, %v1719_v27  ;;  %v1679_v40 = vmax.f32 %v1647_v0, 0.0  ;;  %v1633_v20 = vmul.f32 %v3616_v63, %v3616_v63  ;;  %v3624_v5 = vpop.f32.mrb[27].mxu1 }
 0x533   :  { %2554 = vrsqrt.f32 %v1692_v14  ;;  %v2545_v13 = vpop.eup %2544  ;;  %v1678_v62 = vmax.f32 %v1646_v58, 0.0  ;;  %v1665_v44 = vsub.f32 %v3476_v43, %v3616_v63  ;;  %v1632_v32 = vmul.f32 %v3624_v5, %v3624_v5  ;;  %v2313_v33 = vpop.f32.mrb[42].mxu0 }
 0x534   :  { %v1664_v48 = vsub.f32 %v3469_v53, %v3624_v5  ;;  %v2547_v29 = vpop.eup %2546  ;;  %v1759_v3 = vadd.f32 %v3607_v55, %v1739_v37  ;;  %v1695_v23 = vadd.f32 1e-05, %v1679_v40  ;;  %v1649_v1 = vsub.f32 %v2313_v33, %v1633_v20  ;;  %v1593_v26 = vpop.f32.mrb[43].mxu0 }
 0x535   :  { %v1738_v16 = vmul.f32 %v3596_v24, %v1718_v52  ;;  %v1694_v10 = vadd.f32 1e-05, %v1678_v62  ;;  %v1648_v38 = vsub.f32 %v1593_v26, %v1632_v32  ;;  %v1720_v57 = vmul.f32 %v2547_v29, %v1656_v7 }
 0x536   :  { %v3634_v31 = vpop.f32.mrb[28].mxu1  ;;  %v1721_v8 = vmul.f32 %v2545_v13, %v1657_v35  ;;  %2556 = vrsqrt.f32 %v1695_v23  ;;  %v1681_v18 = vmax.f32 %v1649_v1, 0.0 }
 0x537   :  { %v1635_v56 = vmul.f32 %v3634_v31, %v3634_v31  ;;  %v1667_v30 = vsub.f32 %v3508_v12, %v3634_v31  ;;  %v3646_v54 = vpop.f32.mrb[29].mxu1  ;;  %2558 = vrsqrt.f32 %v1694_v10  ;;  %v1680_v27 = vmax.f32 %v1648_v38, 0.0 }
 0x538   :  { %v1634_v49 = vmul.f32 %v3646_v54, %v3646_v54  ;;  %v1666_v19 = vsub.f32 %v3499_v42, %v3646_v54  ;;  %v2316_v6 = vpop.f32.mrb[44].mxu0  ;;  %v1697_v35 = vadd.f32 1e-05, %v1681_v18  ;;  %v1758_v0 = vadd.f32 %v3607_v55, %v1738_v16 }
 0x539   :  { %v2549_v34 = vpop.eup %2548  ;;  %v1651_v7 = vsub.f32 %v2316_v6, %v1635_v56  ;;  %v1603_v14 = vpop.f32.mrb[45].mxu0  ;;  %v1740_v9 = vmul.f32 %v3596_v24, %v1720_v57  ;;  %v1696_v58 = vadd.f32 1e-05, %v1680_v27  ;;  %v1741_v40 = vmul.f32 %v3596_v24, %v1721_v8 }
 0x53a   :  { %v1650_v52 = vsub.f32 %v1603_v14, %v1634_v49  ;;  %v3654_v37 = vpop.f32.mrb[30].mxu1  ;;  %v1722_v20 = vmul.f32 %v2549_v34, %v1658_v2  ;;  %v2551_v13 = vpop.eup %2550  ;;  %2560 = vrsqrt.f32 %v1697_v35  ;;  %2336 = vmatprep.mubr.msk.f32.mxu1 %vm1219_vm2, %v1758_v0 }
 0x53b   :  { %v1683_v62 = vmax.f32 %v1651_v7, 0.0  ;;  %v1637_v32 = vmul.f32 %v3654_v37, %v3654_v37  ;;  %v1669_v33 = vsub.f32 %v3503_v17, %v3654_v37  ;;  %v3665_v29 = vpop.f32.mrb[31].mxu1  ;;  %2562 = vrsqrt.f32 %v1696_v58  ;;  %2337 = vmatmul.mubr.msk.f32.vlgmr.msra.gmra.mrb[32].mxu1 %vm1219_vm2, %v1759_v3 }
 0x53c   :  { %v2553_v23 = vpop.eup %2552  ;;  %v1682_v1 = vmax.f32 %v1650_v52, 0.0  ;;  %v1636_v60 = vmul.f32 %v3665_v29, %v3665_v29  ;;  %v1668_v36 = vsub.f32 %v3495_v50, %v3665_v29  ;;  %v2319_v2 = vpop.f32.mrb[46].mxu0  ;;  %v1760_v57 = vadd.f32 %v3607_v55, %v1740_v9  ;;  %v2067_v50 = vld [vmem:[%s3819_s8 + $0x40] ss:$0 sm:$0xff] }
 0x53d   :  { %v2555_v26 = vpop.eup %2554  ;;  %v1699_v16 = vadd.f32 1e-05, %v1683_v62  ;;  %v1653_v10 = vsub.f32 %v2319_v2, %v1637_v32  ;;  %v1613_v38 = vpop.f32.mrb[47].mxu0  ;;  %v1761_v8 = vadd.f32 %v3607_v55, %v1741_v40  ;;  %v1742_v27 = vmul.f32 %v3596_v24, %v1722_v20 }
 0x53e   :  { %v1698_v18 = vadd.f32 1e-05, %v1682_v1  ;;  %v1652_v56 = vsub.f32 %v1613_v38, %v1636_v60  ;;  %v1723_v3 = vmul.f32 %v2551_v13, %v1659_v4  ;;  %2339 = vmatprep.mubr.msk.f32.mxu1 %vm1219_vm2, %v1760_v57  ;;  %v1724_v6 = vmul.f32 %v2555_v26, %v1660_v22 }
 0x53f   :  { %2564 = vrsqrt.f32 %v1699_v16  ;;  %v1685_v49 = vmax.f32 %v1653_v10, 0.0  ;;  %v1725_v34 = vmul.f32 %v2553_v23, %v1661_v21  ;;  %2340 = vmatmul.mubr.msk.f32.gmra.mrb[34].mxu1 %vm1219_vm2, %v1761_v8  ;;  %v1762_v7 = vadd.f32 %v3607_v55, %v1742_v27 }
 0x540   :  { %2566 = vrsqrt.f32 %v1698_v18  ;;  %v1684_v35 = vmax.f32 %v1652_v56, 0.0  ;;  %v1743_v28 = vmul.f32 %v3596_v24, %v1723_v3  ;;  %v2557_v61 = vpop.eup %2556  ;;  %v1744_v14 = vmul.f32 %v3596_v24, %v1724_v6 }
 0x541   :  { %v1701_v4 = vadd.f32 1e-05, %v1685_v49  ;;  %v2559_v0 = vpop.eup %2558  ;;  %2342 = vmatprep.mubr.msk.f32.mxu1 %vm1219_vm2, %v1762_v7  ;;  %v1745_v25 = vmul.f32 %v3596_v24, %v1725_v34  ;;  %v1727_v39 = vmul.f32 %v2557_v61, %v1663_v11 }
 0x542   :  { %v1700_v9 = vadd.f32 1e-05, %v1684_v35  ;;  %v1763_v41 = vadd.f32 %v3607_v55, %v1743_v28  ;;  %v1764_v21 = vadd.f32 %v3607_v55, %v1744_v14  ;;  %v1726_v15 = vmul.f32 %v2559_v0, %v1662_v45 }
 0x543   :  { %2568 = vrsqrt.f32 %v1701_v4  ;;  %v1765_v40 = vadd.f32 %v3607_v55, %v1745_v25  ;;  %v1747_v59 = vmul.f32 %v3596_v24, %v1727_v39 }
 0x544   :  { %2570 = vrsqrt.f32 %v1700_v9  ;;  %2343 = vmatmul.mubr.msk.f32.gmra.mrb[36].mxu1 %vm1219_vm2, %v1763_v41  ;;  %v2561_v22 = vpop.eup %2560  ;;  %v1746_v58 = vmul.f32 %v3596_v24, %v1726_v15 }
 0x545   :  { %2345 = vmatprep.mubr.msk.f32.mxu1 %vm1219_vm2, %v1764_v21  ;;  %v2563_v52 = vpop.eup %2562  ;;  %v1729_v46 = vmul.f32 %v2561_v22, %v1665_v44  ;;  %v1767_v13 = vadd.f32 %v3607_v55, %v1747_v59 }
 0x546   :  { %v1766_v47 = vadd.f32 %v3607_v55, %v1746_v58  ;;  %v1728_v11 = vmul.f32 %v2563_v52, %v1664_v48 }
 0x547   :  { %v1749_v62 = vmul.f32 %v3596_v24, %v1729_v46 }
 0x548   :  { %2346 = vmatmul.mubr.msk.f32.gmra.mrb[38].mxu1 %vm1219_vm2, %v1765_v40  ;;  %v1748_v45 = vmul.f32 %v3596_v24, %v1728_v11 }
 0x549   :  { %v2565_v51 = vpop.eup %2564  ;;  %2348 = vmatprep.mubr.msk.f32.mxu1 %vm1219_vm2, %v1766_v47  ;;  %v1769_v32 = vadd.f32 %v3607_v55, %v1749_v62 }
 0x54a   :  { %v2567_v20 = vpop.eup %2566  ;;  %v1731_v43 = vmul.f32 %v2565_v51, %v1667_v30  ;;  %v1768_v63 = vadd.f32 %v3607_v55, %v1748_v45 }
 0x54b   :  { %v1730_v53 = vmul.f32 %v2567_v20, %v1666_v19 }
 0x54c   :  { %2349 = vmatmul.mubr.msk.f32.gmra.mrb[40].mxu1 %vm1219_vm2, %v1767_v13  ;;  %v1751_v23 = vmul.f32 %v3596_v24, %v1731_v43 }
 0x54d   :  { %v2569_v5 = vpop.eup %2568  ;;  %2351 = vmatprep.mubr.msk.f32.mxu1 %vm1219_vm2, %v1768_v63  ;;  %v1750_v44 = vmul.f32 %v3596_v24, %v1730_v53 }
 0x54e   :  { %v2571_v48 = vpop.eup %2570  ;;  %v1733_v12 = vmul.f32 %v2569_v5, %v1669_v33  ;;  %v1771_v54 = vadd.f32 %v3607_v55, %v1751_v23 }
 0x54f   :  { %v1770_v31 = vadd.f32 %v3607_v55, %v1750_v44  ;;  %v1732_v42 = vmul.f32 %v2571_v48, %v1668_v36 }
 0x550   :  { %2352 = vmatmul.mubr.msk.f32.gmra.mrb[42].mxu1 %vm1219_vm2, %v1769_v32  ;;  %v1753_v19 = vmul.f32 %v3596_v24, %v1733_v12 }
 0x551   :  { %2354 = vmatprep.mubr.msk.f32.mxu1 %vm1219_vm2, %v1770_v31  ;;  %v1752_v30 = vmul.f32 %v3596_v24, %v1732_v42 }
 0x552   :  { %v1773_v17 = vadd.f32 %v3607_v55, %v1753_v19 }
 0x553   :  { %v1772_v1 = vadd.f32 %v3607_v55, %v1752_v30 }
 0x554   :  { %2355 = vmatmul.mubr.msk.f32.gmra.mrb[44].mxu1 %vm1219_vm2, %v1771_v54 }
 0x555   :  { %2357 = vmatprep.mubr.msk.f32.mxu1 %vm1219_vm2, %v1772_v1 }
 0x558   :  { %2358 = vmatmul.mubr.msk.f32.gmra.mrb[46].mxu1 %vm1219_vm2, %v1773_v17 }
 0x60e   :  { %v2338_v37 = vpop.f32.mrb[32].mxu1 }
 0x60f   :  { %v1898_v33 = vadd.f32 %v2338_v37, %v2067_v50  ;;  %v1892_v29 = vpop.f32.mrb[33].mxu1 }
 0x610   :  { %v1893_v60 = vadd.f32 %v2067_v50, %v1892_v29 }
 0x611   :  { %1972 = vst.msk [vmem:[%s3821_s9 + $0x8] sm:$0xff] %vm1219_vm2, %v1898_v33 }
 0x612   :  { %1971 = vst.msk [vmem:[%s3821_s9] sm:$0xff] %vm1219_vm2, %v1893_v60  ;;  %v2341_v24 = vpop.f32.mrb[34].mxu1 }
 0x613   :  { %v1908_v55 = vadd.f32 %v2341_v24, %v2067_v50  ;;  %v1902_v36 = vpop.f32.mrb[35].mxu1 }
 0x614   :  { %v1903_v2 = vadd.f32 %v2067_v50, %v1902_v36 }
 0x615   :  { %1974 = vst.msk [vmem:[%s3821_s9 + $0x18] sm:$0xff] %vm1219_vm2, %v1908_v55 }
 0x616   :  { %1973 = vst.msk [vmem:[%s3821_s9 + $0x10] sm:$0xff] %vm1219_vm2, %v1903_v2 }
 0x617   :  { %v2344_v26 = vpop.f32.mrb[36].mxu1 }
 0x618   :  { %v1918_v16 = vadd.f32 %v2344_v26, %v2067_v50  ;;  %v1912_v10 = vpop.f32.mrb[37].mxu1 }
 0x619   :  { %v1913_v38 = vadd.f32 %v2067_v50, %v1912_v10 }
 0x61a   :  { %1976 = vst.msk [vmem:[%s3821_s9 + $0x28] sm:$0xff] %vm1219_vm2, %v1918_v16 }
 0x61b   :  { %1975 = vst.msk [vmem:[%s3821_s9 + $0x20] sm:$0xff] %vm1219_vm2, %v1913_v38  ;;  %v2347_v57 = vpop.f32.mrb[38].mxu1 }
 0x61c   :  { %v1928_v8 = vadd.f32 %v2347_v57, %v2067_v50  ;;  %v1922_v18 = vpop.f32.mrb[39].mxu1 }
 0x61d   :  { %v1923_v56 = vadd.f32 %v2067_v50, %v1922_v18 }
 0x61e   :  { %1978 = vst.msk [vmem:[%s3821_s9 + $0x38] sm:$0xff] %vm1219_vm2, %v1928_v8 }
 0x61f   :  { %1977 = vst.msk [vmem:[%s3821_s9 + $0x30] sm:$0xff] %vm1219_vm2, %v1923_v56  ;;  %v2350_v27 = vpop.f32.mrb[40].mxu1 }
 0x620   :  { %v1938_v3 = vadd.f32 %v2350_v27, %v2067_v50  ;;  %v1932_v49 = vpop.f32.mrb[41].mxu1 }
 0x621   :  { %v1933_v6 = vadd.f32 %v2067_v50, %v1932_v49 }
 0x622   :  { %1980 = vst.msk [vmem:[%s3821_s9 + $0x48] sm:$0xff] %vm1219_vm2, %v1938_v3 }
 0x623   :  { %1979 = vst.msk [vmem:[%s3821_s9 + $0x40] sm:$0xff] %vm1219_vm2, %v1933_v6  ;;  %v2353_v34 = vpop.f32.mrb[42].mxu1 }
 0x624   :  { %v1948_v35 = vadd.f32 %v2353_v34, %v2067_v50  ;;  %v1942_v7 = vpop.f32.mrb[43].mxu1 }
 0x625   :  { %v1943_v28 = vadd.f32 %v2067_v50, %v1942_v7 }
 0x626   :  { %1982 = vst.msk [vmem:[%s3821_s9 + $0x58] sm:$0xff] %vm1219_vm2, %v1948_v35 }
 0x627   :  { %1981 = vst.msk [vmem:[%s3821_s9 + $0x50] sm:$0xff] %vm1219_vm2, %v1943_v28  ;;  %v2356_v61 = vpop.f32.mrb[44].mxu1 }
 0x628   :  { %v1958_v4 = vadd.f32 %v2356_v61, %v2067_v50  ;;  %v1952_v14 = vpop.f32.mrb[45].mxu1 }
 0x629   :  { %v1953_v0 = vadd.f32 %v2067_v50, %v1952_v14 }
 0x62a   :  { %1984 = vst.msk [vmem:[%s3821_s9 + $0x68] sm:$0xff] %vm1219_vm2, %v1958_v4 }
 0x62b   :  { %1983 = vst.msk [vmem:[%s3821_s9 + $0x60] sm:$0xff] %vm1219_vm2, %v1953_v0  ;;  %v2359_v9 = vpop.f32.mrb[46].mxu1 }
 0x62c   :  { %v1968_v41 = vadd.f32 %v2359_v9, %v2067_v50  ;;  %v1962_v25 = vpop.f32.mrb[47].mxu1 }
 0x62d   :  { %v1963_v39 = vadd.f32 %v2067_v50, %v1962_v25 }
 0x62e   :  { %1986 = vst.msk [vmem:[%s3821_s9 + $0x78] sm:$0xff] %vm1219_vm2, %v1968_v41 }
 0x62f   :  { %1985 = vst.msk [vmem:[%s3821_s9 + $0x70] sm:$0xff] %vm1219_vm2, %v1963_v39 }

</bundles_post_ra>
